<compile_context>
chip_gen: v6e
topology: v6e:2x2x1
jax: 0.10.0
libtpu: 0.0.40
codegen_flags: <defaults>
</compile_context>

<pallas_src>
import functools

import jax
import jax.numpy as jnp
from jax.experimental import pallas as pl
from jax.experimental.pallas import tpu as pltpu

BN_EPS = 1e-5


def _round_up(x, m):
    return -(-x // m) * m


# ----------------------------------------------------------------------------
# Pallas kernels (hot path)
# ----------------------------------------------------------------------------
def _conv_matmul_kernel(a_ref, b_ref, s_ref, t_ref, *rest, relu, has_res):
    """Tiled conv-as-matmul: bf16 MXU, f32 accumulator, fused BN affine
    (+ optional residual add) (+ optional ReLU) epilogue on the last K step."""
    if has_res:
        res_ref, o_ref, acc_ref = rest
    else:
        o_ref, acc_ref = rest
    k = pl.program_id(2)

    @pl.when(k == 0)
    def _():
        acc_ref[...] = jnp.zeros_like(acc_ref)

    acc_ref[...] += jnp.dot(a_ref[...], b_ref[...],
                            preferred_element_type=jnp.float32)

    @pl.when(k == pl.num_programs(2) - 1)
    def _():
        y = acc_ref[...] * s_ref[...] + t_ref[...]
        if has_res:
            y = y + res_ref[...]
        if relu:
            y = jnp.maximum(y, 0.0)
        o_ref[...] = y.astype(o_ref.dtype)


def _max9_kernel(*refs):
    """Row-tiled elementwise max over the 9 window taps of a 3x3 pool."""
    o_ref = refs[-1]
    y = refs[0][...]
    for r in refs[1:-1]:
        y = jnp.maximum(y, r[...])
    o_ref[...] = y


def _gap_kernel(x_ref, o_ref):
    # x: (1, H*W, C) -> mean over spatial positions
    o_ref[...] = jnp.mean(x_ref[...], axis=1, keepdims=True)


# ----------------------------------------------------------------------------
# Pallas wrappers
# ----------------------------------------------------------------------------
def _conv_matmul(a, b, scale, shift, relu, residual=None):
    """a: (M, K), b: (K, Cout), scale/shift: (Cout,), optional residual (M, Cout).
    Returns (M, Cout) float32."""
    m, k = a.shape
    cout = b.shape[1]

    tm = min(256, _round_up(m, 8))
    mp = _round_up(m, tm)
    kp = _round_up(k, 128)                 # lane-aligned contraction axis
    tk = 256 if kp % 256 == 0 else 128
    tn = min(128, cout)                    # Cout is 64/128/256/512 in resnet18

    a = jnp.pad(a, ((0, mp - m), (0, kp - k))).astype(jnp.bfloat16)
    b = jnp.pad(b, ((0, kp - k), (0, 0))).astype(jnp.bfloat16)
    s2 = scale.reshape(1, cout).astype(jnp.float32)
    t2 = shift.reshape(1, cout).astype(jnp.float32)

    in_specs = [
        pl.BlockSpec((tm, tk), lambda i, j, kk: (i, kk)),
        pl.BlockSpec((tk, tn), lambda i, j, kk: (kk, j)),
        pl.BlockSpec((1, tn), lambda i, j, kk: (0, j)),
        pl.BlockSpec((1, tn), lambda i, j, kk: (0, j)),
    ]
    inputs = [a, b, s2, t2]
    has_res = residual is not None
    if has_res:
        r = jnp.pad(residual, ((0, mp - m), (0, 0))).astype(jnp.float32)
        in_specs.append(pl.BlockSpec((tm, tn), lambda i, j, kk: (i, j)))
        inputs.append(r)

    out = pl.pallas_call(
        functools.partial(_conv_matmul_kernel, relu=relu, has_res=has_res),
        grid=(mp // tm, cout // tn, kp // tk),
        in_specs=in_specs,
        out_specs=pl.BlockSpec((tm, tn), lambda i, j, kk: (i, j)),
        out_shape=jax.ShapeDtypeStruct((mp, cout), jnp.float32),
        scratch_shapes=[pltpu.VMEM((tm, tn), jnp.float32)],
        compiler_params=pltpu.CompilerParams(
            dimension_semantics=("parallel", "parallel", "arbitrary")),
    )(*inputs)
    return out[:m]


# ----------------------------------------------------------------------------
# Conv / pool building blocks (glue = im2col indexing; compute = Pallas)
# ----------------------------------------------------------------------------
def _im2col(x, kh, kw, stride, pad, pad_value=0.0):
    n, h, w, c = x.shape
    x = x.astype(jnp.bfloat16)  # halve HBM traffic of the patch slab
    if pad > 0:
        x = jnp.pad(
            x, ((0, 0), (pad, pad), (pad, pad), (0, 0)), constant_values=pad_value
        )
    oh = (h + 2 * pad - kh) // stride + 1
    ow = (w + 2 * pad - kw) // stride + 1
    cols = []
    for i in range(kh):
        for j in range(kw):
            cols.append(
                x[
                    :,
                    i : i + (oh - 1) * stride + 1 : stride,
                    j : j + (ow - 1) * stride + 1 : stride,
                    :,
                ]
            )
    patches = jnp.stack(cols, axis=3)  # (N, OH, OW, kh*kw, C)
    return patches.reshape(n * oh * ow, kh * kw * c), oh, ow


def conv_bn(x, params, stride, pad, relu, residual=None):
    """Conv2d (no bias, PyTorch OIHW weights) + eval-mode BN (+ residual + ReLU)."""
    w, gamma, beta, rmean, rvar = params
    cout, cin, kh, kw = w.shape
    a, oh, ow = _im2col(x, kh, kw, stride, pad)
    # weight matrix rows ordered (i, j, cin) to match the im2col column order
    b = jnp.transpose(w, (2, 3, 1, 0)).reshape(kh * kw * cin, cout)
    scale = gamma / jnp.sqrt(rvar + BN_EPS)
    shift = beta - rmean * scale
    out = _conv_matmul(a, b, scale, shift, relu, residual=residual)
    n = x.shape[0]
    return out.reshape(n, oh, ow, cout)


def maxpool_3x3_s2_p1(x):
    n, h, w, c = x.shape
    kh = kw = 3
    stride = 2
    pad = 1
    xp = jnp.pad(
        x, ((0, 0), (pad, pad), (pad, pad), (0, 0)), constant_values=-jnp.inf
    )
    oh = (h + 2 * pad - kh) // stride + 1
    ow = (w + 2 * pad - kw) // stride + 1
    m = n * oh * ow
    tm = min(1024, _round_up(m, 8))
    mp = _round_up(m, tm)
    views = []
    for i in range(kh):
        for j in range(kw):
            v = xp[
                :,
                i : i + (oh - 1) * stride + 1 : stride,
                j : j + (ow - 1) * stride + 1 : stride,
                :,
            ].reshape(m, c)
            views.append(jnp.pad(v, ((0, mp - m), (0, 0))))
    out = pl.pallas_call(
        _max9_kernel,
        grid=(mp // tm,),
        in_specs=[pl.BlockSpec((tm, c), lambda i: (i, 0))] * 9,
        out_specs=pl.BlockSpec((tm, c), lambda i: (i, 0)),
        out_shape=jax.ShapeDtypeStruct((mp, c), jnp.float32),
        compiler_params=pltpu.CompilerParams(dimension_semantics=("parallel",)),
    )(*views)
    return out[:m].reshape(n, oh, ow, c)


def global_avg_pool(x):
    n, h, w, c = x.shape
    xr = x.reshape(n, h * w, c)
    out = pl.pallas_call(
        _gap_kernel,
        grid=(n,),
        in_specs=[pl.BlockSpec((1, h * w, c), lambda i: (i, 0, 0))],
        out_specs=pl.BlockSpec((1, 1, c), lambda i: (i, 0, 0)),
        out_shape=jax.ShapeDtypeStruct((n, 1, c), jnp.float32),
        compiler_params=pltpu.CompilerParams(dimension_semantics=("parallel",)),
    )(xr)
    return out.reshape(n, c)


# ----------------------------------------------------------------------------
# ResNet18 backbone (fc replaced by Identity -> returns 512-d features)
# ----------------------------------------------------------------------------
def _conv_bn_params(key, cin, cout, k):
    k1, k2, k3 = jax.random.split(key, 3)
    fan_in = cin * k * k
    w = jax.random.normal(k1, (cout, cin, k, k), jnp.float32) * (2.0 / fan_in) ** 0.5
    gamma = jax.random.uniform(k2, (cout,), jnp.float32, 0.5, 1.5)
    beta = jax.random.normal(k3, (cout,), jnp.float32) * 0.1
    rmean = jnp.zeros((cout,), jnp.float32)
    rvar = jnp.ones((cout,), jnp.float32)
    return (w, gamma, beta, rmean, rvar)


def make_resnet18_params(key):
    keys = iter(jax.random.split(key, 64))
    params = {"stem": _conv_bn_params(next(keys), 3, 64, 7), "layers": []}
    channels = [64, 128, 256, 512]
    in_c = 64
    for li, c in enumerate(channels):
        blocks = []
        for bi in range(2):
            stride = 2 if (li > 0 and bi == 0) else 1
            blk = {
                "conv1": _conv_bn_params(next(keys), in_c, c, 3),
                "conv2": _conv_bn_params(next(keys), c, c, 3),
            }
            if stride != 1 or in_c != c:
                blk["down"] = _conv_bn_params(next(keys), in_c, c, 1)
            blocks.append(blk)
            in_c = c
        params["layers"].append(blocks)
    return params


def basic_block(x, blk, stride):
    if "down" in blk:
        identity = conv_bn(x, blk["down"], stride=stride, pad=0, relu=False)
    else:
        identity = x
    out = conv_bn(x, blk["conv1"], stride=stride, pad=1, relu=True)
    n, oh, ow, c = out.shape
    # residual add + final ReLU fused into conv2's matmul epilogue
    out = conv_bn(
        out, blk["conv2"], stride=1, pad=1, relu=True,
        residual=identity.reshape(n * oh * ow, c),
    )
    return out


def image_encoder_forward(params, x_nchw):
    """Equivalent of ImageEncoder.forward: returns (N, feature_dim=512) features."""
    x = jnp.transpose(x_nchw, (0, 2, 3, 1)).astype(jnp.float32)  # NCHW -> NHWC
    x = conv_bn(x, params["stem"], stride=2, pad=3, relu=True)
    x = maxpool_3x3_s2_p1(x)
    for li in range(4):
        for bi in range(2):
            stride = 2 if (li > 0 and bi == 0) else 1
            x = basic_block(x, params["layers"][li][bi], stride)
    feats = global_avg_pool(x)  # adaptive avg pool to 1x1 + flatten
    return feats  # model_base.fc = nn.Identity()


# ----------------------------------------------------------------------------
if __name__ == "__main__":
    key = jax.random.PRNGKey(0)
    kp, kx = jax.random.split(key)
    params = make_resnet18_params(kp)
    # PyTorch-style NCHW input: batch=2, channels=3 (RGB), img_size=32
    x = jax.random.normal(kx, (2, 3, 32, 32), jnp.float32)

    feats = jax.jit(image_encoder_forward)(params, x)
    feats = jax.block_until_ready(feats)

    assert feats.shape == (2, 512), feats.shape
    assert bool(jnp.all(jnp.isfinite(feats)))
    print("KERNEL_OK")
</pallas_src>

<mosaic_0001>
module attributes {stable_mosaic.version = 11 : i64} {
  func.func @_conv_matmul_kernel(%arg0: i32, %arg1: i32, %arg2: i32, %arg3: memref<256x256xbf16, #tpu.memory_space<vmem>>, %arg4: memref<256x64xbf16, #tpu.memory_space<vmem>>, %arg5: memref<1x64xf32, #tpu.memory_space<vmem>>, %arg6: memref<1x64xf32, #tpu.memory_space<vmem>>, %arg7: memref<256x64xf32, #tpu.memory_space<vmem>>, %arg8: memref<256x64xf32, #tpu.memory_space<vmem>>) attributes {dimension_semantics = [#tpu.dimension_semantics<parallel>, #tpu.dimension_semantics<parallel>, #tpu.dimension_semantics<arbitrary>], iteration_bounds = array<i64: 2, 1, 1>, scalar_prefetch = 0 : i64, scratch_operands = 1 : i64, tpu.core_type = #tpu.core_type<tc>, window_params = [{transform_indices = @transform_0, window_bounds = array<i64: 256, 256>}, {transform_indices = @transform_1, window_bounds = array<i64: 256, 64>}, {transform_indices = @transform_2, window_bounds = array<i64: 1, 64>}, {transform_indices = @transform_3, window_bounds = array<i64: 1, 64>}, {transform_indices = @transform_4, window_bounds = array<i64: 256, 64>}]} {
    %c0_i32 = arith.constant 0 : i32
    %0 = arith.cmpi eq, %arg2, %c0_i32 : i32
    %1 = arith.extui %0 : i1 to i32
    %c0_i32_0 = arith.constant 0 : i32
    %2 = arith.cmpi ne, %1, %c0_i32_0 : i32
    scf.if %2 {
      %cst_10 = arith.constant 0.000000e+00 : f32
      %12 = vector.broadcast %cst_10 : f32 to vector<256x64xf32>
      %c0_11 = arith.constant 0 : index
      %c0_12 = arith.constant 0 : index
      %13 = vector.load %arg8[%c0_11, %c0_12] : memref<256x64xf32, #tpu.memory_space<vmem>>, vector<256x64xf32>
      tpu.vector_store %arg8[%c0_11, %c0_12], %12 {strides = array<i32>} : memref<256x64xf32, #tpu.memory_space<vmem>>, vector<256x64xf32>,
    } else {
    }
    %c0 = arith.constant 0 : index
    %c0_1 = arith.constant 0 : index
    %3 = vector.load %arg8[%c0, %c0_1] : memref<256x64xf32, #tpu.memory_space<vmem>>, vector<256x64xf32>
    %c0_2 = arith.constant 0 : index
    %c0_3 = arith.constant 0 : index
    %4 = vector.load %arg3[%c0_2, %c0_3] : memref<256x256xbf16, #tpu.memory_space<vmem>>, vector<256x256xbf16>
    %c0_4 = arith.constant 0 : index
    %c0_5 = arith.constant 0 : index
    %5 = vector.load %arg4[%c0_4, %c0_5] : memref<256x64xbf16, #tpu.memory_space<vmem>>, vector<256x64xbf16>
    %cst = arith.constant dense<0.000000e+00> : vector<256x64xf32>
    %6 = tpu.matmul %4, %5, %cst {dimension_numbers = #tpu.dot_dimension_numbers<[1], [0], [0], [1], [0, 0, 1, 1], [], []>} : vector<256x256xbf16>, vector<256x64xbf16>, vector<256x64xf32> -> vector<256x64xf32>
    %7 = arith.addf %3, %6 : vector<256x64xf32>
    %c0_6 = arith.constant 0 : index
    %c0_7 = arith.constant 0 : index
    %8 = vector.load %arg8[%c0_6, %c0_7] : memref<256x64xf32, #tpu.memory_space<vmem>>, vector<256x64xf32>
    tpu.vector_store %arg8[%c0_6, %c0_7], %7 {strides = array<i32>} : memref<256x64xf32, #tpu.memory_space<vmem>>, vector<256x64xf32>,
    %c0_i32_8 = arith.constant 0 : i32
    %9 = arith.cmpi eq, %arg2, %c0_i32_8 : i32
    %10 = arith.extui %9 : i1 to i32
    %c0_i32_9 = arith.constant 0 : i32
    %11 = arith.cmpi ne, %10, %c0_i32_9 : i32
    scf.if %11 {
      %c0_10 = arith.constant 0 : index
      %c0_11 = arith.constant 0 : index
      %12 = vector.load %arg8[%c0_10, %c0_11] : memref<256x64xf32, #tpu.memory_space<vmem>>, vector<256x64xf32>
      %c0_12 = arith.constant 0 : index
      %c0_13 = arith.constant 0 : index
      %13 = vector.load %arg5[%c0_12, %c0_13] : memref<1x64xf32, #tpu.memory_space<vmem>>, vector<1x64xf32>
      %14 = vector.broadcast %13 : vector<1x64xf32> to vector<256x64xf32>
      %15 = arith.mulf %12, %14 : vector<256x64xf32>
      %c0_14 = arith.constant 0 : index
      %c0_15 = arith.constant 0 : index
      %16 = vector.load %arg6[%c0_14, %c0_15] : memref<1x64xf32, #tpu.memory_space<vmem>>, vector<1x64xf32>
      %17 = vector.broadcast %16 : vector<1x64xf32> to vector<256x64xf32>
      %18 = arith.addf %15, %17 : vector<256x64xf32>
      %cst_16 = arith.constant 0.000000e+00 : f32
      %19 = vector.broadcast %cst_16 : f32 to vector<256x64xf32>
      %20 = arith.maximumf %18, %19 : vector<256x64xf32>
      %c0_17 = arith.constant 0 : index
      %c0_18 = arith.constant 0 : index
      %21 = vector.load %arg7[%c0_17, %c0_18] : memref<256x64xf32, #tpu.memory_space<vmem>>, vector<256x64xf32>
      tpu.vector_store %arg7[%c0_17, %c0_18], %20 {strides = array<i32>} : memref<256x64xf32, #tpu.memory_space<vmem>>, vector<256x64xf32>,
    } else {
    }
    return
  }
  func.func @transform_0(%arg0: i32, %arg1: i32, %arg2: i32) -> (i32, i32) {
    %c0_i32 = arith.constant 0 : i32
    return %arg0, %arg2 : i32, i32
  }
  func.func @transform_1(%arg0: i32, %arg1: i32, %arg2: i32) -> (i32, i32) {
    %c0_i32 = arith.constant 0 : i32
    return %arg2, %arg1 : i32, i32
  }
  func.func @transform_2(%arg0: i32, %arg1: i32, %arg2: i32) -> (i32, i32) {
    %c0_i32 = arith.constant 0 : i32
    %c0_i32_0 = arith.constant 0 : i32
    return %c0_i32, %arg1 : i32, i32
  }
  func.func @transform_3(%arg0: i32, %arg1: i32, %arg2: i32) -> (i32, i32) {
    %c0_i32 = arith.constant 0 : i32
    %c0_i32_0 = arith.constant 0 : i32
    return %c0_i32, %arg1 : i32, i32
  }
  func.func @transform_4(%arg0: i32, %arg1: i32, %arg2: i32) -> (i32, i32) {
    %c0_i32 = arith.constant 0 : i32
    return %arg0, %arg1 : i32, i32
  }
}

module attributes {stable_mosaic.version = 11 : i64} {
  func.func @_max9_kernel(%arg0: i32, %arg1: memref<128x64xf32, #tpu.memory_space<vmem>>, %arg2: memref<128x64xf32, #tpu.memory_space<vmem>>, %arg3: memref<128x64xf32, #tpu.memory_space<vmem>>, %arg4: memref<128x64xf32, #tpu.memory_space<vmem>>, %arg5: memref<128x64xf32, #tpu.memory_space<vmem>>, %arg6: memref<128x64xf32, #tpu.memory_space<vmem>>, %arg7: memref<128x64xf32, #tpu.memory_space<vmem>>, %arg8: memref<128x64xf32, #tpu.memory_space<vmem>>, %arg9: memref<128x64xf32, #tpu.memory_space<vmem>>, %arg10: memref<128x64xf32, #tpu.memory_space<vmem>>) attributes {dimension_semantics = [#tpu.dimension_semantics<parallel>], iteration_bounds = array<i64: 1>, scalar_prefetch = 0 : i64, scratch_operands = 0 : i64, tpu.core_type = #tpu.core_type<tc>, window_params = [{transform_indices = @transform_0, window_bounds = array<i64: 128, 64>}, {transform_indices = @transform_1, window_bounds = array<i64: 128, 64>}, {transform_indices = @transform_2, window_bounds = array<i64: 128, 64>}, {transform_indices = @transform_3, window_bounds = array<i64: 128, 64>}, {transform_indices = @transform_4, window_bounds = array<i64: 128, 64>}, {transform_indices = @transform_5, window_bounds = array<i64: 128, 64>}, {transform_indices = @transform_6, window_bounds = array<i64: 128, 64>}, {transform_indices = @transform_7, window_bounds = array<i64: 128, 64>}, {transform_indices = @transform_8, window_bounds = array<i64: 128, 64>}, {transform_indices = @transform_9, window_bounds = array<i64: 128, 64>}]} {
    %c0 = arith.constant 0 : index
    %c0_0 = arith.constant 0 : index
    %0 = vector.load %arg1[%c0, %c0_0] : memref<128x64xf32, #tpu.memory_space<vmem>>, vector<128x64xf32>
    %c0_1 = arith.constant 0 : index
    %c0_2 = arith.constant 0 : index
    %1 = vector.load %arg2[%c0_1, %c0_2] : memref<128x64xf32, #tpu.memory_space<vmem>>, vector<128x64xf32>
    %2 = arith.maximumf %0, %1 : vector<128x64xf32>
    %c0_3 = arith.constant 0 : index
    %c0_4 = arith.constant 0 : index
    %3 = vector.load %arg3[%c0_3, %c0_4] : memref<128x64xf32, #tpu.memory_space<vmem>>, vector<128x64xf32>
    %4 = arith.maximumf %2, %3 : vector<128x64xf32>
    %c0_5 = arith.constant 0 : index
    %c0_6 = arith.constant 0 : index
    %5 = vector.load %arg4[%c0_5, %c0_6] : memref<128x64xf32, #tpu.memory_space<vmem>>, vector<128x64xf32>
    %6 = arith.maximumf %4, %5 : vector<128x64xf32>
    %c0_7 = arith.constant 0 : index
    %c0_8 = arith.constant 0 : index
    %7 = vector.load %arg5[%c0_7, %c0_8] : memref<128x64xf32, #tpu.memory_space<vmem>>, vector<128x64xf32>
    %8 = arith.maximumf %6, %7 : vector<128x64xf32>
    %c0_9 = arith.constant 0 : index
    %c0_10 = arith.constant 0 : index
    %9 = vector.load %arg6[%c0_9, %c0_10] : memref<128x64xf32, #tpu.memory_space<vmem>>, vector<128x64xf32>
    %10 = arith.maximumf %8, %9 : vector<128x64xf32>
    %c0_11 = arith.constant 0 : index
    %c0_12 = arith.constant 0 : index
    %11 = vector.load %arg7[%c0_11, %c0_12] : memref<128x64xf32, #tpu.memory_space<vmem>>, vector<128x64xf32>
    %12 = arith.maximumf %10, %11 : vector<128x64xf32>
    %c0_13 = arith.constant 0 : index
    %c0_14 = arith.constant 0 : index
    %13 = vector.load %arg8[%c0_13, %c0_14] : memref<128x64xf32, #tpu.memory_space<vmem>>, vector<128x64xf32>
    %14 = arith.maximumf %12, %13 : vector<128x64xf32>
    %c0_15 = arith.constant 0 : index
    %c0_16 = arith.constant 0 : index
    %15 = vector.load %arg9[%c0_15, %c0_16] : memref<128x64xf32, #tpu.memory_space<vmem>>, vector<128x64xf32>
    %16 = arith.maximumf %14, %15 : vector<128x64xf32>
    %c0_17 = arith.constant 0 : index
    %c0_18 = arith.constant 0 : index
    %17 = vector.load %arg10[%c0_17, %c0_18] : memref<128x64xf32, #tpu.memory_space<vmem>>, vector<128x64xf32>
    tpu.vector_store %arg10[%c0_17, %c0_18], %16 {strides = array<i32>} : memref<128x64xf32, #tpu.memory_space<vmem>>, vector<128x64xf32>,
    return
  }
  func.func @transform_0(%arg0: i32) -> (i32, i32) {
    %c0_i32 = arith.constant 0 : i32
    %c0_i32_0 = arith.constant 0 : i32
    return %arg0, %c0_i32 : i32, i32
  }
  func.func @transform_1(%arg0: i32) -> (i32, i32) {
    %c0_i32 = arith.constant 0 : i32
    %c0_i32_0 = arith.constant 0 : i32
    return %arg0, %c0_i32 : i32, i32
  }
  func.func @transform_2(%arg0: i32) -> (i32, i32) {
    %c0_i32 = arith.constant 0 : i32
    %c0_i32_0 = arith.constant 0 : i32
    return %arg0, %c0_i32 : i32, i32
  }
  func.func @transform_3(%arg0: i32) -> (i32, i32) {
    %c0_i32 = arith.constant 0 : i32
    %c0_i32_0 = arith.constant 0 : i32
    return %arg0, %c0_i32 : i32, i32
  }
  func.func @transform_4(%arg0: i32) -> (i32, i32) {
    %c0_i32 = arith.constant 0 : i32
    %c0_i32_0 = arith.constant 0 : i32
    return %arg0, %c0_i32 : i32, i32
  }
  func.func @transform_5(%arg0: i32) -> (i32, i32) {
    %c0_i32 = arith.constant 0 : i32
    %c0_i32_0 = arith.constant 0 : i32
    return %arg0, %c0_i32 : i32, i32
  }
  func.func @transform_6(%arg0: i32) -> (i32, i32) {
    %c0_i32 = arith.constant 0 : i32
    %c0_i32_0 = arith.constant 0 : i32
    return %arg0, %c0_i32 : i32, i32
  }
  func.func @transform_7(%arg0: i32) -> (i32, i32) {
    %c0_i32 = arith.constant 0 : i32
    %c0_i32_0 = arith.constant 0 : i32
    return %arg0, %c0_i32 : i32, i32
  }
  func.func @transform_8(%arg0: i32) -> (i32, i32) {
    %c0_i32 = arith.constant 0 : i32
    %c0_i32_0 = arith.constant 0 : i32
    return %arg0, %c0_i32 : i32, i32
  }
  func.func @transform_9(%arg0: i32) -> (i32, i32) {
    %c0_i32 = arith.constant 0 : i32
    %c0_i32_0 = arith.constant 0 : i32
    return %arg0, %c0_i32 : i32, i32
  }
}

module attributes {stable_mosaic.version = 11 : i64} {
  func.func @_conv_matmul_kernel(%arg0: i32, %arg1: i32, %arg2: i32, %arg3: memref<128x128xbf16, #tpu.memory_space<vmem>>, %arg4: memref<128x64xbf16, #tpu.memory_space<vmem>>, %arg5: memref<1x64xf32, #tpu.memory_space<vmem>>, %arg6: memref<1x64xf32, #tpu.memory_space<vmem>>, %arg7: memref<128x64xf32, #tpu.memory_space<vmem>>, %arg8: memref<128x64xf32, #tpu.memory_space<vmem>>) attributes {dimension_semantics = [#tpu.dimension_semantics<parallel>, #tpu.dimension_semantics<parallel>, #tpu.dimension_semantics<arbitrary>], iteration_bounds = array<i64: 1, 1, 5>, scalar_prefetch = 0 : i64, scratch_operands = 1 : i64, tpu.core_type = #tpu.core_type<tc>, window_params = [{transform_indices = @transform_0, window_bounds = array<i64: 128, 128>}, {transform_indices = @transform_1, window_bounds = array<i64: 128, 64>}, {transform_indices = @transform_2, window_bounds = array<i64: 1, 64>}, {transform_indices = @transform_3, window_bounds = array<i64: 1, 64>}, {transform_indices = @transform_4, window_bounds = array<i64: 128, 64>}]} {
    %c0_i32 = arith.constant 0 : i32
    %0 = arith.cmpi eq, %arg2, %c0_i32 : i32
    %1 = arith.extui %0 : i1 to i32
    %c0_i32_0 = arith.constant 0 : i32
    %2 = arith.cmpi ne, %1, %c0_i32_0 : i32
    scf.if %2 {
      %cst_9 = arith.constant 0.000000e+00 : f32
      %12 = vector.broadcast %cst_9 : f32 to vector<128x64xf32>
      %c0_10 = arith.constant 0 : index
      %c0_11 = arith.constant 0 : index
      %13 = vector.load %arg8[%c0_10, %c0_11] : memref<128x64xf32, #tpu.memory_space<vmem>>, vector<128x64xf32>
      tpu.vector_store %arg8[%c0_10, %c0_11], %12 {strides = array<i32>} : memref<128x64xf32, #tpu.memory_space<vmem>>, vector<128x64xf32>,
    } else {
    }
    %c0 = arith.constant 0 : index
    %c0_1 = arith.constant 0 : index
    %3 = vector.load %arg8[%c0, %c0_1] : memref<128x64xf32, #tpu.memory_space<vmem>>, vector<128x64xf32>
    %c0_2 = arith.constant 0 : index
    %c0_3 = arith.constant 0 : index
    %4 = vector.load %arg3[%c0_2, %c0_3] : memref<128x128xbf16, #tpu.memory_space<vmem>>, vector<128x128xbf16>
    %c0_4 = arith.constant 0 : index
    %c0_5 = arith.constant 0 : index
    %5 = vector.load %arg4[%c0_4, %c0_5] : memref<128x64xbf16, #tpu.memory_space<vmem>>, vector<128x64xbf16>
    %cst = arith.constant dense<0.000000e+00> : vector<128x64xf32>
    %6 = tpu.matmul %4, %5, %cst {dimension_numbers = #tpu.dot_dimension_numbers<[1], [0], [0], [1], [0, 0, 1, 1], [], []>} : vector<128x128xbf16>, vector<128x64xbf16>, vector<128x64xf32> -> vector<128x64xf32>
    %7 = arith.addf %3, %6 : vector<128x64xf32>
    %c0_6 = arith.constant 0 : index
    %c0_7 = arith.constant 0 : index
    %8 = vector.load %arg8[%c0_6, %c0_7] : memref<128x64xf32, #tpu.memory_space<vmem>>, vector<128x64xf32>
    tpu.vector_store %arg8[%c0_6, %c0_7], %7 {strides = array<i32>} : memref<128x64xf32, #tpu.memory_space<vmem>>, vector<128x64xf32>,
    %c4_i32 = arith.constant 4 : i32
    %9 = arith.cmpi eq, %arg2, %c4_i32 : i32
    %10 = arith.extui %9 : i1 to i32
    %c0_i32_8 = arith.constant 0 : i32
    %11 = arith.cmpi ne, %10, %c0_i32_8 : i32
    scf.if %11 {
      %c0_9 = arith.constant 0 : index
      %c0_10 = arith.constant 0 : index
      %12 = vector.load %arg8[%c0_9, %c0_10] : memref<128x64xf32, #tpu.memory_space<vmem>>, vector<128x64xf32>
      %c0_11 = arith.constant 0 : index
      %c0_12 = arith.constant 0 : index
      %13 = vector.load %arg5[%c0_11, %c0_12] : memref<1x64xf32, #tpu.memory_space<vmem>>, vector<1x64xf32>
      %14 = vector.broadcast %13 : vector<1x64xf32> to vector<128x64xf32>
      %15 = arith.mulf %12, %14 : vector<128x64xf32>
      %c0_13 = arith.constant 0 : index
      %c0_14 = arith.constant 0 : index
      %16 = vector.load %arg6[%c0_13, %c0_14] : memref<1x64xf32, #tpu.memory_space<vmem>>, vector<1x64xf32>
      %17 = vector.broadcast %16 : vector<1x64xf32> to vector<128x64xf32>
      %18 = arith.addf %15, %17 : vector<128x64xf32>
      %cst_15 = arith.constant 0.000000e+00 : f32
      %19 = vector.broadcast %cst_15 : f32 to vector<128x64xf32>
      %20 = arith.maximumf %18, %19 : vector<128x64xf32>
      %c0_16 = arith.constant 0 : index
      %c0_17 = arith.constant 0 : index
      %21 = vector.load %arg7[%c0_16, %c0_17] : memref<128x64xf32, #tpu.memory_space<vmem>>, vector<128x64xf32>
      tpu.vector_store %arg7[%c0_16, %c0_17], %20 {strides = array<i32>} : memref<128x64xf32, #tpu.memory_space<vmem>>, vector<128x64xf32>,
    } else {
    }
    return
  }
  func.func @transform_0(%arg0: i32, %arg1: i32, %arg2: i32) -> (i32, i32) {
    %c0_i32 = arith.constant 0 : i32
    return %arg0, %arg2 : i32, i32
  }
  func.func @transform_1(%arg0: i32, %arg1: i32, %arg2: i32) -> (i32, i32) {
    %c0_i32 = arith.constant 0 : i32
    return %arg2, %arg1 : i32, i32
  }
  func.func @transform_2(%arg0: i32, %arg1: i32, %arg2: i32) -> (i32, i32) {
    %c0_i32 = arith.constant 0 : i32
    %c0_i32_0 = arith.constant 0 : i32
    return %c0_i32, %arg1 : i32, i32
  }
  func.func @transform_3(%arg0: i32, %arg1: i32, %arg2: i32) -> (i32, i32) {
    %c0_i32 = arith.constant 0 : i32
    %c0_i32_0 = arith.constant 0 : i32
    return %c0_i32, %arg1 : i32, i32
  }
  func.func @transform_4(%arg0: i32, %arg1: i32, %arg2: i32) -> (i32, i32) {
    %c0_i32 = arith.constant 0 : i32
    return %arg0, %arg1 : i32, i32
  }
}

module attributes {stable_mosaic.version = 11 : i64} {
  func.func @_conv_matmul_kernel(%arg0: i32, %arg1: i32, %arg2: i32, %arg3: memref<128x128xbf16, #tpu.memory_space<vmem>>, %arg4: memref<128x64xbf16, #tpu.memory_space<vmem>>, %arg5: memref<1x64xf32, #tpu.memory_space<vmem>>, %arg6: memref<1x64xf32, #tpu.memory_space<vmem>>, %arg7: memref<128x64xf32, #tpu.memory_space<vmem>>, %arg8: memref<128x64xf32, #tpu.memory_space<vmem>>, %arg9: memref<128x64xf32, #tpu.memory_space<vmem>>) attributes {dimension_semantics = [#tpu.dimension_semantics<parallel>, #tpu.dimension_semantics<parallel>, #tpu.dimension_semantics<arbitrary>], iteration_bounds = array<i64: 1, 1, 5>, scalar_prefetch = 0 : i64, scratch_operands = 1 : i64, tpu.core_type = #tpu.core_type<tc>, window_params = [{transform_indices = @transform_0, window_bounds = array<i64: 128, 128>}, {transform_indices = @transform_1, window_bounds = array<i64: 128, 64>}, {transform_indices = @transform_2, window_bounds = array<i64: 1, 64>}, {transform_indices = @transform_3, window_bounds = array<i64: 1, 64>}, {transform_indices = @transform_4, window_bounds = array<i64: 128, 64>}, {transform_indices = @transform_5, window_bounds = array<i64: 128, 64>}]} {
    %c0_i32 = arith.constant 0 : i32
    %0 = arith.cmpi eq, %arg2, %c0_i32 : i32
    %1 = arith.extui %0 : i1 to i32
    %c0_i32_0 = arith.constant 0 : i32
    %2 = arith.cmpi ne, %1, %c0_i32_0 : i32
    scf.if %2 {
      %cst_9 = arith.constant 0.000000e+00 : f32
      %12 = vector.broadcast %cst_9 : f32 to vector<128x64xf32>
      %c0_10 = arith.constant 0 : index
      %c0_11 = arith.constant 0 : index
      %13 = vector.load %arg9[%c0_10, %c0_11] : memref<128x64xf32, #tpu.memory_space<vmem>>, vector<128x64xf32>
      tpu.vector_store %arg9[%c0_10, %c0_11], %12 {strides = array<i32>} : memref<128x64xf32, #tpu.memory_space<vmem>>, vector<128x64xf32>,
    } else {
    }
    %c0 = arith.constant 0 : index
    %c0_1 = arith.constant 0 : index
    %3 = vector.load %arg9[%c0, %c0_1] : memref<128x64xf32, #tpu.memory_space<vmem>>, vector<128x64xf32>
    %c0_2 = arith.constant 0 : index
    %c0_3 = arith.constant 0 : index
    %4 = vector.load %arg3[%c0_2, %c0_3] : memref<128x128xbf16, #tpu.memory_space<vmem>>, vector<128x128xbf16>
    %c0_4 = arith.constant 0 : index
    %c0_5 = arith.constant 0 : index
    %5 = vector.load %arg4[%c0_4, %c0_5] : memref<128x64xbf16, #tpu.memory_space<vmem>>, vector<128x64xbf16>
    %cst = arith.constant dense<0.000000e+00> : vector<128x64xf32>
    %6 = tpu.matmul %4, %5, %cst {dimension_numbers = #tpu.dot_dimension_numbers<[1], [0], [0], [1], [0, 0, 1, 1], [], []>} : vector<128x128xbf16>, vector<128x64xbf16>, vector<128x64xf32> -> vector<128x64xf32>
    %7 = arith.addf %3, %6 : vector<128x64xf32>
    %c0_6 = arith.constant 0 : index
    %c0_7 = arith.constant 0 : index
    %8 = vector.load %arg9[%c0_6, %c0_7] : memref<128x64xf32, #tpu.memory_space<vmem>>, vector<128x64xf32>
    tpu.vector_store %arg9[%c0_6, %c0_7], %7 {strides = array<i32>} : memref<128x64xf32, #tpu.memory_space<vmem>>, vector<128x64xf32>,
    %c4_i32 = arith.constant 4 : i32
    %9 = arith.cmpi eq, %arg2, %c4_i32 : i32
    %10 = arith.extui %9 : i1 to i32
    %c0_i32_8 = arith.constant 0 : i32
    %11 = arith.cmpi ne, %10, %c0_i32_8 : i32
    scf.if %11 {
      %c0_9 = arith.constant 0 : index
      %c0_10 = arith.constant 0 : index
      %12 = vector.load %arg9[%c0_9, %c0_10] : memref<128x64xf32, #tpu.memory_space<vmem>>, vector<128x64xf32>
      %c0_11 = arith.constant 0 : index
      %c0_12 = arith.constant 0 : index
      %13 = vector.load %arg5[%c0_11, %c0_12] : memref<1x64xf32, #tpu.memory_space<vmem>>, vector<1x64xf32>
      %14 = vector.broadcast %13 : vector<1x64xf32> to vector<128x64xf32>
      %15 = arith.mulf %12, %14 : vector<128x64xf32>
      %c0_13 = arith.constant 0 : index
      %c0_14 = arith.constant 0 : index
      %16 = vector.load %arg6[%c0_13, %c0_14] : memref<1x64xf32, #tpu.memory_space<vmem>>, vector<1x64xf32>
      %17 = vector.broadcast %16 : vector<1x64xf32> to vector<128x64xf32>
      %18 = arith.addf %15, %17 : vector<128x64xf32>
      %c0_15 = arith.constant 0 : index
      %c0_16 = arith.constant 0 : index
      %19 = vector.load %arg7[%c0_15, %c0_16] : memref<128x64xf32, #tpu.memory_space<vmem>>, vector<128x64xf32>
      %20 = arith.addf %18, %19 : vector<128x64xf32>
      %cst_17 = arith.constant 0.000000e+00 : f32
      %21 = vector.broadcast %cst_17 : f32 to vector<128x64xf32>
      %22 = arith.maximumf %20, %21 : vector<128x64xf32>
      %c0_18 = arith.constant 0 : index
      %c0_19 = arith.constant 0 : index
      %23 = vector.load %arg8[%c0_18, %c0_19] : memref<128x64xf32, #tpu.memory_space<vmem>>, vector<128x64xf32>
      tpu.vector_store %arg8[%c0_18, %c0_19], %22 {strides = array<i32>} : memref<128x64xf32, #tpu.memory_space<vmem>>, vector<128x64xf32>,
    } else {
    }
    return
  }
  func.func @transform_0(%arg0: i32, %arg1: i32, %arg2: i32) -> (i32, i32) {
    %c0_i32 = arith.constant 0 : i32
    return %arg0, %arg2 : i32, i32
  }
  func.func @transform_1(%arg0: i32, %arg1: i32, %arg2: i32) -> (i32, i32) {
    %c0_i32 = arith.constant 0 : i32
    return %arg2, %arg1 : i32, i32
  }
  func.func @transform_2(%arg0: i32, %arg1: i32, %arg2: i32) -> (i32, i32) {
    %c0_i32 = arith.constant 0 : i32
    %c0_i32_0 = arith.constant 0 : i32
    return %c0_i32, %arg1 : i32, i32
  }
  func.func @transform_3(%arg0: i32, %arg1: i32, %arg2: i32) -> (i32, i32) {
    %c0_i32 = arith.constant 0 : i32
    %c0_i32_0 = arith.constant 0 : i32
    return %c0_i32, %arg1 : i32, i32
  }
  func.func @transform_4(%arg0: i32, %arg1: i32, %arg2: i32) -> (i32, i32) {
    %c0_i32 = arith.constant 0 : i32
    return %arg0, %arg1 : i32, i32
  }
  func.func @transform_5(%arg0: i32, %arg1: i32, %arg2: i32) -> (i32, i32) {
    %c0_i32 = arith.constant 0 : i32
    return %arg0, %arg1 : i32, i32
  }
}

module attributes {stable_mosaic.version = 11 : i64} {
  func.func @_conv_matmul_kernel(%arg0: i32, %arg1: i32, %arg2: i32, %arg3: memref<32x128xbf16, #tpu.memory_space<vmem>>, %arg4: memref<128x128xbf16, #tpu.memory_space<vmem>>, %arg5: memref<1x128xf32, #tpu.memory_space<vmem>>, %arg6: memref<1x128xf32, #tpu.memory_space<vmem>>, %arg7: memref<32x128xf32, #tpu.memory_space<vmem>>, %arg8: memref<32x128xf32, #tpu.memory_space<vmem>>) attributes {dimension_semantics = [#tpu.dimension_semantics<parallel>, #tpu.dimension_semantics<parallel>, #tpu.dimension_semantics<arbitrary>], iteration_bounds = array<i64: 1, 1, 1>, scalar_prefetch = 0 : i64, scratch_operands = 1 : i64, tpu.core_type = #tpu.core_type<tc>, window_params = [{transform_indices = @transform_0, window_bounds = array<i64: 32, 128>}, {transform_indices = @transform_1, window_bounds = array<i64: 128, 128>}, {transform_indices = @transform_2, window_bounds = array<i64: 1, 128>}, {transform_indices = @transform_3, window_bounds = array<i64: 1, 128>}, {transform_indices = @transform_4, window_bounds = array<i64: 32, 128>}]} {
    %c0_i32 = arith.constant 0 : i32
    %0 = arith.cmpi eq, %arg2, %c0_i32 : i32
    %1 = arith.extui %0 : i1 to i32
    %c0_i32_0 = arith.constant 0 : i32
    %2 = arith.cmpi ne, %1, %c0_i32_0 : i32
    scf.if %2 {
      %cst_10 = arith.constant 0.000000e+00 : f32
      %12 = vector.broadcast %cst_10 : f32 to vector<32x128xf32>
      %c0_11 = arith.constant 0 : index
      %c0_12 = arith.constant 0 : index
      %13 = vector.load %arg8[%c0_11, %c0_12] : memref<32x128xf32, #tpu.memory_space<vmem>>, vector<32x128xf32>
      tpu.vector_store %arg8[%c0_11, %c0_12], %12 {strides = array<i32>} : memref<32x128xf32, #tpu.memory_space<vmem>>, vector<32x128xf32>,
    } else {
    }
    %c0 = arith.constant 0 : index
    %c0_1 = arith.constant 0 : index
    %3 = vector.load %arg8[%c0, %c0_1] : memref<32x128xf32, #tpu.memory_space<vmem>>, vector<32x128xf32>
    %c0_2 = arith.constant 0 : index
    %c0_3 = arith.constant 0 : index
    %4 = vector.load %arg3[%c0_2, %c0_3] : memref<32x128xbf16, #tpu.memory_space<vmem>>, vector<32x128xbf16>
    %c0_4 = arith.constant 0 : index
    %c0_5 = arith.constant 0 : index
    %5 = vector.load %arg4[%c0_4, %c0_5] : memref<128x128xbf16, #tpu.memory_space<vmem>>, vector<128x128xbf16>
    %cst = arith.constant dense<0.000000e+00> : vector<32x128xf32>
    %6 = tpu.matmul %4, %5, %cst {dimension_numbers = #tpu.dot_dimension_numbers<[1], [0], [0], [1], [0, 0, 1, 1], [], []>} : vector<32x128xbf16>, vector<128x128xbf16>, vector<32x128xf32> -> vector<32x128xf32>
    %7 = arith.addf %3, %6 : vector<32x128xf32>
    %c0_6 = arith.constant 0 : index
    %c0_7 = arith.constant 0 : index
    %8 = vector.load %arg8[%c0_6, %c0_7] : memref<32x128xf32, #tpu.memory_space<vmem>>, vector<32x128xf32>
    tpu.vector_store %arg8[%c0_6, %c0_7], %7 {strides = array<i32>} : memref<32x128xf32, #tpu.memory_space<vmem>>, vector<32x128xf32>,
    %c0_i32_8 = arith.constant 0 : i32
    %9 = arith.cmpi eq, %arg2, %c0_i32_8 : i32
    %10 = arith.extui %9 : i1 to i32
    %c0_i32_9 = arith.constant 0 : i32
    %11 = arith.cmpi ne, %10, %c0_i32_9 : i32
    scf.if %11 {
      %c0_10 = arith.constant 0 : index
      %c0_11 = arith.constant 0 : index
      %12 = vector.load %arg8[%c0_10, %c0_11] : memref<32x128xf32, #tpu.memory_space<vmem>>, vector<32x128xf32>
      %c0_12 = arith.constant 0 : index
      %c0_13 = arith.constant 0 : index
      %13 = vector.load %arg5[%c0_12, %c0_13] : memref<1x128xf32, #tpu.memory_space<vmem>>, vector<1x128xf32>
      %14 = vector.broadcast %13 : vector<1x128xf32> to vector<32x128xf32>
      %15 = arith.mulf %12, %14 : vector<32x128xf32>
      %c0_14 = arith.constant 0 : index
      %c0_15 = arith.constant 0 : index
      %16 = vector.load %arg6[%c0_14, %c0_15] : memref<1x128xf32, #tpu.memory_space<vmem>>, vector<1x128xf32>
      %17 = vector.broadcast %16 : vector<1x128xf32> to vector<32x128xf32>
      %18 = arith.addf %15, %17 : vector<32x128xf32>
      %c0_16 = arith.constant 0 : index
      %c0_17 = arith.constant 0 : index
      %19 = vector.load %arg7[%c0_16, %c0_17] : memref<32x128xf32, #tpu.memory_space<vmem>>, vector<32x128xf32>
      tpu.vector_store %arg7[%c0_16, %c0_17], %18 {strides = array<i32>} : memref<32x128xf32, #tpu.memory_space<vmem>>, vector<32x128xf32>,
    } else {
    }
    return
  }
  func.func @transform_0(%arg0: i32, %arg1: i32, %arg2: i32) -> (i32, i32) {
    %c0_i32 = arith.constant 0 : i32
    return %arg0, %arg2 : i32, i32
  }
  func.func @transform_1(%arg0: i32, %arg1: i32, %arg2: i32) -> (i32, i32) {
    %c0_i32 = arith.constant 0 : i32
    return %arg2, %arg1 : i32, i32
  }
  func.func @transform_2(%arg0: i32, %arg1: i32, %arg2: i32) -> (i32, i32) {
    %c0_i32 = arith.constant 0 : i32
    %c0_i32_0 = arith.constant 0 : i32
    return %c0_i32, %arg1 : i32, i32
  }
  func.func @transform_3(%arg0: i32, %arg1: i32, %arg2: i32) -> (i32, i32) {
    %c0_i32 = arith.constant 0 : i32
    %c0_i32_0 = arith.constant 0 : i32
    return %c0_i32, %arg1 : i32, i32
  }
  func.func @transform_4(%arg0: i32, %arg1: i32, %arg2: i32) -> (i32, i32) {
    %c0_i32 = arith.constant 0 : i32
    return %arg0, %arg1 : i32, i32
  }
}

module attributes {stable_mosaic.version = 11 : i64} {
  func.func @_conv_matmul_kernel(%arg0: i32, %arg1: i32, %arg2: i32, %arg3: memref<32x128xbf16, #tpu.memory_space<vmem>>, %arg4: memref<128x128xbf16, #tpu.memory_space<vmem>>, %arg5: memref<1x128xf32, #tpu.memory_space<vmem>>, %arg6: memref<1x128xf32, #tpu.memory_space<vmem>>, %arg7: memref<32x128xf32, #tpu.memory_space<vmem>>, %arg8: memref<32x128xf32, #tpu.memory_space<vmem>>) attributes {dimension_semantics = [#tpu.dimension_semantics<parallel>, #tpu.dimension_semantics<parallel>, #tpu.dimension_semantics<arbitrary>], iteration_bounds = array<i64: 1, 1, 5>, scalar_prefetch = 0 : i64, scratch_operands = 1 : i64, tpu.core_type = #tpu.core_type<tc>, window_params = [{transform_indices = @transform_0, window_bounds = array<i64: 32, 128>}, {transform_indices = @transform_1, window_bounds = array<i64: 128, 128>}, {transform_indices = @transform_2, window_bounds = array<i64: 1, 128>}, {transform_indices = @transform_3, window_bounds = array<i64: 1, 128>}, {transform_indices = @transform_4, window_bounds = array<i64: 32, 128>}]} {
    %c0_i32 = arith.constant 0 : i32
    %0 = arith.cmpi eq, %arg2, %c0_i32 : i32
    %1 = arith.extui %0 : i1 to i32
    %c0_i32_0 = arith.constant 0 : i32
    %2 = arith.cmpi ne, %1, %c0_i32_0 : i32
    scf.if %2 {
      %cst_9 = arith.constant 0.000000e+00 : f32
      %12 = vector.broadcast %cst_9 : f32 to vector<32x128xf32>
      %c0_10 = arith.constant 0 : index
      %c0_11 = arith.constant 0 : index
      %13 = vector.load %arg8[%c0_10, %c0_11] : memref<32x128xf32, #tpu.memory_space<vmem>>, vector<32x128xf32>
      tpu.vector_store %arg8[%c0_10, %c0_11], %12 {strides = array<i32>} : memref<32x128xf32, #tpu.memory_space<vmem>>, vector<32x128xf32>,
    } else {
    }
    %c0 = arith.constant 0 : index
    %c0_1 = arith.constant 0 : index
    %3 = vector.load %arg8[%c0, %c0_1] : memref<32x128xf32, #tpu.memory_space<vmem>>, vector<32x128xf32>
    %c0_2 = arith.constant 0 : index
    %c0_3 = arith.constant 0 : index
    %4 = vector.load %arg3[%c0_2, %c0_3] : memref<32x128xbf16, #tpu.memory_space<vmem>>, vector<32x128xbf16>
    %c0_4 = arith.constant 0 : index
    %c0_5 = arith.constant 0 : index
    %5 = vector.load %arg4[%c0_4, %c0_5] : memref<128x128xbf16, #tpu.memory_space<vmem>>, vector<128x128xbf16>
    %cst = arith.constant dense<0.000000e+00> : vector<32x128xf32>
    %6 = tpu.matmul %4, %5, %cst {dimension_numbers = #tpu.dot_dimension_numbers<[1], [0], [0], [1], [0, 0, 1, 1], [], []>} : vector<32x128xbf16>, vector<128x128xbf16>, vector<32x128xf32> -> vector<32x128xf32>
    %7 = arith.addf %3, %6 : vector<32x128xf32>
    %c0_6 = arith.constant 0 : index
    %c0_7 = arith.constant 0 : index
    %8 = vector.load %arg8[%c0_6, %c0_7] : memref<32x128xf32, #tpu.memory_space<vmem>>, vector<32x128xf32>
    tpu.vector_store %arg8[%c0_6, %c0_7], %7 {strides = array<i32>} : memref<32x128xf32, #tpu.memory_space<vmem>>, vector<32x128xf32>,
    %c4_i32 = arith.constant 4 : i32
    %9 = arith.cmpi eq, %arg2, %c4_i32 : i32
    %10 = arith.extui %9 : i1 to i32
    %c0_i32_8 = arith.constant 0 : i32
    %11 = arith.cmpi ne, %10, %c0_i32_8 : i32
    scf.if %11 {
      %c0_9 = arith.constant 0 : index
      %c0_10 = arith.constant 0 : index
      %12 = vector.load %arg8[%c0_9, %c0_10] : memref<32x128xf32, #tpu.memory_space<vmem>>, vector<32x128xf32>
      %c0_11 = arith.constant 0 : index
      %c0_12 = arith.constant 0 : index
      %13 = vector.load %arg5[%c0_11, %c0_12] : memref<1x128xf32, #tpu.memory_space<vmem>>, vector<1x128xf32>
      %14 = vector.broadcast %13 : vector<1x128xf32> to vector<32x128xf32>
      %15 = arith.mulf %12, %14 : vector<32x128xf32>
      %c0_13 = arith.constant 0 : index
      %c0_14 = arith.constant 0 : index
      %16 = vector.load %arg6[%c0_13, %c0_14] : memref<1x128xf32, #tpu.memory_space<vmem>>, vector<1x128xf32>
      %17 = vector.broadcast %16 : vector<1x128xf32> to vector<32x128xf32>
      %18 = arith.addf %15, %17 : vector<32x128xf32>
      %cst_15 = arith.constant 0.000000e+00 : f32
      %19 = vector.broadcast %cst_15 : f32 to vector<32x128xf32>
      %20 = arith.maximumf %18, %19 : vector<32x128xf32>
      %c0_16 = arith.constant 0 : index
      %c0_17 = arith.constant 0 : index
      %21 = vector.load %arg7[%c0_16, %c0_17] : memref<32x128xf32, #tpu.memory_space<vmem>>, vector<32x128xf32>
      tpu.vector_store %arg7[%c0_16, %c0_17], %20 {strides = array<i32>} : memref<32x128xf32, #tpu.memory_space<vmem>>, vector<32x128xf32>,
    } else {
    }
    return
  }
  func.func @transform_0(%arg0: i32, %arg1: i32, %arg2: i32) -> (i32, i32) {
    %c0_i32 = arith.constant 0 : i32
    return %arg0, %arg2 : i32, i32
  }
  func.func @transform_1(%arg0: i32, %arg1: i32, %arg2: i32) -> (i32, i32) {
    %c0_i32 = arith.constant 0 : i32
    return %arg2, %arg1 : i32, i32
  }
  func.func @transform_2(%arg0: i32, %arg1: i32, %arg2: i32) -> (i32, i32) {
    %c0_i32 = arith.constant 0 : i32
    %c0_i32_0 = arith.constant 0 : i32
    return %c0_i32, %arg1 : i32, i32
  }
  func.func @transform_3(%arg0: i32, %arg1: i32, %arg2: i32) -> (i32, i32) {
    %c0_i32 = arith.constant 0 : i32
    %c0_i32_0 = arith.constant 0 : i32
    return %c0_i32, %arg1 : i32, i32
  }
  func.func @transform_4(%arg0: i32, %arg1: i32, %arg2: i32) -> (i32, i32) {
    %c0_i32 = arith.constant 0 : i32
    return %arg0, %arg1 : i32, i32
  }
}

module attributes {stable_mosaic.version = 11 : i64} {
  func.func @_conv_matmul_kernel(%arg0: i32, %arg1: i32, %arg2: i32, %arg3: memref<32x128xbf16, #tpu.memory_space<vmem>>, %arg4: memref<128x128xbf16, #tpu.memory_space<vmem>>, %arg5: memref<1x128xf32, #tpu.memory_space<vmem>>, %arg6: memref<1x128xf32, #tpu.memory_space<vmem>>, %arg7: memref<32x128xf32, #tpu.memory_space<vmem>>, %arg8: memref<32x128xf32, #tpu.memory_space<vmem>>) attributes {dimension_semantics = [#tpu.dimension_semantics<parallel>, #tpu.dimension_semantics<parallel>, #tpu.dimension_semantics<arbitrary>], iteration_bounds = array<i64: 1, 1, 9>, scalar_prefetch = 0 : i64, scratch_operands = 1 : i64, tpu.core_type = #tpu.core_type<tc>, window_params = [{transform_indices = @transform_0, window_bounds = array<i64: 32, 128>}, {transform_indices = @transform_1, window_bounds = array<i64: 128, 128>}, {transform_indices = @transform_2, window_bounds = array<i64: 1, 128>}, {transform_indices = @transform_3, window_bounds = array<i64: 1, 128>}, {transform_indices = @transform_4, window_bounds = array<i64: 32, 128>}]} {
    %c0_i32 = arith.constant 0 : i32
    %0 = arith.cmpi eq, %arg2, %c0_i32 : i32
    %1 = arith.extui %0 : i1 to i32
    %c0_i32_0 = arith.constant 0 : i32
    %2 = arith.cmpi ne, %1, %c0_i32_0 : i32
    scf.if %2 {
      %cst_9 = arith.constant 0.000000e+00 : f32
      %12 = vector.broadcast %cst_9 : f32 to vector<32x128xf32>
      %c0_10 = arith.constant 0 : index
      %c0_11 = arith.constant 0 : index
      %13 = vector.load %arg8[%c0_10, %c0_11] : memref<32x128xf32, #tpu.memory_space<vmem>>, vector<32x128xf32>
      tpu.vector_store %arg8[%c0_10, %c0_11], %12 {strides = array<i32>} : memref<32x128xf32, #tpu.memory_space<vmem>>, vector<32x128xf32>,
    } else {
    }
    %c0 = arith.constant 0 : index
    %c0_1 = arith.constant 0 : index
    %3 = vector.load %arg8[%c0, %c0_1] : memref<32x128xf32, #tpu.memory_space<vmem>>, vector<32x128xf32>
    %c0_2 = arith.constant 0 : index
    %c0_3 = arith.constant 0 : index
    %4 = vector.load %arg3[%c0_2, %c0_3] : memref<32x128xbf16, #tpu.memory_space<vmem>>, vector<32x128xbf16>
    %c0_4 = arith.constant 0 : index
    %c0_5 = arith.constant 0 : index
    %5 = vector.load %arg4[%c0_4, %c0_5] : memref<128x128xbf16, #tpu.memory_space<vmem>>, vector<128x128xbf16>
    %cst = arith.constant dense<0.000000e+00> : vector<32x128xf32>
    %6 = tpu.matmul %4, %5, %cst {dimension_numbers = #tpu.dot_dimension_numbers<[1], [0], [0], [1], [0, 0, 1, 1], [], []>} : vector<32x128xbf16>, vector<128x128xbf16>, vector<32x128xf32> -> vector<32x128xf32>
    %7 = arith.addf %3, %6 : vector<32x128xf32>
    %c0_6 = arith.constant 0 : index
    %c0_7 = arith.constant 0 : index
    %8 = vector.load %arg8[%c0_6, %c0_7] : memref<32x128xf32, #tpu.memory_space<vmem>>, vector<32x128xf32>
    tpu.vector_store %arg8[%c0_6, %c0_7], %7 {strides = array<i32>} : memref<32x128xf32, #tpu.memory_space<vmem>>, vector<32x128xf32>,
    %c8_i32 = arith.constant 8 : i32
    %9 = arith.cmpi eq, %arg2, %c8_i32 : i32
    %10 = arith.extui %9 : i1 to i32
    %c0_i32_8 = arith.constant 0 : i32
    %11 = arith.cmpi ne, %10, %c0_i32_8 : i32
    scf.if %11 {
      %c0_9 = arith.constant 0 : index
      %c0_10 = arith.constant 0 : index
      %12 = vector.load %arg8[%c0_9, %c0_10] : memref<32x128xf32, #tpu.memory_space<vmem>>, vector<32x128xf32>
      %c0_11 = arith.constant 0 : index
      %c0_12 = arith.constant 0 : index
      %13 = vector.load %arg5[%c0_11, %c0_12] : memref<1x128xf32, #tpu.memory_space<vmem>>, vector<1x128xf32>
      %14 = vector.broadcast %13 : vector<1x128xf32> to vector<32x128xf32>
      %15 = arith.mulf %12, %14 : vector<32x128xf32>
      %c0_13 = arith.constant 0 : index
      %c0_14 = arith.constant 0 : index
      %16 = vector.load %arg6[%c0_13, %c0_14] : memref<1x128xf32, #tpu.memory_space<vmem>>, vector<1x128xf32>
      %17 = vector.broadcast %16 : vector<1x128xf32> to vector<32x128xf32>
      %18 = arith.addf %15, %17 : vector<32x128xf32>
      %cst_15 = arith.constant 0.000000e+00 : f32
      %19 = vector.broadcast %cst_15 : f32 to vector<32x128xf32>
      %20 = arith.maximumf %18, %19 : vector<32x128xf32>
      %c0_16 = arith.constant 0 : index
      %c0_17 = arith.constant 0 : index
      %21 = vector.load %arg7[%c0_16, %c0_17] : memref<32x128xf32, #tpu.memory_space<vmem>>, vector<32x128xf32>
      tpu.vector_store %arg7[%c0_16, %c0_17], %20 {strides = array<i32>} : memref<32x128xf32, #tpu.memory_space<vmem>>, vector<32x128xf32>,
    } else {
    }
    return
  }
  func.func @transform_0(%arg0: i32, %arg1: i32, %arg2: i32) -> (i32, i32) {
    %c0_i32 = arith.constant 0 : i32
    return %arg0, %arg2 : i32, i32
  }
  func.func @transform_1(%arg0: i32, %arg1: i32, %arg2: i32) -> (i32, i32) {
    %c0_i32 = arith.constant 0 : i32
    return %arg2, %arg1 : i32, i32
  }
  func.func @transform_2(%arg0: i32, %arg1: i32, %arg2: i32) -> (i32, i32) {
    %c0_i32 = arith.constant 0 : i32
    %c0_i32_0 = arith.constant 0 : i32
    return %c0_i32, %arg1 : i32, i32
  }
  func.func @transform_3(%arg0: i32, %arg1: i32, %arg2: i32) -> (i32, i32) {
    %c0_i32 = arith.constant 0 : i32
    %c0_i32_0 = arith.constant 0 : i32
    return %c0_i32, %arg1 : i32, i32
  }
  func.func @transform_4(%arg0: i32, %arg1: i32, %arg2: i32) -> (i32, i32) {
    %c0_i32 = arith.constant 0 : i32
    return %arg0, %arg1 : i32, i32
  }
}

module attributes {stable_mosaic.version = 11 : i64} {
  func.func @_conv_matmul_kernel(%arg0: i32, %arg1: i32, %arg2: i32, %arg3: memref<32x128xbf16, #tpu.memory_space<vmem>>, %arg4: memref<128x128xbf16, #tpu.memory_space<vmem>>, %arg5: memref<1x128xf32, #tpu.memory_space<vmem>>, %arg6: memref<1x128xf32, #tpu.memory_space<vmem>>, %arg7: memref<32x128xf32, #tpu.memory_space<vmem>>, %arg8: memref<32x128xf32, #tpu.memory_space<vmem>>, %arg9: memref<32x128xf32, #tpu.memory_space<vmem>>) attributes {dimension_semantics = [#tpu.dimension_semantics<parallel>, #tpu.dimension_semantics<parallel>, #tpu.dimension_semantics<arbitrary>], iteration_bounds = array<i64: 1, 1, 9>, scalar_prefetch = 0 : i64, scratch_operands = 1 : i64, tpu.core_type = #tpu.core_type<tc>, window_params = [{transform_indices = @transform_0, window_bounds = array<i64: 32, 128>}, {transform_indices = @transform_1, window_bounds = array<i64: 128, 128>}, {transform_indices = @transform_2, window_bounds = array<i64: 1, 128>}, {transform_indices = @transform_3, window_bounds = array<i64: 1, 128>}, {transform_indices = @transform_4, window_bounds = array<i64: 32, 128>}, {transform_indices = @transform_5, window_bounds = array<i64: 32, 128>}]} {
    %c0_i32 = arith.constant 0 : i32
    %0 = arith.cmpi eq, %arg2, %c0_i32 : i32
    %1 = arith.extui %0 : i1 to i32
    %c0_i32_0 = arith.constant 0 : i32
    %2 = arith.cmpi ne, %1, %c0_i32_0 : i32
    scf.if %2 {
      %cst_9 = arith.constant 0.000000e+00 : f32
      %12 = vector.broadcast %cst_9 : f32 to vector<32x128xf32>
      %c0_10 = arith.constant 0 : index
      %c0_11 = arith.constant 0 : index
      %13 = vector.load %arg9[%c0_10, %c0_11] : memref<32x128xf32, #tpu.memory_space<vmem>>, vector<32x128xf32>
      tpu.vector_store %arg9[%c0_10, %c0_11], %12 {strides = array<i32>} : memref<32x128xf32, #tpu.memory_space<vmem>>, vector<32x128xf32>,
    } else {
    }
    %c0 = arith.constant 0 : index
    %c0_1 = arith.constant 0 : index
    %3 = vector.load %arg9[%c0, %c0_1] : memref<32x128xf32, #tpu.memory_space<vmem>>, vector<32x128xf32>
    %c0_2 = arith.constant 0 : index
    %c0_3 = arith.constant 0 : index
    %4 = vector.load %arg3[%c0_2, %c0_3] : memref<32x128xbf16, #tpu.memory_space<vmem>>, vector<32x128xbf16>
    %c0_4 = arith.constant 0 : index
    %c0_5 = arith.constant 0 : index
    %5 = vector.load %arg4[%c0_4, %c0_5] : memref<128x128xbf16, #tpu.memory_space<vmem>>, vector<128x128xbf16>
    %cst = arith.constant dense<0.000000e+00> : vector<32x128xf32>
    %6 = tpu.matmul %4, %5, %cst {dimension_numbers = #tpu.dot_dimension_numbers<[1], [0], [0], [1], [0, 0, 1, 1], [], []>} : vector<32x128xbf16>, vector<128x128xbf16>, vector<32x128xf32> -> vector<32x128xf32>
    %7 = arith.addf %3, %6 : vector<32x128xf32>
    %c0_6 = arith.constant 0 : index
    %c0_7 = arith.constant 0 : index
    %8 = vector.load %arg9[%c0_6, %c0_7] : memref<32x128xf32, #tpu.memory_space<vmem>>, vector<32x128xf32>
    tpu.vector_store %arg9[%c0_6, %c0_7], %7 {strides = array<i32>} : memref<32x128xf32, #tpu.memory_space<vmem>>, vector<32x128xf32>,
    %c8_i32 = arith.constant 8 : i32
    %9 = arith.cmpi eq, %arg2, %c8_i32 : i32
    %10 = arith.extui %9 : i1 to i32
    %c0_i32_8 = arith.constant 0 : i32
    %11 = arith.cmpi ne, %10, %c0_i32_8 : i32
    scf.if %11 {
      %c0_9 = arith.constant 0 : index
      %c0_10 = arith.constant 0 : index
      %12 = vector.load %arg9[%c0_9, %c0_10] : memref<32x128xf32, #tpu.memory_space<vmem>>, vector<32x128xf32>
      %c0_11 = arith.constant 0 : index
      %c0_12 = arith.constant 0 : index
      %13 = vector.load %arg5[%c0_11, %c0_12] : memref<1x128xf32, #tpu.memory_space<vmem>>, vector<1x128xf32>
      %14 = vector.broadcast %13 : vector<1x128xf32> to vector<32x128xf32>
      %15 = arith.mulf %12, %14 : vector<32x128xf32>
      %c0_13 = arith.constant 0 : index
      %c0_14 = arith.constant 0 : index
      %16 = vector.load %arg6[%c0_13, %c0_14] : memref<1x128xf32, #tpu.memory_space<vmem>>, vector<1x128xf32>
      %17 = vector.broadcast %16 : vector<1x128xf32> to vector<32x128xf32>
      %18 = arith.addf %15, %17 : vector<32x128xf32>
      %c0_15 = arith.constant 0 : index
      %c0_16 = arith.constant 0 : index
      %19 = vector.load %arg7[%c0_15, %c0_16] : memref<32x128xf32, #tpu.memory_space<vmem>>, vector<32x128xf32>
      %20 = arith.addf %18, %19 : vector<32x128xf32>
      %cst_17 = arith.constant 0.000000e+00 : f32
      %21 = vector.broadcast %cst_17 : f32 to vector<32x128xf32>
      %22 = arith.maximumf %20, %21 : vector<32x128xf32>
      %c0_18 = arith.constant 0 : index
      %c0_19 = arith.constant 0 : index
      %23 = vector.load %arg8[%c0_18, %c0_19] : memref<32x128xf32, #tpu.memory_space<vmem>>, vector<32x128xf32>
      tpu.vector_store %arg8[%c0_18, %c0_19], %22 {strides = array<i32>} : memref<32x128xf32, #tpu.memory_space<vmem>>, vector<32x128xf32>,
    } else {
    }
    return
  }
  func.func @transform_0(%arg0: i32, %arg1: i32, %arg2: i32) -> (i32, i32) {
    %c0_i32 = arith.constant 0 : i32
    return %arg0, %arg2 : i32, i32
  }
  func.func @transform_1(%arg0: i32, %arg1: i32, %arg2: i32) -> (i32, i32) {
    %c0_i32 = arith.constant 0 : i32
    return %arg2, %arg1 : i32, i32
  }
  func.func @transform_2(%arg0: i32, %arg1: i32, %arg2: i32) -> (i32, i32) {
    %c0_i32 = arith.constant 0 : i32
    %c0_i32_0 = arith.constant 0 : i32
    return %c0_i32, %arg1 : i32, i32
  }
  func.func @transform_3(%arg0: i32, %arg1: i32, %arg2: i32) -> (i32, i32) {
    %c0_i32 = arith.constant 0 : i32
    %c0_i32_0 = arith.constant 0 : i32
    return %c0_i32, %arg1 : i32, i32
  }
  func.func @transform_4(%arg0: i32, %arg1: i32, %arg2: i32) -> (i32, i32) {
    %c0_i32 = arith.constant 0 : i32
    return %arg0, %arg1 : i32, i32
  }
  func.func @transform_5(%arg0: i32, %arg1: i32, %arg2: i32) -> (i32, i32) {
    %c0_i32 = arith.constant 0 : i32
    return %arg0, %arg1 : i32, i32
  }
}

module attributes {stable_mosaic.version = 11 : i64} {
  func.func @_conv_matmul_kernel(%arg0: i32, %arg1: i32, %arg2: i32, %arg3: memref<8x128xbf16, #tpu.memory_space<vmem>>, %arg4: memref<128x128xbf16, #tpu.memory_space<vmem>>, %arg5: memref<1x128xf32, #tpu.memory_space<vmem>>, %arg6: memref<1x128xf32, #tpu.memory_space<vmem>>, %arg7: memref<8x128xf32, #tpu.memory_space<vmem>>, %arg8: memref<8x128xf32, #tpu.memory_space<vmem>>) attributes {dimension_semantics = [#tpu.dimension_semantics<parallel>, #tpu.dimension_semantics<parallel>, #tpu.dimension_semantics<arbitrary>], iteration_bounds = array<i64: 1, 2, 9>, scalar_prefetch = 0 : i64, scratch_operands = 1 : i64, tpu.core_type = #tpu.core_type<tc>, window_params = [{transform_indices = @transform_0, window_bounds = array<i64: 8, 128>}, {transform_indices = @transform_1, window_bounds = array<i64: 128, 128>}, {transform_indices = @transform_2, window_bounds = array<i64: 1, 128>}, {transform_indices = @transform_3, window_bounds = array<i64: 1, 128>}, {transform_indices = @transform_4, window_bounds = array<i64: 8, 128>}]} {
    %c0_i32 = arith.constant 0 : i32
    %0 = arith.cmpi eq, %arg2, %c0_i32 : i32
    %1 = arith.extui %0 : i1 to i32
    %c0_i32_0 = arith.constant 0 : i32
    %2 = arith.cmpi ne, %1, %c0_i32_0 : i32
    scf.if %2 {
      %cst_9 = arith.constant 0.000000e+00 : f32
      %12 = vector.broadcast %cst_9 : f32 to vector<8x128xf32>
      %c0_10 = arith.constant 0 : index
      %c0_11 = arith.constant 0 : index
      %13 = vector.load %arg8[%c0_10, %c0_11] : memref<8x128xf32, #tpu.memory_space<vmem>>, vector<8x128xf32>
      tpu.vector_store %arg8[%c0_10, %c0_11], %12 {strides = array<i32>} : memref<8x128xf32, #tpu.memory_space<vmem>>, vector<8x128xf32>,
    } else {
    }
    %c0 = arith.constant 0 : index
    %c0_1 = arith.constant 0 : index
    %3 = vector.load %arg8[%c0, %c0_1] : memref<8x128xf32, #tpu.memory_space<vmem>>, vector<8x128xf32>
    %c0_2 = arith.constant 0 : index
    %c0_3 = arith.constant 0 : index
    %4 = vector.load %arg3[%c0_2, %c0_3] : memref<8x128xbf16, #tpu.memory_space<vmem>>, vector<8x128xbf16>
    %c0_4 = arith.constant 0 : index
    %c0_5 = arith.constant 0 : index
    %5 = vector.load %arg4[%c0_4, %c0_5] : memref<128x128xbf16, #tpu.memory_space<vmem>>, vector<128x128xbf16>
    %cst = arith.constant dense<0.000000e+00> : vector<8x128xf32>
    %6 = tpu.matmul %4, %5, %cst {dimension_numbers = #tpu.dot_dimension_numbers<[1], [0], [0], [1], [0, 0, 1, 1], [], []>} : vector<8x128xbf16>, vector<128x128xbf16>, vector<8x128xf32> -> vector<8x128xf32>
    %7 = arith.addf %3, %6 : vector<8x128xf32>
    %c0_6 = arith.constant 0 : index
    %c0_7 = arith.constant 0 : index
    %8 = vector.load %arg8[%c0_6, %c0_7] : memref<8x128xf32, #tpu.memory_space<vmem>>, vector<8x128xf32>
    tpu.vector_store %arg8[%c0_6, %c0_7], %7 {strides = array<i32>} : memref<8x128xf32, #tpu.memory_space<vmem>>, vector<8x128xf32>,
    %c8_i32 = arith.constant 8 : i32
    %9 = arith.cmpi eq, %arg2, %c8_i32 : i32
    %10 = arith.extui %9 : i1 to i32
    %c0_i32_8 = arith.constant 0 : i32
    %11 = arith.cmpi ne, %10, %c0_i32_8 : i32
    scf.if %11 {
      %c0_9 = arith.constant 0 : index
      %c0_10 = arith.constant 0 : index
      %12 = vector.load %arg8[%c0_9, %c0_10] : memref<8x128xf32, #tpu.memory_space<vmem>>, vector<8x128xf32>
      %c0_11 = arith.constant 0 : index
      %c0_12 = arith.constant 0 : index
      %13 = vector.load %arg5[%c0_11, %c0_12] : memref<1x128xf32, #tpu.memory_space<vmem>>, vector<1x128xf32>
      %14 = vector.broadcast %13 : vector<1x128xf32> to vector<8x128xf32>
      %15 = arith.mulf %12, %14 : vector<8x128xf32>
      %c0_13 = arith.constant 0 : index
      %c0_14 = arith.constant 0 : index
      %16 = vector.load %arg6[%c0_13, %c0_14] : memref<1x128xf32, #tpu.memory_space<vmem>>, vector<1x128xf32>
      %17 = vector.broadcast %16 : vector<1x128xf32> to vector<8x128xf32>
      %18 = arith.addf %15, %17 : vector<8x128xf32>
      %cst_15 = arith.constant 0.000000e+00 : f32
      %19 = vector.broadcast %cst_15 : f32 to vector<8x128xf32>
      %20 = arith.maximumf %18, %19 : vector<8x128xf32>
      %c0_16 = arith.constant 0 : index
      %c0_17 = arith.constant 0 : index
      %21 = vector.load %arg7[%c0_16, %c0_17] : memref<8x128xf32, #tpu.memory_space<vmem>>, vector<8x128xf32>
      tpu.vector_store %arg7[%c0_16, %c0_17], %20 {strides = array<i32>} : memref<8x128xf32, #tpu.memory_space<vmem>>, vector<8x128xf32>,
    } else {
    }
    return
  }
  func.func @transform_0(%arg0: i32, %arg1: i32, %arg2: i32) -> (i32, i32) {
    %c0_i32 = arith.constant 0 : i32
    return %arg0, %arg2 : i32, i32
  }
  func.func @transform_1(%arg0: i32, %arg1: i32, %arg2: i32) -> (i32, i32) {
    %c0_i32 = arith.constant 0 : i32
    return %arg2, %arg1 : i32, i32
  }
  func.func @transform_2(%arg0: i32, %arg1: i32, %arg2: i32) -> (i32, i32) {
    %c0_i32 = arith.constant 0 : i32
    %c0_i32_0 = arith.constant 0 : i32
    return %c0_i32, %arg1 : i32, i32
  }
  func.func @transform_3(%arg0: i32, %arg1: i32, %arg2: i32) -> (i32, i32) {
    %c0_i32 = arith.constant 0 : i32
    %c0_i32_0 = arith.constant 0 : i32
    return %c0_i32, %arg1 : i32, i32
  }
  func.func @transform_4(%arg0: i32, %arg1: i32, %arg2: i32) -> (i32, i32) {
    %c0_i32 = arith.constant 0 : i32
    return %arg0, %arg1 : i32, i32
  }
}

module attributes {stable_mosaic.version = 11 : i64} {
  func.func @_conv_matmul_kernel(%arg0: i32, %arg1: i32, %arg2: i32, %arg3: memref<8x128xbf16, #tpu.memory_space<vmem>>, %arg4: memref<128x128xbf16, #tpu.memory_space<vmem>>, %arg5: memref<1x128xf32, #tpu.memory_space<vmem>>, %arg6: memref<1x128xf32, #tpu.memory_space<vmem>>, %arg7: memref<8x128xf32, #tpu.memory_space<vmem>>, %arg8: memref<8x128xf32, #tpu.memory_space<vmem>>) attributes {dimension_semantics = [#tpu.dimension_semantics<parallel>, #tpu.dimension_semantics<parallel>, #tpu.dimension_semantics<arbitrary>], iteration_bounds = array<i64: 1, 2, 1>, scalar_prefetch = 0 : i64, scratch_operands = 1 : i64, tpu.core_type = #tpu.core_type<tc>, window_params = [{transform_indices = @transform_0, window_bounds = array<i64: 8, 128>}, {transform_indices = @transform_1, window_bounds = array<i64: 128, 128>}, {transform_indices = @transform_2, window_bounds = array<i64: 1, 128>}, {transform_indices = @transform_3, window_bounds = array<i64: 1, 128>}, {transform_indices = @transform_4, window_bounds = array<i64: 8, 128>}]} {
    %c0_i32 = arith.constant 0 : i32
    %0 = arith.cmpi eq, %arg2, %c0_i32 : i32
    %1 = arith.extui %0 : i1 to i32
    %c0_i32_0 = arith.constant 0 : i32
    %2 = arith.cmpi ne, %1, %c0_i32_0 : i32
    scf.if %2 {
      %cst_10 = arith.constant 0.000000e+00 : f32
      %12 = vector.broadcast %cst_10 : f32 to vector<8x128xf32>
      %c0_11 = arith.constant 0 : index
      %c0_12 = arith.constant 0 : index
      %13 = vector.load %arg8[%c0_11, %c0_12] : memref<8x128xf32, #tpu.memory_space<vmem>>, vector<8x128xf32>
      tpu.vector_store %arg8[%c0_11, %c0_12], %12 {strides = array<i32>} : memref<8x128xf32, #tpu.memory_space<vmem>>, vector<8x128xf32>,
    } else {
    }
    %c0 = arith.constant 0 : index
    %c0_1 = arith.constant 0 : index
    %3 = vector.load %arg8[%c0, %c0_1] : memref<8x128xf32, #tpu.memory_space<vmem>>, vector<8x128xf32>
    %c0_2 = arith.constant 0 : index
    %c0_3 = arith.constant 0 : index
    %4 = vector.load %arg3[%c0_2, %c0_3] : memref<8x128xbf16, #tpu.memory_space<vmem>>, vector<8x128xbf16>
    %c0_4 = arith.constant 0 : index
    %c0_5 = arith.constant 0 : index
    %5 = vector.load %arg4[%c0_4, %c0_5] : memref<128x128xbf16, #tpu.memory_space<vmem>>, vector<128x128xbf16>
    %cst = arith.constant dense<0.000000e+00> : vector<8x128xf32>
    %6 = tpu.matmul %4, %5, %cst {dimension_numbers = #tpu.dot_dimension_numbers<[1], [0], [0], [1], [0, 0, 1, 1], [], []>} : vector<8x128xbf16>, vector<128x128xbf16>, vector<8x128xf32> -> vector<8x128xf32>
    %7 = arith.addf %3, %6 : vector<8x128xf32>
    %c0_6 = arith.constant 0 : index
    %c0_7 = arith.constant 0 : index
    %8 = vector.load %arg8[%c0_6, %c0_7] : memref<8x128xf32, #tpu.memory_space<vmem>>, vector<8x128xf32>
    tpu.vector_store %arg8[%c0_6, %c0_7], %7 {strides = array<i32>} : memref<8x128xf32, #tpu.memory_space<vmem>>, vector<8x128xf32>,
    %c0_i32_8 = arith.constant 0 : i32
    %9 = arith.cmpi eq, %arg2, %c0_i32_8 : i32
    %10 = arith.extui %9 : i1 to i32
    %c0_i32_9 = arith.constant 0 : i32
    %11 = arith.cmpi ne, %10, %c0_i32_9 : i32
    scf.if %11 {
      %c0_10 = arith.constant 0 : index
      %c0_11 = arith.constant 0 : index
      %12 = vector.load %arg8[%c0_10, %c0_11] : memref<8x128xf32, #tpu.memory_space<vmem>>, vector<8x128xf32>
      %c0_12 = arith.constant 0 : index
      %c0_13 = arith.constant 0 : index
      %13 = vector.load %arg5[%c0_12, %c0_13] : memref<1x128xf32, #tpu.memory_space<vmem>>, vector<1x128xf32>
      %14 = vector.broadcast %13 : vector<1x128xf32> to vector<8x128xf32>
      %15 = arith.mulf %12, %14 : vector<8x128xf32>
      %c0_14 = arith.constant 0 : index
      %c0_15 = arith.constant 0 : index
      %16 = vector.load %arg6[%c0_14, %c0_15] : memref<1x128xf32, #tpu.memory_space<vmem>>, vector<1x128xf32>
      %17 = vector.broadcast %16 : vector<1x128xf32> to vector<8x128xf32>
      %18 = arith.addf %15, %17 : vector<8x128xf32>
      %c0_16 = arith.constant 0 : index
      %c0_17 = arith.constant 0 : index
      %19 = vector.load %arg7[%c0_16, %c0_17] : memref<8x128xf32, #tpu.memory_space<vmem>>, vector<8x128xf32>
      tpu.vector_store %arg7[%c0_16, %c0_17], %18 {strides = array<i32>} : memref<8x128xf32, #tpu.memory_space<vmem>>, vector<8x128xf32>,
    } else {
    }
    return
  }
  func.func @transform_0(%arg0: i32, %arg1: i32, %arg2: i32) -> (i32, i32) {
    %c0_i32 = arith.constant 0 : i32
    return %arg0, %arg2 : i32, i32
  }
  func.func @transform_1(%arg0: i32, %arg1: i32, %arg2: i32) -> (i32, i32) {
    %c0_i32 = arith.constant 0 : i32
    return %arg2, %arg1 : i32, i32
  }
  func.func @transform_2(%arg0: i32, %arg1: i32, %arg2: i32) -> (i32, i32) {
    %c0_i32 = arith.constant 0 : i32
    %c0_i32_0 = arith.constant 0 : i32
    return %c0_i32, %arg1 : i32, i32
  }
  func.func @transform_3(%arg0: i32, %arg1: i32, %arg2: i32) -> (i32, i32) {
    %c0_i32 = arith.constant 0 : i32
    %c0_i32_0 = arith.constant 0 : i32
    return %c0_i32, %arg1 : i32, i32
  }
  func.func @transform_4(%arg0: i32, %arg1: i32, %arg2: i32) -> (i32, i32) {
    %c0_i32 = arith.constant 0 : i32
    return %arg0, %arg1 : i32, i32
  }
}

module attributes {stable_mosaic.version = 11 : i64} {
  func.func @_conv_matmul_kernel(%arg0: i32, %arg1: i32, %arg2: i32, %arg3: memref<8x256xbf16, #tpu.memory_space<vmem>>, %arg4: memref<256x128xbf16, #tpu.memory_space<vmem>>, %arg5: memref<1x128xf32, #tpu.memory_space<vmem>>, %arg6: memref<1x128xf32, #tpu.memory_space<vmem>>, %arg7: memref<8x128xf32, #tpu.memory_space<vmem>>, %arg8: memref<8x128xf32, #tpu.memory_space<vmem>>, %arg9: memref<8x128xf32, #tpu.memory_space<vmem>>) attributes {dimension_semantics = [#tpu.dimension_semantics<parallel>, #tpu.dimension_semantics<parallel>, #tpu.dimension_semantics<arbitrary>], iteration_bounds = array<i64: 1, 2, 9>, scalar_prefetch = 0 : i64, scratch_operands = 1 : i64, tpu.core_type = #tpu.core_type<tc>, window_params = [{transform_indices = @transform_0, window_bounds = array<i64: 8, 256>}, {transform_indices = @transform_1, window_bounds = array<i64: 256, 128>}, {transform_indices = @transform_2, window_bounds = array<i64: 1, 128>}, {transform_indices = @transform_3, window_bounds = array<i64: 1, 128>}, {transform_indices = @transform_4, window_bounds = array<i64: 8, 128>}, {transform_indices = @transform_5, window_bounds = array<i64: 8, 128>}]} {
    %c0_i32 = arith.constant 0 : i32
    %0 = arith.cmpi eq, %arg2, %c0_i32 : i32
    %1 = arith.extui %0 : i1 to i32
    %c0_i32_0 = arith.constant 0 : i32
    %2 = arith.cmpi ne, %1, %c0_i32_0 : i32
    scf.if %2 {
      %cst_9 = arith.constant 0.000000e+00 : f32
      %12 = vector.broadcast %cst_9 : f32 to vector<8x128xf32>
      %c0_10 = arith.constant 0 : index
      %c0_11 = arith.constant 0 : index
      %13 = vector.load %arg9[%c0_10, %c0_11] : memref<8x128xf32, #tpu.memory_space<vmem>>, vector<8x128xf32>
      tpu.vector_store %arg9[%c0_10, %c0_11], %12 {strides = array<i32>} : memref<8x128xf32, #tpu.memory_space<vmem>>, vector<8x128xf32>,
    } else {
    }
    %c0 = arith.constant 0 : index
    %c0_1 = arith.constant 0 : index
    %3 = vector.load %arg9[%c0, %c0_1] : memref<8x128xf32, #tpu.memory_space<vmem>>, vector<8x128xf32>
    %c0_2 = arith.constant 0 : index
    %c0_3 = arith.constant 0 : index
    %4 = vector.load %arg3[%c0_2, %c0_3] : memref<8x256xbf16, #tpu.memory_space<vmem>>, vector<8x256xbf16>
    %c0_4 = arith.constant 0 : index
    %c0_5 = arith.constant 0 : index
    %5 = vector.load %arg4[%c0_4, %c0_5] : memref<256x128xbf16, #tpu.memory_space<vmem>>, vector<256x128xbf16>
    %cst = arith.constant dense<0.000000e+00> : vector<8x128xf32>
    %6 = tpu.matmul %4, %5, %cst {dimension_numbers = #tpu.dot_dimension_numbers<[1], [0], [0], [1], [0, 0, 1, 1], [], []>} : vector<8x256xbf16>, vector<256x128xbf16>, vector<8x128xf32> -> vector<8x128xf32>
    %7 = arith.addf %3, %6 : vector<8x128xf32>
    %c0_6 = arith.constant 0 : index
    %c0_7 = arith.constant 0 : index
    %8 = vector.load %arg9[%c0_6, %c0_7] : memref<8x128xf32, #tpu.memory_space<vmem>>, vector<8x128xf32>
    tpu.vector_store %arg9[%c0_6, %c0_7], %7 {strides = array<i32>} : memref<8x128xf32, #tpu.memory_space<vmem>>, vector<8x128xf32>,
    %c8_i32 = arith.constant 8 : i32
    %9 = arith.cmpi eq, %arg2, %c8_i32 : i32
    %10 = arith.extui %9 : i1 to i32
    %c0_i32_8 = arith.constant 0 : i32
    %11 = arith.cmpi ne, %10, %c0_i32_8 : i32
    scf.if %11 {
      %c0_9 = arith.constant 0 : index
      %c0_10 = arith.constant 0 : index
      %12 = vector.load %arg9[%c0_9, %c0_10] : memref<8x128xf32, #tpu.memory_space<vmem>>, vector<8x128xf32>
      %c0_11 = arith.constant 0 : index
      %c0_12 = arith.constant 0 : index
      %13 = vector.load %arg5[%c0_11, %c0_12] : memref<1x128xf32, #tpu.memory_space<vmem>>, vector<1x128xf32>
      %14 = vector.broadcast %13 : vector<1x128xf32> to vector<8x128xf32>
      %15 = arith.mulf %12, %14 : vector<8x128xf32>
      %c0_13 = arith.constant 0 : index
      %c0_14 = arith.constant 0 : index
      %16 = vector.load %arg6[%c0_13, %c0_14] : memref<1x128xf32, #tpu.memory_space<vmem>>, vector<1x128xf32>
      %17 = vector.broadcast %16 : vector<1x128xf32> to vector<8x128xf32>
      %18 = arith.addf %15, %17 : vector<8x128xf32>
      %c0_15 = arith.constant 0 : index
      %c0_16 = arith.constant 0 : index
      %19 = vector.load %arg7[%c0_15, %c0_16] : memref<8x128xf32, #tpu.memory_space<vmem>>, vector<8x128xf32>
      %20 = arith.addf %18, %19 : vector<8x128xf32>
      %cst_17 = arith.constant 0.000000e+00 : f32
      %21 = vector.broadcast %cst_17 : f32 to vector<8x128xf32>
      %22 = arith.maximumf %20, %21 : vector<8x128xf32>
      %c0_18 = arith.constant 0 : index
      %c0_19 = arith.constant 0 : index
      %23 = vector.load %arg8[%c0_18, %c0_19] : memref<8x128xf32, #tpu.memory_space<vmem>>, vector<8x128xf32>
      tpu.vector_store %arg8[%c0_18, %c0_19], %22 {strides = array<i32>} : memref<8x128xf32, #tpu.memory_space<vmem>>, vector<8x128xf32>,
    } else {
    }
    return
  }
  func.func @transform_0(%arg0: i32, %arg1: i32, %arg2: i32) -> (i32, i32) {
    %c0_i32 = arith.constant 0 : i32
    return %arg0, %arg2 : i32, i32
  }
  func.func @transform_1(%arg0: i32, %arg1: i32, %arg2: i32) -> (i32, i32) {
    %c0_i32 = arith.constant 0 : i32
    return %arg2, %arg1 : i32, i32
  }
  func.func @transform_2(%arg0: i32, %arg1: i32, %arg2: i32) -> (i32, i32) {
    %c0_i32 = arith.constant 0 : i32
    %c0_i32_0 = arith.constant 0 : i32
    return %c0_i32, %arg1 : i32, i32
  }
  func.func @transform_3(%arg0: i32, %arg1: i32, %arg2: i32) -> (i32, i32) {
    %c0_i32 = arith.constant 0 : i32
    %c0_i32_0 = arith.constant 0 : i32
    return %c0_i32, %arg1 : i32, i32
  }
  func.func @transform_4(%arg0: i32, %arg1: i32, %arg2: i32) -> (i32, i32) {
    %c0_i32 = arith.constant 0 : i32
    return %arg0, %arg1 : i32, i32
  }
  func.func @transform_5(%arg0: i32, %arg1: i32, %arg2: i32) -> (i32, i32) {
    %c0_i32 = arith.constant 0 : i32
    return %arg0, %arg1 : i32, i32
  }
}

module attributes {stable_mosaic.version = 11 : i64} {
  func.func @_conv_matmul_kernel(%arg0: i32, %arg1: i32, %arg2: i32, %arg3: memref<8x256xbf16, #tpu.memory_space<vmem>>, %arg4: memref<256x128xbf16, #tpu.memory_space<vmem>>, %arg5: memref<1x128xf32, #tpu.memory_space<vmem>>, %arg6: memref<1x128xf32, #tpu.memory_space<vmem>>, %arg7: memref<8x128xf32, #tpu.memory_space<vmem>>, %arg8: memref<8x128xf32, #tpu.memory_space<vmem>>) attributes {dimension_semantics = [#tpu.dimension_semantics<parallel>, #tpu.dimension_semantics<parallel>, #tpu.dimension_semantics<arbitrary>], iteration_bounds = array<i64: 1, 2, 9>, scalar_prefetch = 0 : i64, scratch_operands = 1 : i64, tpu.core_type = #tpu.core_type<tc>, window_params = [{transform_indices = @transform_0, window_bounds = array<i64: 8, 256>}, {transform_indices = @transform_1, window_bounds = array<i64: 256, 128>}, {transform_indices = @transform_2, window_bounds = array<i64: 1, 128>}, {transform_indices = @transform_3, window_bounds = array<i64: 1, 128>}, {transform_indices = @transform_4, window_bounds = array<i64: 8, 128>}]} {
    %c0_i32 = arith.constant 0 : i32
    %0 = arith.cmpi eq, %arg2, %c0_i32 : i32
    %1 = arith.extui %0 : i1 to i32
    %c0_i32_0 = arith.constant 0 : i32
    %2 = arith.cmpi ne, %1, %c0_i32_0 : i32
    scf.if %2 {
      %cst_9 = arith.constant 0.000000e+00 : f32
      %12 = vector.broadcast %cst_9 : f32 to vector<8x128xf32>
      %c0_10 = arith.constant 0 : index
      %c0_11 = arith.constant 0 : index
      %13 = vector.load %arg8[%c0_10, %c0_11] : memref<8x128xf32, #tpu.memory_space<vmem>>, vector<8x128xf32>
      tpu.vector_store %arg8[%c0_10, %c0_11], %12 {strides = array<i32>} : memref<8x128xf32, #tpu.memory_space<vmem>>, vector<8x128xf32>,
    } else {
    }
    %c0 = arith.constant 0 : index
    %c0_1 = arith.constant 0 : index
    %3 = vector.load %arg8[%c0, %c0_1] : memref<8x128xf32, #tpu.memory_space<vmem>>, vector<8x128xf32>
    %c0_2 = arith.constant 0 : index
    %c0_3 = arith.constant 0 : index
    %4 = vector.load %arg3[%c0_2, %c0_3] : memref<8x256xbf16, #tpu.memory_space<vmem>>, vector<8x256xbf16>
    %c0_4 = arith.constant 0 : index
    %c0_5 = arith.constant 0 : index
    %5 = vector.load %arg4[%c0_4, %c0_5] : memref<256x128xbf16, #tpu.memory_space<vmem>>, vector<256x128xbf16>
    %cst = arith.constant dense<0.000000e+00> : vector<8x128xf32>
    %6 = tpu.matmul %4, %5, %cst {dimension_numbers = #tpu.dot_dimension_numbers<[1], [0], [0], [1], [0, 0, 1, 1], [], []>} : vector<8x256xbf16>, vector<256x128xbf16>, vector<8x128xf32> -> vector<8x128xf32>
    %7 = arith.addf %3, %6 : vector<8x128xf32>
    %c0_6 = arith.constant 0 : index
    %c0_7 = arith.constant 0 : index
    %8 = vector.load %arg8[%c0_6, %c0_7] : memref<8x128xf32, #tpu.memory_space<vmem>>, vector<8x128xf32>
    tpu.vector_store %arg8[%c0_6, %c0_7], %7 {strides = array<i32>} : memref<8x128xf32, #tpu.memory_space<vmem>>, vector<8x128xf32>,
    %c8_i32 = arith.constant 8 : i32
    %9 = arith.cmpi eq, %arg2, %c8_i32 : i32
    %10 = arith.extui %9 : i1 to i32
    %c0_i32_8 = arith.constant 0 : i32
    %11 = arith.cmpi ne, %10, %c0_i32_8 : i32
    scf.if %11 {
      %c0_9 = arith.constant 0 : index
      %c0_10 = arith.constant 0 : index
      %12 = vector.load %arg8[%c0_9, %c0_10] : memref<8x128xf32, #tpu.memory_space<vmem>>, vector<8x128xf32>
      %c0_11 = arith.constant 0 : index
      %c0_12 = arith.constant 0 : index
      %13 = vector.load %arg5[%c0_11, %c0_12] : memref<1x128xf32, #tpu.memory_space<vmem>>, vector<1x128xf32>
      %14 = vector.broadcast %13 : vector<1x128xf32> to vector<8x128xf32>
      %15 = arith.mulf %12, %14 : vector<8x128xf32>
      %c0_13 = arith.constant 0 : index
      %c0_14 = arith.constant 0 : index
      %16 = vector.load %arg6[%c0_13, %c0_14] : memref<1x128xf32, #tpu.memory_space<vmem>>, vector<1x128xf32>
      %17 = vector.broadcast %16 : vector<1x128xf32> to vector<8x128xf32>
      %18 = arith.addf %15, %17 : vector<8x128xf32>
      %cst_15 = arith.constant 0.000000e+00 : f32
      %19 = vector.broadcast %cst_15 : f32 to vector<8x128xf32>
      %20 = arith.maximumf %18, %19 : vector<8x128xf32>
      %c0_16 = arith.constant 0 : index
      %c0_17 = arith.constant 0 : index
      %21 = vector.load %arg7[%c0_16, %c0_17] : memref<8x128xf32, #tpu.memory_space<vmem>>, vector<8x128xf32>
      tpu.vector_store %arg7[%c0_16, %c0_17], %20 {strides = array<i32>} : memref<8x128xf32, #tpu.memory_space<vmem>>, vector<8x128xf32>,
    } else {
    }
    return
  }
  func.func @transform_0(%arg0: i32, %arg1: i32, %arg2: i32) -> (i32, i32) {
    %c0_i32 = arith.constant 0 : i32
    return %arg0, %arg2 : i32, i32
  }
  func.func @transform_1(%arg0: i32, %arg1: i32, %arg2: i32) -> (i32, i32) {
    %c0_i32 = arith.constant 0 : i32
    return %arg2, %arg1 : i32, i32
  }
  func.func @transform_2(%arg0: i32, %arg1: i32, %arg2: i32) -> (i32, i32) {
    %c0_i32 = arith.constant 0 : i32
    %c0_i32_0 = arith.constant 0 : i32
    return %c0_i32, %arg1 : i32, i32
  }
  func.func @transform_3(%arg0: i32, %arg1: i32, %arg2: i32) -> (i32, i32) {
    %c0_i32 = arith.constant 0 : i32
    %c0_i32_0 = arith.constant 0 : i32
    return %c0_i32, %arg1 : i32, i32
  }
  func.func @transform_4(%arg0: i32, %arg1: i32, %arg2: i32) -> (i32, i32) {
    %c0_i32 = arith.constant 0 : i32
    return %arg0, %arg1 : i32, i32
  }
}

module attributes {stable_mosaic.version = 11 : i64} {
  func.func @_conv_matmul_kernel(%arg0: i32, %arg1: i32, %arg2: i32, %arg3: memref<8x256xbf16, #tpu.memory_space<vmem>>, %arg4: memref<256x128xbf16, #tpu.memory_space<vmem>>, %arg5: memref<1x128xf32, #tpu.memory_space<vmem>>, %arg6: memref<1x128xf32, #tpu.memory_space<vmem>>, %arg7: memref<8x128xf32, #tpu.memory_space<vmem>>, %arg8: memref<8x128xf32, #tpu.memory_space<vmem>>) attributes {dimension_semantics = [#tpu.dimension_semantics<parallel>, #tpu.dimension_semantics<parallel>, #tpu.dimension_semantics<arbitrary>], iteration_bounds = array<i64: 1, 4, 9>, scalar_prefetch = 0 : i64, scratch_operands = 1 : i64, tpu.core_type = #tpu.core_type<tc>, window_params = [{transform_indices = @transform_0, window_bounds = array<i64: 8, 256>}, {transform_indices = @transform_1, window_bounds = array<i64: 256, 128>}, {transform_indices = @transform_2, window_bounds = array<i64: 1, 128>}, {transform_indices = @transform_3, window_bounds = array<i64: 1, 128>}, {transform_indices = @transform_4, window_bounds = array<i64: 8, 128>}]} {
    %c0_i32 = arith.constant 0 : i32
    %0 = arith.cmpi eq, %arg2, %c0_i32 : i32
    %1 = arith.extui %0 : i1 to i32
    %c0_i32_0 = arith.constant 0 : i32
    %2 = arith.cmpi ne, %1, %c0_i32_0 : i32
    scf.if %2 {
      %cst_9 = arith.constant 0.000000e+00 : f32
      %12 = vector.broadcast %cst_9 : f32 to vector<8x128xf32>
      %c0_10 = arith.constant 0 : index
      %c0_11 = arith.constant 0 : index
      %13 = vector.load %arg8[%c0_10, %c0_11] : memref<8x128xf32, #tpu.memory_space<vmem>>, vector<8x128xf32>
      tpu.vector_store %arg8[%c0_10, %c0_11], %12 {strides = array<i32>} : memref<8x128xf32, #tpu.memory_space<vmem>>, vector<8x128xf32>,
    } else {
    }
    %c0 = arith.constant 0 : index
    %c0_1 = arith.constant 0 : index
    %3 = vector.load %arg8[%c0, %c0_1] : memref<8x128xf32, #tpu.memory_space<vmem>>, vector<8x128xf32>
    %c0_2 = arith.constant 0 : index
    %c0_3 = arith.constant 0 : index
    %4 = vector.load %arg3[%c0_2, %c0_3] : memref<8x256xbf16, #tpu.memory_space<vmem>>, vector<8x256xbf16>
    %c0_4 = arith.constant 0 : index
    %c0_5 = arith.constant 0 : index
    %5 = vector.load %arg4[%c0_4, %c0_5] : memref<256x128xbf16, #tpu.memory_space<vmem>>, vector<256x128xbf16>
    %cst = arith.constant dense<0.000000e+00> : vector<8x128xf32>
    %6 = tpu.matmul %4, %5, %cst {dimension_numbers = #tpu.dot_dimension_numbers<[1], [0], [0], [1], [0, 0, 1, 1], [], []>} : vector<8x256xbf16>, vector<256x128xbf16>, vector<8x128xf32> -> vector<8x128xf32>
    %7 = arith.addf %3, %6 : vector<8x128xf32>
    %c0_6 = arith.constant 0 : index
    %c0_7 = arith.constant 0 : index
    %8 = vector.load %arg8[%c0_6, %c0_7] : memref<8x128xf32, #tpu.memory_space<vmem>>, vector<8x128xf32>
    tpu.vector_store %arg8[%c0_6, %c0_7], %7 {strides = array<i32>} : memref<8x128xf32, #tpu.memory_space<vmem>>, vector<8x128xf32>,
    %c8_i32 = arith.constant 8 : i32
    %9 = arith.cmpi eq, %arg2, %c8_i32 : i32
    %10 = arith.extui %9 : i1 to i32
    %c0_i32_8 = arith.constant 0 : i32
    %11 = arith.cmpi ne, %10, %c0_i32_8 : i32
    scf.if %11 {
      %c0_9 = arith.constant 0 : index
      %c0_10 = arith.constant 0 : index
      %12 = vector.load %arg8[%c0_9, %c0_10] : memref<8x128xf32, #tpu.memory_space<vmem>>, vector<8x128xf32>
      %c0_11 = arith.constant 0 : index
      %c0_12 = arith.constant 0 : index
      %13 = vector.load %arg5[%c0_11, %c0_12] : memref<1x128xf32, #tpu.memory_space<vmem>>, vector<1x128xf32>
      %14 = vector.broadcast %13 : vector<1x128xf32> to vector<8x128xf32>
      %15 = arith.mulf %12, %14 : vector<8x128xf32>
      %c0_13 = arith.constant 0 : index
      %c0_14 = arith.constant 0 : index
      %16 = vector.load %arg6[%c0_13, %c0_14] : memref<1x128xf32, #tpu.memory_space<vmem>>, vector<1x128xf32>
      %17 = vector.broadcast %16 : vector<1x128xf32> to vector<8x128xf32>
      %18 = arith.addf %15, %17 : vector<8x128xf32>
      %cst_15 = arith.constant 0.000000e+00 : f32
      %19 = vector.broadcast %cst_15 : f32 to vector<8x128xf32>
      %20 = arith.maximumf %18, %19 : vector<8x128xf32>
      %c0_16 = arith.constant 0 : index
      %c0_17 = arith.constant 0 : index
      %21 = vector.load %arg7[%c0_16, %c0_17] : memref<8x128xf32, #tpu.memory_space<vmem>>, vector<8x128xf32>
      tpu.vector_store %arg7[%c0_16, %c0_17], %20 {strides = array<i32>} : memref<8x128xf32, #tpu.memory_space<vmem>>, vector<8x128xf32>,
    } else {
    }
    return
  }
  func.func @transform_0(%arg0: i32, %arg1: i32, %arg2: i32) -> (i32, i32) {
    %c0_i32 = arith.constant 0 : i32
    return %arg0, %arg2 : i32, i32
  }
  func.func @transform_1(%arg0: i32, %arg1: i32, %arg2: i32) -> (i32, i32) {
    %c0_i32 = arith.constant 0 : i32
    return %arg2, %arg1 : i32, i32
  }
  func.func @transform_2(%arg0: i32, %arg1: i32, %arg2: i32) -> (i32, i32) {
    %c0_i32 = arith.constant 0 : i32
    %c0_i32_0 = arith.constant 0 : i32
    return %c0_i32, %arg1 : i32, i32
  }
  func.func @transform_3(%arg0: i32, %arg1: i32, %arg2: i32) -> (i32, i32) {
    %c0_i32 = arith.constant 0 : i32
    %c0_i32_0 = arith.constant 0 : i32
    return %c0_i32, %arg1 : i32, i32
  }
  func.func @transform_4(%arg0: i32, %arg1: i32, %arg2: i32) -> (i32, i32) {
    %c0_i32 = arith.constant 0 : i32
    return %arg0, %arg1 : i32, i32
  }
}

module attributes {stable_mosaic.version = 11 : i64} {
  func.func @_conv_matmul_kernel(%arg0: i32, %arg1: i32, %arg2: i32, %arg3: memref<8x256xbf16, #tpu.memory_space<vmem>>, %arg4: memref<256x128xbf16, #tpu.memory_space<vmem>>, %arg5: memref<1x128xf32, #tpu.memory_space<vmem>>, %arg6: memref<1x128xf32, #tpu.memory_space<vmem>>, %arg7: memref<8x128xf32, #tpu.memory_space<vmem>>, %arg8: memref<8x128xf32, #tpu.memory_space<vmem>>) attributes {dimension_semantics = [#tpu.dimension_semantics<parallel>, #tpu.dimension_semantics<parallel>, #tpu.dimension_semantics<arbitrary>], iteration_bounds = array<i64: 1, 4, 1>, scalar_prefetch = 0 : i64, scratch_operands = 1 : i64, tpu.core_type = #tpu.core_type<tc>, window_params = [{transform_indices = @transform_0, window_bounds = array<i64: 8, 256>}, {transform_indices = @transform_1, window_bounds = array<i64: 256, 128>}, {transform_indices = @transform_2, window_bounds = array<i64: 1, 128>}, {transform_indices = @transform_3, window_bounds = array<i64: 1, 128>}, {transform_indices = @transform_4, window_bounds = array<i64: 8, 128>}]} {
    %c0_i32 = arith.constant 0 : i32
    %0 = arith.cmpi eq, %arg2, %c0_i32 : i32
    %1 = arith.extui %0 : i1 to i32
    %c0_i32_0 = arith.constant 0 : i32
    %2 = arith.cmpi ne, %1, %c0_i32_0 : i32
    scf.if %2 {
      %cst_10 = arith.constant 0.000000e+00 : f32
      %12 = vector.broadcast %cst_10 : f32 to vector<8x128xf32>
      %c0_11 = arith.constant 0 : index
      %c0_12 = arith.constant 0 : index
      %13 = vector.load %arg8[%c0_11, %c0_12] : memref<8x128xf32, #tpu.memory_space<vmem>>, vector<8x128xf32>
      tpu.vector_store %arg8[%c0_11, %c0_12], %12 {strides = array<i32>} : memref<8x128xf32, #tpu.memory_space<vmem>>, vector<8x128xf32>,
    } else {
    }
    %c0 = arith.constant 0 : index
    %c0_1 = arith.constant 0 : index
    %3 = vector.load %arg8[%c0, %c0_1] : memref<8x128xf32, #tpu.memory_space<vmem>>, vector<8x128xf32>
    %c0_2 = arith.constant 0 : index
    %c0_3 = arith.constant 0 : index
    %4 = vector.load %arg3[%c0_2, %c0_3] : memref<8x256xbf16, #tpu.memory_space<vmem>>, vector<8x256xbf16>
    %c0_4 = arith.constant 0 : index
    %c0_5 = arith.constant 0 : index
    %5 = vector.load %arg4[%c0_4, %c0_5] : memref<256x128xbf16, #tpu.memory_space<vmem>>, vector<256x128xbf16>
    %cst = arith.constant dense<0.000000e+00> : vector<8x128xf32>
    %6 = tpu.matmul %4, %5, %cst {dimension_numbers = #tpu.dot_dimension_numbers<[1], [0], [0], [1], [0, 0, 1, 1], [], []>} : vector<8x256xbf16>, vector<256x128xbf16>, vector<8x128xf32> -> vector<8x128xf32>
    %7 = arith.addf %3, %6 : vector<8x128xf32>
    %c0_6 = arith.constant 0 : index
    %c0_7 = arith.constant 0 : index
    %8 = vector.load %arg8[%c0_6, %c0_7] : memref<8x128xf32, #tpu.memory_space<vmem>>, vector<8x128xf32>
    tpu.vector_store %arg8[%c0_6, %c0_7], %7 {strides = array<i32>} : memref<8x128xf32, #tpu.memory_space<vmem>>, vector<8x128xf32>,
    %c0_i32_8 = arith.constant 0 : i32
    %9 = arith.cmpi eq, %arg2, %c0_i32_8 : i32
    %10 = arith.extui %9 : i1 to i32
    %c0_i32_9 = arith.constant 0 : i32
    %11 = arith.cmpi ne, %10, %c0_i32_9 : i32
    scf.if %11 {
      %c0_10 = arith.constant 0 : index
      %c0_11 = arith.constant 0 : index
      %12 = vector.load %arg8[%c0_10, %c0_11] : memref<8x128xf32, #tpu.memory_space<vmem>>, vector<8x128xf32>
      %c0_12 = arith.constant 0 : index
      %c0_13 = arith.constant 0 : index
      %13 = vector.load %arg5[%c0_12, %c0_13] : memref<1x128xf32, #tpu.memory_space<vmem>>, vector<1x128xf32>
      %14 = vector.broadcast %13 : vector<1x128xf32> to vector<8x128xf32>
      %15 = arith.mulf %12, %14 : vector<8x128xf32>
      %c0_14 = arith.constant 0 : index
      %c0_15 = arith.constant 0 : index
      %16 = vector.load %arg6[%c0_14, %c0_15] : memref<1x128xf32, #tpu.memory_space<vmem>>, vector<1x128xf32>
      %17 = vector.broadcast %16 : vector<1x128xf32> to vector<8x128xf32>
      %18 = arith.addf %15, %17 : vector<8x128xf32>
      %c0_16 = arith.constant 0 : index
      %c0_17 = arith.constant 0 : index
      %19 = vector.load %arg7[%c0_16, %c0_17] : memref<8x128xf32, #tpu.memory_space<vmem>>, vector<8x128xf32>
      tpu.vector_store %arg7[%c0_16, %c0_17], %18 {strides = array<i32>} : memref<8x128xf32, #tpu.memory_space<vmem>>, vector<8x128xf32>,
    } else {
    }
    return
  }
  func.func @transform_0(%arg0: i32, %arg1: i32, %arg2: i32) -> (i32, i32) {
    %c0_i32 = arith.constant 0 : i32
    return %arg0, %arg2 : i32, i32
  }
  func.func @transform_1(%arg0: i32, %arg1: i32, %arg2: i32) -> (i32, i32) {
    %c0_i32 = arith.constant 0 : i32
    return %arg2, %arg1 : i32, i32
  }
  func.func @transform_2(%arg0: i32, %arg1: i32, %arg2: i32) -> (i32, i32) {
    %c0_i32 = arith.constant 0 : i32
    %c0_i32_0 = arith.constant 0 : i32
    return %c0_i32, %arg1 : i32, i32
  }
  func.func @transform_3(%arg0: i32, %arg1: i32, %arg2: i32) -> (i32, i32) {
    %c0_i32 = arith.constant 0 : i32
    %c0_i32_0 = arith.constant 0 : i32
    return %c0_i32, %arg1 : i32, i32
  }
  func.func @transform_4(%arg0: i32, %arg1: i32, %arg2: i32) -> (i32, i32) {
    %c0_i32 = arith.constant 0 : i32
    return %arg0, %arg1 : i32, i32
  }
}

module attributes {stable_mosaic.version = 11 : i64} {
  func.func @_conv_matmul_kernel(%arg0: i32, %arg1: i32, %arg2: i32, %arg3: memref<8x256xbf16, #tpu.memory_space<vmem>>, %arg4: memref<256x128xbf16, #tpu.memory_space<vmem>>, %arg5: memref<1x128xf32, #tpu.memory_space<vmem>>, %arg6: memref<1x128xf32, #tpu.memory_space<vmem>>, %arg7: memref<8x128xf32, #tpu.memory_space<vmem>>, %arg8: memref<8x128xf32, #tpu.memory_space<vmem>>, %arg9: memref<8x128xf32, #tpu.memory_space<vmem>>) attributes {dimension_semantics = [#tpu.dimension_semantics<parallel>, #tpu.dimension_semantics<parallel>, #tpu.dimension_semantics<arbitrary>], iteration_bounds = array<i64: 1, 4, 18>, scalar_prefetch = 0 : i64, scratch_operands = 1 : i64, tpu.core_type = #tpu.core_type<tc>, window_params = [{transform_indices = @transform_0, window_bounds = array<i64: 8, 256>}, {transform_indices = @transform_1, window_bounds = array<i64: 256, 128>}, {transform_indices = @transform_2, window_bounds = array<i64: 1, 128>}, {transform_indices = @transform_3, window_bounds = array<i64: 1, 128>}, {transform_indices = @transform_4, window_bounds = array<i64: 8, 128>}, {transform_indices = @transform_5, window_bounds = array<i64: 8, 128>}]} {
    %c0_i32 = arith.constant 0 : i32
    %0 = arith.cmpi eq, %arg2, %c0_i32 : i32
    %1 = arith.extui %0 : i1 to i32
    %c0_i32_0 = arith.constant 0 : i32
    %2 = arith.cmpi ne, %1, %c0_i32_0 : i32
    scf.if %2 {
      %cst_9 = arith.constant 0.000000e+00 : f32
      %12 = vector.broadcast %cst_9 : f32 to vector<8x128xf32>
      %c0_10 = arith.constant 0 : index
      %c0_11 = arith.constant 0 : index
      %13 = vector.load %arg9[%c0_10, %c0_11] : memref<8x128xf32, #tpu.memory_space<vmem>>, vector<8x128xf32>
      tpu.vector_store %arg9[%c0_10, %c0_11], %12 {strides = array<i32>} : memref<8x128xf32, #tpu.memory_space<vmem>>, vector<8x128xf32>,
    } else {
    }
    %c0 = arith.constant 0 : index
    %c0_1 = arith.constant 0 : index
    %3 = vector.load %arg9[%c0, %c0_1] : memref<8x128xf32, #tpu.memory_space<vmem>>, vector<8x128xf32>
    %c0_2 = arith.constant 0 : index
    %c0_3 = arith.constant 0 : index
    %4 = vector.load %arg3[%c0_2, %c0_3] : memref<8x256xbf16, #tpu.memory_space<vmem>>, vector<8x256xbf16>
    %c0_4 = arith.constant 0 : index
    %c0_5 = arith.constant 0 : index
    %5 = vector.load %arg4[%c0_4, %c0_5] : memref<256x128xbf16, #tpu.memory_space<vmem>>, vector<256x128xbf16>
    %cst = arith.constant dense<0.000000e+00> : vector<8x128xf32>
    %6 = tpu.matmul %4, %5, %cst {dimension_numbers = #tpu.dot_dimension_numbers<[1], [0], [0], [1], [0, 0, 1, 1], [], []>} : vector<8x256xbf16>, vector<256x128xbf16>, vector<8x128xf32> -> vector<8x128xf32>
    %7 = arith.addf %3, %6 : vector<8x128xf32>
    %c0_6 = arith.constant 0 : index
    %c0_7 = arith.constant 0 : index
    %8 = vector.load %arg9[%c0_6, %c0_7] : memref<8x128xf32, #tpu.memory_space<vmem>>, vector<8x128xf32>
    tpu.vector_store %arg9[%c0_6, %c0_7], %7 {strides = array<i32>} : memref<8x128xf32, #tpu.memory_space<vmem>>, vector<8x128xf32>,
    %c17_i32 = arith.constant 17 : i32
    %9 = arith.cmpi eq, %arg2, %c17_i32 : i32
    %10 = arith.extui %9 : i1 to i32
    %c0_i32_8 = arith.constant 0 : i32
    %11 = arith.cmpi ne, %10, %c0_i32_8 : i32
    scf.if %11 {
      %c0_9 = arith.constant 0 : index
      %c0_10 = arith.constant 0 : index
      %12 = vector.load %arg9[%c0_9, %c0_10] : memref<8x128xf32, #tpu.memory_space<vmem>>, vector<8x128xf32>
      %c0_11 = arith.constant 0 : index
      %c0_12 = arith.constant 0 : index
      %13 = vector.load %arg5[%c0_11, %c0_12] : memref<1x128xf32, #tpu.memory_space<vmem>>, vector<1x128xf32>
      %14 = vector.broadcast %13 : vector<1x128xf32> to vector<8x128xf32>
      %15 = arith.mulf %12, %14 : vector<8x128xf32>
      %c0_13 = arith.constant 0 : index
      %c0_14 = arith.constant 0 : index
      %16 = vector.load %arg6[%c0_13, %c0_14] : memref<1x128xf32, #tpu.memory_space<vmem>>, vector<1x128xf32>
      %17 = vector.broadcast %16 : vector<1x128xf32> to vector<8x128xf32>
      %18 = arith.addf %15, %17 : vector<8x128xf32>
      %c0_15 = arith.constant 0 : index
      %c0_16 = arith.constant 0 : index
      %19 = vector.load %arg7[%c0_15, %c0_16] : memref<8x128xf32, #tpu.memory_space<vmem>>, vector<8x128xf32>
      %20 = arith.addf %18, %19 : vector<8x128xf32>
      %cst_17 = arith.constant 0.000000e+00 : f32
      %21 = vector.broadcast %cst_17 : f32 to vector<8x128xf32>
      %22 = arith.maximumf %20, %21 : vector<8x128xf32>
      %c0_18 = arith.constant 0 : index
      %c0_19 = arith.constant 0 : index
      %23 = vector.load %arg8[%c0_18, %c0_19] : memref<8x128xf32, #tpu.memory_space<vmem>>, vector<8x128xf32>
      tpu.vector_store %arg8[%c0_18, %c0_19], %22 {strides = array<i32>} : memref<8x128xf32, #tpu.memory_space<vmem>>, vector<8x128xf32>,
    } else {
    }
    return
  }
  func.func @transform_0(%arg0: i32, %arg1: i32, %arg2: i32) -> (i32, i32) {
    %c0_i32 = arith.constant 0 : i32
    return %arg0, %arg2 : i32, i32
  }
  func.func @transform_1(%arg0: i32, %arg1: i32, %arg2: i32) -> (i32, i32) {
    %c0_i32 = arith.constant 0 : i32
    return %arg2, %arg1 : i32, i32
  }
  func.func @transform_2(%arg0: i32, %arg1: i32, %arg2: i32) -> (i32, i32) {
    %c0_i32 = arith.constant 0 : i32
    %c0_i32_0 = arith.constant 0 : i32
    return %c0_i32, %arg1 : i32, i32
  }
  func.func @transform_3(%arg0: i32, %arg1: i32, %arg2: i32) -> (i32, i32) {
    %c0_i32 = arith.constant 0 : i32
    %c0_i32_0 = arith.constant 0 : i32
    return %c0_i32, %arg1 : i32, i32
  }
  func.func @transform_4(%arg0: i32, %arg1: i32, %arg2: i32) -> (i32, i32) {
    %c0_i32 = arith.constant 0 : i32
    return %arg0, %arg1 : i32, i32
  }
  func.func @transform_5(%arg0: i32, %arg1: i32, %arg2: i32) -> (i32, i32) {
    %c0_i32 = arith.constant 0 : i32
    return %arg0, %arg1 : i32, i32
  }
}

module attributes {stable_mosaic.version = 11 : i64} {
  func.func @_conv_matmul_kernel(%arg0: i32, %arg1: i32, %arg2: i32, %arg3: memref<8x256xbf16, #tpu.memory_space<vmem>>, %arg4: memref<256x128xbf16, #tpu.memory_space<vmem>>, %arg5: memref<1x128xf32, #tpu.memory_space<vmem>>, %arg6: memref<1x128xf32, #tpu.memory_space<vmem>>, %arg7: memref<8x128xf32, #tpu.memory_space<vmem>>, %arg8: memref<8x128xf32, #tpu.memory_space<vmem>>) attributes {dimension_semantics = [#tpu.dimension_semantics<parallel>, #tpu.dimension_semantics<parallel>, #tpu.dimension_semantics<arbitrary>], iteration_bounds = array<i64: 1, 4, 18>, scalar_prefetch = 0 : i64, scratch_operands = 1 : i64, tpu.core_type = #tpu.core_type<tc>, window_params = [{transform_indices = @transform_0, window_bounds = array<i64: 8, 256>}, {transform_indices = @transform_1, window_bounds = array<i64: 256, 128>}, {transform_indices = @transform_2, window_bounds = array<i64: 1, 128>}, {transform_indices = @transform_3, window_bounds = array<i64: 1, 128>}, {transform_indices = @transform_4, window_bounds = array<i64: 8, 128>}]} {
    %c0_i32 = arith.constant 0 : i32
    %0 = arith.cmpi eq, %arg2, %c0_i32 : i32
    %1 = arith.extui %0 : i1 to i32
    %c0_i32_0 = arith.constant 0 : i32
    %2 = arith.cmpi ne, %1, %c0_i32_0 : i32
    scf.if %2 {
      %cst_9 = arith.constant 0.000000e+00 : f32
      %12 = vector.broadcast %cst_9 : f32 to vector<8x128xf32>
      %c0_10 = arith.constant 0 : index
      %c0_11 = arith.constant 0 : index
      %13 = vector.load %arg8[%c0_10, %c0_11] : memref<8x128xf32, #tpu.memory_space<vmem>>, vector<8x128xf32>
      tpu.vector_store %arg8[%c0_10, %c0_11], %12 {strides = array<i32>} : memref<8x128xf32, #tpu.memory_space<vmem>>, vector<8x128xf32>,
    } else {
    }
    %c0 = arith.constant 0 : index
    %c0_1 = arith.constant 0 : index
    %3 = vector.load %arg8[%c0, %c0_1] : memref<8x128xf32, #tpu.memory_space<vmem>>, vector<8x128xf32>
    %c0_2 = arith.constant 0 : index
    %c0_3 = arith.constant 0 : index
    %4 = vector.load %arg3[%c0_2, %c0_3] : memref<8x256xbf16, #tpu.memory_space<vmem>>, vector<8x256xbf16>
    %c0_4 = arith.constant 0 : index
    %c0_5 = arith.constant 0 : index
    %5 = vector.load %arg4[%c0_4, %c0_5] : memref<256x128xbf16, #tpu.memory_space<vmem>>, vector<256x128xbf16>
    %cst = arith.constant dense<0.000000e+00> : vector<8x128xf32>
    %6 = tpu.matmul %4, %5, %cst {dimension_numbers = #tpu.dot_dimension_numbers<[1], [0], [0], [1], [0, 0, 1, 1], [], []>} : vector<8x256xbf16>, vector<256x128xbf16>, vector<8x128xf32> -> vector<8x128xf32>
    %7 = arith.addf %3, %6 : vector<8x128xf32>
    %c0_6 = arith.constant 0 : index
    %c0_7 = arith.constant 0 : index
    %8 = vector.load %arg8[%c0_6, %c0_7] : memref<8x128xf32, #tpu.memory_space<vmem>>, vector<8x128xf32>
    tpu.vector_store %arg8[%c0_6, %c0_7], %7 {strides = array<i32>} : memref<8x128xf32, #tpu.memory_space<vmem>>, vector<8x128xf32>,
    %c17_i32 = arith.constant 17 : i32
    %9 = arith.cmpi eq, %arg2, %c17_i32 : i32
    %10 = arith.extui %9 : i1 to i32
    %c0_i32_8 = arith.constant 0 : i32
    %11 = arith.cmpi ne, %10, %c0_i32_8 : i32
    scf.if %11 {
      %c0_9 = arith.constant 0 : index
      %c0_10 = arith.constant 0 : index
      %12 = vector.load %arg8[%c0_9, %c0_10] : memref<8x128xf32, #tpu.memory_space<vmem>>, vector<8x128xf32>
      %c0_11 = arith.constant 0 : index
      %c0_12 = arith.constant 0 : index
      %13 = vector.load %arg5[%c0_11, %c0_12] : memref<1x128xf32, #tpu.memory_space<vmem>>, vector<1x128xf32>
      %14 = vector.broadcast %13 : vector<1x128xf32> to vector<8x128xf32>
      %15 = arith.mulf %12, %14 : vector<8x128xf32>
      %c0_13 = arith.constant 0 : index
      %c0_14 = arith.constant 0 : index
      %16 = vector.load %arg6[%c0_13, %c0_14] : memref<1x128xf32, #tpu.memory_space<vmem>>, vector<1x128xf32>
      %17 = vector.broadcast %16 : vector<1x128xf32> to vector<8x128xf32>
      %18 = arith.addf %15, %17 : vector<8x128xf32>
      %cst_15 = arith.constant 0.000000e+00 : f32
      %19 = vector.broadcast %cst_15 : f32 to vector<8x128xf32>
      %20 = arith.maximumf %18, %19 : vector<8x128xf32>
      %c0_16 = arith.constant 0 : index
      %c0_17 = arith.constant 0 : index
      %21 = vector.load %arg7[%c0_16, %c0_17] : memref<8x128xf32, #tpu.memory_space<vmem>>, vector<8x128xf32>
      tpu.vector_store %arg7[%c0_16, %c0_17], %20 {strides = array<i32>} : memref<8x128xf32, #tpu.memory_space<vmem>>, vector<8x128xf32>,
    } else {
    }
    return
  }
  func.func @transform_0(%arg0: i32, %arg1: i32, %arg2: i32) -> (i32, i32) {
    %c0_i32 = arith.constant 0 : i32
    return %arg0, %arg2 : i32, i32
  }
  func.func @transform_1(%arg0: i32, %arg1: i32, %arg2: i32) -> (i32, i32) {
    %c0_i32 = arith.constant 0 : i32
    return %arg2, %arg1 : i32, i32
  }
  func.func @transform_2(%arg0: i32, %arg1: i32, %arg2: i32) -> (i32, i32) {
    %c0_i32 = arith.constant 0 : i32
    %c0_i32_0 = arith.constant 0 : i32
    return %c0_i32, %arg1 : i32, i32
  }
  func.func @transform_3(%arg0: i32, %arg1: i32, %arg2: i32) -> (i32, i32) {
    %c0_i32 = arith.constant 0 : i32
    %c0_i32_0 = arith.constant 0 : i32
    return %c0_i32, %arg1 : i32, i32
  }
  func.func @transform_4(%arg0: i32, %arg1: i32, %arg2: i32) -> (i32, i32) {
    %c0_i32 = arith.constant 0 : i32
    return %arg0, %arg1 : i32, i32
  }
}

module attributes {stable_mosaic.version = 11 : i64} {
  func.func @_gap_kernel(%arg0: i32, %arg1: memref<1x1x512xf32, #tpu.memory_space<vmem>>, %arg2: memref<1x1x512xf32, #tpu.memory_space<vmem>>) attributes {dimension_semantics = [#tpu.dimension_semantics<parallel>], iteration_bounds = array<i64: 2>, scalar_prefetch = 0 : i64, scratch_operands = 0 : i64, tpu.core_type = #tpu.core_type<tc>, window_params = [{transform_indices = @transform_0, window_bounds = array<i64: 1, 1, 512>}, {transform_indices = @transform_1, window_bounds = array<i64: 1, 1, 512>}]} {
    %c0 = arith.constant 0 : index
    %c0_0 = arith.constant 0 : index
    %c0_1 = arith.constant 0 : index
    %0 = vector.load %arg1[%c0, %c0_0, %c0_1] : memref<1x1x512xf32, #tpu.memory_space<vmem>>, vector<1x1x512xf32>
    %cst = arith.constant dense<0.000000e+00> : vector<1x512xf32>
    %1 = vector.multi_reduction <add>, %0, %cst [1] : vector<1x1x512xf32> to vector<1x512xf32>
    %2 = vector.shape_cast %1 : vector<1x512xf32> to vector<1x1x512xf32>
    %cst_2 = arith.constant 1.000000e+00 : f32
    %3 = vector.broadcast %cst_2 : f32 to vector<1x1x512xf32>
    %4 = arith.divf %2, %3 : vector<1x1x512xf32>
    %c0_3 = arith.constant 0 : index
    %c0_4 = arith.constant 0 : index
    %c0_5 = arith.constant 0 : index
    %5 = vector.load %arg2[%c0_3, %c0_4, %c0_5] : memref<1x1x512xf32, #tpu.memory_space<vmem>>, vector<1x1x512xf32>
    tpu.vector_store %arg2[%c0_3, %c0_4, %c0_5], %4 {strides = array<i32>} : memref<1x1x512xf32, #tpu.memory_space<vmem>>, vector<1x1x512xf32>,
    return
  }
  func.func @transform_0(%arg0: i32) -> (i32, i32, i32) {
    %c0_i32 = arith.constant 0 : i32
    %c0_i32_0 = arith.constant 0 : i32
    %c0_i32_1 = arith.constant 0 : i32
    return %arg0, %c0_i32, %c0_i32_0 : i32, i32, i32
  }
  func.func @transform_1(%arg0: i32) -> (i32, i32, i32) {
    %c0_i32 = arith.constant 0 : i32
    %c0_i32_0 = arith.constant 0 : i32
    %c0_i32_1 = arith.constant 0 : i32
    return %arg0, %c0_i32, %c0_i32_0 : i32, i32, i32
  }
}

</mosaic_0001>

<bundles_post_ra>
// kernel: image_encoder_forward.23
= control target key start
LH: loop header
LB: loop body
LE: loop exit
PB: predicated region body
PF: predicated region fallthrough
CT: control target
= control target key end

     0   :  { %vm304_vm0 = vcmask 523264   ;;  %s871_s0 = inlined_call_operand.vmem [shape: f32[128,64], index: 0, kind: input, shape index: {}]   ;;  %s872_s1 = inlined_call_operand.vmem [shape: f32[128,64], index: 1, kind: input, shape index: {}]   ;;  %s873_s2 = inlined_call_operand.vmem [shape: f32[128,64], index: 2, kind: input, shape index: {}]   ;;  %s874_s3 = inlined_call_operand.vmem [shape: f32[128,64], index: 3, kind: input, shape index: {}]   ;;  %s875_s4 = inlined_call_operand.vmem [shape: f32[128,64], index: 4, kind: input, shape index: {}]   ;;  %s876_s5 = inlined_call_operand.vmem [shape: f32[128,64], index: 5, kind: input, shape index: {}]   ;;  %s877_s6 = inlined_call_operand.vmem [shape: f32[128,64], index: 6, kind: input, shape index: {}]   ;;  %s878_s7 = inlined_call_operand.vmem [shape: f32[128,64], index: 7, kind: input, shape index: {}]   ;;  %s879_s8 = inlined_call_operand.vmem [shape: f32[128,64], index: 8, kind: input, shape index: {}]   ;;  %s880_s9 = inlined_call_operand.vmem [shape: f32[128,64], index: 9, kind: output, shape index: {}]  }
   0x1   :  { %v32_v0 = vld [vmem:[%s871_s0] sm:$0xff]  ;;  %v33_v6 = vld [vmem:[%s871_s0 + $0x8] sm:$0xff]  ;;  %v34_v15 = vld [vmem:[%s871_s0 + $0x10] sm:$0xff] }
   0x2   :  { %v48_v1 = vld [vmem:[%s872_s1] sm:$0xff]  ;;  %v49_v7 = vld [vmem:[%s872_s1 + $0x8] sm:$0xff]  ;;  %v50_v16 = vld [vmem:[%s872_s1 + $0x10] sm:$0xff] }
   0x3   :  { %v80_v2 = vld [vmem:[%s873_s2] sm:$0xff]  ;;  %v64_v3 = vmax.f32 %v32_v0, %v48_v1  ;;  %v81_v8 = vld [vmem:[%s873_s2 + $0x8] sm:$0xff]  ;;  %v65_v10 = vmax.f32 %v33_v6, %v49_v7  ;;  %v82_v17 = vld [vmem:[%s873_s2 + $0x10] sm:$0xff]  ;;  %v66_v20 = vmax.f32 %v34_v15, %v50_v16 }
   0x4   :  { %v112_v4 = vld [vmem:[%s874_s3] sm:$0xff]  ;;  %v113_v13 = vld [vmem:[%s874_s3 + $0x8] sm:$0xff]  ;;  %v114_v24 = vld [vmem:[%s874_s3 + $0x10] sm:$0xff] }
   0x5   :  { %v96_v5 = vmax.f32 %v64_v3, %v80_v2  ;;  %v144_v9 = vld [vmem:[%s875_s4] sm:$0xff]  ;;  %v97_v14 = vmax.f32 %v65_v10, %v81_v8  ;;  %v145_v19 = vld [vmem:[%s875_s4 + $0x8] sm:$0xff]  ;;  %v98_v26 = vmax.f32 %v66_v20, %v82_v17  ;;  %v35_v27 = vld [vmem:[%s871_s0 + $0x18] sm:$0xff] }
   0x6   :  { %v176_v12 = vld [vmem:[%s876_s5] sm:$0xff]  ;;  %v177_v23 = vld [vmem:[%s876_s5 + $0x8] sm:$0xff]  ;;  %v51_v28 = vld [vmem:[%s872_s1 + $0x18] sm:$0xff] }
   0x7   :  { %v128_v11 = vmax.f32 %v96_v5, %v112_v4  ;;  %v208_v21 = vld [vmem:[%s877_s6] sm:$0xff]  ;;  %v129_v22 = vmax.f32 %v97_v14, %v113_v13  ;;  %v83_v29 = vld [vmem:[%s873_s2 + $0x18] sm:$0xff]  ;;  %v146_v33 = vld [vmem:[%s875_s4 + $0x10] sm:$0xff]  ;;  %v67_v34 = vmax.f32 %v35_v27, %v51_v28  ;;  %v130_v37 = vmax.f32 %v98_v26, %v114_v24 }
   0x8   :  { %v240_v30 = vld [vmem:[%s878_s7] sm:$0xff]  ;;  %v209_v36 = vld [vmem:[%s877_s6 + $0x8] sm:$0xff]  ;;  %v178_v38 = vld [vmem:[%s876_s5 + $0x10] sm:$0xff] }
   0x9   :  { %v160_v18 = vmax.f32 %v128_v11, %v144_v9  ;;  %v272_v31 = vld [vmem:[%s879_s8] sm:$0xff]  ;;  %v161_v32 = vmax.f32 %v129_v22, %v145_v19  ;;  %v115_v39 = vld [vmem:[%s874_s3 + $0x18] sm:$0xff]  ;;  %v99_v41 = vmax.f32 %v67_v34, %v83_v29  ;;  %v241_v46 = vld [vmem:[%s878_s7 + $0x8] sm:$0xff]  ;;  %v162_v48 = vmax.f32 %v130_v37, %v146_v33 }
   0xa   :  { %v36_v42 = vld [vmem:[%s871_s0 + $0x20] sm:$0xff]  ;;  %v273_v47 = vld [vmem:[%s879_s8 + $0x8] sm:$0xff]  ;;  %v147_v49 = vld [vmem:[%s875_s4 + $0x18] sm:$0xff] }
   0xb   :  { %v192_v25 = vmax.f32 %v160_v18, %v176_v12  ;;  %v193_v40 = vmax.f32 %v161_v32, %v177_v23  ;;  %v52_v43 = vld [vmem:[%s872_s1 + $0x20] sm:$0xff]  ;;  %v210_v52 = vld [vmem:[%s877_s6 + $0x10] sm:$0xff]  ;;  %v131_v53 = vmax.f32 %v99_v41, %v115_v39  ;;  %v179_v54 = vld [vmem:[%s876_s5 + $0x18] sm:$0xff]  ;;  %v194_v57 = vmax.f32 %v162_v48, %v178_v38 }
   0xc   :  { %v84_v44 = vld [vmem:[%s873_s2 + $0x20] sm:$0xff]  ;;  %v68_v50 = vmax.f32 %v36_v42, %v52_v43  ;;  %v37_v59 = vld [vmem:[%s871_s0 + $0x28] sm:$0xff]  ;;  %v242_v63 = vld [vmem:[%s878_s7 + $0x10] sm:$0xff] }
   0xd   :  { %v224_v35 = vmax.f32 %v192_v25, %v208_v21  ;;  %v225_v51 = vmax.f32 %v193_v40, %v209_v36  ;;  %v116_v55 = vld [vmem:[%s874_s3 + $0x20] sm:$0xff]  ;;  %v53_v60 = vld [vmem:[%s872_s1 + $0x28] sm:$0xff]  ;;  %v274_v0 = vld [vmem:[%s879_s8 + $0x10] sm:$0xff]  ;;  %v163_v1 = vmax.f32 %v131_v53, %v147_v49  ;;  %v226_v4 = vmax.f32 %v194_v57, %v210_v52 }
   0xe   :  { %v100_v58 = vmax.f32 %v68_v50, %v84_v44  ;;  %v85_v61 = vld [vmem:[%s873_s2 + $0x28] sm:$0xff]  ;;  %v148_v2 = vld [vmem:[%s875_s4 + $0x20] sm:$0xff]  ;;  %v69_v3 = vmax.f32 %v37_v59, %v53_v60  ;;  %v211_v5 = vld [vmem:[%s877_s6 + $0x18] sm:$0xff] }
   0xf   :  { %v256_v45 = vmax.f32 %v224_v35, %v240_v30  ;;  %v257_v62 = vmax.f32 %v225_v51, %v241_v46  ;;  %v180_v7 = vld [vmem:[%s876_s5 + $0x20] sm:$0xff]  ;;  %v117_v8 = vld [vmem:[%s874_s3 + $0x28] sm:$0xff]  ;;  %v195_v10 = vmax.f32 %v163_v1, %v179_v54  ;;  %v38_v12 = vld [vmem:[%s871_s0 + $0x30] sm:$0xff]  ;;  %v258_v15 = vmax.f32 %v226_v4, %v242_v63 }
  0x10   :  { %v132_v6 = vmax.f32 %v100_v58, %v116_v55  ;;  %v101_v11 = vmax.f32 %v69_v3, %v85_v61  ;;  %v54_v13 = vld [vmem:[%s872_s1 + $0x30] sm:$0xff]  ;;  %v243_v16 = vld [vmem:[%s878_s7 + $0x18] sm:$0xff]  ;;  %v149_v19 = vld [vmem:[%s875_s4 + $0x28] sm:$0xff] }
  0x11   :  { %v288_v56 = vmax.f32 %v256_v45, %v272_v31  ;;  %v289_v9 = vmax.f32 %v257_v62, %v273_v47  ;;  %v86_v14 = vld [vmem:[%s873_s2 + $0x30] sm:$0xff]  ;;  %v275_v17 = vld [vmem:[%s879_s8 + $0x18] sm:$0xff]  ;;  %v70_v20 = vmax.f32 %v38_v12, %v54_v13  ;;  %v227_v21 = vmax.f32 %v195_v10, %v211_v5  ;;  %v212_v22 = vld [vmem:[%s877_s6 + $0x20] sm:$0xff] }
  0x12   :  { %v164_v18 = vmax.f32 %v132_v6, %v148_v2  ;;  %v133_v23 = vmax.f32 %v101_v11, %v117_v8  ;;  %v181_v24 = vld [vmem:[%s876_s5 + $0x28] sm:$0xff]  ;;  %v118_v25 = vld [vmem:[%s874_s3 + $0x30] sm:$0xff]  ;;  %v290_v26 = vmax.f32 %v258_v15, %v274_v0  ;;  %v39_v29 = vld [vmem:[%s871_s0 + $0x38] sm:$0xff] }
  0x13   :  { %305 = vst.msk [vmem:[%s880_s9] sm:$0xff] %vm304_vm0, %v288_v56  ;;  %306 = vst.msk [vmem:[%s880_s9 + $0x8] sm:$0xff] %vm304_vm0, %v289_v9  ;;  %v102_v28 = vmax.f32 %v70_v20, %v86_v14  ;;  %v55_v30 = vld [vmem:[%s872_s1 + $0x38] sm:$0xff]  ;;  %v259_v32 = vmax.f32 %v227_v21, %v243_v16  ;;  %v244_v33 = vld [vmem:[%s878_s7 + $0x20] sm:$0xff] }
  0x14   :  { %v196_v27 = vmax.f32 %v164_v18, %v180_v7  ;;  %v87_v31 = vld [vmem:[%s873_s2 + $0x38] sm:$0xff]  ;;  %v276_v34 = vld [vmem:[%s879_s8 + $0x20] sm:$0xff]  ;;  %v165_v35 = vmax.f32 %v133_v23, %v149_v19  ;;  %v150_v36 = vld [vmem:[%s875_s4 + $0x30] sm:$0xff]  ;;  %v71_v37 = vmax.f32 %v39_v29, %v55_v30  ;;  %307 = vst.msk [vmem:[%s880_s9 + $0x10] sm:$0xff] %vm304_vm0, %v290_v26 }
  0x15   :  { %v213_v39 = vld [vmem:[%s877_s6 + $0x28] sm:$0xff]  ;;  %v134_v40 = vmax.f32 %v102_v28, %v118_v25  ;;  %v182_v41 = vld [vmem:[%s876_s5 + $0x30] sm:$0xff]  ;;  %v119_v42 = vld [vmem:[%s874_s3 + $0x38] sm:$0xff]  ;;  %v291_v43 = vmax.f32 %v259_v32, %v275_v17 }
  0x16   :  { %v228_v38 = vmax.f32 %v196_v27, %v212_v22  ;;  %v197_v44 = vmax.f32 %v165_v35, %v181_v24  ;;  %v103_v45 = vmax.f32 %v71_v37, %v87_v31  ;;  %v40_v46 = vld [vmem:[%s871_s0 + $0x40] sm:$0xff]  ;;  %v245_v50 = vld [vmem:[%s878_s7 + $0x28] sm:$0xff]  ;;  %v151_v53 = vld [vmem:[%s875_s4 + $0x38] sm:$0xff] }
  0x17   :  { %v56_v47 = vld [vmem:[%s872_s1 + $0x40] sm:$0xff]  ;;  %v277_v51 = vld [vmem:[%s879_s8 + $0x28] sm:$0xff]  ;;  %v166_v52 = vmax.f32 %v134_v40, %v150_v36  ;;  %308 = vst.msk [vmem:[%s880_s9 + $0x18] sm:$0xff] %vm304_vm0, %v291_v43  ;;  %v214_v56 = vld [vmem:[%s877_s6 + $0x30] sm:$0xff] }
  0x18   :  { %v88_v48 = vld [vmem:[%s873_s2 + $0x40] sm:$0xff]  ;;  %v260_v49 = vmax.f32 %v228_v38, %v244_v33  ;;  %v72_v54 = vmax.f32 %v40_v46, %v56_v47  ;;  %v229_v55 = vmax.f32 %v197_v44, %v213_v39  ;;  %v135_v57 = vmax.f32 %v103_v45, %v119_v42  ;;  %v183_v58 = vld [vmem:[%s876_s5 + $0x38] sm:$0xff]  ;;  %v41_v63 = vld [vmem:[%s871_s0 + $0x48] sm:$0xff] }
  0x19   :  { %v120_v59 = vld [vmem:[%s874_s3 + $0x40] sm:$0xff]  ;;  %v198_v61 = vmax.f32 %v166_v52, %v182_v41  ;;  %v57_v0 = vld [vmem:[%s872_s1 + $0x48] sm:$0xff]  ;;  %v246_v3 = vld [vmem:[%s878_s7 + $0x30] sm:$0xff] }
  0x1a   :  { %v292_v60 = vmax.f32 %v260_v49, %v276_v34  ;;  %v104_v62 = vmax.f32 %v72_v54, %v88_v48  ;;  %v89_v1 = vld [vmem:[%s873_s2 + $0x48] sm:$0xff]  ;;  %v261_v2 = vmax.f32 %v229_v55, %v245_v50  ;;  %v278_v4 = vld [vmem:[%s879_s8 + $0x30] sm:$0xff]  ;;  %v167_v5 = vmax.f32 %v135_v57, %v151_v53  ;;  %v152_v6 = vld [vmem:[%s875_s4 + $0x40] sm:$0xff] }
  0x1b   :  { %v73_v7 = vmax.f32 %v41_v63, %v57_v0  ;;  %v230_v8 = vmax.f32 %v198_v61, %v214_v56  ;;  %v215_v9 = vld [vmem:[%s877_s6 + $0x38] sm:$0xff]  ;;  %v184_v11 = vld [vmem:[%s876_s5 + $0x40] sm:$0xff]  ;;  %v121_v12 = vld [vmem:[%s874_s3 + $0x48] sm:$0xff] }
  0x1c   :  { %309 = vst.msk [vmem:[%s880_s9 + $0x20] sm:$0xff] %vm304_vm0, %v292_v60  ;;  %v136_v10 = vmax.f32 %v104_v62, %v120_v59  ;;  %v293_v13 = vmax.f32 %v261_v2, %v277_v51  ;;  %v199_v14 = vmax.f32 %v167_v5, %v183_v58  ;;  %v42_v16 = vld [vmem:[%s871_s0 + $0x50] sm:$0xff]  ;;  %v247_v20 = vld [vmem:[%s878_s7 + $0x38] sm:$0xff]  ;;  %v153_v23 = vld [vmem:[%s875_s4 + $0x48] sm:$0xff] }
  0x1d   :  { %v105_v15 = vmax.f32 %v73_v7, %v89_v1  ;;  %v58_v17 = vld [vmem:[%s872_s1 + $0x50] sm:$0xff]  ;;  %v262_v19 = vmax.f32 %v230_v8, %v246_v3  ;;  %v279_v21 = vld [vmem:[%s879_s8 + $0x38] sm:$0xff]  ;;  %v216_v26 = vld [vmem:[%s877_s6 + $0x40] sm:$0xff] }
  0x1e   :  { %v90_v18 = vld [vmem:[%s873_s2 + $0x50] sm:$0xff]  ;;  %v168_v22 = vmax.f32 %v136_v10, %v152_v6  ;;  %v74_v24 = vmax.f32 %v42_v16, %v58_v17  ;;  %310 = vst.msk [vmem:[%s880_s9 + $0x28] sm:$0xff] %vm304_vm0, %v293_v13  ;;  %v231_v25 = vmax.f32 %v199_v14, %v215_v9  ;;  %v185_v28 = vld [vmem:[%s876_s5 + $0x48] sm:$0xff]  ;;  %v43_v33 = vld [vmem:[%s871_s0 + $0x58] sm:$0xff] }
  0x1f   :  { %v137_v27 = vmax.f32 %v105_v15, %v121_v12  ;;  %v122_v29 = vld [vmem:[%s874_s3 + $0x50] sm:$0xff]  ;;  %v294_v30 = vmax.f32 %v262_v19, %v278_v4  ;;  %v59_v34 = vld [vmem:[%s872_s1 + $0x58] sm:$0xff]  ;;  %v248_v37 = vld [vmem:[%s878_s7 + $0x40] sm:$0xff] }
  0x20   :  { %v200_v31 = vmax.f32 %v168_v22, %v184_v11  ;;  %v106_v32 = vmax.f32 %v74_v24, %v90_v18  ;;  %v91_v35 = vld [vmem:[%s873_s2 + $0x58] sm:$0xff]  ;;  %v263_v36 = vmax.f32 %v231_v25, %v247_v20  ;;  %v280_v38 = vld [vmem:[%s879_s8 + $0x40] sm:$0xff]  ;;  %v154_v40 = vld [vmem:[%s875_s4 + $0x50] sm:$0xff]  ;;  %v75_v41 = vmax.f32 %v43_v33, %v59_v34 }
  0x21   :  { %v169_v39 = vmax.f32 %v137_v27, %v153_v23  ;;  %311 = vst.msk [vmem:[%s880_s9 + $0x30] sm:$0xff] %vm304_vm0, %v294_v30  ;;  %v217_v43 = vld [vmem:[%s877_s6 + $0x48] sm:$0xff]  ;;  %v186_v45 = vld [vmem:[%s876_s5 + $0x50] sm:$0xff]  ;;  %v123_v46 = vld [vmem:[%s874_s3 + $0x58] sm:$0xff] }
  0x22   :  { %v232_v42 = vmax.f32 %v200_v31, %v216_v26  ;;  %v138_v44 = vmax.f32 %v106_v32, %v122_v29  ;;  %v295_v47 = vmax.f32 %v263_v36, %v279_v21  ;;  %v107_v49 = vmax.f32 %v75_v41, %v91_v35  ;;  %v44_v50 = vld [vmem:[%s871_s0 + $0x60] sm:$0xff]  ;;  %v249_v54 = vld [vmem:[%s878_s7 + $0x48] sm:$0xff]  ;;  %v155_v57 = vld [vmem:[%s875_s4 + $0x58] sm:$0xff] }
  0x23   :  { %v201_v48 = vmax.f32 %v169_v39, %v185_v28  ;;  %v60_v51 = vld [vmem:[%s872_s1 + $0x60] sm:$0xff]  ;;  %v281_v55 = vld [vmem:[%s879_s8 + $0x48] sm:$0xff]  ;;  %v218_v60 = vld [vmem:[%s877_s6 + $0x50] sm:$0xff] }
  0x24   :  { %v92_v52 = vld [vmem:[%s873_s2 + $0x60] sm:$0xff]  ;;  %v264_v53 = vmax.f32 %v232_v42, %v248_v37  ;;  %v170_v56 = vmax.f32 %v138_v44, %v154_v40  ;;  %v76_v58 = vmax.f32 %v44_v50, %v60_v51  ;;  %312 = vst.msk [vmem:[%s880_s9 + $0x38] sm:$0xff] %vm304_vm0, %v295_v47  ;;  %v139_v61 = vmax.f32 %v107_v49, %v123_v46  ;;  %v187_v62 = vld [vmem:[%s876_s5 + $0x58] sm:$0xff]  ;;  %v45_v3 = vld [vmem:[%s871_s0 + $0x68] sm:$0xff] }
  0x25   :  { %v233_v59 = vmax.f32 %v201_v48, %v217_v43  ;;  %v124_v63 = vld [vmem:[%s874_s3 + $0x60] sm:$0xff]  ;;  %v61_v4 = vld [vmem:[%s872_s1 + $0x68] sm:$0xff]  ;;  %v250_v7 = vld [vmem:[%s878_s7 + $0x50] sm:$0xff] }
  0x26   :  { %v296_v0 = vmax.f32 %v264_v53, %v280_v38  ;;  %v202_v1 = vmax.f32 %v170_v56, %v186_v45  ;;  %v108_v2 = vmax.f32 %v76_v58, %v92_v52  ;;  %v93_v5 = vld [vmem:[%s873_s2 + $0x68] sm:$0xff]  ;;  %v282_v8 = vld [vmem:[%s879_s8 + $0x50] sm:$0xff]  ;;  %v171_v9 = vmax.f32 %v139_v61, %v155_v57  ;;  %v156_v10 = vld [vmem:[%s875_s4 + $0x60] sm:$0xff] }
  0x27   :  { %v265_v6 = vmax.f32 %v233_v59, %v249_v54  ;;  %v77_v11 = vmax.f32 %v45_v3, %v61_v4  ;;  %v219_v13 = vld [vmem:[%s877_s6 + $0x58] sm:$0xff]  ;;  %v188_v15 = vld [vmem:[%s876_s5 + $0x60] sm:$0xff]  ;;  %v125_v16 = vld [vmem:[%s874_s3 + $0x68] sm:$0xff] }
  0x28   :  { %313 = vst.msk [vmem:[%s880_s9 + $0x40] sm:$0xff] %vm304_vm0, %v296_v0  ;;  %v234_v12 = vmax.f32 %v202_v1, %v218_v60  ;;  %v140_v14 = vmax.f32 %v108_v2, %v124_v63  ;;  %v203_v18 = vmax.f32 %v171_v9, %v187_v62  ;;  %v46_v20 = vld [vmem:[%s871_s0 + $0x70] sm:$0xff]  ;;  %v251_v24 = vld [vmem:[%s878_s7 + $0x58] sm:$0xff]  ;;  %v157_v27 = vld [vmem:[%s875_s4 + $0x68] sm:$0xff] }
  0x29   :  { %v297_v17 = vmax.f32 %v265_v6, %v281_v55  ;;  %v109_v19 = vmax.f32 %v77_v11, %v93_v5  ;;  %v62_v21 = vld [vmem:[%s872_s1 + $0x70] sm:$0xff]  ;;  %v283_v25 = vld [vmem:[%s879_s8 + $0x58] sm:$0xff]  ;;  %v220_v30 = vld [vmem:[%s877_s6 + $0x60] sm:$0xff] }
  0x2a   :  { %v94_v22 = vld [vmem:[%s873_s2 + $0x70] sm:$0xff]  ;;  %v266_v23 = vmax.f32 %v234_v12, %v250_v7  ;;  %v172_v26 = vmax.f32 %v140_v14, %v156_v10  ;;  %v78_v28 = vmax.f32 %v46_v20, %v62_v21  ;;  %v235_v29 = vmax.f32 %v203_v18, %v219_v13  ;;  %v189_v32 = vld [vmem:[%s876_s5 + $0x68] sm:$0xff]  ;;  %v47_v37 = vld [vmem:[%s871_s0 + $0x78] sm:$0xff] }
  0x2b   :  { %314 = vst.msk [vmem:[%s880_s9 + $0x48] sm:$0xff] %vm304_vm0, %v297_v17  ;;  %v141_v31 = vmax.f32 %v109_v19, %v125_v16  ;;  %v126_v33 = vld [vmem:[%s874_s3 + $0x70] sm:$0xff]  ;;  %v63_v38 = vld [vmem:[%s872_s1 + $0x78] sm:$0xff]  ;;  %v252_v41 = vld [vmem:[%s878_s7 + $0x60] sm:$0xff] }
  0x2c   :  { %v298_v34 = vmax.f32 %v266_v23, %v282_v8  ;;  %v204_v35 = vmax.f32 %v172_v26, %v188_v15  ;;  %v110_v36 = vmax.f32 %v78_v28, %v94_v22  ;;  %v95_v39 = vld [vmem:[%s873_s2 + $0x78] sm:$0xff]  ;;  %v267_v40 = vmax.f32 %v235_v29, %v251_v24  ;;  %v158_v43 = vld [vmem:[%s875_s4 + $0x70] sm:$0xff]  ;;  %v221_v46 = vld [vmem:[%s877_s6 + $0x68] sm:$0xff] }
  0x2d   :  { %v173_v42 = vmax.f32 %v141_v31, %v157_v27  ;;  %v79_v44 = vmax.f32 %v47_v37, %v63_v38  ;;  %v127_v48 = vld [vmem:[%s874_s3 + $0x78] sm:$0xff]  ;;  %v284_v50 = vld [vmem:[%s879_s8 + $0x60] sm:$0xff]  ;;  %v190_v52 = vld [vmem:[%s876_s5 + $0x70] sm:$0xff] }
  0x2e   :  { %315 = vst.msk [vmem:[%s880_s9 + $0x50] sm:$0xff] %vm304_vm0, %v298_v34  ;;  %v236_v45 = vmax.f32 %v204_v35, %v220_v30  ;;  %v142_v47 = vmax.f32 %v110_v36, %v126_v33  ;;  %v299_v49 = vmax.f32 %v267_v40, %v283_v25  ;;  %v253_v55 = vld [vmem:[%s878_s7 + $0x68] sm:$0xff]  ;;  %v159_v57 = vld [vmem:[%s875_s4 + $0x78] sm:$0xff]  ;;  %v222_v59 = vld [vmem:[%s877_s6 + $0x70] sm:$0xff] }
  0x2f   :  { %v205_v51 = vmax.f32 %v173_v42, %v189_v32  ;;  %v111_v53 = vmax.f32 %v79_v44, %v95_v39  ;;  %v285_v62 = vld [vmem:[%s879_s8 + $0x68] sm:$0xff]  ;;  %v191_v0 = vld [vmem:[%s876_s5 + $0x78] sm:$0xff]  ;;  %v254_v2 = vld [vmem:[%s878_s7 + $0x70] sm:$0xff] }
  0x30   :  { %v268_v54 = vmax.f32 %v236_v45, %v252_v41  ;;  %v174_v56 = vmax.f32 %v142_v47, %v158_v43  ;;  %316 = vst.msk [vmem:[%s880_s9 + $0x58] sm:$0xff] %vm304_vm0, %v299_v49  ;;  %v223_v5 = vld [vmem:[%s877_s6 + $0x78] sm:$0xff]  ;;  %v286_v7 = vld [vmem:[%s879_s8 + $0x70] sm:$0xff] }
  0x31   :  { %v237_v58 = vmax.f32 %v205_v51, %v221_v46  ;;  %v143_v60 = vmax.f32 %v111_v53, %v127_v48  ;;  %v255_v10 = vld [vmem:[%s878_s7 + $0x78] sm:$0xff] }
  0x32   :  { %v300_v61 = vmax.f32 %v268_v54, %v284_v50  ;;  %v206_v63 = vmax.f32 %v174_v56, %v190_v52  ;;  %v287_v13 = vld [vmem:[%s879_s8 + $0x78] sm:$0xff] }
  0x33   :  { %v269_v1 = vmax.f32 %v237_v58, %v253_v55  ;;  %v175_v3 = vmax.f32 %v143_v60, %v159_v57 }
  0x34   :  { %317 = vst.msk [vmem:[%s880_s9 + $0x60] sm:$0xff] %vm304_vm0, %v300_v61  ;;  %v238_v4 = vmax.f32 %v206_v63, %v222_v59 }
  0x35   :  { %v301_v6 = vmax.f32 %v269_v1, %v285_v62  ;;  %v207_v8 = vmax.f32 %v175_v3, %v191_v0 }
  0x36   :  { %v270_v9 = vmax.f32 %v238_v4, %v254_v2 }
  0x37   :  { %318 = vst.msk [vmem:[%s880_s9 + $0x68] sm:$0xff] %vm304_vm0, %v301_v6  ;;  %v239_v11 = vmax.f32 %v207_v8, %v223_v5 }
  0x38   :  { %v302_v12 = vmax.f32 %v270_v9, %v286_v7 }
  0x39   :  { %v271_v14 = vmax.f32 %v239_v11, %v255_v10 }
  0x3a   :  { %319 = vst.msk [vmem:[%s880_s9 + $0x70] sm:$0xff] %vm304_vm0, %v302_v12 }
  0x3b   :  { %v303_v15 = vmax.f32 %v271_v14, %v287_v13 }
  0x3d   :  { %320 = vst.msk [vmem:[%s880_s9 + $0x78] sm:$0xff] %vm304_vm0, %v303_v15 }

// kernel: image_encoder_forward.22
= control target key start
LH: loop header
LB: loop body
LE: loop exit
PB: predicated region body
PF: predicated region fallthrough
CT: control target
= control target key end

     0   :  { %s1560_s15 = smov 0   ;;  %s1562_s16 = smov 0   ;;  %s1886_s0 = inlined_call_operand.vmem [shape: bf16[512,256], index: 0, kind: input, shape index: {}]   ;;  %s1887_s1 = inlined_call_operand.vmem [shape: bf16[256,64], index: 1, kind: input, shape index: {}]   ;;  %s1888_s2 = inlined_call_operand.vmem [shape: f32[1,64], index: 2, kind: input, shape index: {}]   ;;  %s1889_s3 = inlined_call_operand.vmem [shape: f32[1,64], index: 3, kind: input, shape index: {}]   ;;  %s1890_s4 = inlined_call_operand.vmem [shape: f32[512,64], index: 4, kind: output, shape index: {}]  }
   0x1   :  { %s1564_s17 = smov 0  }
   0x2 LB: > { %s33_s18 = sadd.s32 1, %s1528_s16  ;;  %p1234_p0 = scmp.ge.s32.totalorder %s1532_s17, 1  ;;  %s1532_s17 = sphi %s1564_s17, %s14_s17   ;;  %s1528_s16 = sphi %s1562_s16, %s1892_s16   ;;  %s1524_s15 = sphi %s1560_s15, %s1891_s15  }
   0x3   : > { %p35_p1 = scmp.ge.s32.totalorder %s33_s18, 2  ;;  %p224_p2 = scmp.lt.s32.totalorder %s1532_s17, 3 }
   0x5   : > { %s1894_s18 = smov (%p35_p1, %s33_s18), 0  ;;  %p225_p3 = pnand %p1234_p0, %p224_p2 }
   0x6   : > { %s1235_s21 = sshll.u32 (!%p225_p3), %s1524_s15, 5 }
   0x7   : > { %228 = sbr.rel (%p225_p3) target bundleno = 320 (0x140), region = 36  ;;  %p274_p4 = scmp.lt.s32.totalorder (!%p225_p3), %s1235_s21, 63 }
   0xc   : > { %v1446_v0 = vld [vmem:[%s1887_s1 + $0x78] sm:$0xff]   ;;  %v1448_v2 = vld [vmem:[%s1887_s1 + $0x70] sm:$0xff]   ;;  %v1450_v4 = vld [vmem:[%s1887_s1 + $0x68] sm:$0xff]   ;;  %s1896_s21 = smov (!%p274_p4, %s1235_s21), 63  ;;  %vm313_vm0 = vcmask 523264   ;;  %v1534_v48 = vmov 0.0  }
   0xd   : > { %v1447_v1 = vld [vmem:[%s1887_s1 + $0x38] sm:$0xff]   ;;  %1293 = vmatprep.subr.bf16.mxu0 %v1446_v0  ;;  %1405 = vmatprep.subr.bf16.mxu1 %v1446_v0  ;;  %v1449_v3 = vld [vmem:[%s1887_s1 + $0x30] sm:$0xff]   ;;  %v1451_v5 = vld [vmem:[%s1887_s1 + $0x28] sm:$0xff]   ;;  %s1292_s10 = sshll.u32 %s1896_s21, 3  ;;  %314 = vst.msk [vmem:[#allocation2] sm:$0xff] %vm313_vm0, %v1534_v48 }
   0xe   : > { %1294 = vmatpush3.bf16.msra.mxu0 %v1447_v1  ;;  %1413 = vmatpush3.bf16.msra.mxu1 %v1447_v1  ;;  %v1452_v6 = vld [vmem:[%s1887_s1 + $0x60] sm:$0xff]   ;;  %v1454_v8 = vld [vmem:[%s1887_s1 + $0x58] sm:$0xff]   ;;  %s1613_s15 = scalar_lea.vmem %s1886_s0, %s1292_s10  ;;  %v1456_v10 = vld [vmem:[%s1887_s1 + $0x50] sm:$0xff]   ;;  %315 = vst.msk [vmem:[#allocation2 + $0x8] sm:$0xff] %vm313_vm0, %v1534_v48 }
   0xf   : > { %1295 = vmatprep.subr.bf16.mxu0 %v1448_v2  ;;  %1406 = vmatprep.subr.bf16.mxu1 %v1448_v2  ;;  %v1453_v7 = vld [vmem:[%s1887_s1 + $0x20] sm:$0xff]   ;;  %v1455_v9 = vld [vmem:[%s1887_s1 + $0x18] sm:$0xff]   ;;  %v1457_v13 = vld [vmem:[%s1887_s1 + $0x10] sm:$0xff]   ;;  %316 = vst.msk [vmem:[#allocation2 + $0x10] sm:$0xff] %vm313_vm0, %v1534_v48 }
  0x10   : > { %v1464_v11 = vld [vmem:[%s1613_s15 + $0x4] ss:$8 sps:$4 sm:$0xff]   ;;  %v1462_v18 = vld [vmem:[%s1613_s15] ss:$8 sps:$4 sm:$0xff]   ;;  %v1468_v20 = vld [vmem:[%s1613_s15 + $0x14] ss:$8 sps:$4 sm:$0xff]  }
  0x11   : > { %v1467_v12 = vld [vmem:[%s1613_s15 + $0x84] ss:$8 sps:$4 sm:$0xff]   ;;  %730 = vmatprep.mubr.bf16.mxu0 %v1464_v11  ;;  %v1465_v19 = vld [vmem:[%s1613_s15 + $0x80] ss:$8 sps:$4 sm:$0xff]   ;;  %v1470_v21 = vld [vmem:[%s1613_s15 + $0x94] ss:$8 sps:$4 sm:$0xff]  }
  0x12   : > { %1296 = vmatpush3.bf16.msra.mxu0 %v1449_v3  ;;  %1414 = vmatpush3.bf16.msra.mxu1 %v1449_v3  ;;  %v1458_v14 = vld [vmem:[%s1887_s1 + $0x48] sm:$0xff]   ;;  %v1460_v16 = vld [vmem:[%s1887_s1 + $0x40] sm:$0xff]   ;;  %v1472_v22 = vld [vmem:[%s1613_s15 + $0x10] ss:$8 sps:$4 sm:$0xff]   ;;  %317 = vst.msk [vmem:[#allocation2 + $0x18] sm:$0xff] %vm313_vm0, %v1534_v48 }
  0x13   : > { %1297 = vmatprep.subr.bf16.mxu0 %v1450_v4  ;;  %1407 = vmatprep.subr.bf16.mxu1 %v1450_v4  ;;  %v1459_v15 = vld [vmem:[%s1887_s1 + $0x8] sm:$0xff]   ;;  %v1461_v17 = vld [vmem:[%s1887_s1] sm:$0xff]   ;;  %v1473_v23 = vld [vmem:[%s1613_s15 + $0x90] ss:$8 sps:$4 sm:$0xff]   ;;  %318 = vst.msk [vmem:[#allocation2 + $0x20] sm:$0xff] %vm313_vm0, %v1534_v48 }
  0x14   : > { %794 = vmatprep.mubr.bf16.mxu1 %v1467_v12  ;;  %v1474_v24 = vld [vmem:[%s1613_s15 + $0x24] ss:$8 sps:$4 sm:$0xff]   ;;  %v1478_v26 = vld [vmem:[%s1613_s15 + $0x20] ss:$8 sps:$4 sm:$0xff]   ;;  %v1480_v28 = vld [vmem:[%s1613_s15 + $0x34] ss:$8 sps:$4 sm:$0xff]  }
  0x15   : > { %v1476_v25 = vld [vmem:[%s1613_s15 + $0xa4] ss:$8 sps:$4 sm:$0xff]   ;;  %v1479_v27 = vld [vmem:[%s1613_s15 + $0xa0] ss:$8 sps:$4 sm:$0xff]   ;;  %v1482_v29 = vld [vmem:[%s1613_s15 + $0xb4] ss:$8 sps:$4 sm:$0xff]  }
  0x16   : > { %1298 = vmatpush3.bf16.msra.mxu0 %v1451_v5  ;;  %1415 = vmatpush3.bf16.msra.mxu1 %v1451_v5  ;;  %v1484_v30 = vld [vmem:[%s1613_s15 + $0x30] ss:$8 sps:$4 sm:$0xff]   ;;  %v1486_v32 = vld [vmem:[%s1613_s15 + $0x44] ss:$8 sps:$4 sm:$0xff]   ;;  %v1490_v34 = vld [vmem:[%s1613_s15 + $0x40] ss:$8 sps:$4 sm:$0xff]  }
  0x17   : > { %1299 = vmatprep.subr.bf16.mxu0 %v1452_v6  ;;  %1408 = vmatprep.subr.bf16.mxu1 %v1452_v6  ;;  %v1485_v31 = vld [vmem:[%s1613_s15 + $0xb0] ss:$8 sps:$4 sm:$0xff]   ;;  %v1488_v33 = vld [vmem:[%s1613_s15 + $0xc4] ss:$8 sps:$4 sm:$0xff]   ;;  %v1491_v35 = vld [vmem:[%s1613_s15 + $0xc0] ss:$8 sps:$4 sm:$0xff]  }
  0x18   : > { %v1492_v36 = vld [vmem:[%s1613_s15 + $0x54] ss:$8 sps:$4 sm:$0xff]   ;;  %v1496_v38 = vld [vmem:[%s1613_s15 + $0x50] ss:$8 sps:$4 sm:$0xff]   ;;  %v1498_v40 = vld [vmem:[%s1613_s15 + $0x64] ss:$8 sps:$4 sm:$0xff]  }
  0x19   : > { %v1494_v37 = vld [vmem:[%s1613_s15 + $0xd4] ss:$8 sps:$4 sm:$0xff]   ;;  %v1497_v39 = vld [vmem:[%s1613_s15 + $0xd0] ss:$8 sps:$4 sm:$0xff]   ;;  %v1500_v41 = vld [vmem:[%s1613_s15 + $0xe4] ss:$8 sps:$4 sm:$0xff]  }
  0x1a   : > { %1300 = vmatpush3.bf16.msra.mxu0 %v1453_v7  ;;  %1416 = vmatpush3.bf16.msra.mxu1 %v1453_v7  ;;  %v1502_v42 = vld [vmem:[%s1613_s15 + $0x60] ss:$8 sps:$4 sm:$0xff]   ;;  %v1504_v44 = vld [vmem:[%s1613_s15 + $0x74] ss:$8 sps:$4 sm:$0xff]   ;;  %v1508_v46 = vld [vmem:[%s1613_s15 + $0x70] ss:$8 sps:$4 sm:$0xff]  }
  0x1b   : > { %1301 = vmatprep.subr.bf16.mxu0 %v1454_v8  ;;  %1409 = vmatprep.subr.bf16.mxu1 %v1454_v8  ;;  %v1503_v43 = vld [vmem:[%s1613_s15 + $0xe0] ss:$8 sps:$4 sm:$0xff]   ;;  %v1506_v45 = vld [vmem:[%s1613_s15 + $0xf4] ss:$8 sps:$4 sm:$0xff]   ;;  %v1509_v47 = vld [vmem:[%s1613_s15 + $0xf0] ss:$8 sps:$4 sm:$0xff]   ;;  %s1725_s15 = scalar_lea.vmem %s1890_s4, %s1292_s10 }
  0x1c   : > { %319 = vst.msk [vmem:[#allocation2 + $0x28] sm:$0xff] %vm313_vm0, %v1534_v48  ;;  %320 = vst.msk [vmem:[#allocation2 + $0x30] sm:$0xff] %vm313_vm0, %v1534_v48  ;;  %v346_v51 = vld [vmem:[#allocation2] sm:$0xff]  ;;  %v347_v61 = vld [vmem:[#allocation2 + $0x8] sm:$0xff] }
  0x1d   : > { %321 = vst.msk [vmem:[#allocation2 + $0x38] sm:$0xff] %vm313_vm0, %v1534_v48  ;;  %322 = vst.msk [vmem:[#allocation2 + $0x40] sm:$0xff] %vm313_vm0, %v1534_v48  ;;  %v348_v7 = vld [vmem:[#allocation2 + $0x10] sm:$0xff] }
  0x1e   : > { %1302 = vmatpush3.bf16.msra.mxu0 %v1455_v9  ;;  %1417 = vmatpush3.bf16.msra.mxu1 %v1455_v9  ;;  %323 = vst.msk [vmem:[#allocation2 + $0x48] sm:$0xff] %vm313_vm0, %v1534_v48  ;;  %324 = vst.msk [vmem:[#allocation2 + $0x50] sm:$0xff] %vm313_vm0, %v1534_v48 }
  0x1f   : > { %1303 = vmatprep.subr.bf16.mxu0 %v1456_v10  ;;  %1410 = vmatprep.subr.bf16.mxu1 %v1456_v10  ;;  %325 = vst.msk [vmem:[#allocation2 + $0x58] sm:$0xff] %vm313_vm0, %v1534_v48  ;;  %326 = vst.msk [vmem:[#allocation2 + $0x60] sm:$0xff] %vm313_vm0, %v1534_v48 }
  0x20   : > { %327 = vst.msk [vmem:[#allocation2 + $0x68] sm:$0xff] %vm313_vm0, %v1534_v48  ;;  %328 = vst.msk [vmem:[#allocation2 + $0x70] sm:$0xff] %vm313_vm0, %v1534_v48 }
  0x21   : > { %329 = vst.msk [vmem:[#allocation2 + $0x78] sm:$0xff] %vm313_vm0, %v1534_v48  ;;  %330 = vst.msk [vmem:[#allocation2 + $0x80] sm:$0xff] %vm313_vm0, %v1534_v48 }
  0x22   : > { %1304 = vmatpush3.bf16.msra.mxu0 %v1457_v13  ;;  %1418 = vmatpush3.bf16.msra.mxu1 %v1457_v13  ;;  %331 = vst.msk [vmem:[#allocation2 + $0x88] sm:$0xff] %vm313_vm0, %v1534_v48  ;;  %332 = vst.msk [vmem:[#allocation2 + $0x90] sm:$0xff] %vm313_vm0, %v1534_v48  ;;  %v1707_v13 = vld [vmem:[%s1888_s2] ss:$0 sm:$0xff] }
  0x23   : > { %1305 = vmatprep.subr.bf16.mxu0 %v1458_v14  ;;  %1411 = vmatprep.subr.bf16.mxu1 %v1458_v14  ;;  %333 = vst.msk [vmem:[#allocation2 + $0x98] sm:$0xff] %vm313_vm0, %v1534_v48  ;;  %334 = vst.msk [vmem:[#allocation2 + $0xa0] sm:$0xff] %vm313_vm0, %v1534_v48 }
  0x24   : > { %335 = vst.msk [vmem:[#allocation2 + $0xa8] sm:$0xff] %vm313_vm0, %v1534_v48  ;;  %336 = vst.msk [vmem:[#allocation2 + $0xb0] sm:$0xff] %vm313_vm0, %v1534_v48 }
  0x25   : > { %337 = vst.msk [vmem:[#allocation2 + $0xb8] sm:$0xff] %vm313_vm0, %v1534_v48  ;;  %338 = vst.msk [vmem:[#allocation2 + $0xc0] sm:$0xff] %vm313_vm0, %v1534_v48 }
  0x26   : > { %1306 = vmatpush3.bf16.msra.mxu0 %v1459_v15  ;;  %1419 = vmatpush3.bf16.msra.mxu1 %v1459_v15  ;;  %339 = vst.msk [vmem:[#allocation2 + $0xc8] sm:$0xff] %vm313_vm0, %v1534_v48  ;;  %340 = vst.msk [vmem:[#allocation2 + $0xd0] sm:$0xff] %vm313_vm0, %v1534_v48 }
  0x27   : > { %1307 = vmatprep.subr.bf16.mxu0 %v1460_v16  ;;  %1412 = vmatprep.subr.bf16.mxu1 %v1460_v16  ;;  %341 = vst.msk [vmem:[#allocation2 + $0xd8] sm:$0xff] %vm313_vm0, %v1534_v48  ;;  %342 = vst.msk [vmem:[#allocation2 + $0xe0] sm:$0xff] %vm313_vm0, %v1534_v48  ;;  %v1712_v16 = vld [vmem:[%s1889_s3] ss:$0 sm:$0xff] }
  0x28   : > { %343 = vst.msk [vmem:[#allocation2 + $0xe8] sm:$0xff] %vm313_vm0, %v1534_v48  ;;  %344 = vst.msk [vmem:[#allocation2 + $0xf0] sm:$0xff] %vm313_vm0, %v1534_v48  ;;  %v362_v53 = vld [vmem:[#allocation2 + $0x80] sm:$0xff] }
  0x29   : > { %345 = vst.msk [vmem:[#allocation2 + $0xf8] sm:$0xff] %vm313_vm0, %v1534_v48  ;;  %v363_v63 = vld [vmem:[#allocation2 + $0x88] sm:$0xff]  ;;  %v364_v9 = vld [vmem:[#allocation2 + $0x90] sm:$0xff] }
  0x2a   : > { %1308 = vmatpush3.bf16.msra.mxu0 %v1461_v17  ;;  %1420 = vmatpush3.bf16.msra.mxu1 %v1461_v17 }
  0x2d   : > { %731 = vmatmul.mubr.bf16.vlgmr.msra.gmra.mxu0 %v1462_v18  ;;  %795 = vmatmul.mubr.bf16.vlgmr.msra.gmra.mxu1 %v1465_v19  ;;  %v349_v19 = vld [vmem:[#allocation2 + $0x18] sm:$0xff] }
  0x2e   : > { %738 = vmatprep.mubr.bf16.mxu0 %v1468_v20  ;;  %802 = vmatprep.mubr.bf16.mxu1 %v1470_v21 }
  0x35   : > { %739 = vmatmul.mubr.bf16.gmra.mxu0 %v1472_v22  ;;  %803 = vmatmul.mubr.bf16.gmra.mxu1 %v1473_v23  ;;  %v365_v23 = vld [vmem:[#allocation2 + $0x98] sm:$0xff] }
  0x36   : > { %746 = vmatprep.mubr.bf16.mxu0 %v1474_v24  ;;  %810 = vmatprep.mubr.bf16.mxu1 %v1476_v25 }
  0x3d   : > { %747 = vmatmul.mubr.bf16.gmra.mxu0 %v1478_v26  ;;  %811 = vmatmul.mubr.bf16.gmra.mxu1 %v1479_v27 }
  0x3e   : > { %754 = vmatprep.mubr.bf16.mxu0 %v1480_v28  ;;  %818 = vmatprep.mubr.bf16.mxu1 %v1482_v29 }
  0x45   : > { %755 = vmatmul.mubr.bf16.gmra.mxu0 %v1484_v30  ;;  %819 = vmatmul.mubr.bf16.gmra.mxu1 %v1485_v31 }
  0x46   : > { %762 = vmatprep.mubr.bf16.mxu0 %v1486_v32  ;;  %826 = vmatprep.mubr.bf16.mxu1 %v1488_v33 }
  0x4d   : > { %763 = vmatmul.mubr.bf16.gmra.mxu0 %v1490_v34  ;;  %827 = vmatmul.mubr.bf16.gmra.mxu1 %v1491_v35 }
  0x4e   : > { %770 = vmatprep.mubr.bf16.mxu0 %v1492_v36  ;;  %834 = vmatprep.mubr.bf16.mxu1 %v1494_v37 }
  0x55   : > { %771 = vmatmul.mubr.bf16.gmra.mxu0 %v1496_v38  ;;  %835 = vmatmul.mubr.bf16.gmra.mxu1 %v1497_v39 }
  0x56   : > { %778 = vmatprep.mubr.bf16.mxu0 %v1498_v40  ;;  %842 = vmatprep.mubr.bf16.mxu1 %v1500_v41 }
  0x5d   : > { %779 = vmatmul.mubr.bf16.gmra.mxu0 %v1502_v42  ;;  %843 = vmatmul.mubr.bf16.gmra.mxu1 %v1503_v43  ;;  %v350_v43 = vld [vmem:[#allocation2 + $0x20] sm:$0xff] }
  0x5e   : > { %786 = vmatprep.mubr.bf16.mxu0 %v1504_v44  ;;  %850 = vmatprep.mubr.bf16.mxu1 %v1506_v45  ;;  %v366_v44 = vld [vmem:[#allocation2 + $0xa0] sm:$0xff] }
  0x65   : > { %787 = vmatmul.mubr.bf16.gmra.mxu0 %v1508_v46  ;;  %851 = vmatmul.mubr.bf16.gmra.mxu1 %v1509_v47 }
  0xed   : > { %v1309_v49 = vpop.f32.mrf.mxu0  ;;  %v1357_v50 = vpop.f32.mrf.mxu1 }
  0xef   : > { %v1310_v52 = vpop.f32.mrf.mxu0  ;;  %v1358_v54 = vpop.f32.mrf.mxu1 }
  0xf0   : > { %v1311_v55 = vadd.f32 %v1310_v52, %v1309_v49  ;;  %v1359_v56 = vadd.f32 %v1358_v54, %v1357_v50 }
  0xf1   : > { %v1312_v57 = vpop.f32.mrf.mxu0  ;;  %v1360_v58 = vpop.f32.mrf.mxu1 }
  0xf2   : > { %v859_v59 = vadd.f32 %v1311_v55, %v346_v51  ;;  %v875_v60 = vadd.f32 %v1359_v56, %v362_v53 }
  0xf3   : > { %v1313_v62 = vpop.f32.mrf.mxu0  ;;  %v1361_v0 = vpop.f32.mrf.mxu1 }
  0xf4   : > { %892 = vst.msk [vmem:[#allocation2] sm:$0xff] %vm313_vm0, %v859_v59  ;;  %908 = vst.msk [vmem:[#allocation2 + $0x80] sm:$0xff] %vm313_vm0, %v875_v60  ;;  %v1314_v1 = vadd.f32 %v1313_v62, %v1312_v57  ;;  %v1362_v2 = vadd.f32 %v1361_v0, %v1360_v58  ;;  %v367_v62 = vld [vmem:[#allocation2 + $0xa8] sm:$0xff] }
  0xf5   : > { %v1315_v3 = vpop.f32.mrf.mxu0  ;;  %v1363_v4 = vpop.f32.mrf.mxu1 }
  0xf6   : > { %v860_v5 = vadd.f32 %v1314_v1, %v347_v61  ;;  %v876_v6 = vadd.f32 %v1362_v2, %v363_v63  ;;  %v351_v61 = vld [vmem:[#allocation2 + $0x28] sm:$0xff] }
  0xf7   : > { %v1316_v8 = vpop.f32.mrf.mxu0  ;;  %v1364_v10 = vpop.f32.mrf.mxu1 }
  0xf8   : > { %893 = vst.msk [vmem:[#allocation2 + $0x8] sm:$0xff] %vm313_vm0, %v860_v5  ;;  %909 = vst.msk [vmem:[#allocation2 + $0x88] sm:$0xff] %vm313_vm0, %v876_v6  ;;  %v1317_v11 = vadd.f32 %v1316_v8, %v1315_v3  ;;  %v1365_v12 = vadd.f32 %v1364_v10, %v1363_v4 }
  0xf9   : > { %v1318_v14 = vpop.f32.mrf.mxu0  ;;  %v1366_v15 = vpop.f32.mrf.mxu1 }
  0xfa   : > { %v861_v17 = vadd.f32 %v1317_v11, %v348_v7  ;;  %v877_v18 = vadd.f32 %v1365_v12, %v364_v9 }
  0xfb   : > { %v927_v20 = vld [vmem:[#allocation2] sm:$0xff]  ;;  %v1319_v22 = vpop.f32.mrf.mxu0  ;;  %v1367_v24 = vpop.f32.mrf.mxu1 }
  0xfc   : > { %v943_v21 = vld [vmem:[#allocation2 + $0x80] sm:$0xff]  ;;  %v966_v25 = vmul.f32 %v1707_v13, %v927_v20  ;;  %894 = vst.msk [vmem:[#allocation2 + $0x10] sm:$0xff] %vm313_vm0, %v861_v17  ;;  %910 = vst.msk [vmem:[#allocation2 + $0x90] sm:$0xff] %vm313_vm0, %v877_v18  ;;  %v1320_v27 = vadd.f32 %v1319_v22, %v1318_v14  ;;  %v1368_v28 = vadd.f32 %v1367_v24, %v1366_v15  ;;  %v352_v17 = vld [vmem:[#allocation2 + $0x30] sm:$0xff] }
  0xfd   : > { %v982_v26 = vmul.f32 %v1707_v13, %v943_v21  ;;  %v1321_v29 = vpop.f32.mrf.mxu0  ;;  %v1369_v30 = vpop.f32.mrf.mxu1  ;;  %v368_v18 = vld [vmem:[#allocation2 + $0xb0] sm:$0xff] }
  0xfe   : > { %v1005_v31 = vadd.f32 %v1712_v16, %v966_v25  ;;  %v862_v33 = vadd.f32 %v1320_v27, %v349_v19  ;;  %v878_v34 = vadd.f32 %v1368_v28, %v365_v23  ;;  %v353_v27 = vld [vmem:[#allocation2 + $0x38] sm:$0xff] }
  0xff   : > { %v1021_v32 = vadd.f32 %v1712_v16, %v982_v26  ;;  %v928_v35 = vld [vmem:[#allocation2 + $0x8] sm:$0xff]  ;;  %v1322_v37 = vpop.f32.mrf.mxu0  ;;  %v1370_v38 = vpop.f32.mrf.mxu1 }
 0x100   : > { %v944_v36 = vld [vmem:[#allocation2 + $0x88] sm:$0xff]  ;;  %v1037_v39 = vmax.f32 %v1005_v31, 0.0  ;;  %v967_v41 = vmul.f32 %v1707_v13, %v928_v35  ;;  %895 = vst.msk [vmem:[#allocation2 + $0x18] sm:$0xff] %vm313_vm0, %v862_v33  ;;  %911 = vst.msk [vmem:[#allocation2 + $0x98] sm:$0xff] %vm313_vm0, %v878_v34  ;;  %v1323_v45 = vadd.f32 %v1322_v37, %v1321_v29  ;;  %v1371_v46 = vadd.f32 %v1370_v38, %v1369_v30  ;;  %v369_v29 = vld [vmem:[#allocation2 + $0xb8] sm:$0xff] }
 0x101   : > { %v1053_v40 = vmax.f32 %v1021_v32, 0.0  ;;  %v983_v42 = vmul.f32 %v1707_v13, %v944_v36  ;;  %v1324_v47 = vpop.f32.mrf.mxu0  ;;  %v1372_v48 = vpop.f32.mrf.mxu1 }
 0x102   : > { %1069 = vst.msk [vmem:[%s1725_s15] sm:$0xff] %vm313_vm0, %v1037_v39  ;;  %v1006_v49 = vadd.f32 %v1712_v16, %v967_v41  ;;  %v863_v53 = vadd.f32 %v1323_v45, %v350_v43  ;;  %v879_v54 = vadd.f32 %v1371_v46, %v366_v44  ;;  %v354_v45 = vld [vmem:[#allocation2 + $0x40] sm:$0xff] }
 0x103   : > { %1085 = vst.msk [vmem:[%s1725_s15 + $0x80] sm:$0xff] %vm313_vm0, %v1053_v40  ;;  %v1022_v50 = vadd.f32 %v1712_v16, %v983_v42  ;;  %v929_v51 = vld [vmem:[#allocation2 + $0x10] sm:$0xff]  ;;  %v1325_v55 = vpop.f32.mrf.mxu0  ;;  %v1373_v56 = vpop.f32.mrf.mxu1 }
 0x104   : > { %v945_v52 = vld [vmem:[#allocation2 + $0x90] sm:$0xff]  ;;  %v1038_v57 = vmax.f32 %v1006_v49, 0.0  ;;  %v968_v59 = vmul.f32 %v1707_v13, %v929_v51  ;;  %896 = vst.msk [vmem:[#allocation2 + $0x20] sm:$0xff] %vm313_vm0, %v863_v53  ;;  %912 = vst.msk [vmem:[#allocation2 + $0xa0] sm:$0xff] %vm313_vm0, %v879_v54  ;;  %v1326_v63 = vadd.f32 %v1325_v55, %v1324_v47  ;;  %v1374_v0 = vadd.f32 %v1373_v56, %v1372_v48  ;;  %v370_v47 = vld [vmem:[#allocation2 + $0xc0] sm:$0xff] }
 0x105   : > { %v1054_v58 = vmax.f32 %v1022_v50, 0.0  ;;  %v984_v60 = vmul.f32 %v1707_v13, %v945_v52  ;;  %v1327_v1 = vpop.f32.mrf.mxu0  ;;  %v1375_v2 = vpop.f32.mrf.mxu1 }
 0x106   : > { %1070 = vst.msk [vmem:[%s1725_s15 + $0x8] sm:$0xff] %vm313_vm0, %v1038_v57  ;;  %v1007_v3 = vadd.f32 %v1712_v16, %v968_v59  ;;  %v864_v7 = vadd.f32 %v1326_v63, %v351_v61  ;;  %v880_v8 = vadd.f32 %v1374_v0, %v367_v62  ;;  %v355_v63 = vld [vmem:[#allocation2 + $0x48] sm:$0xff] }
 0x107   : > { %1086 = vst.msk [vmem:[%s1725_s15 + $0x88] sm:$0xff] %vm313_vm0, %v1054_v58  ;;  %v1023_v4 = vadd.f32 %v1712_v16, %v984_v60  ;;  %v930_v5 = vld [vmem:[#allocation2 + $0x18] sm:$0xff]  ;;  %v1328_v9 = vpop.f32.mrf.mxu0  ;;  %v1376_v10 = vpop.f32.mrf.mxu1 }
 0x108   : > { %v946_v6 = vld [vmem:[#allocation2 + $0x98] sm:$0xff]  ;;  %v1039_v11 = vmax.f32 %v1007_v3, 0.0  ;;  %v969_v14 = vmul.f32 %v1707_v13, %v930_v5  ;;  %897 = vst.msk [vmem:[#allocation2 + $0x28] sm:$0xff] %vm313_vm0, %v864_v7  ;;  %913 = vst.msk [vmem:[#allocation2 + $0xa8] sm:$0xff] %vm313_vm0, %v880_v8  ;;  %v1329_v19 = vadd.f32 %v1328_v9, %v1327_v1  ;;  %v1377_v20 = vadd.f32 %v1376_v10, %v1375_v2  ;;  %v371_v1 = vld [vmem:[#allocation2 + $0xc8] sm:$0xff] }
 0x109   : > { %v1055_v12 = vmax.f32 %v1023_v4, 0.0  ;;  %v985_v15 = vmul.f32 %v1707_v13, %v946_v6  ;;  %v1330_v21 = vpop.f32.mrf.mxu0  ;;  %v1378_v22 = vpop.f32.mrf.mxu1 }
 0x10a   : > { %1071 = vst.msk [vmem:[%s1725_s15 + $0x10] sm:$0xff] %vm313_vm0, %v1039_v11  ;;  %v1008_v23 = vadd.f32 %v1712_v16, %v969_v14  ;;  %v865_v25 = vadd.f32 %v1329_v19, %v352_v17  ;;  %v881_v26 = vadd.f32 %v1377_v20, %v368_v18  ;;  %v356_v17 = vld [vmem:[#allocation2 + $0x50] sm:$0xff] }
 0x10b   : > { %1087 = vst.msk [vmem:[%s1725_s15 + $0x90] sm:$0xff] %vm313_vm0, %v1055_v12  ;;  %v1024_v24 = vadd.f32 %v1712_v16, %v985_v15  ;;  %v1331_v28 = vpop.f32.mrf.mxu0  ;;  %v1379_v30 = vpop.f32.mrf.mxu1  ;;  %v931_v33 = vld [vmem:[#allocation2 + $0x20] sm:$0xff] }
 0x10c   : > { %v1040_v31 = vmax.f32 %v1008_v23, 0.0  ;;  %v947_v34 = vld [vmem:[#allocation2 + $0xa0] sm:$0xff]  ;;  %v1332_v35 = vadd.f32 %v1331_v28, %v1330_v21  ;;  %v1380_v36 = vadd.f32 %v1379_v30, %v1378_v22  ;;  %v970_v37 = vmul.f32 %v1707_v13, %v931_v33  ;;  %898 = vst.msk [vmem:[#allocation2 + $0x30] sm:$0xff] %vm313_vm0, %v865_v25  ;;  %914 = vst.msk [vmem:[#allocation2 + $0xb0] sm:$0xff] %vm313_vm0, %v881_v26  ;;  %v372_v23 = vld [vmem:[#allocation2 + $0xd0] sm:$0xff] }
 0x10d   : > { %v1056_v32 = vmax.f32 %v1024_v24, 0.0  ;;  %v986_v38 = vmul.f32 %v1707_v13, %v947_v34  ;;  %v1333_v39 = vpop.f32.mrf.mxu0  ;;  %v1381_v40 = vpop.f32.mrf.mxu1 }
 0x10e   : > { %1072 = vst.msk [vmem:[%s1725_s15 + $0x18] sm:$0xff] %vm313_vm0, %v1040_v31  ;;  %v866_v41 = vadd.f32 %v1332_v35, %v353_v27  ;;  %v882_v42 = vadd.f32 %v1380_v36, %v369_v29  ;;  %v1009_v43 = vadd.f32 %v1712_v16, %v970_v37 }
 0x10f   : > { %1088 = vst.msk [vmem:[%s1725_s15 + $0x98] sm:$0xff] %vm313_vm0, %v1056_v32  ;;  %v1025_v44 = vadd.f32 %v1712_v16, %v986_v38  ;;  %v1334_v46 = vpop.f32.mrf.mxu0  ;;  %v1382_v48 = vpop.f32.mrf.mxu1  ;;  %v932_v49 = vld [vmem:[#allocation2 + $0x28] sm:$0xff] }
 0x110   : > { %v948_v50 = vld [vmem:[#allocation2 + $0xa8] sm:$0xff]  ;;  %899 = vst.msk [vmem:[#allocation2 + $0x38] sm:$0xff] %vm313_vm0, %v866_v41  ;;  %915 = vst.msk [vmem:[#allocation2 + $0xb8] sm:$0xff] %vm313_vm0, %v882_v42  ;;  %v1335_v51 = vadd.f32 %v1334_v46, %v1333_v39  ;;  %v1383_v52 = vadd.f32 %v1382_v48, %v1381_v40  ;;  %v1041_v53 = vmax.f32 %v1009_v43, 0.0  ;;  %v971_v55 = vmul.f32 %v1707_v13, %v932_v49  ;;  %v373_v46 = vld [vmem:[#allocation2 + $0xd8] sm:$0xff] }
 0x111   : > { %v1057_v54 = vmax.f32 %v1025_v44, 0.0  ;;  %v987_v56 = vmul.f32 %v1707_v13, %v948_v50  ;;  %v1336_v57 = vpop.f32.mrf.mxu0  ;;  %v1384_v58 = vpop.f32.mrf.mxu1 }
 0x112   : > { %v867_v59 = vadd.f32 %v1335_v51, %v354_v45  ;;  %v883_v60 = vadd.f32 %v1383_v52, %v370_v47  ;;  %1073 = vst.msk [vmem:[%s1725_s15 + $0x20] sm:$0xff] %vm313_vm0, %v1041_v53  ;;  %v1010_v61 = vadd.f32 %v1712_v16, %v971_v55  ;;  %v357_v45 = vld [vmem:[#allocation2 + $0x58] sm:$0xff] }
 0x113   : > { %1089 = vst.msk [vmem:[%s1725_s15 + $0xa0] sm:$0xff] %vm313_vm0, %v1057_v54  ;;  %v1026_v62 = vadd.f32 %v1712_v16, %v987_v56  ;;  %v1337_v0 = vpop.f32.mrf.mxu0  ;;  %v1385_v2 = vpop.f32.mrf.mxu1  ;;  %v933_v3 = vld [vmem:[#allocation2 + $0x30] sm:$0xff] }
 0x114   : > { %v949_v4 = vld [vmem:[#allocation2 + $0xb0] sm:$0xff]  ;;  %900 = vst.msk [vmem:[#allocation2 + $0x40] sm:$0xff] %vm313_vm0, %v867_v59  ;;  %916 = vst.msk [vmem:[#allocation2 + $0xc0] sm:$0xff] %vm313_vm0, %v883_v60  ;;  %v1338_v5 = vadd.f32 %v1337_v0, %v1336_v57  ;;  %v1386_v6 = vadd.f32 %v1385_v2, %v1384_v58  ;;  %v1042_v7 = vmax.f32 %v1010_v61, 0.0  ;;  %v972_v9 = vmul.f32 %v1707_v13, %v933_v3  ;;  %v374_v0 = vld [vmem:[#allocation2 + $0xe0] sm:$0xff] }
 0x115   : > { %v1058_v8 = vmax.f32 %v1026_v62, 0.0  ;;  %v988_v10 = vmul.f32 %v1707_v13, %v949_v4  ;;  %v1339_v11 = vpop.f32.mrf.mxu0  ;;  %v1387_v12 = vpop.f32.mrf.mxu1 }
 0x116   : > { %v868_v14 = vadd.f32 %v1338_v5, %v355_v63  ;;  %v884_v15 = vadd.f32 %v1386_v6, %v371_v1  ;;  %1074 = vst.msk [vmem:[%s1725_s15 + $0x28] sm:$0xff] %vm313_vm0, %v1042_v7  ;;  %v1011_v18 = vadd.f32 %v1712_v16, %v972_v9  ;;  %v358_v63 = vld [vmem:[#allocation2 + $0x60] sm:$0xff] }
 0x117   : > { %1090 = vst.msk [vmem:[%s1725_s15 + $0xa8] sm:$0xff] %vm313_vm0, %v1058_v8  ;;  %v1027_v19 = vadd.f32 %v1712_v16, %v988_v10  ;;  %v934_v20 = vld [vmem:[#allocation2 + $0x38] sm:$0xff]  ;;  %v1340_v22 = vpop.f32.mrf.mxu0  ;;  %v1388_v24 = vpop.f32.mrf.mxu1 }
 0x118   : > { %v950_v21 = vld [vmem:[#allocation2 + $0xb8] sm:$0xff]  ;;  %v973_v25 = vmul.f32 %v1707_v13, %v934_v20  ;;  %901 = vst.msk [vmem:[#allocation2 + $0x48] sm:$0xff] %vm313_vm0, %v868_v14  ;;  %917 = vst.msk [vmem:[#allocation2 + $0xc8] sm:$0xff] %vm313_vm0, %v884_v15  ;;  %v1341_v27 = vadd.f32 %v1340_v22, %v1339_v11  ;;  %v1389_v28 = vadd.f32 %v1388_v24, %v1387_v12  ;;  %v1043_v29 = vmax.f32 %v1011_v18, 0.0  ;;  %v375_v20 = vld [vmem:[#allocation2 + $0xe8] sm:$0xff] }
 0x119   : > { %v989_v26 = vmul.f32 %v1707_v13, %v950_v21  ;;  %v1059_v30 = vmax.f32 %v1027_v19, 0.0  ;;  %v1342_v31 = vpop.f32.mrf.mxu0  ;;  %v1390_v32 = vpop.f32.mrf.mxu1  ;;  %v359_v19 = vld [vmem:[#allocation2 + $0x68] sm:$0xff] }
 0x11a   : > { %v1012_v33 = vadd.f32 %v1712_v16, %v973_v25  ;;  %v869_v35 = vadd.f32 %v1341_v27, %v356_v17  ;;  %v885_v36 = vadd.f32 %v1389_v28, %v372_v23  ;;  %1075 = vst.msk [vmem:[%s1725_s15 + $0x30] sm:$0xff] %vm313_vm0, %v1043_v29  ;;  %v360_v29 = vld [vmem:[#allocation2 + $0x70] sm:$0xff] }
 0x11b   : > { %v1028_v34 = vadd.f32 %v1712_v16, %v989_v26  ;;  %1091 = vst.msk [vmem:[%s1725_s15 + $0xb0] sm:$0xff] %vm313_vm0, %v1059_v30  ;;  %v935_v37 = vld [vmem:[#allocation2 + $0x40] sm:$0xff]  ;;  %v1343_v39 = vpop.f32.mrf.mxu0  ;;  %v1391_v40 = vpop.f32.mrf.mxu1 }
 0x11c   : > { %v951_v38 = vld [vmem:[#allocation2 + $0xc0] sm:$0xff]  ;;  %v1044_v41 = vmax.f32 %v1012_v33, 0.0  ;;  %v974_v43 = vmul.f32 %v1707_v13, %v935_v37  ;;  %902 = vst.msk [vmem:[#allocation2 + $0x50] sm:$0xff] %vm313_vm0, %v869_v35  ;;  %918 = vst.msk [vmem:[#allocation2 + $0xd0] sm:$0xff] %vm313_vm0, %v885_v36  ;;  %v1344_v47 = vadd.f32 %v1343_v39, %v1342_v31  ;;  %v1392_v48 = vadd.f32 %v1391_v40, %v1390_v32  ;;  %v376_v31 = vld [vmem:[#allocation2 + $0xf0] sm:$0xff] }
 0x11d   : > { %v1060_v42 = vmax.f32 %v1028_v34, 0.0  ;;  %v990_v44 = vmul.f32 %v1707_v13, %v951_v38  ;;  %v1345_v49 = vpop.f32.mrf.mxu0  ;;  %v1393_v50 = vpop.f32.mrf.mxu1 }
 0x11e   : > { %1076 = vst.msk [vmem:[%s1725_s15 + $0x38] sm:$0xff] %vm313_vm0, %v1044_v41  ;;  %v1013_v51 = vadd.f32 %v1712_v16, %v974_v43  ;;  %v870_v55 = vadd.f32 %v1344_v47, %v357_v45  ;;  %v886_v56 = vadd.f32 %v1392_v48, %v373_v46  ;;  %v361_v47 = vld [vmem:[#allocation2 + $0x78] sm:$0xff] }
 0x11f   : > { %1092 = vst.msk [vmem:[%s1725_s15 + $0xb8] sm:$0xff] %vm313_vm0, %v1060_v42  ;;  %v1029_v52 = vadd.f32 %v1712_v16, %v990_v44  ;;  %v936_v53 = vld [vmem:[#allocation2 + $0x48] sm:$0xff]  ;;  %v1346_v57 = vpop.f32.mrf.mxu0  ;;  %v1394_v58 = vpop.f32.mrf.mxu1 }
 0x120   : > { %v952_v54 = vld [vmem:[#allocation2 + $0xc8] sm:$0xff]  ;;  %v1045_v59 = vmax.f32 %v1013_v51, 0.0  ;;  %v975_v61 = vmul.f32 %v1707_v13, %v936_v53  ;;  %903 = vst.msk [vmem:[#allocation2 + $0x58] sm:$0xff] %vm313_vm0, %v870_v55  ;;  %919 = vst.msk [vmem:[#allocation2 + $0xd8] sm:$0xff] %vm313_vm0, %v886_v56  ;;  %v1347_v1 = vadd.f32 %v1346_v57, %v1345_v49  ;;  %v1395_v2 = vadd.f32 %v1394_v58, %v1393_v50  ;;  %v377_v49 = vld [vmem:[#allocation2 + $0xf8] sm:$0xff] }
 0x121   : > { %v1061_v60 = vmax.f32 %v1029_v52, 0.0  ;;  %v991_v62 = vmul.f32 %v1707_v13, %v952_v54  ;;  %v1348_v3 = vpop.f32.mrf.mxu0  ;;  %v1396_v4 = vpop.f32.mrf.mxu1 }
 0x122   : > { %1077 = vst.msk [vmem:[%s1725_s15 + $0x40] sm:$0xff] %vm313_vm0, %v1045_v59  ;;  %v1014_v5 = vadd.f32 %v1712_v16, %v975_v61  ;;  %v871_v9 = vadd.f32 %v1347_v1, %v358_v63  ;;  %v887_v10 = vadd.f32 %v1395_v2, %v374_v0 }
 0x123   : > { %1093 = vst.msk [vmem:[%s1725_s15 + $0xc0] sm:$0xff] %vm313_vm0, %v1061_v60  ;;  %v1030_v6 = vadd.f32 %v1712_v16, %v991_v62  ;;  %v937_v7 = vld [vmem:[#allocation2 + $0x50] sm:$0xff]  ;;  %v1349_v11 = vpop.f32.mrf.mxu0  ;;  %v1397_v12 = vpop.f32.mrf.mxu1 }
 0x124   : > { %v953_v8 = vld [vmem:[#allocation2 + $0xd0] sm:$0xff]  ;;  %v1046_v14 = vmax.f32 %v1014_v5, 0.0  ;;  %v976_v17 = vmul.f32 %v1707_v13, %v937_v7  ;;  %904 = vst.msk [vmem:[#allocation2 + $0x60] sm:$0xff] %vm313_vm0, %v871_v9  ;;  %920 = vst.msk [vmem:[#allocation2 + $0xe0] sm:$0xff] %vm313_vm0, %v887_v10  ;;  %v1350_v21 = vadd.f32 %v1349_v11, %v1348_v3  ;;  %v1398_v22 = vadd.f32 %v1397_v12, %v1396_v4 }
 0x125   : > { %v1062_v15 = vmax.f32 %v1030_v6, 0.0  ;;  %v992_v18 = vmul.f32 %v1707_v13, %v953_v8  ;;  %v1351_v23 = vpop.f32.mrf.mxu0  ;;  %v1399_v24 = vpop.f32.mrf.mxu1 }
 0x126   : > { %1078 = vst.msk [vmem:[%s1725_s15 + $0x48] sm:$0xff] %vm313_vm0, %v1046_v14  ;;  %v1015_v25 = vadd.f32 %v1712_v16, %v976_v17  ;;  %v872_v27 = vadd.f32 %v1350_v21, %v359_v19  ;;  %v888_v28 = vadd.f32 %v1398_v22, %v375_v20 }
 0x127   : > { %1094 = vst.msk [vmem:[%s1725_s15 + $0xc8] sm:$0xff] %vm313_vm0, %v1062_v15  ;;  %v1031_v26 = vadd.f32 %v1712_v16, %v992_v18  ;;  %v1352_v30 = vpop.f32.mrf.mxu0  ;;  %v1400_v32 = vpop.f32.mrf.mxu1  ;;  %v938_v35 = vld [vmem:[#allocation2 + $0x58] sm:$0xff] }
 0x128   : > { %v1047_v33 = vmax.f32 %v1015_v25, 0.0  ;;  %v954_v36 = vld [vmem:[#allocation2 + $0xd8] sm:$0xff]  ;;  %v1353_v37 = vadd.f32 %v1352_v30, %v1351_v23  ;;  %v1401_v38 = vadd.f32 %v1400_v32, %v1399_v24  ;;  %v977_v39 = vmul.f32 %v1707_v13, %v938_v35  ;;  %905 = vst.msk [vmem:[#allocation2 + $0x68] sm:$0xff] %vm313_vm0, %v872_v27  ;;  %921 = vst.msk [vmem:[#allocation2 + $0xe8] sm:$0xff] %vm313_vm0, %v888_v28 }
 0x129   : > { %v1063_v34 = vmax.f32 %v1031_v26, 0.0  ;;  %v993_v40 = vmul.f32 %v1707_v13, %v954_v36  ;;  %v1354_v41 = vpop.f32.mrf.mxu0  ;;  %v1402_v42 = vpop.f32.mrf.mxu1 }
 0x12a   : > { %1079 = vst.msk [vmem:[%s1725_s15 + $0x50] sm:$0xff] %vm313_vm0, %v1047_v33  ;;  %v873_v43 = vadd.f32 %v1353_v37, %v360_v29  ;;  %v889_v44 = vadd.f32 %v1401_v38, %v376_v31  ;;  %v1016_v45 = vadd.f32 %v1712_v16, %v977_v39 }
 0x12b   : > { %1095 = vst.msk [vmem:[%s1725_s15 + $0xd0] sm:$0xff] %vm313_vm0, %v1063_v34  ;;  %v1032_v46 = vadd.f32 %v1712_v16, %v993_v40  ;;  %v1355_v48 = vpop.f32.mrf.mxu0  ;;  %v1403_v50 = vpop.f32.mrf.mxu1  ;;  %v939_v51 = vld [vmem:[#allocation2 + $0x60] sm:$0xff] }
 0x12c   : > { %v955_v52 = vld [vmem:[#allocation2 + $0xe0] sm:$0xff]  ;;  %906 = vst.msk [vmem:[#allocation2 + $0x70] sm:$0xff] %vm313_vm0, %v873_v43  ;;  %922 = vst.msk [vmem:[#allocation2 + $0xf0] sm:$0xff] %vm313_vm0, %v889_v44  ;;  %v1356_v53 = vadd.f32 %v1355_v48, %v1354_v41  ;;  %v1404_v54 = vadd.f32 %v1403_v50, %v1402_v42  ;;  %v1048_v55 = vmax.f32 %v1016_v45, 0.0  ;;  %v978_v57 = vmul.f32 %v1707_v13, %v939_v51 }
 0x12d   : > { %v1064_v56 = vmax.f32 %v1032_v46, 0.0  ;;  %v994_v58 = vmul.f32 %v1707_v13, %v955_v52 }
 0x12e   : > { %v874_v59 = vadd.f32 %v1356_v53, %v361_v47  ;;  %v890_v60 = vadd.f32 %v1404_v54, %v377_v49  ;;  %1080 = vst.msk [vmem:[%s1725_s15 + $0x58] sm:$0xff] %vm313_vm0, %v1048_v55  ;;  %v1017_v61 = vadd.f32 %v1712_v16, %v978_v57 }
 0x12f   : > { %1096 = vst.msk [vmem:[%s1725_s15 + $0xd8] sm:$0xff] %vm313_vm0, %v1064_v56  ;;  %v1033_v62 = vadd.f32 %v1712_v16, %v994_v58  ;;  %v940_v63 = vld [vmem:[#allocation2 + $0x68] sm:$0xff] }
 0x130   : > { %v956_v0 = vld [vmem:[#allocation2 + $0xe8] sm:$0xff]  ;;  %907 = vst.msk [vmem:[#allocation2 + $0x78] sm:$0xff] %vm313_vm0, %v874_v59  ;;  %923 = vst.msk [vmem:[#allocation2 + $0xf8] sm:$0xff] %vm313_vm0, %v890_v60  ;;  %v1049_v1 = vmax.f32 %v1017_v61, 0.0  ;;  %v979_v3 = vmul.f32 %v1707_v13, %v940_v63 }
 0x131   : > { %v1065_v2 = vmax.f32 %v1033_v62, 0.0  ;;  %v995_v4 = vmul.f32 %v1707_v13, %v956_v0 }
 0x132   : > { %1081 = vst.msk [vmem:[%s1725_s15 + $0x60] sm:$0xff] %vm313_vm0, %v1049_v1  ;;  %v1018_v5 = vadd.f32 %v1712_v16, %v979_v3 }
 0x133   : > { %1097 = vst.msk [vmem:[%s1725_s15 + $0xe0] sm:$0xff] %vm313_vm0, %v1065_v2  ;;  %v1034_v6 = vadd.f32 %v1712_v16, %v995_v4  ;;  %v941_v7 = vld [vmem:[#allocation2 + $0x70] sm:$0xff] }
 0x134   : > { %v957_v8 = vld [vmem:[#allocation2 + $0xf0] sm:$0xff]  ;;  %v980_v9 = vmul.f32 %v1707_v13, %v941_v7  ;;  %v1050_v11 = vmax.f32 %v1018_v5, 0.0 }
 0x135   : > { %v996_v10 = vmul.f32 %v1707_v13, %v957_v8  ;;  %v1066_v12 = vmax.f32 %v1034_v6, 0.0 }
 0x136   : > { %v1019_v14 = vadd.f32 %v1712_v16, %v980_v9  ;;  %1082 = vst.msk [vmem:[%s1725_s15 + $0x68] sm:$0xff] %vm313_vm0, %v1050_v11 }
 0x137   : > { %v1035_v15 = vadd.f32 %v1712_v16, %v996_v10  ;;  %1098 = vst.msk [vmem:[%s1725_s15 + $0xe8] sm:$0xff] %vm313_vm0, %v1066_v12  ;;  %v942_v17 = vld [vmem:[#allocation2 + $0x78] sm:$0xff] }
 0x138   : > { %v958_v18 = vld [vmem:[#allocation2 + $0xf8] sm:$0xff]  ;;  %v1051_v19 = vmax.f32 %v1019_v14, 0.0  ;;  %v981_v21 = vmul.f32 %v1707_v13, %v942_v17 }
 0x139   : > { %v1067_v20 = vmax.f32 %v1035_v15, 0.0  ;;  %v997_v22 = vmul.f32 %v1707_v13, %v958_v18 }
 0x13a   : > { %1083 = vst.msk [vmem:[%s1725_s15 + $0x70] sm:$0xff] %vm313_vm0, %v1051_v19  ;;  %v1020_v23 = vadd.f32 %v1712_v16, %v981_v21 }
 0x13b   : > { %1099 = vst.msk [vmem:[%s1725_s15 + $0xf0] sm:$0xff] %vm313_vm0, %v1067_v20  ;;  %v1036_v24 = vadd.f32 %v1712_v16, %v997_v22 }
 0x13c   : > { %v1052_v25 = vmax.f32 %v1020_v23, 0.0 }
 0x13d   : > { %v1068_v26 = vmax.f32 %v1036_v24, 0.0 }
 0x13e   : > { %1084 = vst.msk [vmem:[%s1725_s15 + $0x78] sm:$0xff] %vm313_vm0, %v1052_v25 }
 0x13f   : > { %1100 = vst.msk [vmem:[%s1725_s15 + $0xf8] sm:$0xff] %vm313_vm0, %v1068_v26 }
 0x140 PF: > { %s14_s17 = sadd.s32 1, %s1532_s17   ;;  %s1891_s15 = smov %s1528_s16 }
 0x141   : > { %p11_p5 = scmp.ge.s32.totalorder %s14_s17, 4   ;;  %s1892_s16 = smov %s1894_s18 }
 0x143   :  { %13 = sbr.rel (!%p11_p5) target bundleno = 2 (0x2), region = 83 }

// kernel: image_encoder_forward.24
= control target key start
LH: loop header
LB: loop body
LE: loop exit
PB: predicated region body
PF: predicated region fallthrough
CT: control target
= control target key end

     0   :  { %s1134_s15 = smov 0   ;;  %s1136_s16 = smov 0   ;;  %s1359_s0 = inlined_call_operand.vmem [shape: bf16[128,640], index: 0, kind: input, shape index: {}]   ;;  %s1360_s1 = inlined_call_operand.vmem [shape: bf16[640,64], index: 1, kind: input, shape index: {}]   ;;  %s1361_s2 = inlined_call_operand.vmem [shape: f32[1,64], index: 2, kind: input, shape index: {}]   ;;  %s1362_s3 = inlined_call_operand.vmem [shape: f32[1,64], index: 3, kind: input, shape index: {}]   ;;  %s1363_s4 = inlined_call_operand.vmem [shape: f32[128,64], index: 4, kind: output, shape index: {}]  }
   0x1   :  { %s1138_s17 = smov 0   ;;  %s1140_s18 = smov 0  }
   0x2   :  { %s1142_s19 = smov 0  }
   0x3 LB: > { %s26_s20 = sadd.s32 1, %s1102_s18  ;;  %p49_p1 = scmp.ne.s32.totalorder %s1094_s16, %s1090_s15  ;;  %s1106_s19 = sphi %s1142_s19, %s14_s19   ;;  %s1102_s18 = sphi %s1140_s18, %s1367_s18   ;;  %s1098_s17 = sphi %s1138_s17, %s1366_s17   ;;  %s1094_s16 = sphi %s1136_s16, %s1365_s16   ;;  %s1090_s15 = sphi %s1134_s15, %s1364_s15  }
   0x4   : > { %p27_p0 = scmp.ge.s32.totalorder %s26_s20, 5  ;;  %p50_p2 = scmp.eq.s32.totalorder %s1106_s19, 0 }
   0x5   : > { %s42_s22 = sadd.s32 1, %s1094_s16  ;;  %p916_p5 = scmp.ge.s32.totalorder %s1106_s19, 5 }
   0x6   : > { %s1369_s20 = smov (%p27_p0, %s26_s20), 0  ;;  %p51_p3 = por %p50_p2, %p49_p1 }
   0x7   : > { %s38_s21 = ssub.s32 %s1102_s18, %s1369_s20  ;;  %195 = sbr.rel (%p916_p5) target bundleno = 26 (0x1a), region = 24 }
   0x8   : > { %p40_p4 = scmp.eq.s32.totalorder %s38_s21, 0 }
   0xa   : > { %s1169_s23 = scalar_select %p40_p4, %s1094_s16, %s42_s22  }
   0xc   : > { %198 = sbr.rel (!%p51_p3) target bundleno = 26 (0x1a), region = 28  ;;  %s200_s24 = sand.u32 (%p51_p3), 1, %s1094_s16  }
   0xd   : > { %s918_s25 = sshll.u32 (%p51_p3), %s1102_s18, 2  ;;  %s917_s26 = sshll.u32 (%p51_p3), %s200_s24, 6 }
   0xe   : > { %s1177_s29 = scalar_lea.vmem (%p51_p3), %s1359_s0, %s918_s25  ;;  %s202_s30 = scalar_lea.vmem (%p51_p3), [#allocation3], %s917_s26 }
   0xf   : > { %v224_v0 = vld [vmem:[%s1177_s29] sm:$0xf] (%p51_p3)  ;;  %v226_v1 = vld [vmem:[%s1177_s29 + $0x14] sm:$0xf] (%p51_p3)  ;;  %v228_v2 = vld [vmem:[%s1177_s29 + $0x28] sm:$0xf] (%p51_p3) }
  0x10   : > { %225 = vst [vmem:[%s202_s30] sm:$0xf] (%p51_p3), %v224_v0  ;;  %227 = vst [vmem:[%s202_s30 + $0x4] sm:$0xf] (%p51_p3), %v226_v1  ;;  %v230_v3 = vld [vmem:[%s1177_s29 + $0x3c] sm:$0xf] (%p51_p3) }
  0x11   : > { %v232_v4 = vld [vmem:[%s1177_s29 + $0x50] sm:$0xf]  ;;  %229 = vst [vmem:[%s202_s30 + $0x8] sm:$0xf] %v228_v2  ;;  %231 = vst [vmem:[%s202_s30 + $0xc] sm:$0xf] %v230_v3 }
  0x12   : > { %233 = vst [vmem:[%s202_s30 + $0x10] sm:$0xf] %v232_v4  ;;  %v234_v5 = vld [vmem:[%s1177_s29 + $0x64] sm:$0xf]  ;;  %v236_v6 = vld [vmem:[%s1177_s29 + $0x78] sm:$0xf] }
  0x13   : > { %v238_v7 = vld [vmem:[%s1177_s29 + $0x8c] sm:$0xf]  ;;  %235 = vst [vmem:[%s202_s30 + $0x14] sm:$0xf] %v234_v5  ;;  %237 = vst [vmem:[%s202_s30 + $0x18] sm:$0xf] %v236_v6 }
  0x14   : > { %239 = vst [vmem:[%s202_s30 + $0x1c] sm:$0xf] %v238_v7  ;;  %v240_v8 = vld [vmem:[%s1177_s29 + $0xa0] sm:$0xf]  ;;  %v242_v9 = vld [vmem:[%s1177_s29 + $0xb4] sm:$0xf] }
  0x15   : > { %v244_v10 = vld [vmem:[%s1177_s29 + $0xc8] sm:$0xf]  ;;  %241 = vst [vmem:[%s202_s30 + $0x20] sm:$0xf] %v240_v8  ;;  %243 = vst [vmem:[%s202_s30 + $0x24] sm:$0xf] %v242_v9 }
  0x16   : > { %245 = vst [vmem:[%s202_s30 + $0x28] sm:$0xf] %v244_v10  ;;  %v246_v11 = vld [vmem:[%s1177_s29 + $0xdc] sm:$0xf]  ;;  %v248_v12 = vld [vmem:[%s1177_s29 + $0xf0] sm:$0xf] }
  0x17   : > { %v250_v13 = vld [vmem:[%s1177_s29 + $0x104] sm:$0xf]  ;;  %247 = vst [vmem:[%s202_s30 + $0x2c] sm:$0xf] %v246_v11  ;;  %249 = vst [vmem:[%s202_s30 + $0x30] sm:$0xf] %v248_v12 }
  0x18   : > { %251 = vst [vmem:[%s202_s30 + $0x34] sm:$0xf] %v250_v13  ;;  %v252_v14 = vld [vmem:[%s1177_s29 + $0x118] sm:$0xf]  ;;  %v254_v15 = vld [vmem:[%s1177_s29 + $0x12c] sm:$0xf] }
  0x19   : > { %253 = vst [vmem:[%s202_s30 + $0x38] sm:$0xf] %v252_v14  ;;  %255 = vst [vmem:[%s202_s30 + $0x3c] sm:$0xf] %v254_v15 }
  0x1a PF: > { %p919_p6 = scmp.ge.s32.totalorder %s1106_s19, 1  ;;  %p322_p7 = scmp.lt.s32.totalorder %s1106_s19, 6 }
  0x1c   : > { %p323_p8 = pnand %p919_p6, %p322_p7 }
  0x1d   : > { %s329_s5 = sand.u32 (!%p323_p8), 1, %s1090_s15   ;;  %s921_s6 = sshll.u32 (!%p323_p8), %s1098_s17, 4 }
  0x1e   : > { %326 = sbr.rel (%p323_p8) target bundleno = 310 (0x136), region = 73  ;;  %s920_s7 = sshll.u32 (!%p323_p8), %s329_s5, 6 }
  0x1f   : > { %p373_p9 = scmp.lt.s32.totalorder (!%p323_p8), %s921_s6, 79  ;;  %s1204_s12 = scalar_lea.vmem (!%p323_p8), [#allocation3], %s920_s7 }
  0x20   : > { %p923_p10 = scmp.ne.s32.totalorder (!%p323_p8), %s1098_s17, 0 }
  0x23   : > { %s1371_s6 = smov (!%p373_p9, %s921_s6), 79  ;;  %400 = sbr.rel (%p923_p10) target bundleno = 49 (0x31), region = 81 }
  0x24   : > { %s922_s8 = sshll.u32 %s1371_s6, 2 }
  0x25   : > { %s1202_s11 = scalar_lea.vmem %s1360_s1, %s922_s8 }
  0x28   : > { %vm401_vm0 = vcmask 523264   ;;  %v1108_v16 = vmov 0.0  }
  0x29   : > { %402 = vst.msk [vmem:[#allocation2] sm:$0xff] %vm401_vm0, %v1108_v16  ;;  %403 = vst.msk [vmem:[#allocation2 + $0x8] sm:$0xff] %vm401_vm0, %v1108_v16 }
  0x2a   : > { %404 = vst.msk [vmem:[#allocation2 + $0x10] sm:$0xff] %vm401_vm0, %v1108_v16  ;;  %405 = vst.msk [vmem:[#allocation2 + $0x18] sm:$0xff] %vm401_vm0, %v1108_v16 }
  0x2b   : > { %406 = vst.msk [vmem:[#allocation2 + $0x20] sm:$0xff] %vm401_vm0, %v1108_v16  ;;  %407 = vst.msk [vmem:[#allocation2 + $0x28] sm:$0xff] %vm401_vm0, %v1108_v16 }
  0x2c   : > { %408 = vst.msk [vmem:[#allocation2 + $0x30] sm:$0xff] %vm401_vm0, %v1108_v16  ;;  %409 = vst.msk [vmem:[#allocation2 + $0x38] sm:$0xff] %vm401_vm0, %v1108_v16 }
  0x2d   : > { %410 = vst.msk [vmem:[#allocation2 + $0x40] sm:$0xff] %vm401_vm0, %v1108_v16  ;;  %411 = vst.msk [vmem:[#allocation2 + $0x48] sm:$0xff] %vm401_vm0, %v1108_v16 }
  0x2e   : > { %412 = vst.msk [vmem:[#allocation2 + $0x50] sm:$0xff] %vm401_vm0, %v1108_v16  ;;  %413 = vst.msk [vmem:[#allocation2 + $0x58] sm:$0xff] %vm401_vm0, %v1108_v16 }
  0x2f   : > { %414 = vst.msk [vmem:[#allocation2 + $0x60] sm:$0xff] %vm401_vm0, %v1108_v16  ;;  %415 = vst.msk [vmem:[#allocation2 + $0x68] sm:$0xff] %vm401_vm0, %v1108_v16 }
  0x30   : > { %416 = vst.msk [vmem:[#allocation2 + $0x70] sm:$0xff] %vm401_vm0, %v1108_v16  ;;  %417 = vst.msk [vmem:[#allocation2 + $0x78] sm:$0xff] %vm401_vm0, %v1108_v16 }
  0x31 PF: > { %v1052_v17 = vld [vmem:[%s1202_s11 + $0x38] sm:$0xff]   ;;  %v1053_v18 = vld [vmem:[%s1202_s11 + $0x30] sm:$0xff]   ;;  %v1054_v19 = vld [vmem:[%s1202_s11 + $0x28] sm:$0xff]   ;;  %vm675_vm1 = vcmask 523264   ;;  %p940_p11 = scmp.ne.s32.totalorder %s1098_s17, 4 }
  0x32   : > { %963 = vmatprep.subr.bf16.mxu0 %v1052_v17  ;;  %995 = vmatprep.subr.bf16.mxu1 %v1052_v17  ;;  %v1055_v20 = vld [vmem:[%s1202_s11 + $0x20] sm:$0xff]   ;;  %v1056_v23 = vld [vmem:[%s1202_s11 + $0x18] sm:$0xff]   ;;  %v1057_v24 = vld [vmem:[%s1202_s11 + $0x10] sm:$0xff]  }
  0x33   : > { %964 = vmatpush3.bf16.msra.mxu0 %v1052_v17  ;;  %1003 = vmatpush3.bf16.msra.mxu1 %v1052_v17  ;;  %v1060_v21 = vld [vmem:[%s1204_s12] sm:$0xff]   ;;  %v1058_v25 = vld [vmem:[%s1202_s11 + $0x8] sm:$0xff]   ;;  %v1064_v29 = vld [vmem:[%s1204_s12 + $0x10] sm:$0xff]  }
  0x34   : > { %965 = vmatprep.subr.bf16.mxu0 %v1053_v18  ;;  %996 = vmatprep.subr.bf16.mxu1 %v1053_v18  ;;  %v1061_v22 = vld [vmem:[%s1204_s12 + $0x20] sm:$0xff]   ;;  %v1062_v27 = vld [vmem:[%s1204_s12 + $0x8] sm:$0xff]   ;;  %v1065_v30 = vld [vmem:[%s1204_s12 + $0x30] sm:$0xff]  }
  0x35   : > { %979 = vmatprep.mubr.bf16.mxu0 %v1060_v21  ;;  %987 = vmatprep.mubr.bf16.mxu1 %v1061_v22  ;;  %v1059_v26 = vld [vmem:[%s1202_s11] sm:$0xff]   ;;  %v1063_v28 = vld [vmem:[%s1204_s12 + $0x28] sm:$0xff]   ;;  %v1066_v31 = vld [vmem:[%s1204_s12 + $0x18] sm:$0xff]  }
  0x36   : > { %v1067_v32 = vld [vmem:[%s1204_s12 + $0x38] sm:$0xff]   ;;  %v420_v33 = vld [vmem:[#allocation2 + $0x10] sm:$0xff]  ;;  %v418_v37 = vld [vmem:[#allocation2] sm:$0xff] }
  0x37   : > { %966 = vmatpush3.bf16.msra.mxu0 %v1053_v18  ;;  %1004 = vmatpush3.bf16.msra.mxu1 %v1053_v18  ;;  %v428_v34 = vld [vmem:[#allocation2 + $0x50] sm:$0xff]  ;;  %v426_v38 = vld [vmem:[#allocation2 + $0x40] sm:$0xff]  ;;  %v421_v43 = vld [vmem:[#allocation2 + $0x18] sm:$0xff] }
  0x38   : > { %967 = vmatprep.subr.bf16.mxu0 %v1054_v19  ;;  %997 = vmatprep.subr.bf16.mxu1 %v1054_v19  ;;  %v429_v44 = vld [vmem:[#allocation2 + $0x58] sm:$0xff]  ;;  %v419_v49 = vld [vmem:[#allocation2 + $0x8] sm:$0xff]  ;;  %v424_v55 = vld [vmem:[#allocation2 + $0x30] sm:$0xff] }
  0x39   : > { %v427_v50 = vld [vmem:[#allocation2 + $0x48] sm:$0xff]  ;;  %v432_v56 = vld [vmem:[#allocation2 + $0x70] sm:$0xff]  ;;  %v422_v61 = vld [vmem:[#allocation2 + $0x20] sm:$0xff] }
  0x3a   : > { %v430_v62 = vld [vmem:[#allocation2 + $0x60] sm:$0xff]  ;;  %v425_v3 = vld [vmem:[#allocation2 + $0x38] sm:$0xff]  ;;  %v423_v9 = vld [vmem:[#allocation2 + $0x28] sm:$0xff] }
  0x3b   : > { %968 = vmatpush3.bf16.msra.mxu0 %v1054_v19  ;;  %1005 = vmatpush3.bf16.msra.mxu1 %v1054_v19  ;;  %v433_v4 = vld [vmem:[#allocation2 + $0x78] sm:$0xff]  ;;  %v431_v10 = vld [vmem:[#allocation2 + $0x68] sm:$0xff] }
  0x3c   : > { %969 = vmatprep.subr.bf16.mxu0 %v1055_v20  ;;  %998 = vmatprep.subr.bf16.mxu1 %v1055_v20 }
  0x3f   : > { %970 = vmatpush3.bf16.msra.mxu0 %v1055_v20  ;;  %1006 = vmatpush3.bf16.msra.mxu1 %v1055_v20 }
  0x40   : > { %971 = vmatprep.subr.bf16.mxu0 %v1056_v23  ;;  %999 = vmatprep.subr.bf16.mxu1 %v1056_v23 }
  0x43   : > { %972 = vmatpush3.bf16.msra.mxu0 %v1056_v23  ;;  %1007 = vmatpush3.bf16.msra.mxu1 %v1056_v23 }
  0x44   : > { %973 = vmatprep.subr.bf16.mxu0 %v1057_v24  ;;  %1000 = vmatprep.subr.bf16.mxu1 %v1057_v24 }
  0x47   : > { %974 = vmatpush3.bf16.msra.mxu0 %v1057_v24  ;;  %1008 = vmatpush3.bf16.msra.mxu1 %v1057_v24 }
  0x48   : > { %975 = vmatprep.subr.bf16.mxu0 %v1058_v25  ;;  %1001 = vmatprep.subr.bf16.mxu1 %v1058_v25 }
  0x4b   : > { %976 = vmatpush3.bf16.msra.mxu0 %v1058_v25  ;;  %1009 = vmatpush3.bf16.msra.mxu1 %v1058_v25 }
  0x4c   : > { %977 = vmatprep.subr.bf16.mxu0 %v1059_v26  ;;  %1002 = vmatprep.subr.bf16.mxu1 %v1059_v26 }
  0x4f   : > { %978 = vmatpush3.bf16.msra.mxu0 %v1059_v26  ;;  %1010 = vmatpush3.bf16.msra.mxu1 %v1059_v26 }
  0x52   : > { %980 = vmatmul.mubr.bf16.vlgmr.msra.gmra.mxu0 %v1062_v27  ;;  %988 = vmatmul.mubr.bf16.vlgmr.msra.gmra.mxu1 %v1063_v28 }
  0x53   : > { %983 = vmatprep.mubr.bf16.mxu0 %v1064_v29  ;;  %991 = vmatprep.mubr.bf16.mxu1 %v1065_v30 }
  0x5a   : > { %984 = vmatmul.mubr.bf16.gmra.mxu0 %v1066_v31  ;;  %992 = vmatmul.mubr.bf16.gmra.mxu1 %v1067_v32 }
 0x112   : > { %v981_v35 = vpop.f32.mrf.mxu0  ;;  %v989_v36 = vpop.f32.mrf.mxu1 }
 0x113   : > { %v661_v39 = vadd.f32 %v981_v35, %v420_v33  ;;  %v669_v40 = vadd.f32 %v989_v36, %v428_v34 }
 0x114   : > { %v596_v41 = vpop.f32.mrf.mxu0  ;;  %v628_v42 = vpop.f32.mrf.mxu1 }
 0x115   : > { %678 = vst.msk [vmem:[#allocation2 + $0x10] sm:$0xff] %vm675_vm1, %v661_v39  ;;  %686 = vst.msk [vmem:[#allocation2 + $0x50] sm:$0xff] %vm675_vm1, %v669_v40  ;;  %v659_v45 = vadd.f32 %v596_v41, %v418_v37  ;;  %v667_v46 = vadd.f32 %v628_v42, %v426_v38 }
 0x116   : > { %v982_v47 = vpop.f32.mrf.mxu0  ;;  %v990_v48 = vpop.f32.mrf.mxu1 }
 0x117   : > { %676 = vst.msk [vmem:[#allocation2] sm:$0xff] %vm675_vm1, %v659_v45  ;;  %684 = vst.msk [vmem:[#allocation2 + $0x40] sm:$0xff] %vm675_vm1, %v667_v46  ;;  %v662_v51 = vadd.f32 %v982_v47, %v421_v43  ;;  %v670_v52 = vadd.f32 %v990_v48, %v429_v44 }
 0x118   : > { %v599_v53 = vpop.f32.mrf.mxu0  ;;  %v631_v54 = vpop.f32.mrf.mxu1 }
 0x119   : > { %679 = vst.msk [vmem:[#allocation2 + $0x18] sm:$0xff] %vm675_vm1, %v662_v51  ;;  %687 = vst.msk [vmem:[#allocation2 + $0x58] sm:$0xff] %vm675_vm1, %v670_v52  ;;  %v660_v57 = vadd.f32 %v599_v53, %v419_v49  ;;  %v668_v58 = vadd.f32 %v631_v54, %v427_v50 }
 0x11a   : > { %v985_v59 = vpop.f32.mrf.mxu0  ;;  %v993_v60 = vpop.f32.mrf.mxu1 }
 0x11b   : > { %677 = vst.msk [vmem:[#allocation2 + $0x8] sm:$0xff] %vm675_vm1, %v660_v57  ;;  %685 = vst.msk [vmem:[#allocation2 + $0x48] sm:$0xff] %vm675_vm1, %v668_v58  ;;  %v665_v63 = vadd.f32 %v985_v59, %v424_v55  ;;  %v673_v0 = vadd.f32 %v993_v60, %v432_v56 }
 0x11c   : > { %v612_v1 = vpop.f32.mrf.mxu0  ;;  %v644_v2 = vpop.f32.mrf.mxu1 }
 0x11d   : > { %682 = vst.msk [vmem:[#allocation2 + $0x30] sm:$0xff] %vm675_vm1, %v665_v63  ;;  %690 = vst.msk [vmem:[#allocation2 + $0x70] sm:$0xff] %vm675_vm1, %v673_v0  ;;  %v663_v5 = vadd.f32 %v612_v1, %v422_v61  ;;  %v671_v6 = vadd.f32 %v644_v2, %v430_v62 }
 0x11e   : > { %v986_v7 = vpop.f32.mrf.mxu0  ;;  %v994_v8 = vpop.f32.mrf.mxu1 }
 0x11f   : > { %680 = vst.msk [vmem:[#allocation2 + $0x20] sm:$0xff] %vm675_vm1, %v663_v5  ;;  %688 = vst.msk [vmem:[#allocation2 + $0x60] sm:$0xff] %vm675_vm1, %v671_v6  ;;  %v666_v11 = vadd.f32 %v986_v7, %v425_v3  ;;  %v674_v12 = vadd.f32 %v994_v8, %v433_v4  ;;  %695 = sbr.rel (%p940_p11) target bundleno = 310 (0x136), region = 85 }
 0x120   : > { %v615_v13 = vpop.f32.mrf.mxu0  ;;  %v647_v14 = vpop.f32.mrf.mxu1 }
 0x121   : > { %683 = vst.msk [vmem:[#allocation2 + $0x38] sm:$0xff] %vm675_vm1, %v666_v11  ;;  %691 = vst.msk [vmem:[#allocation2 + $0x78] sm:$0xff] %vm675_vm1, %v674_v12  ;;  %v664_v15 = vadd.f32 %v615_v13, %v423_v9  ;;  %v672_v16 = vadd.f32 %v647_v14, %v431_v10 }
 0x123   : > { %681 = vst.msk [vmem:[#allocation2 + $0x28] sm:$0xff] %vm675_vm1, %v664_v15  ;;  %689 = vst.msk [vmem:[#allocation2 + $0x68] sm:$0xff] %vm675_vm1, %v672_v16 }
 0x124   : > { %v696_v17 = vld [vmem:[#allocation2] sm:$0xff]  ;;  %v697_v21 = vld [vmem:[#allocation2 + $0x8] sm:$0xff]  ;;  %v698_v22 = vld [vmem:[#allocation2 + $0x10] sm:$0xff] }
 0x125   : > { %v941_v18 = vld [vmem:[%s1361_s2] ss:$0 sm:$0xff]  ;;  %v699_v23 = vld [vmem:[#allocation2 + $0x18] sm:$0xff]  ;;  %v702_v29 = vld [vmem:[#allocation2 + $0x30] sm:$0xff] }
 0x126   : > { %v1262_v19 = vld [vmem:[%s1362_s3] ss:$0 sm:$0xff]  ;;  %v719_v20 = vmul.f32 %v941_v18, %v696_v17  ;;  %v720_v24 = vmul.f32 %v941_v18, %v697_v21  ;;  %v721_v25 = vmul.f32 %v941_v18, %v698_v22  ;;  %v722_v26 = vmul.f32 %v941_v18, %v699_v23  ;;  %v705_v44 = vld [vmem:[#allocation2 + $0x48] sm:$0xff]  ;;  %v706_v45 = vld [vmem:[#allocation2 + $0x50] sm:$0xff] }
 0x127   : > { %v700_v27 = vld [vmem:[#allocation2 + $0x20] sm:$0xff]  ;;  %v725_v33 = vmul.f32 %v941_v18, %v702_v29  ;;  %v707_v46 = vld [vmem:[#allocation2 + $0x58] sm:$0xff]  ;;  %v710_v53 = vld [vmem:[#allocation2 + $0x70] sm:$0xff]  ;;  %v728_v60 = vmul.f32 %v941_v18, %v705_v44  ;;  %v729_v61 = vmul.f32 %v941_v18, %v706_v45 }
 0x128   : > { %v742_v30 = vadd.f32 %v1262_v19, %v719_v20  ;;  %v723_v31 = vmul.f32 %v941_v18, %v700_v27  ;;  %v703_v34 = vld [vmem:[#allocation2 + $0x38] sm:$0xff]  ;;  %v743_v35 = vadd.f32 %v1262_v19, %v720_v24  ;;  %v744_v36 = vadd.f32 %v1262_v19, %v721_v25  ;;  %v704_v39 = vld [vmem:[#allocation2 + $0x40] sm:$0xff] }
 0x129   : > { %v745_v37 = vadd.f32 %v1262_v19, %v722_v26  ;;  %v726_v38 = vmul.f32 %v941_v18, %v703_v34  ;;  %v748_v43 = vadd.f32 %v1262_v19, %v725_v33  ;;  %v708_v51 = vld [vmem:[#allocation2 + $0x60] sm:$0xff]  ;;  %v727_v57 = vmul.f32 %v941_v18, %v704_v39  ;;  %v711_v58 = vld [vmem:[#allocation2 + $0x78] sm:$0xff] }
 0x12a   : > { %v701_v28 = vld [vmem:[#allocation2 + $0x28] sm:$0xff]  ;;  %v758_v40 = vmax.f32 %v742_v30, 0.0  ;;  %v746_v41 = vadd.f32 %v1262_v19, %v723_v31  ;;  %v759_v47 = vmax.f32 %v743_v35, 0.0  ;;  %v760_v48 = vmax.f32 %v744_v36, 0.0 }
 0x12b   : > { %v724_v32 = vmul.f32 %v941_v18, %v701_v28  ;;  %v761_v49 = vmax.f32 %v745_v37, 0.0  ;;  %v749_v50 = vadd.f32 %v1262_v19, %v726_v38  ;;  %v709_v52 = vld [vmem:[#allocation2 + $0x68] sm:$0xff]  ;;  %v764_v56 = vmax.f32 %v748_v43, 0.0 }
 0x12c   : > { %774 = vst.msk [vmem:[%s1363_s4] sm:$0xff] %vm675_vm1, %v758_v40  ;;  %v762_v54 = vmax.f32 %v746_v41, 0.0  ;;  %775 = vst.msk [vmem:[%s1363_s4 + $0x8] sm:$0xff] %vm675_vm1, %v759_v47  ;;  %v730_v62 = vmul.f32 %v941_v18, %v707_v46  ;;  %v750_v63 = vadd.f32 %v1262_v19, %v727_v57  ;;  %v731_v0 = vmul.f32 %v941_v18, %v708_v51 }
 0x12d   : > { %v747_v42 = vadd.f32 %v1262_v19, %v724_v32  ;;  %776 = vst.msk [vmem:[%s1363_s4 + $0x10] sm:$0xff] %vm675_vm1, %v760_v48  ;;  %777 = vst.msk [vmem:[%s1363_s4 + $0x18] sm:$0xff] %vm675_vm1, %v761_v49  ;;  %v765_v59 = vmax.f32 %v749_v50, 0.0  ;;  %v732_v1 = vmul.f32 %v941_v18, %v709_v52  ;;  %v733_v2 = vmul.f32 %v941_v18, %v710_v53 }
 0x12e   : > { %778 = vst.msk [vmem:[%s1363_s4 + $0x20] sm:$0xff] %vm675_vm1, %v762_v54  ;;  %780 = vst.msk [vmem:[%s1363_s4 + $0x30] sm:$0xff] %vm675_vm1, %v764_v56  ;;  %v751_v3 = vadd.f32 %v1262_v19, %v728_v60  ;;  %v752_v4 = vadd.f32 %v1262_v19, %v729_v61  ;;  %v753_v5 = vadd.f32 %v1262_v19, %v730_v62  ;;  %v766_v7 = vmax.f32 %v750_v63, 0.0 }
 0x12f   : > { %v763_v55 = vmax.f32 %v747_v42, 0.0  ;;  %781 = vst.msk [vmem:[%s1363_s4 + $0x38] sm:$0xff] %vm675_vm1, %v765_v59  ;;  %v734_v6 = vmul.f32 %v941_v18, %v711_v58  ;;  %v754_v8 = vadd.f32 %v1262_v19, %v731_v0  ;;  %v755_v9 = vadd.f32 %v1262_v19, %v732_v1 }
 0x130   : > { %v756_v10 = vadd.f32 %v1262_v19, %v733_v2  ;;  %v767_v11 = vmax.f32 %v751_v3, 0.0  ;;  %v768_v12 = vmax.f32 %v752_v4, 0.0  ;;  %v769_v13 = vmax.f32 %v753_v5, 0.0  ;;  %782 = vst.msk [vmem:[%s1363_s4 + $0x40] sm:$0xff] %vm675_vm1, %v766_v7 }
 0x131   : > { %779 = vst.msk [vmem:[%s1363_s4 + $0x28] sm:$0xff] %vm675_vm1, %v763_v55  ;;  %v757_v14 = vadd.f32 %v1262_v19, %v734_v6  ;;  %v770_v15 = vmax.f32 %v754_v8, 0.0  ;;  %v771_v16 = vmax.f32 %v755_v9, 0.0 }
 0x132   : > { %v772_v17 = vmax.f32 %v756_v10, 0.0  ;;  %783 = vst.msk [vmem:[%s1363_s4 + $0x48] sm:$0xff] %vm675_vm1, %v767_v11  ;;  %784 = vst.msk [vmem:[%s1363_s4 + $0x50] sm:$0xff] %vm675_vm1, %v768_v12 }
 0x133   : > { %785 = vst.msk [vmem:[%s1363_s4 + $0x58] sm:$0xff] %vm675_vm1, %v769_v13  ;;  %v773_v18 = vmax.f32 %v757_v14, 0.0  ;;  %786 = vst.msk [vmem:[%s1363_s4 + $0x60] sm:$0xff] %vm675_vm1, %v770_v15 }
 0x134   : > { %787 = vst.msk [vmem:[%s1363_s4 + $0x68] sm:$0xff] %vm675_vm1, %v771_v16  ;;  %788 = vst.msk [vmem:[%s1363_s4 + $0x70] sm:$0xff] %vm675_vm1, %v772_v17 }
 0x135   : > { %789 = vst.msk [vmem:[%s1363_s4 + $0x78] sm:$0xff] %vm675_vm1, %v773_v18 }
 0x136 PF: > { %s14_s19 = sadd.s32 1, %s1106_s19   ;;  %s1364_s15 = smov %s1094_s16 }
 0x137   : > { %p11_p12 = scmp.ge.s32.totalorder %s14_s19, 7   ;;  %s1365_s16 = smov %s1169_s23 }
 0x138   : > { %s1366_s17 = smov %s1102_s18  ;;  %s1367_s18 = smov %s1369_s20 }
 0x139   :  { %13 = sbr.rel (!%p11_p12) target bundleno = 3 (0x3), region = 129 }

// kernel: image_encoder_forward.25
= control target key start
LH: loop header
LB: loop body
LE: loop exit
PB: predicated region body
PF: predicated region fallthrough
CT: control target
= control target key end

     0   :  { %s1250_s18 = smov 0   ;;  %s1252_s19 = smov 0   ;;  %s1541_s0 = inlined_call_operand.vmem [shape: bf16[128,640], index: 0, kind: input, shape index: {}]   ;;  %s1542_s1 = inlined_call_operand.vmem [shape: bf16[640,64], index: 1, kind: input, shape index: {}]   ;;  %s1543_s2 = inlined_call_operand.vmem [shape: f32[1,64], index: 2, kind: input, shape index: {}]   ;;  %s1544_s3 = inlined_call_operand.vmem [shape: f32[1,64], index: 3, kind: input, shape index: {}]   ;;  %s1545_s4 = inlined_call_operand.vmem [shape: f32[128,64], index: 4, kind: input, shape index: {}]   ;;  %s1546_s5 = inlined_call_operand.vmem [shape: f32[128,64], index: 5, kind: output, shape index: {}]  }
   0x1   :  { %s1254_s20 = smov 0   ;;  %s1256_s21 = smov 0  }
   0x2   :  { %s1258_s22 = smov 0  }
   0x3 LB: > { %s27_s23 = sadd.s32 1, %s1213_s21  ;;  %p50_p1 = scmp.ne.s32.totalorder %s1205_s19, %s1201_s18  ;;  %s1217_s22 = sphi %s1258_s22, %s15_s22   ;;  %s1213_s21 = sphi %s1256_s21, %s1550_s21   ;;  %s1209_s20 = sphi %s1254_s20, %s1549_s20   ;;  %s1205_s19 = sphi %s1252_s19, %s1548_s19   ;;  %s1201_s18 = sphi %s1250_s18, %s1547_s18  }
   0x4   : > { %p28_p0 = scmp.ge.s32.totalorder %s27_s23, 5  ;;  %p51_p2 = scmp.eq.s32.totalorder %s1217_s22, 0 }
   0x5   : > { %s43_s25 = sadd.s32 1, %s1205_s19  ;;  %p1027_p5 = scmp.ge.s32.totalorder %s1217_s22, 5 }
   0x6   : > { %s1552_s23 = smov (%p28_p0, %s27_s23), 0  ;;  %p52_p3 = por %p51_p2, %p50_p1 }
   0x7   : > { %s39_s24 = ssub.s32 %s1213_s21, %s1552_s23  ;;  %236 = sbr.rel (%p1027_p5) target bundleno = 26 (0x1a), region = 28 }
   0x8   : > { %p41_p4 = scmp.eq.s32.totalorder %s39_s24, 0 }
   0xa   : > { %s1285_s26 = scalar_select %p41_p4, %s1205_s19, %s43_s25  }
   0xc   : > { %239 = sbr.rel (!%p52_p3) target bundleno = 26 (0x1a), region = 32  ;;  %s241_s27 = sand.u32 (%p52_p3), 1, %s1205_s19  }
   0xd   : > { %s1029_s28 = sshll.u32 (%p52_p3), %s1213_s21, 2  ;;  %s1028_s29 = sshll.u32 (%p52_p3), %s241_s27, 6 }
   0xe   : > { %s1293_s7 = scalar_lea.vmem (%p52_p3), %s1541_s0, %s1029_s28  ;;  %s243_s8 = scalar_lea.vmem (%p52_p3), [#allocation3], %s1028_s29 }
   0xf   : > { %v265_v0 = vld [vmem:[%s1293_s7] sm:$0xf] (%p52_p3)  ;;  %v267_v1 = vld [vmem:[%s1293_s7 + $0x14] sm:$0xf] (%p52_p3)  ;;  %v269_v2 = vld [vmem:[%s1293_s7 + $0x28] sm:$0xf] (%p52_p3) }
  0x10   : > { %266 = vst [vmem:[%s243_s8] sm:$0xf] (%p52_p3), %v265_v0  ;;  %268 = vst [vmem:[%s243_s8 + $0x4] sm:$0xf] (%p52_p3), %v267_v1  ;;  %v271_v3 = vld [vmem:[%s1293_s7 + $0x3c] sm:$0xf] (%p52_p3) }
  0x11   : > { %v273_v4 = vld [vmem:[%s1293_s7 + $0x50] sm:$0xf]  ;;  %270 = vst [vmem:[%s243_s8 + $0x8] sm:$0xf] %v269_v2  ;;  %272 = vst [vmem:[%s243_s8 + $0xc] sm:$0xf] %v271_v3 }
  0x12   : > { %274 = vst [vmem:[%s243_s8 + $0x10] sm:$0xf] %v273_v4  ;;  %v275_v5 = vld [vmem:[%s1293_s7 + $0x64] sm:$0xf]  ;;  %v277_v6 = vld [vmem:[%s1293_s7 + $0x78] sm:$0xf] }
  0x13   : > { %v279_v7 = vld [vmem:[%s1293_s7 + $0x8c] sm:$0xf]  ;;  %276 = vst [vmem:[%s243_s8 + $0x14] sm:$0xf] %v275_v5  ;;  %278 = vst [vmem:[%s243_s8 + $0x18] sm:$0xf] %v277_v6 }
  0x14   : > { %280 = vst [vmem:[%s243_s8 + $0x1c] sm:$0xf] %v279_v7  ;;  %v281_v8 = vld [vmem:[%s1293_s7 + $0xa0] sm:$0xf]  ;;  %v283_v9 = vld [vmem:[%s1293_s7 + $0xb4] sm:$0xf] }
  0x15   : > { %v285_v10 = vld [vmem:[%s1293_s7 + $0xc8] sm:$0xf]  ;;  %282 = vst [vmem:[%s243_s8 + $0x20] sm:$0xf] %v281_v8  ;;  %284 = vst [vmem:[%s243_s8 + $0x24] sm:$0xf] %v283_v9 }
  0x16   : > { %286 = vst [vmem:[%s243_s8 + $0x28] sm:$0xf] %v285_v10  ;;  %v287_v11 = vld [vmem:[%s1293_s7 + $0xdc] sm:$0xf]  ;;  %v289_v12 = vld [vmem:[%s1293_s7 + $0xf0] sm:$0xf] }
  0x17   : > { %v291_v13 = vld [vmem:[%s1293_s7 + $0x104] sm:$0xf]  ;;  %288 = vst [vmem:[%s243_s8 + $0x2c] sm:$0xf] %v287_v11  ;;  %290 = vst [vmem:[%s243_s8 + $0x30] sm:$0xf] %v289_v12 }
  0x18   : > { %292 = vst [vmem:[%s243_s8 + $0x34] sm:$0xf] %v291_v13  ;;  %v293_v14 = vld [vmem:[%s1293_s7 + $0x118] sm:$0xf]  ;;  %v295_v15 = vld [vmem:[%s1293_s7 + $0x12c] sm:$0xf] }
  0x19   : > { %294 = vst [vmem:[%s243_s8 + $0x38] sm:$0xf] %v293_v14  ;;  %296 = vst [vmem:[%s243_s8 + $0x3c] sm:$0xf] %v295_v15 }
  0x1a PF: > { %p1030_p6 = scmp.ge.s32.totalorder %s1217_s22, 1  ;;  %p363_p7 = scmp.lt.s32.totalorder %s1217_s22, 6 }
  0x1c   : > { %p364_p8 = pnand %p1030_p6, %p363_p7 }
  0x1d   : > { %s370_s9 = sand.u32 (!%p364_p8), 1, %s1201_s18   ;;  %s1032_s10 = sshll.u32 (!%p364_p8), %s1209_s20, 4 }
  0x1e   : > { %367 = sbr.rel (%p364_p8) target bundleno = 316 (0x13c), region = 77  ;;  %s1031_s11 = sshll.u32 (!%p364_p8), %s370_s9, 6 }
  0x1f   : > { %p424_p9 = scmp.lt.s32.totalorder (!%p364_p8), %s1032_s10, 79  ;;  %s1320_s16 = scalar_lea.vmem (!%p364_p8), [#allocation3], %s1031_s11 }
  0x20   : > { %p1034_p10 = scmp.ne.s32.totalorder (!%p364_p8), %s1209_s20, 0 }
  0x23   : > { %s1554_s10 = smov (!%p424_p9, %s1032_s10), 79  ;;  %460 = sbr.rel (%p1034_p10) target bundleno = 49 (0x31), region = 85 }
  0x24   : > { %s1033_s12 = sshll.u32 %s1554_s10, 2 }
  0x25   : > { %s1318_s15 = scalar_lea.vmem %s1542_s1, %s1033_s12 }
  0x28   : > { %vm461_vm0 = vcmask 523264   ;;  %v1219_v16 = vmov 0.0  }
  0x29   : > { %462 = vst.msk [vmem:[#allocation2] sm:$0xff] %vm461_vm0, %v1219_v16  ;;  %463 = vst.msk [vmem:[#allocation2 + $0x8] sm:$0xff] %vm461_vm0, %v1219_v16 }
  0x2a   : > { %464 = vst.msk [vmem:[#allocation2 + $0x10] sm:$0xff] %vm461_vm0, %v1219_v16  ;;  %465 = vst.msk [vmem:[#allocation2 + $0x18] sm:$0xff] %vm461_vm0, %v1219_v16 }
  0x2b   : > { %466 = vst.msk [vmem:[#allocation2 + $0x20] sm:$0xff] %vm461_vm0, %v1219_v16  ;;  %467 = vst.msk [vmem:[#allocation2 + $0x28] sm:$0xff] %vm461_vm0, %v1219_v16 }
  0x2c   : > { %468 = vst.msk [vmem:[#allocation2 + $0x30] sm:$0xff] %vm461_vm0, %v1219_v16  ;;  %469 = vst.msk [vmem:[#allocation2 + $0x38] sm:$0xff] %vm461_vm0, %v1219_v16 }
  0x2d   : > { %470 = vst.msk [vmem:[#allocation2 + $0x40] sm:$0xff] %vm461_vm0, %v1219_v16  ;;  %471 = vst.msk [vmem:[#allocation2 + $0x48] sm:$0xff] %vm461_vm0, %v1219_v16 }
  0x2e   : > { %472 = vst.msk [vmem:[#allocation2 + $0x50] sm:$0xff] %vm461_vm0, %v1219_v16  ;;  %473 = vst.msk [vmem:[#allocation2 + $0x58] sm:$0xff] %vm461_vm0, %v1219_v16 }
  0x2f   : > { %474 = vst.msk [vmem:[#allocation2 + $0x60] sm:$0xff] %vm461_vm0, %v1219_v16  ;;  %475 = vst.msk [vmem:[#allocation2 + $0x68] sm:$0xff] %vm461_vm0, %v1219_v16 }
  0x30   : > { %476 = vst.msk [vmem:[#allocation2 + $0x70] sm:$0xff] %vm461_vm0, %v1219_v16  ;;  %477 = vst.msk [vmem:[#allocation2 + $0x78] sm:$0xff] %vm461_vm0, %v1219_v16 }
  0x31 PF: > { %v1163_v17 = vld [vmem:[%s1318_s15 + $0x38] sm:$0xff]   ;;  %v1164_v18 = vld [vmem:[%s1318_s15 + $0x30] sm:$0xff]   ;;  %v1165_v19 = vld [vmem:[%s1318_s15 + $0x28] sm:$0xff]   ;;  %vm735_vm1 = vcmask 523264   ;;  %p1051_p11 = scmp.ne.s32.totalorder %s1209_s20, 4 }
  0x32   : > { %1074 = vmatprep.subr.bf16.mxu0 %v1163_v17  ;;  %1106 = vmatprep.subr.bf16.mxu1 %v1163_v17  ;;  %v1166_v20 = vld [vmem:[%s1318_s15 + $0x20] sm:$0xff]   ;;  %v1167_v23 = vld [vmem:[%s1318_s15 + $0x18] sm:$0xff]   ;;  %v1168_v24 = vld [vmem:[%s1318_s15 + $0x10] sm:$0xff]  }
  0x33   : > { %1075 = vmatpush3.bf16.msra.mxu0 %v1163_v17  ;;  %1114 = vmatpush3.bf16.msra.mxu1 %v1163_v17  ;;  %v1171_v21 = vld [vmem:[%s1320_s16] sm:$0xff]   ;;  %v1169_v25 = vld [vmem:[%s1318_s15 + $0x8] sm:$0xff]   ;;  %v1175_v29 = vld [vmem:[%s1320_s16 + $0x10] sm:$0xff]  }
  0x34   : > { %1076 = vmatprep.subr.bf16.mxu0 %v1164_v18  ;;  %1107 = vmatprep.subr.bf16.mxu1 %v1164_v18  ;;  %v1172_v22 = vld [vmem:[%s1320_s16 + $0x20] sm:$0xff]   ;;  %v1173_v27 = vld [vmem:[%s1320_s16 + $0x8] sm:$0xff]   ;;  %v1176_v30 = vld [vmem:[%s1320_s16 + $0x30] sm:$0xff]  }
  0x35   : > { %1090 = vmatprep.mubr.bf16.mxu0 %v1171_v21  ;;  %1098 = vmatprep.mubr.bf16.mxu1 %v1172_v22  ;;  %v1170_v26 = vld [vmem:[%s1318_s15] sm:$0xff]   ;;  %v1174_v28 = vld [vmem:[%s1320_s16 + $0x28] sm:$0xff]   ;;  %v1177_v31 = vld [vmem:[%s1320_s16 + $0x18] sm:$0xff]  }
  0x36   : > { %v1178_v32 = vld [vmem:[%s1320_s16 + $0x38] sm:$0xff]   ;;  %v480_v33 = vld [vmem:[#allocation2 + $0x10] sm:$0xff]  ;;  %v478_v37 = vld [vmem:[#allocation2] sm:$0xff] }
  0x37   : > { %1077 = vmatpush3.bf16.msra.mxu0 %v1164_v18  ;;  %1115 = vmatpush3.bf16.msra.mxu1 %v1164_v18  ;;  %v488_v34 = vld [vmem:[#allocation2 + $0x50] sm:$0xff]  ;;  %v486_v38 = vld [vmem:[#allocation2 + $0x40] sm:$0xff]  ;;  %v481_v43 = vld [vmem:[#allocation2 + $0x18] sm:$0xff] }
  0x38   : > { %1078 = vmatprep.subr.bf16.mxu0 %v1165_v19  ;;  %1108 = vmatprep.subr.bf16.mxu1 %v1165_v19  ;;  %v489_v44 = vld [vmem:[#allocation2 + $0x58] sm:$0xff]  ;;  %v479_v49 = vld [vmem:[#allocation2 + $0x8] sm:$0xff]  ;;  %v484_v55 = vld [vmem:[#allocation2 + $0x30] sm:$0xff] }
  0x39   : > { %v487_v50 = vld [vmem:[#allocation2 + $0x48] sm:$0xff]  ;;  %v492_v56 = vld [vmem:[#allocation2 + $0x70] sm:$0xff]  ;;  %v482_v61 = vld [vmem:[#allocation2 + $0x20] sm:$0xff] }
  0x3a   : > { %v490_v62 = vld [vmem:[#allocation2 + $0x60] sm:$0xff]  ;;  %v485_v3 = vld [vmem:[#allocation2 + $0x38] sm:$0xff]  ;;  %v483_v9 = vld [vmem:[#allocation2 + $0x28] sm:$0xff] }
  0x3b   : > { %1079 = vmatpush3.bf16.msra.mxu0 %v1165_v19  ;;  %1116 = vmatpush3.bf16.msra.mxu1 %v1165_v19  ;;  %v493_v4 = vld [vmem:[#allocation2 + $0x78] sm:$0xff]  ;;  %v491_v10 = vld [vmem:[#allocation2 + $0x68] sm:$0xff] }
  0x3c   : > { %1080 = vmatprep.subr.bf16.mxu0 %v1166_v20  ;;  %1109 = vmatprep.subr.bf16.mxu1 %v1166_v20 }
  0x3f   : > { %1081 = vmatpush3.bf16.msra.mxu0 %v1166_v20  ;;  %1117 = vmatpush3.bf16.msra.mxu1 %v1166_v20 }
  0x40   : > { %1082 = vmatprep.subr.bf16.mxu0 %v1167_v23  ;;  %1110 = vmatprep.subr.bf16.mxu1 %v1167_v23 }
  0x43   : > { %1083 = vmatpush3.bf16.msra.mxu0 %v1167_v23  ;;  %1118 = vmatpush3.bf16.msra.mxu1 %v1167_v23 }
  0x44   : > { %1084 = vmatprep.subr.bf16.mxu0 %v1168_v24  ;;  %1111 = vmatprep.subr.bf16.mxu1 %v1168_v24 }
  0x47   : > { %1085 = vmatpush3.bf16.msra.mxu0 %v1168_v24  ;;  %1119 = vmatpush3.bf16.msra.mxu1 %v1168_v24 }
  0x48   : > { %1086 = vmatprep.subr.bf16.mxu0 %v1169_v25  ;;  %1112 = vmatprep.subr.bf16.mxu1 %v1169_v25 }
  0x4b   : > { %1087 = vmatpush3.bf16.msra.mxu0 %v1169_v25  ;;  %1120 = vmatpush3.bf16.msra.mxu1 %v1169_v25 }
  0x4c   : > { %1088 = vmatprep.subr.bf16.mxu0 %v1170_v26  ;;  %1113 = vmatprep.subr.bf16.mxu1 %v1170_v26 }
  0x4f   : > { %1089 = vmatpush3.bf16.msra.mxu0 %v1170_v26  ;;  %1121 = vmatpush3.bf16.msra.mxu1 %v1170_v26 }
  0x52   : > { %1091 = vmatmul.mubr.bf16.vlgmr.msra.gmra.mxu0 %v1173_v27  ;;  %1099 = vmatmul.mubr.bf16.vlgmr.msra.gmra.mxu1 %v1174_v28 }
  0x53   : > { %1094 = vmatprep.mubr.bf16.mxu0 %v1175_v29  ;;  %1102 = vmatprep.mubr.bf16.mxu1 %v1176_v30 }
  0x5a   : > { %1095 = vmatmul.mubr.bf16.gmra.mxu0 %v1177_v31  ;;  %1103 = vmatmul.mubr.bf16.gmra.mxu1 %v1178_v32 }
 0x112   : > { %v1092_v35 = vpop.f32.mrf.mxu0  ;;  %v1100_v36 = vpop.f32.mrf.mxu1 }
 0x113   : > { %v721_v39 = vadd.f32 %v1092_v35, %v480_v33  ;;  %v729_v40 = vadd.f32 %v1100_v36, %v488_v34 }
 0x114   : > { %v656_v41 = vpop.f32.mrf.mxu0  ;;  %v688_v42 = vpop.f32.mrf.mxu1 }
 0x115   : > { %738 = vst.msk [vmem:[#allocation2 + $0x10] sm:$0xff] %vm735_vm1, %v721_v39  ;;  %746 = vst.msk [vmem:[#allocation2 + $0x50] sm:$0xff] %vm735_vm1, %v729_v40  ;;  %v719_v45 = vadd.f32 %v656_v41, %v478_v37  ;;  %v727_v46 = vadd.f32 %v688_v42, %v486_v38 }
 0x116   : > { %v1093_v47 = vpop.f32.mrf.mxu0  ;;  %v1101_v48 = vpop.f32.mrf.mxu1 }
 0x117   : > { %736 = vst.msk [vmem:[#allocation2] sm:$0xff] %vm735_vm1, %v719_v45  ;;  %744 = vst.msk [vmem:[#allocation2 + $0x40] sm:$0xff] %vm735_vm1, %v727_v46  ;;  %v722_v51 = vadd.f32 %v1093_v47, %v481_v43  ;;  %v730_v52 = vadd.f32 %v1101_v48, %v489_v44 }
 0x118   : > { %v659_v53 = vpop.f32.mrf.mxu0  ;;  %v691_v54 = vpop.f32.mrf.mxu1 }
 0x119   : > { %739 = vst.msk [vmem:[#allocation2 + $0x18] sm:$0xff] %vm735_vm1, %v722_v51  ;;  %747 = vst.msk [vmem:[#allocation2 + $0x58] sm:$0xff] %vm735_vm1, %v730_v52  ;;  %v720_v57 = vadd.f32 %v659_v53, %v479_v49  ;;  %v728_v58 = vadd.f32 %v691_v54, %v487_v50 }
 0x11a   : > { %v1096_v59 = vpop.f32.mrf.mxu0  ;;  %v1104_v60 = vpop.f32.mrf.mxu1 }
 0x11b   : > { %737 = vst.msk [vmem:[#allocation2 + $0x8] sm:$0xff] %vm735_vm1, %v720_v57  ;;  %745 = vst.msk [vmem:[#allocation2 + $0x48] sm:$0xff] %vm735_vm1, %v728_v58  ;;  %v725_v63 = vadd.f32 %v1096_v59, %v484_v55  ;;  %v733_v0 = vadd.f32 %v1104_v60, %v492_v56 }
 0x11c   : > { %v672_v1 = vpop.f32.mrf.mxu0  ;;  %v704_v2 = vpop.f32.mrf.mxu1 }
 0x11d   : > { %742 = vst.msk [vmem:[#allocation2 + $0x30] sm:$0xff] %vm735_vm1, %v725_v63  ;;  %750 = vst.msk [vmem:[#allocation2 + $0x70] sm:$0xff] %vm735_vm1, %v733_v0  ;;  %v723_v5 = vadd.f32 %v672_v1, %v482_v61  ;;  %v731_v6 = vadd.f32 %v704_v2, %v490_v62 }
 0x11e   : > { %v1097_v7 = vpop.f32.mrf.mxu0  ;;  %v1105_v8 = vpop.f32.mrf.mxu1 }
 0x11f   : > { %740 = vst.msk [vmem:[#allocation2 + $0x20] sm:$0xff] %vm735_vm1, %v723_v5  ;;  %748 = vst.msk [vmem:[#allocation2 + $0x60] sm:$0xff] %vm735_vm1, %v731_v6  ;;  %v726_v11 = vadd.f32 %v1097_v7, %v485_v3  ;;  %v734_v12 = vadd.f32 %v1105_v8, %v493_v4  ;;  %755 = sbr.rel (%p1051_p11) target bundleno = 316 (0x13c), region = 89 }
 0x120   : > { %v675_v13 = vpop.f32.mrf.mxu0  ;;  %v707_v14 = vpop.f32.mrf.mxu1 }
 0x121   : > { %743 = vst.msk [vmem:[#allocation2 + $0x38] sm:$0xff] %vm735_vm1, %v726_v11  ;;  %751 = vst.msk [vmem:[#allocation2 + $0x78] sm:$0xff] %vm735_vm1, %v734_v12  ;;  %v724_v15 = vadd.f32 %v675_v13, %v483_v9  ;;  %v732_v16 = vadd.f32 %v707_v14, %v491_v10 }
 0x123   : > { %741 = vst.msk [vmem:[#allocation2 + $0x28] sm:$0xff] %vm735_vm1, %v724_v15  ;;  %749 = vst.msk [vmem:[#allocation2 + $0x68] sm:$0xff] %vm735_vm1, %v732_v16 }
 0x124   : > { %v756_v17 = vld [vmem:[#allocation2] sm:$0xff]  ;;  %v757_v21 = vld [vmem:[#allocation2 + $0x8] sm:$0xff]  ;;  %v758_v24 = vld [vmem:[#allocation2 + $0x10] sm:$0xff] }
 0x125   : > { %v1375_v18 = vld [vmem:[%s1543_s2] ss:$0 sm:$0xff]  ;;  %v759_v25 = vld [vmem:[#allocation2 + $0x18] sm:$0xff]  ;;  %v819_v27 = vld [vmem:[%s1545_s4 + $0x8] sm:$0xff] }
 0x126   : > { %v1380_v19 = vld [vmem:[%s1544_s3] ss:$0 sm:$0xff]  ;;  %v779_v20 = vmul.f32 %v1375_v18, %v756_v17  ;;  %v780_v23 = vmul.f32 %v1375_v18, %v757_v21  ;;  %v781_v28 = vmul.f32 %v1375_v18, %v758_v24  ;;  %v820_v29 = vld [vmem:[%s1545_s4 + $0x10] sm:$0xff]  ;;  %v782_v30 = vmul.f32 %v1375_v18, %v759_v25  ;;  %v821_v33 = vld [vmem:[%s1545_s4 + $0x18] sm:$0xff] }
 0x127   : > { %v818_v22 = vld [vmem:[%s1545_s4] sm:$0xff]  ;;  %v762_v36 = vld [vmem:[#allocation2 + $0x30] sm:$0xff]  ;;  %v823_v45 = vld [vmem:[%s1545_s4 + $0x28] sm:$0xff] }
 0x128   : > { %v802_v26 = vadd.f32 %v1380_v19, %v779_v20  ;;  %v760_v31 = vld [vmem:[#allocation2 + $0x20] sm:$0xff]  ;;  %v803_v32 = vadd.f32 %v1380_v19, %v780_v23  ;;  %v804_v38 = vadd.f32 %v1380_v19, %v781_v28  ;;  %v805_v39 = vadd.f32 %v1380_v19, %v782_v30  ;;  %v763_v42 = vld [vmem:[#allocation2 + $0x38] sm:$0xff]  ;;  %v824_v53 = vld [vmem:[%s1545_s4 + $0x30] sm:$0xff] }
 0x129   : > { %v783_v34 = vmul.f32 %v1375_v18, %v760_v31  ;;  %v822_v40 = vld [vmem:[%s1545_s4 + $0x20] sm:$0xff]  ;;  %v785_v46 = vmul.f32 %v1375_v18, %v762_v36  ;;  %v786_v47 = vmul.f32 %v1375_v18, %v763_v42  ;;  %v825_v54 = vld [vmem:[%s1545_s4 + $0x38] sm:$0xff]  ;;  %v765_v55 = vld [vmem:[#allocation2 + $0x48] sm:$0xff] }
 0x12a   : > { %v761_v35 = vld [vmem:[#allocation2 + $0x28] sm:$0xff]  ;;  %v834_v37 = vadd.f32 %v818_v22, %v802_v26  ;;  %v835_v43 = vadd.f32 %v819_v27, %v803_v32  ;;  %v764_v48 = vld [vmem:[#allocation2 + $0x40] sm:$0xff]  ;;  %v836_v50 = vadd.f32 %v820_v29, %v804_v38  ;;  %v837_v51 = vadd.f32 %v821_v33, %v805_v39  ;;  %v766_v60 = vld [vmem:[#allocation2 + $0x50] sm:$0xff] }
 0x12b   : > { %v784_v41 = vmul.f32 %v1375_v18, %v761_v35  ;;  %v806_v44 = vadd.f32 %v1380_v19, %v783_v34  ;;  %v808_v58 = vadd.f32 %v1380_v19, %v785_v46  ;;  %v809_v59 = vadd.f32 %v1380_v19, %v786_v47  ;;  %v767_v61 = vld [vmem:[#allocation2 + $0x58] sm:$0xff]  ;;  %v768_v2 = vld [vmem:[#allocation2 + $0x60] sm:$0xff]  ;;  %v769_v8 = vld [vmem:[#allocation2 + $0x68] sm:$0xff] }
 0x12c   : > { %v850_v49 = vmax.f32 %v834_v37, 0.0  ;;  %v851_v56 = vmax.f32 %v835_v43, 0.0  ;;  %v852_v62 = vmax.f32 %v836_v50, 0.0  ;;  %v853_v63 = vmax.f32 %v837_v51, 0.0  ;;  %v826_v6 = vld [vmem:[%s1545_s4 + $0x40] sm:$0xff]  ;;  %v827_v11 = vld [vmem:[%s1545_s4 + $0x48] sm:$0xff] }
 0x12d   : > { %v807_v52 = vadd.f32 %v1380_v19, %v784_v41  ;;  %v838_v57 = vadd.f32 %v822_v40, %v806_v44  ;;  %v787_v1 = vmul.f32 %v1375_v18, %v764_v48  ;;  %v840_v4 = vadd.f32 %v824_v53, %v808_v58  ;;  %v770_v14 = vld [vmem:[#allocation2 + $0x70] sm:$0xff]  ;;  %v771_v15 = vld [vmem:[#allocation2 + $0x78] sm:$0xff]  ;;  %v830_v27 = vld [vmem:[%s1545_s4 + $0x60] sm:$0xff] }
 0x12e   : > { %866 = vst.msk [vmem:[%s1546_s5] sm:$0xff] %vm735_vm1, %v850_v49  ;;  %867 = vst.msk [vmem:[%s1546_s5 + $0x8] sm:$0xff] %vm735_vm1, %v851_v56  ;;  %v841_v5 = vadd.f32 %v825_v54, %v809_v59  ;;  %v788_v7 = vmul.f32 %v1375_v18, %v765_v55  ;;  %v789_v12 = vmul.f32 %v1375_v18, %v766_v60  ;;  %v828_v21 = vld [vmem:[%s1545_s4 + $0x50] sm:$0xff]  ;;  %v829_v22 = vld [vmem:[%s1545_s4 + $0x58] sm:$0xff] }
 0x12f   : > { %v839_v0 = vadd.f32 %v823_v45, %v807_v52  ;;  %v854_v3 = vmax.f32 %v838_v57, 0.0  ;;  %868 = vst.msk [vmem:[%s1546_s5 + $0x10] sm:$0xff] %vm735_vm1, %v852_v62  ;;  %869 = vst.msk [vmem:[%s1546_s5 + $0x18] sm:$0xff] %vm735_vm1, %v853_v63  ;;  %v810_v10 = vadd.f32 %v1380_v19, %v787_v1  ;;  %v790_v13 = vmul.f32 %v1375_v18, %v767_v61  ;;  %v831_v31 = vld [vmem:[%s1545_s4 + $0x68] sm:$0xff]  ;;  %v832_v38 = vld [vmem:[%s1545_s4 + $0x70] sm:$0xff] }
 0x130   : > { %v856_v16 = vmax.f32 %v840_v4, 0.0  ;;  %v857_v17 = vmax.f32 %v841_v5, 0.0  ;;  %v811_v20 = vadd.f32 %v1380_v19, %v788_v7  ;;  %v791_v23 = vmul.f32 %v1375_v18, %v768_v2  ;;  %v833_v39 = vld [vmem:[%s1545_s4 + $0x78] sm:$0xff] }
 0x131   : > { %v855_v9 = vmax.f32 %v839_v0, 0.0  ;;  %870 = vst.msk [vmem:[%s1546_s5 + $0x20] sm:$0xff] %vm735_vm1, %v854_v3  ;;  %v842_v24 = vadd.f32 %v826_v6, %v810_v10  ;;  %v812_v25 = vadd.f32 %v1380_v19, %v789_v12  ;;  %v813_v26 = vadd.f32 %v1380_v19, %v790_v13 }
 0x132   : > { %v792_v28 = vmul.f32 %v1375_v18, %v769_v8  ;;  %872 = vst.msk [vmem:[%s1546_s5 + $0x30] sm:$0xff] %vm735_vm1, %v856_v16  ;;  %873 = vst.msk [vmem:[%s1546_s5 + $0x38] sm:$0xff] %vm735_vm1, %v857_v17  ;;  %v843_v29 = vadd.f32 %v827_v11, %v811_v20  ;;  %v814_v30 = vadd.f32 %v1380_v19, %v791_v23 }
 0x133   : > { %871 = vst.msk [vmem:[%s1546_s5 + $0x28] sm:$0xff] %vm735_vm1, %v855_v9  ;;  %v793_v32 = vmul.f32 %v1375_v18, %v770_v14  ;;  %v794_v33 = vmul.f32 %v1375_v18, %v771_v15  ;;  %v858_v34 = vmax.f32 %v842_v24, 0.0  ;;  %v844_v35 = vadd.f32 %v828_v21, %v812_v25 }
 0x134   : > { %v845_v36 = vadd.f32 %v829_v22, %v813_v26  ;;  %v815_v37 = vadd.f32 %v1380_v19, %v792_v28  ;;  %v859_v40 = vmax.f32 %v843_v29, 0.0  ;;  %v846_v41 = vadd.f32 %v830_v27, %v814_v30 }
 0x135   : > { %v816_v42 = vadd.f32 %v1380_v19, %v793_v32  ;;  %v817_v43 = vadd.f32 %v1380_v19, %v794_v33  ;;  %874 = vst.msk [vmem:[%s1546_s5 + $0x40] sm:$0xff] %vm735_vm1, %v858_v34  ;;  %v860_v18 = vmax.f32 %v844_v35, 0.0 }
 0x136   : > { %v861_v44 = vmax.f32 %v845_v36, 0.0  ;;  %v847_v45 = vadd.f32 %v831_v31, %v815_v37  ;;  %875 = vst.msk [vmem:[%s1546_s5 + $0x48] sm:$0xff] %vm735_vm1, %v859_v40  ;;  %v862_v46 = vmax.f32 %v846_v41, 0.0 }
 0x137   : > { %v848_v47 = vadd.f32 %v832_v38, %v816_v42  ;;  %v849_v48 = vadd.f32 %v833_v39, %v817_v43  ;;  %876 = vst.msk [vmem:[%s1546_s5 + $0x50] sm:$0xff] %vm735_vm1, %v860_v18 }
 0x138   : > { %877 = vst.msk [vmem:[%s1546_s5 + $0x58] sm:$0xff] %vm735_vm1, %v861_v44  ;;  %v863_v19 = vmax.f32 %v847_v45, 0.0  ;;  %878 = vst.msk [vmem:[%s1546_s5 + $0x60] sm:$0xff] %vm735_vm1, %v862_v46 }
 0x139   : > { %v864_v49 = vmax.f32 %v848_v47, 0.0  ;;  %v865_v50 = vmax.f32 %v849_v48, 0.0 }
 0x13a   : > { %879 = vst.msk [vmem:[%s1546_s5 + $0x68] sm:$0xff] %vm735_vm1, %v863_v19 }
 0x13b   : > { %880 = vst.msk [vmem:[%s1546_s5 + $0x70] sm:$0xff] %vm735_vm1, %v864_v49  ;;  %881 = vst.msk [vmem:[%s1546_s5 + $0x78] sm:$0xff] %vm735_vm1, %v865_v50 }
 0x13c PF: > { %s15_s22 = sadd.s32 1, %s1217_s22   ;;  %s1547_s18 = smov %s1205_s19 }
 0x13d   : > { %p12_p12 = scmp.ge.s32.totalorder %s15_s22, 7   ;;  %s1548_s19 = smov %s1285_s26 }
 0x13e   : > { %s1549_s20 = smov %s1213_s21  ;;  %s1550_s21 = smov %s1552_s23 }
 0x13f   :  { %14 = sbr.rel (!%p12_p12) target bundleno = 3 (0x3), region = 136 }

// kernel: image_encoder_forward.28
= control target key start
LH: loop header
LB: loop body
LE: loop exit
PB: predicated region body
PF: predicated region fallthrough
CT: control target
= control target key end

     0   :  { %s329_s1 = inlined_call_operand.vmem [shape: bf16[128,128], index: 1, kind: input, shape index: {}]   ;;  %s330_s0 = inlined_call_operand.vmem [shape: bf16[32,128], index: 0, kind: input, shape index: {}]   ;;  %s331_s2 = inlined_call_operand.vmem [shape: f32[1,128], index: 2, kind: input, shape index: {}]   ;;  %s332_s3 = inlined_call_operand.vmem [shape: f32[1,128], index: 3, kind: input, shape index: {}]   ;;  %s333_s4 = inlined_call_operand.vmem [shape: f32[32,128], index: 4, kind: output, shape index: {}]  }
   0x1   :  { %v246_v0 = vld [vmem:[%s329_s1 + $0x38] sm:$0xff]   ;;  %v247_v1 = vld [vmem:[%s329_s1 + $0x30] sm:$0xff]   ;;  %v248_v2 = vld [vmem:[%s329_s1 + $0x28] sm:$0xff]  }
   0x2   :  { %226 = vmatprep.subr.bf16.mxu0 %v246_v0  ;;  %v249_v3 = vld [vmem:[%s329_s1 + $0x20] sm:$0xff]   ;;  %v250_v5 = vld [vmem:[%s329_s1 + $0x18] sm:$0xff]   ;;  %v251_v6 = vld [vmem:[%s329_s1 + $0x10] sm:$0xff]  }
   0x3   :  { %227 = vmatpush3.bf16.msra.mxu0 %v246_v0  ;;  %v254_v4 = vld [vmem:[%s330_s0] sm:$0xff]   ;;  %v252_v7 = vld [vmem:[%s329_s1 + $0x8] sm:$0xff]  }
   0x4   :  { %228 = vmatprep.subr.bf16.mxu0 %v247_v1  ;;  %242 = vmatprep.mubr.bf16.mxu0 %v254_v4  ;;  %v253_v8 = vld [vmem:[%s329_s1] sm:$0xff]   ;;  %v255_v9 = vld [vmem:[%s330_s0 + $0x8] sm:$0xff]  }
   0x5   :  { %v214_v10 = vld [vmem:[%s331_s2] ss:$0 sm:$0xff] }
   0x6   :  { %v215_v12 = vld [vmem:[%s332_s3] ss:$0 sm:$0xff] }
   0x7   :  { %229 = vmatpush3.bf16.msra.mxu0 %v247_v1 }
   0x8   :  { %230 = vmatprep.subr.bf16.mxu0 %v248_v2 }
   0xb   :  { %231 = vmatpush3.bf16.msra.mxu0 %v248_v2 }
   0xc   :  { %232 = vmatprep.subr.bf16.mxu0 %v249_v3 }
   0xf   :  { %233 = vmatpush3.bf16.msra.mxu0 %v249_v3 }
  0x10   :  { %234 = vmatprep.subr.bf16.mxu0 %v250_v5 }
  0x13   :  { %235 = vmatpush3.bf16.msra.mxu0 %v250_v5 }
  0x14   :  { %236 = vmatprep.subr.bf16.mxu0 %v251_v6 }
  0x17   :  { %237 = vmatpush3.bf16.msra.mxu0 %v251_v6 }
  0x18   :  { %238 = vmatprep.subr.bf16.mxu0 %v252_v7 }
  0x1b   :  { %239 = vmatpush3.bf16.msra.mxu0 %v252_v7 }
  0x1c   :  { %240 = vmatprep.subr.bf16.mxu0 %v253_v8 }
  0x1f   :  { %241 = vmatpush3.bf16.msra.mxu0 %v253_v8 }
  0x22   :  { %243 = vmatmul.mubr.bf16.vlgmr.msra.gmra.mxu0 %v255_v9 }
  0xe2   :  { %v244_v11 = vpop.f32.mrf.mxu0 }
  0xe3   :  { %v183_v13 = vmul.f32 %v244_v11, %v214_v10 }
  0xe4   :  { %v144_v14 = vpop.f32.mrf.mxu0 }
  0xe5   :  { %v194_v15 = vadd.f32 %v215_v12, %v183_v13  ;;  %v181_v16 = vmul.f32 %v214_v10, %v144_v14 }
  0xe6   :  { %v245_v17 = vpop.f32.mrf.mxu0 }
  0xe7   :  { %198 = vst [vmem:[%s333_s4 + $0x10] sm:$0xff] %v194_v15  ;;  %v192_v18 = vadd.f32 %v215_v12, %v181_v16  ;;  %v184_v19 = vmul.f32 %v245_v17, %v214_v10 }
  0xe8   :  { %v147_v20 = vpop.f32.mrf.mxu0 }
  0xe9   :  { %196 = vst [vmem:[%s333_s4] sm:$0xff] %v192_v18  ;;  %v195_v21 = vadd.f32 %v215_v12, %v184_v19  ;;  %v182_v22 = vmul.f32 %v214_v10, %v147_v20 }
  0xeb   :  { %199 = vst [vmem:[%s333_s4 + $0x18] sm:$0xff] %v195_v21  ;;  %v193_v23 = vadd.f32 %v215_v12, %v182_v22 }
  0xed   :  { %197 = vst [vmem:[%s333_s4 + $0x8] sm:$0xff] %v193_v23 }

// kernel: image_encoder_forward.29
= control target key start
LH: loop header
LB: loop body
LE: loop exit
PB: predicated region body
PF: predicated region fallthrough
CT: control target
= control target key end

     0   :  { %s834_s15 = smov 0   ;;  %s836_s16 = smov 0   ;;  %s936_s0 = inlined_call_operand.vmem [shape: bf16[32,640], index: 0, kind: input, shape index: {}]   ;;  %s937_s1 = inlined_call_operand.vmem [shape: bf16[640,128], index: 1, kind: input, shape index: {}]   ;;  %s938_s2 = inlined_call_operand.vmem [shape: f32[1,128], index: 2, kind: input, shape index: {}]   ;;  %s939_s3 = inlined_call_operand.vmem [shape: f32[1,128], index: 3, kind: input, shape index: {}]   ;;  %s940_s4 = inlined_call_operand.vmem [shape: f32[32,128], index: 4, kind: output, shape index: {}]  }
   0x1   :  { %s838_s17 = smov 0   ;;  %s840_s18 = smov 0  }
   0x2   :  { %s842_s19 = smov 0  }
   0x3 LB: > { %s26_s20 = sadd.s32 1, %s802_s18  ;;  %p49_p1 = scmp.ne.s32.totalorder %s794_s16, %s790_s15  ;;  %s806_s19 = sphi %s842_s19, %s14_s19   ;;  %s802_s18 = sphi %s840_s18, %s944_s18   ;;  %s798_s17 = sphi %s838_s17, %s943_s17   ;;  %s794_s16 = sphi %s836_s16, %s942_s16   ;;  %s790_s15 = sphi %s834_s15, %s941_s15  }
   0x4   : > { %p27_p0 = scmp.ge.s32.totalorder %s26_s20, 5  ;;  %p50_p2 = scmp.eq.s32.totalorder %s806_s19, 0 }
   0x5   : > { %s42_s22 = sadd.s32 1, %s794_s16  ;;  %p662_p5 = scmp.ge.s32.totalorder %s806_s19, 5 }
   0x6   : > { %s946_s20 = smov (%p27_p0, %s26_s20), 0  ;;  %p51_p3 = por %p50_p2, %p49_p1 }
   0x7   : > { %s38_s21 = ssub.s32 %s802_s18, %s946_s20  ;;  %195 = sbr.rel (%p662_p5) target bundleno = 18 (0x12), region = 24 }
   0x8   : > { %p40_p4 = scmp.eq.s32.totalorder %s38_s21, 0 }
   0xa   : > { %s869_s23 = scalar_select %p40_p4, %s794_s16, %s42_s22  }
   0xc   : > { %198 = sbr.rel (!%p51_p3) target bundleno = 18 (0x12), region = 28  ;;  %s200_s24 = sand.u32 (%p51_p3), 1, %s794_s16  }
   0xd   : > { %s664_s25 = sshll.u32 (%p51_p3), %s802_s18, 2  ;;  %s663_s26 = sshll.u32 (%p51_p3), %s200_s24, 4 }
   0xe   : > { %s207_s29 = scalar_lea.vmem (%p51_p3), %s936_s0, %s664_s25  ;;  %s202_s30 = scalar_lea.vmem (%p51_p3), [#allocation3], %s663_s26 }
   0xf   : > { %v224_v0 = vld [vmem:[%s207_s29] sm:$0xf] (%p51_p3)  ;;  %v226_v1 = vld [vmem:[%s207_s29 + $0x14] sm:$0xf] (%p51_p3)  ;;  %v228_v2 = vld [vmem:[%s207_s29 + $0x28] sm:$0xf] (%p51_p3) }
  0x10   : > { %225 = vst [vmem:[%s202_s30] sm:$0xf] (%p51_p3), %v224_v0  ;;  %227 = vst [vmem:[%s202_s30 + $0x4] sm:$0xf] (%p51_p3), %v226_v1  ;;  %v230_v3 = vld [vmem:[%s207_s29 + $0x3c] sm:$0xf] (%p51_p3) }
  0x11   : > { %229 = vst [vmem:[%s202_s30 + $0x8] sm:$0xf] %v228_v2  ;;  %231 = vst [vmem:[%s202_s30 + $0xc] sm:$0xf] %v230_v3 }
  0x12 PF: > { %p665_p6 = scmp.ge.s32.totalorder %s806_s19, 1  ;;  %p274_p7 = scmp.lt.s32.totalorder %s806_s19, 6 }
  0x14   : > { %p275_p8 = pnand %p665_p6, %p274_p7 }
  0x15   : > { %s281_s5 = sand.u32 (!%p275_p8), 1, %s790_s15   ;;  %s667_s6 = sshll.u32 (!%p275_p8), %s798_s17, 4 }
  0x16   : > { %278 = sbr.rel (%p275_p8) target bundleno = 284 (0x11c), region = 73  ;;  %s881_s7 = sshll.u32 (!%p275_p8), %s281_s5, 4 }
  0x17   : > { %p325_p9 = scmp.lt.s32.totalorder (!%p275_p8), %s667_s6, 79  ;;  %s283_s12 = scalar_lea.vmem (!%p275_p8), [#allocation3], %s881_s7 }
  0x18   : > { %p669_p10 = scmp.ne.s32.totalorder (!%p275_p8), %s798_s17, 0 }
  0x1b   : > { %s948_s6 = smov (!%p325_p9, %s667_s6), 79  ;;  %352 = sbr.rel (%p669_p10) target bundleno = 35 (0x23), region = 81 }
  0x1c   : > { %s668_s8 = sshll.u32 %s948_s6, 2 }
  0x1d   : > { %s886_s11 = scalar_lea.vmem %s937_s1, %s668_s8 }
  0x20   : > { %v808_v4 = vmov 0.0  }
  0x21   : > { %353 = vst [vmem:[#allocation2 + $0x10] sm:$0xff] %v808_v4  ;;  %354 = vst [vmem:[#allocation2] sm:$0xff] %v808_v4 }
  0x22   : > { %355 = vst [vmem:[#allocation2 + $0x18] sm:$0xff] %v808_v4  ;;  %356 = vst [vmem:[#allocation2 + $0x8] sm:$0xff] %v808_v4 }
  0x23 PF: > { %v758_v5 = vld [vmem:[%s886_s11 + $0x38] sm:$0xff]   ;;  %v759_v6 = vld [vmem:[%s886_s11 + $0x30] sm:$0xff]   ;;  %v760_v7 = vld [vmem:[%s886_s11 + $0x28] sm:$0xff]   ;;  %p680_p11 = scmp.ne.s32.totalorder %s798_s17, 4 }
  0x24   : > { %697 = vmatprep.subr.bf16.mxu0 %v758_v5  ;;  %v761_v8 = vld [vmem:[%s886_s11 + $0x20] sm:$0xff]   ;;  %v762_v10 = vld [vmem:[%s886_s11 + $0x18] sm:$0xff]   ;;  %v763_v11 = vld [vmem:[%s886_s11 + $0x10] sm:$0xff]  }
  0x25   : > { %698 = vmatpush3.bf16.msra.mxu0 %v758_v5  ;;  %v766_v9 = vld [vmem:[%s283_s12] sm:$0xff]   ;;  %v764_v12 = vld [vmem:[%s886_s11 + $0x8] sm:$0xff]  }
  0x26   : > { %699 = vmatprep.subr.bf16.mxu0 %v759_v6  ;;  %713 = vmatprep.mubr.bf16.mxu0 %v766_v9  ;;  %v765_v13 = vld [vmem:[%s886_s11] sm:$0xff]   ;;  %v767_v14 = vld [vmem:[%s283_s12 + $0x8] sm:$0xff]  }
  0x28   : > { %v357_v17 = vld [vmem:[#allocation2 + $0x10] sm:$0xff]  ;;  %v358_v23 = vld [vmem:[#allocation2] sm:$0xff] }
  0x29   : > { %700 = vmatpush3.bf16.msra.mxu0 %v759_v6  ;;  %v359_v15 = vld [vmem:[#allocation2 + $0x18] sm:$0xff]  ;;  %v360_v20 = vld [vmem:[#allocation2 + $0x8] sm:$0xff] }
  0x2a   : > { %701 = vmatprep.subr.bf16.mxu0 %v760_v7 }
  0x2d   : > { %702 = vmatpush3.bf16.msra.mxu0 %v760_v7 }
  0x2e   : > { %703 = vmatprep.subr.bf16.mxu0 %v761_v8 }
  0x31   : > { %704 = vmatpush3.bf16.msra.mxu0 %v761_v8 }
  0x32   : > { %705 = vmatprep.subr.bf16.mxu0 %v762_v10 }
  0x35   : > { %706 = vmatpush3.bf16.msra.mxu0 %v762_v10 }
  0x36   : > { %707 = vmatprep.subr.bf16.mxu0 %v763_v11 }
  0x39   : > { %708 = vmatpush3.bf16.msra.mxu0 %v763_v11 }
  0x3a   : > { %709 = vmatprep.subr.bf16.mxu0 %v764_v12 }
  0x3d   : > { %710 = vmatpush3.bf16.msra.mxu0 %v764_v12 }
  0x3e   : > { %711 = vmatprep.subr.bf16.mxu0 %v765_v13 }
  0x41   : > { %712 = vmatpush3.bf16.msra.mxu0 %v765_v13 }
  0x44   : > { %714 = vmatmul.mubr.bf16.vlgmr.msra.gmra.mxu0 %v767_v14 }
 0x104   : > { %v715_v16 = vpop.f32.mrf.mxu0 }
 0x105   : > { %v492_v18 = vadd.f32 %v715_v16, %v359_v15 }
 0x106   : > { %v475_v19 = vpop.f32.mrf.mxu0 }
 0x107   : > { %496 = vst [vmem:[#allocation2 + $0x18] sm:$0xff] %v492_v18  ;;  %v490_v21 = vadd.f32 %v475_v19, %v357_v17 }
 0x108   : > { %v716_v22 = vpop.f32.mrf.mxu0 }
 0x109   : > { %494 = vst [vmem:[#allocation2 + $0x10] sm:$0xff] %v490_v21  ;;  %v493_v24 = vadd.f32 %v716_v22, %v360_v20  ;;  %501 = sbr.rel (%p680_p11) target bundleno = 284 (0x11c), region = 85 }
 0x10a   : > { %v478_v25 = vpop.f32.mrf.mxu0 }
 0x10b   : > { %497 = vst [vmem:[#allocation2 + $0x8] sm:$0xff] %v493_v24  ;;  %v491_v26 = vadd.f32 %v478_v25, %v358_v23 }
 0x10d   : > { %495 = vst [vmem:[#allocation2] sm:$0xff] %v491_v26 }
 0x10e   : > { %v681_v28 = vld [vmem:[%s938_s2] ss:$0 sm:$0xff]  ;;  %v504_v32 = vld [vmem:[#allocation2 + $0x18] sm:$0xff] }
 0x10f   : > { %v682_v29 = vld [vmem:[%s939_s3] ss:$0 sm:$0xff]  ;;  %v515_v35 = vmul.f32 %v681_v28, %v504_v32 }
 0x110   : > { %v502_v27 = vld [vmem:[#allocation2 + $0x10] sm:$0xff] }
 0x111   : > { %v513_v30 = vmul.f32 %v681_v28, %v502_v27  ;;  %v526_v39 = vadd.f32 %v682_v29, %v515_v35 }
 0x112   : > { %v505_v33 = vld [vmem:[#allocation2 + $0x8] sm:$0xff] }
 0x113   : > { %v516_v36 = vmul.f32 %v681_v28, %v505_v33  ;;  %v524_v37 = vadd.f32 %v682_v29, %v513_v30  ;;  %v530_v43 = vmax.f32 %v526_v39, 0.0 }
 0x114   : > { %v503_v31 = vld [vmem:[#allocation2] sm:$0xff] }
 0x115   : > { %v514_v34 = vmul.f32 %v681_v28, %v503_v31  ;;  %v527_v40 = vadd.f32 %v682_v29, %v516_v36  ;;  %v528_v41 = vmax.f32 %v524_v37, 0.0  ;;  %534 = vst [vmem:[%s940_s4 + $0x10] sm:$0xff] %v530_v43 }
 0x117   : > { %v525_v38 = vadd.f32 %v682_v29, %v514_v34  ;;  %v531_v44 = vmax.f32 %v527_v40, 0.0  ;;  %532 = vst [vmem:[%s940_s4] sm:$0xff] %v528_v41 }
 0x119   : > { %v529_v42 = vmax.f32 %v525_v38, 0.0  ;;  %535 = vst [vmem:[%s940_s4 + $0x18] sm:$0xff] %v531_v44 }
 0x11b   : > { %533 = vst [vmem:[%s940_s4 + $0x8] sm:$0xff] %v529_v42 }
 0x11c PF: > { %s14_s19 = sadd.s32 1, %s806_s19   ;;  %s941_s15 = smov %s794_s16 }
 0x11d   : > { %p11_p12 = scmp.ge.s32.totalorder %s14_s19, 7   ;;  %s942_s16 = smov %s869_s23 }
 0x11e   : > { %s943_s17 = smov %s802_s18  ;;  %s944_s18 = smov %s946_s20 }
 0x11f   :  { %13 = sbr.rel (!%p11_p12) target bundleno = 3 (0x3), region = 129 }

// kernel: image_encoder_forward.30
= control target key start
LH: loop header
LB: loop body
LE: loop exit
PB: predicated region body
PF: predicated region fallthrough
CT: control target
= control target key end

     0   :  { %s926_s18 = smov 0   ;;  %s928_s19 = smov 0   ;;  %s1040_s0 = inlined_call_operand.vmem [shape: bf16[32,1152], index: 0, kind: input, shape index: {}]   ;;  %s1041_s1 = inlined_call_operand.vmem [shape: bf16[1152,128], index: 1, kind: input, shape index: {}]   ;;  %s1042_s2 = inlined_call_operand.vmem [shape: f32[1,128], index: 2, kind: input, shape index: {}]   ;;  %s1043_s3 = inlined_call_operand.vmem [shape: f32[1,128], index: 3, kind: input, shape index: {}]   ;;  %s1044_s4 = inlined_call_operand.vmem [shape: f32[32,128], index: 4, kind: input, shape index: {}]   ;;  %s1045_s5 = inlined_call_operand.vmem [shape: f32[32,128], index: 5, kind: output, shape index: {}]  }
   0x1   :  { %s930_s20 = smov 0   ;;  %s932_s21 = smov 0  }
   0x2   :  { %s934_s22 = smov 0  }
   0x3 LB: > { %s27_s23 = sadd.s32 1, %s889_s21  ;;  %p50_p1 = scmp.ne.s32.totalorder %s881_s19, %s877_s18  ;;  %s893_s22 = sphi %s934_s22, %s15_s22   ;;  %s889_s21 = sphi %s932_s21, %s1049_s21   ;;  %s885_s20 = sphi %s930_s20, %s1048_s20   ;;  %s881_s19 = sphi %s928_s19, %s1047_s19   ;;  %s877_s18 = sphi %s926_s18, %s1046_s18  }
   0x4   : > { %p28_p0 = scmp.ge.s32.totalorder %s27_s23, 9  ;;  %p51_p2 = scmp.eq.s32.totalorder %s893_s22, 0 }
   0x5   : > { %s43_s25 = sadd.s32 1, %s881_s19  ;;  %p749_p5 = scmp.ge.s32.totalorder %s893_s22, 9 }
   0x6   : > { %s1051_s23 = smov (%p28_p0, %s27_s23), 0  ;;  %p52_p3 = por %p51_p2, %p50_p1 }
   0x7   : > { %s39_s24 = ssub.s32 %s889_s21, %s1051_s23  ;;  %236 = sbr.rel (%p749_p5) target bundleno = 18 (0x12), region = 28 }
   0x8   : > { %p41_p4 = scmp.eq.s32.totalorder %s39_s24, 0 }
   0xa   : > { %s961_s26 = scalar_select %p41_p4, %s881_s19, %s43_s25  }
   0xc   : > { %239 = sbr.rel (!%p52_p3) target bundleno = 18 (0x12), region = 32  ;;  %s241_s27 = sand.u32 (%p52_p3), 1, %s881_s19  }
   0xd   : > { %s751_s28 = sshll.u32 (%p52_p3), %s889_s21, 2  ;;  %s750_s29 = sshll.u32 (%p52_p3), %s241_s27, 4 }
   0xe   : > { %s248_s7 = scalar_lea.vmem (%p52_p3), %s1040_s0, %s751_s28  ;;  %s243_s8 = scalar_lea.vmem (%p52_p3), [#allocation3], %s750_s29 }
   0xf   : > { %v265_v0 = vld [vmem:[%s248_s7] sm:$0xf] (%p52_p3)  ;;  %v267_v1 = vld [vmem:[%s248_s7 + $0x24] sm:$0xf] (%p52_p3)  ;;  %v269_v2 = vld [vmem:[%s248_s7 + $0x48] sm:$0xf] (%p52_p3) }
  0x10   : > { %266 = vst [vmem:[%s243_s8] sm:$0xf] (%p52_p3), %v265_v0  ;;  %268 = vst [vmem:[%s243_s8 + $0x4] sm:$0xf] (%p52_p3), %v267_v1  ;;  %v271_v3 = vld [vmem:[%s248_s7 + $0x6c] sm:$0xf] (%p52_p3) }
  0x11   : > { %270 = vst [vmem:[%s243_s8 + $0x8] sm:$0xf] %v269_v2  ;;  %272 = vst [vmem:[%s243_s8 + $0xc] sm:$0xf] %v271_v3 }
  0x12 PF: > { %p752_p6 = scmp.ge.s32.totalorder %s893_s22, 1  ;;  %p315_p7 = scmp.lt.s32.totalorder %s893_s22, 10 }
  0x14   : > { %p316_p8 = pnand %p752_p6, %p315_p7 }
  0x15   : > { %s322_s9 = sand.u32 (!%p316_p8), 1, %s877_s18   ;;  %s754_s10 = sshll.u32 (!%p316_p8), %s885_s20, 4 }
  0x16   : > { %319 = sbr.rel (%p316_p8) target bundleno = 286 (0x11e), region = 77  ;;  %s973_s11 = sshll.u32 (!%p316_p8), %s322_s9, 4 }
  0x17   : > { %p376_p9 = scmp.lt.s32.totalorder (!%p316_p8), %s754_s10, 143  ;;  %s324_s16 = scalar_lea.vmem (!%p316_p8), [#allocation3], %s973_s11 }
  0x18   : > { %p756_p10 = scmp.ne.s32.totalorder (!%p316_p8), %s885_s20, 0 }
  0x1b   : > { %s1053_s10 = smov (!%p376_p9, %s754_s10), 143  ;;  %412 = sbr.rel (%p756_p10) target bundleno = 35 (0x23), region = 85 }
  0x1c   : > { %s755_s12 = sshll.u32 %s1053_s10, 2 }
  0x1d   : > { %s978_s15 = scalar_lea.vmem %s1041_s1, %s755_s12 }
  0x20   : > { %v895_v4 = vmov 0.0  }
  0x21   : > { %413 = vst [vmem:[#allocation2 + $0x10] sm:$0xff] %v895_v4  ;;  %414 = vst [vmem:[#allocation2] sm:$0xff] %v895_v4 }
  0x22   : > { %415 = vst [vmem:[#allocation2 + $0x18] sm:$0xff] %v895_v4  ;;  %416 = vst [vmem:[#allocation2 + $0x8] sm:$0xff] %v895_v4 }
  0x23 PF: > { %v845_v5 = vld [vmem:[%s978_s15 + $0x38] sm:$0xff]   ;;  %v846_v6 = vld [vmem:[%s978_s15 + $0x30] sm:$0xff]   ;;  %v847_v7 = vld [vmem:[%s978_s15 + $0x28] sm:$0xff]   ;;  %p767_p11 = scmp.ne.s32.totalorder %s885_s20, 8 }
  0x24   : > { %784 = vmatprep.subr.bf16.mxu0 %v845_v5  ;;  %v848_v8 = vld [vmem:[%s978_s15 + $0x20] sm:$0xff]   ;;  %v849_v10 = vld [vmem:[%s978_s15 + $0x18] sm:$0xff]   ;;  %v850_v11 = vld [vmem:[%s978_s15 + $0x10] sm:$0xff]  }
  0x25   : > { %785 = vmatpush3.bf16.msra.mxu0 %v845_v5  ;;  %v853_v9 = vld [vmem:[%s324_s16] sm:$0xff]   ;;  %v851_v12 = vld [vmem:[%s978_s15 + $0x8] sm:$0xff]  }
  0x26   : > { %786 = vmatprep.subr.bf16.mxu0 %v846_v6  ;;  %800 = vmatprep.mubr.bf16.mxu0 %v853_v9  ;;  %v852_v13 = vld [vmem:[%s978_s15] sm:$0xff]   ;;  %v854_v14 = vld [vmem:[%s324_s16 + $0x8] sm:$0xff]  }
  0x28   : > { %v417_v17 = vld [vmem:[#allocation2 + $0x10] sm:$0xff]  ;;  %v418_v23 = vld [vmem:[#allocation2] sm:$0xff] }
  0x29   : > { %787 = vmatpush3.bf16.msra.mxu0 %v846_v6  ;;  %v419_v15 = vld [vmem:[#allocation2 + $0x18] sm:$0xff]  ;;  %v420_v20 = vld [vmem:[#allocation2 + $0x8] sm:$0xff] }
  0x2a   : > { %788 = vmatprep.subr.bf16.mxu0 %v847_v7 }
  0x2d   : > { %789 = vmatpush3.bf16.msra.mxu0 %v847_v7 }
  0x2e   : > { %790 = vmatprep.subr.bf16.mxu0 %v848_v8 }
  0x31   : > { %791 = vmatpush3.bf16.msra.mxu0 %v848_v8 }
  0x32   : > { %792 = vmatprep.subr.bf16.mxu0 %v849_v10 }
  0x35   : > { %793 = vmatpush3.bf16.msra.mxu0 %v849_v10 }
  0x36   : > { %794 = vmatprep.subr.bf16.mxu0 %v850_v11 }
  0x39   : > { %795 = vmatpush3.bf16.msra.mxu0 %v850_v11 }
  0x3a   : > { %796 = vmatprep.subr.bf16.mxu0 %v851_v12 }
  0x3d   : > { %797 = vmatpush3.bf16.msra.mxu0 %v851_v12 }
  0x3e   : > { %798 = vmatprep.subr.bf16.mxu0 %v852_v13 }
  0x41   : > { %799 = vmatpush3.bf16.msra.mxu0 %v852_v13 }
  0x44   : > { %801 = vmatmul.mubr.bf16.vlgmr.msra.gmra.mxu0 %v854_v14 }
 0x104   : > { %v802_v16 = vpop.f32.mrf.mxu0 }
 0x105   : > { %v552_v18 = vadd.f32 %v802_v16, %v419_v15 }
 0x106   : > { %v535_v19 = vpop.f32.mrf.mxu0 }
 0x107   : > { %556 = vst [vmem:[#allocation2 + $0x18] sm:$0xff] %v552_v18  ;;  %v550_v21 = vadd.f32 %v535_v19, %v417_v17 }
 0x108   : > { %v803_v22 = vpop.f32.mrf.mxu0 }
 0x109   : > { %554 = vst [vmem:[#allocation2 + $0x10] sm:$0xff] %v550_v21  ;;  %v553_v24 = vadd.f32 %v803_v22, %v420_v20  ;;  %561 = sbr.rel (%p767_p11) target bundleno = 286 (0x11e), region = 89 }
 0x10a   : > { %v538_v25 = vpop.f32.mrf.mxu0 }
 0x10b   : > { %557 = vst [vmem:[#allocation2 + $0x8] sm:$0xff] %v553_v24  ;;  %v551_v26 = vadd.f32 %v538_v25, %v418_v23 }
 0x10d   : > { %555 = vst [vmem:[#allocation2] sm:$0xff] %v551_v26 }
 0x10e   : > { %v768_v28 = vld [vmem:[%s1042_s2] ss:$0 sm:$0xff]  ;;  %v564_v34 = vld [vmem:[#allocation2 + $0x18] sm:$0xff]  ;;  %v589_v37 = vld [vmem:[%s1044_s4 + $0x8] sm:$0xff] }
 0x10f   : > { %v769_v29 = vld [vmem:[%s1043_s3] ss:$0 sm:$0xff]  ;;  %v575_v38 = vmul.f32 %v768_v28, %v564_v34  ;;  %v590_v41 = vld [vmem:[%s1044_s4 + $0x10] sm:$0xff]  ;;  %v591_v42 = vld [vmem:[%s1044_s4 + $0x18] sm:$0xff] }
 0x110   : > { %v562_v27 = vld [vmem:[#allocation2 + $0x10] sm:$0xff]  ;;  %v588_v32 = vld [vmem:[%s1044_s4] sm:$0xff] }
 0x111   : > { %v573_v30 = vmul.f32 %v768_v28, %v562_v27  ;;  %v586_v44 = vadd.f32 %v769_v29, %v575_v38 }
 0x112   : > { %v565_v35 = vld [vmem:[#allocation2 + $0x8] sm:$0xff] }
 0x113   : > { %v584_v36 = vadd.f32 %v769_v29, %v573_v30  ;;  %v576_v39 = vmul.f32 %v768_v28, %v565_v35  ;;  %v594_v48 = vadd.f32 %v590_v41, %v586_v44 }
 0x114   : > { %v563_v31 = vld [vmem:[#allocation2] sm:$0xff] }
 0x115   : > { %v574_v33 = vmul.f32 %v768_v28, %v563_v31  ;;  %v592_v43 = vadd.f32 %v588_v32, %v584_v36  ;;  %v587_v45 = vadd.f32 %v769_v29, %v576_v39  ;;  %v598_v51 = vmax.f32 %v594_v48, 0.0 }
 0x117   : > { %v585_v40 = vadd.f32 %v769_v29, %v574_v33  ;;  %v596_v47 = vmax.f32 %v592_v43, 0.0  ;;  %v595_v49 = vadd.f32 %v591_v42, %v587_v45  ;;  %602 = vst [vmem:[%s1045_s5 + $0x10] sm:$0xff] %v598_v51 }
 0x119   : > { %v593_v46 = vadd.f32 %v589_v37, %v585_v40  ;;  %600 = vst [vmem:[%s1045_s5] sm:$0xff] %v596_v47  ;;  %v599_v52 = vmax.f32 %v595_v49, 0.0 }
 0x11b   : > { %v597_v50 = vmax.f32 %v593_v46, 0.0  ;;  %603 = vst [vmem:[%s1045_s5 + $0x18] sm:$0xff] %v599_v52 }
 0x11d   : > { %601 = vst [vmem:[%s1045_s5 + $0x8] sm:$0xff] %v597_v50 }
 0x11e PF: > { %s15_s22 = sadd.s32 1, %s893_s22   ;;  %s1046_s18 = smov %s881_s19 }
 0x11f   : > { %p12_p12 = scmp.ge.s32.totalorder %s15_s22, 11   ;;  %s1047_s19 = smov %s961_s26 }
 0x120   : > { %s1048_s20 = smov %s889_s21  ;;  %s1049_s21 = smov %s1051_s23 }
 0x121   :  { %14 = sbr.rel (!%p12_p12) target bundleno = 3 (0x3), region = 136 }

// kernel: image_encoder_forward.31
= control target key start
LH: loop header
LB: loop body
LE: loop exit
PB: predicated region body
PF: predicated region fallthrough
CT: control target
= control target key end

     0   :  { %s834_s15 = smov 0   ;;  %s836_s16 = smov 0   ;;  %s936_s0 = inlined_call_operand.vmem [shape: bf16[32,1152], index: 0, kind: input, shape index: {}]   ;;  %s937_s1 = inlined_call_operand.vmem [shape: bf16[1152,128], index: 1, kind: input, shape index: {}]   ;;  %s938_s2 = inlined_call_operand.vmem [shape: f32[1,128], index: 2, kind: input, shape index: {}]   ;;  %s939_s3 = inlined_call_operand.vmem [shape: f32[1,128], index: 3, kind: input, shape index: {}]   ;;  %s940_s4 = inlined_call_operand.vmem [shape: f32[32,128], index: 4, kind: output, shape index: {}]  }
   0x1   :  { %s838_s17 = smov 0   ;;  %s840_s18 = smov 0  }
   0x2   :  { %s842_s19 = smov 0  }
   0x3 LB: > { %s26_s20 = sadd.s32 1, %s802_s18  ;;  %p49_p1 = scmp.ne.s32.totalorder %s794_s16, %s790_s15  ;;  %s806_s19 = sphi %s842_s19, %s14_s19   ;;  %s802_s18 = sphi %s840_s18, %s944_s18   ;;  %s798_s17 = sphi %s838_s17, %s943_s17   ;;  %s794_s16 = sphi %s836_s16, %s942_s16   ;;  %s790_s15 = sphi %s834_s15, %s941_s15  }
   0x4   : > { %p27_p0 = scmp.ge.s32.totalorder %s26_s20, 9  ;;  %p50_p2 = scmp.eq.s32.totalorder %s806_s19, 0 }
   0x5   : > { %s42_s22 = sadd.s32 1, %s794_s16  ;;  %p662_p5 = scmp.ge.s32.totalorder %s806_s19, 9 }
   0x6   : > { %s946_s20 = smov (%p27_p0, %s26_s20), 0  ;;  %p51_p3 = por %p50_p2, %p49_p1 }
   0x7   : > { %s38_s21 = ssub.s32 %s802_s18, %s946_s20  ;;  %195 = sbr.rel (%p662_p5) target bundleno = 18 (0x12), region = 24 }
   0x8   : > { %p40_p4 = scmp.eq.s32.totalorder %s38_s21, 0 }
   0xa   : > { %s869_s23 = scalar_select %p40_p4, %s794_s16, %s42_s22  }
   0xc   : > { %198 = sbr.rel (!%p51_p3) target bundleno = 18 (0x12), region = 28  ;;  %s200_s24 = sand.u32 (%p51_p3), 1, %s794_s16  }
   0xd   : > { %s664_s25 = sshll.u32 (%p51_p3), %s802_s18, 2  ;;  %s663_s26 = sshll.u32 (%p51_p3), %s200_s24, 4 }
   0xe   : > { %s207_s29 = scalar_lea.vmem (%p51_p3), %s936_s0, %s664_s25  ;;  %s202_s30 = scalar_lea.vmem (%p51_p3), [#allocation3], %s663_s26 }
   0xf   : > { %v224_v0 = vld [vmem:[%s207_s29] sm:$0xf] (%p51_p3)  ;;  %v226_v1 = vld [vmem:[%s207_s29 + $0x24] sm:$0xf] (%p51_p3)  ;;  %v228_v2 = vld [vmem:[%s207_s29 + $0x48] sm:$0xf] (%p51_p3) }
  0x10   : > { %225 = vst [vmem:[%s202_s30] sm:$0xf] (%p51_p3), %v224_v0  ;;  %227 = vst [vmem:[%s202_s30 + $0x4] sm:$0xf] (%p51_p3), %v226_v1  ;;  %v230_v3 = vld [vmem:[%s207_s29 + $0x6c] sm:$0xf] (%p51_p3) }
  0x11   : > { %229 = vst [vmem:[%s202_s30 + $0x8] sm:$0xf] %v228_v2  ;;  %231 = vst [vmem:[%s202_s30 + $0xc] sm:$0xf] %v230_v3 }
  0x12 PF: > { %p665_p6 = scmp.ge.s32.totalorder %s806_s19, 1  ;;  %p274_p7 = scmp.lt.s32.totalorder %s806_s19, 10 }
  0x14   : > { %p275_p8 = pnand %p665_p6, %p274_p7 }
  0x15   : > { %s281_s5 = sand.u32 (!%p275_p8), 1, %s790_s15   ;;  %s667_s6 = sshll.u32 (!%p275_p8), %s798_s17, 4 }
  0x16   : > { %278 = sbr.rel (%p275_p8) target bundleno = 284 (0x11c), region = 73  ;;  %s881_s7 = sshll.u32 (!%p275_p8), %s281_s5, 4 }
  0x17   : > { %p325_p9 = scmp.lt.s32.totalorder (!%p275_p8), %s667_s6, 143  ;;  %s283_s12 = scalar_lea.vmem (!%p275_p8), [#allocation3], %s881_s7 }
  0x18   : > { %p669_p10 = scmp.ne.s32.totalorder (!%p275_p8), %s798_s17, 0 }
  0x1b   : > { %s948_s6 = smov (!%p325_p9, %s667_s6), 143  ;;  %352 = sbr.rel (%p669_p10) target bundleno = 35 (0x23), region = 81 }
  0x1c   : > { %s668_s8 = sshll.u32 %s948_s6, 2 }
  0x1d   : > { %s886_s11 = scalar_lea.vmem %s937_s1, %s668_s8 }
  0x20   : > { %v808_v4 = vmov 0.0  }
  0x21   : > { %353 = vst [vmem:[#allocation2 + $0x10] sm:$0xff] %v808_v4  ;;  %354 = vst [vmem:[#allocation2] sm:$0xff] %v808_v4 }
  0x22   : > { %355 = vst [vmem:[#allocation2 + $0x18] sm:$0xff] %v808_v4  ;;  %356 = vst [vmem:[#allocation2 + $0x8] sm:$0xff] %v808_v4 }
  0x23 PF: > { %v758_v5 = vld [vmem:[%s886_s11 + $0x38] sm:$0xff]   ;;  %v759_v6 = vld [vmem:[%s886_s11 + $0x30] sm:$0xff]   ;;  %v760_v7 = vld [vmem:[%s886_s11 + $0x28] sm:$0xff]   ;;  %p680_p11 = scmp.ne.s32.totalorder %s798_s17, 8 }
  0x24   : > { %697 = vmatprep.subr.bf16.mxu0 %v758_v5  ;;  %v761_v8 = vld [vmem:[%s886_s11 + $0x20] sm:$0xff]   ;;  %v762_v10 = vld [vmem:[%s886_s11 + $0x18] sm:$0xff]   ;;  %v763_v11 = vld [vmem:[%s886_s11 + $0x10] sm:$0xff]  }
  0x25   : > { %698 = vmatpush3.bf16.msra.mxu0 %v758_v5  ;;  %v766_v9 = vld [vmem:[%s283_s12] sm:$0xff]   ;;  %v764_v12 = vld [vmem:[%s886_s11 + $0x8] sm:$0xff]  }
  0x26   : > { %699 = vmatprep.subr.bf16.mxu0 %v759_v6  ;;  %713 = vmatprep.mubr.bf16.mxu0 %v766_v9  ;;  %v765_v13 = vld [vmem:[%s886_s11] sm:$0xff]   ;;  %v767_v14 = vld [vmem:[%s283_s12 + $0x8] sm:$0xff]  }
  0x28   : > { %v357_v17 = vld [vmem:[#allocation2 + $0x10] sm:$0xff]  ;;  %v358_v23 = vld [vmem:[#allocation2] sm:$0xff] }
  0x29   : > { %700 = vmatpush3.bf16.msra.mxu0 %v759_v6  ;;  %v359_v15 = vld [vmem:[#allocation2 + $0x18] sm:$0xff]  ;;  %v360_v20 = vld [vmem:[#allocation2 + $0x8] sm:$0xff] }
  0x2a   : > { %701 = vmatprep.subr.bf16.mxu0 %v760_v7 }
  0x2d   : > { %702 = vmatpush3.bf16.msra.mxu0 %v760_v7 }
  0x2e   : > { %703 = vmatprep.subr.bf16.mxu0 %v761_v8 }
  0x31   : > { %704 = vmatpush3.bf16.msra.mxu0 %v761_v8 }
  0x32   : > { %705 = vmatprep.subr.bf16.mxu0 %v762_v10 }
  0x35   : > { %706 = vmatpush3.bf16.msra.mxu0 %v762_v10 }
  0x36   : > { %707 = vmatprep.subr.bf16.mxu0 %v763_v11 }
  0x39   : > { %708 = vmatpush3.bf16.msra.mxu0 %v763_v11 }
  0x3a   : > { %709 = vmatprep.subr.bf16.mxu0 %v764_v12 }
  0x3d   : > { %710 = vmatpush3.bf16.msra.mxu0 %v764_v12 }
  0x3e   : > { %711 = vmatprep.subr.bf16.mxu0 %v765_v13 }
  0x41   : > { %712 = vmatpush3.bf16.msra.mxu0 %v765_v13 }
  0x44   : > { %714 = vmatmul.mubr.bf16.vlgmr.msra.gmra.mxu0 %v767_v14 }
 0x104   : > { %v715_v16 = vpop.f32.mrf.mxu0 }
 0x105   : > { %v492_v18 = vadd.f32 %v715_v16, %v359_v15 }
 0x106   : > { %v475_v19 = vpop.f32.mrf.mxu0 }
 0x107   : > { %496 = vst [vmem:[#allocation2 + $0x18] sm:$0xff] %v492_v18  ;;  %v490_v21 = vadd.f32 %v475_v19, %v357_v17 }
 0x108   : > { %v716_v22 = vpop.f32.mrf.mxu0 }
 0x109   : > { %494 = vst [vmem:[#allocation2 + $0x10] sm:$0xff] %v490_v21  ;;  %v493_v24 = vadd.f32 %v716_v22, %v360_v20  ;;  %501 = sbr.rel (%p680_p11) target bundleno = 284 (0x11c), region = 85 }
 0x10a   : > { %v478_v25 = vpop.f32.mrf.mxu0 }
 0x10b   : > { %497 = vst [vmem:[#allocation2 + $0x8] sm:$0xff] %v493_v24  ;;  %v491_v26 = vadd.f32 %v478_v25, %v358_v23 }
 0x10d   : > { %495 = vst [vmem:[#allocation2] sm:$0xff] %v491_v26 }
 0x10e   : > { %v681_v28 = vld [vmem:[%s938_s2] ss:$0 sm:$0xff]  ;;  %v504_v32 = vld [vmem:[#allocation2 + $0x18] sm:$0xff] }
 0x10f   : > { %v682_v29 = vld [vmem:[%s939_s3] ss:$0 sm:$0xff]  ;;  %v515_v35 = vmul.f32 %v681_v28, %v504_v32 }
 0x110   : > { %v502_v27 = vld [vmem:[#allocation2 + $0x10] sm:$0xff] }
 0x111   : > { %v513_v30 = vmul.f32 %v681_v28, %v502_v27  ;;  %v526_v39 = vadd.f32 %v682_v29, %v515_v35 }
 0x112   : > { %v505_v33 = vld [vmem:[#allocation2 + $0x8] sm:$0xff] }
 0x113   : > { %v516_v36 = vmul.f32 %v681_v28, %v505_v33  ;;  %v524_v37 = vadd.f32 %v682_v29, %v513_v30  ;;  %v530_v43 = vmax.f32 %v526_v39, 0.0 }
 0x114   : > { %v503_v31 = vld [vmem:[#allocation2] sm:$0xff] }
 0x115   : > { %v514_v34 = vmul.f32 %v681_v28, %v503_v31  ;;  %v527_v40 = vadd.f32 %v682_v29, %v516_v36  ;;  %v528_v41 = vmax.f32 %v524_v37, 0.0  ;;  %534 = vst [vmem:[%s940_s4 + $0x10] sm:$0xff] %v530_v43 }
 0x117   : > { %v525_v38 = vadd.f32 %v682_v29, %v514_v34  ;;  %v531_v44 = vmax.f32 %v527_v40, 0.0  ;;  %532 = vst [vmem:[%s940_s4] sm:$0xff] %v528_v41 }
 0x119   : > { %v529_v42 = vmax.f32 %v525_v38, 0.0  ;;  %535 = vst [vmem:[%s940_s4 + $0x18] sm:$0xff] %v531_v44 }
 0x11b   : > { %533 = vst [vmem:[%s940_s4 + $0x8] sm:$0xff] %v529_v42 }
 0x11c PF: > { %s14_s19 = sadd.s32 1, %s806_s19   ;;  %s941_s15 = smov %s794_s16 }
 0x11d   : > { %p11_p12 = scmp.ge.s32.totalorder %s14_s19, 11   ;;  %s942_s16 = smov %s869_s23 }
 0x11e   : > { %s943_s17 = smov %s802_s18  ;;  %s944_s18 = smov %s946_s20 }
 0x11f   :  { %13 = sbr.rel (!%p11_p12) target bundleno = 3 (0x3), region = 129 }

// kernel: image_encoder_forward.34
= control target key start
LH: loop header
LB: loop body
LE: loop exit
PB: predicated region body
PF: predicated region fallthrough
CT: control target
= control target key end

     0   :  { %s864_s15 = smov 0   ;;  %s866_s16 = smov 0   ;;  %s1005_s0 = inlined_call_operand.vmem [shape: bf16[8,1152], index: 0, kind: input, shape index: {}]   ;;  %s1006_s1 = inlined_call_operand.vmem [shape: bf16[1152,256], index: 1, kind: input, shape index: {}]   ;;  %s1007_s2 = inlined_call_operand.vmem [shape: f32[1,256], index: 2, kind: input, shape index: {}]   ;;  %s1008_s3 = inlined_call_operand.vmem [shape: f32[1,256], index: 3, kind: input, shape index: {}]   ;;  %s1009_s4 = inlined_call_operand.vmem [shape: f32[8,256], index: 4, kind: output, shape index: {}]  }
   0x1   :  { %s868_s17 = smov 0   ;;  %s870_s18 = smov 0  }
   0x2   :  { %s872_s19 = smov 0   ;;  %s874_s20 = smov 0  }
   0x3   :  { %s876_s21 = smov 0  }
   0x4 LB: > { %s26_s22 = sadd.s32 1, %s826_s19  ;;  %s29_s23 = sadd.s32 1, %s830_s20  ;;  %s834_s21 = sphi %s876_s21, %s14_s21   ;;  %s830_s20 = sphi %s874_s20, %s1015_s20   ;;  %s826_s19 = sphi %s872_s19, %s1014_s19   ;;  %s822_s18 = sphi %s870_s18, %s1013_s18   ;;  %s818_s17 = sphi %s868_s17, %s1012_s17   ;;  %s814_s16 = sphi %s866_s16, %s1011_s16   ;;  %s810_s15 = sphi %s864_s15, %s1010_s15  }
   0x5   : > { %p27_p0 = scmp.ge.s32.totalorder %s26_s22, 9  ;;  %p77_p1 = scmp.ne.s32.totalorder %s814_s16, %s810_s15 }
   0x6   : > { %p78_p2 = scmp.eq.s32.totalorder %s834_s21, 0  ;;  %s70_s27 = sadd.s32 1, %s814_s16 }
   0x7   : > { %s1017_s22 = smov (%p27_p0, %s26_s22), 0  ;;  %s1019_s23 = smov (!%p27_p0, %s29_s23), %s830_s20 }
   0x8   : > { %p79_p3 = por %p78_p2, %p77_p1  ;;  %p31_p4 = scmp.ge.s32.totalorder %s1019_s23, 2 }
   0x9   : > { %s65_s24 = ssub.s32 %s826_s19, %s1017_s22  ;;  %p660_p6 = scmp.ge.s32.totalorder %s834_s21, 18 }
   0xa   : > { %s1021_s23 = smov (%p31_p4, %s1019_s23), 0 }
   0xb   : > { %s66_s25 = ssub.s32 %s830_s20, %s1021_s23  ;;  %183 = sbr.rel (%p660_p6) target bundleno = 32 (0x20), region = 16 }
   0xc   : > { %s67_s26 = sor.u32 %s66_s25, %s65_s24 }
   0xd   : > { %p68_p5 = scmp.eq.s32.totalorder %s67_s26, 0 }
   0xf   : > { %s915_s28 = scalar_select %p68_p5, %s814_s16, %s70_s27  }
  0x10   : > { %197 = sbr.rel (!%p79_p3) target bundleno = 32 (0x20), region = 24  ;;  %s199_s29 = sand.u32 (%p79_p3), 1, %s814_s16  }
  0x11   : > { %s683_s30 = sshll.u32 (%p79_p3), %s826_s19, 5  ;;  %s661_s5 = sshll.u32 (%p79_p3), %s199_s29, 6 }
  0x12   : > { %s204_s6 = sadd.s32 (%p79_p3), %s830_s20, %s683_s30  ;;  %s201_s11 = scalar_lea.vmem (%p79_p3), [#allocation3], %s661_s5 }
  0x13   : > { %s664_s7 = sshll.u32 (%p79_p3), %s204_s6, 2 }
  0x14   : > { %s924_s10 = scalar_lea.vmem (%p79_p3), %s1006_s1, %s664_s7 }
  0x15   : > { %v223_v0 = vld [vmem:[%s924_s10] sm:$0xf]  ;;  %v225_v1 = vld [vmem:[%s924_s10 + $0x8] sm:$0xf]  ;;  %v227_v2 = vld [vmem:[%s924_s10 + $0x10] sm:$0xf] }
  0x16   : > { %224 = vst [vmem:[%s201_s11] sm:$0xf] %v223_v0  ;;  %226 = vst [vmem:[%s201_s11 + $0x4] sm:$0xf] %v225_v1  ;;  %v229_v3 = vld [vmem:[%s924_s10 + $0x18] sm:$0xf] }
  0x17   : > { %228 = vst [vmem:[%s201_s11 + $0x8] sm:$0xf] %v227_v2  ;;  %v231_v4 = vld [vmem:[%s924_s10 + $0x20] sm:$0xf]  ;;  %v233_v5 = vld [vmem:[%s924_s10 + $0x28] sm:$0xf] }
  0x18   : > { %230 = vst [vmem:[%s201_s11 + $0xc] sm:$0xf] %v229_v3  ;;  %232 = vst [vmem:[%s201_s11 + $0x10] sm:$0xf] %v231_v4  ;;  %v235_v6 = vld [vmem:[%s924_s10 + $0x30] sm:$0xf] }
  0x19   : > { %234 = vst [vmem:[%s201_s11 + $0x14] sm:$0xf] %v233_v5  ;;  %v237_v7 = vld [vmem:[%s924_s10 + $0x38] sm:$0xf]  ;;  %v239_v8 = vld [vmem:[%s924_s10 + $0x40] sm:$0xf] }
  0x1a   : > { %236 = vst [vmem:[%s201_s11 + $0x18] sm:$0xf] %v235_v6  ;;  %238 = vst [vmem:[%s201_s11 + $0x1c] sm:$0xf] %v237_v7  ;;  %v241_v9 = vld [vmem:[%s924_s10 + $0x48] sm:$0xf] }
  0x1b   : > { %240 = vst [vmem:[%s201_s11 + $0x20] sm:$0xf] %v239_v8  ;;  %v243_v10 = vld [vmem:[%s924_s10 + $0x50] sm:$0xf]  ;;  %v245_v11 = vld [vmem:[%s924_s10 + $0x58] sm:$0xf] }
  0x1c   : > { %242 = vst [vmem:[%s201_s11 + $0x24] sm:$0xf] %v241_v9  ;;  %244 = vst [vmem:[%s201_s11 + $0x28] sm:$0xf] %v243_v10  ;;  %v247_v12 = vld [vmem:[%s924_s10 + $0x60] sm:$0xf] }
  0x1d   : > { %246 = vst [vmem:[%s201_s11 + $0x2c] sm:$0xf] %v245_v11  ;;  %v249_v13 = vld [vmem:[%s924_s10 + $0x68] sm:$0xf]  ;;  %v251_v14 = vld [vmem:[%s924_s10 + $0x70] sm:$0xf] }
  0x1e   : > { %248 = vst [vmem:[%s201_s11 + $0x30] sm:$0xf] %v247_v12  ;;  %250 = vst [vmem:[%s201_s11 + $0x34] sm:$0xf] %v249_v13  ;;  %v253_v15 = vld [vmem:[%s924_s10 + $0x78] sm:$0xf] }
  0x1f   : > { %252 = vst [vmem:[%s201_s11 + $0x38] sm:$0xf] %v251_v14  ;;  %254 = vst [vmem:[%s201_s11 + $0x3c] sm:$0xf] %v253_v15 }
  0x20 PF: > { %p665_p7 = scmp.ge.s32.totalorder %s834_s21, 1  ;;  %p321_p8 = scmp.lt.s32.totalorder %s834_s21, 19 }
  0x22   : > { %p322_p9 = pnand %p665_p7, %p321_p8 }
  0x23   : > { %s328_s12 = sand.u32 (!%p322_p9), 1, %s810_s15   ;;  %p372_p10 = scmp.lt.s32.totalorder (!%p322_p9), %s818_s17, 8 }
  0x24   : > { %325 = sbr.rel (%p322_p9) target bundleno = 292 (0x124), region = 73  ;;  %s666_s13 = sshll.u32 (!%p322_p9), %s328_s12, 6 }
  0x25   : > { %p379_p11 = scmp.lt.s32.totalorder (!%p322_p9), %s822_s18, 1  ;;  %s330_s12 = scalar_lea.vmem (!%p322_p9), [#allocation3], %s666_s13 }
  0x26   : > { %p669_p12 = scmp.ne.s32.totalorder (!%p322_p9), %s818_s17, 0 }
  0x29   : > { %s373_s14 = scalar_select %p372_p10, %s818_s17, 8 }
  0x2a   : > { %s1023_s18 = smov (!%p379_p11, %s822_s18), 1  ;;  %397 = sbr.rel (%p669_p12) target bundleno = 49 (0x31), region = 81 }
  0x2b   : > { %s667_s24 = sshll.u32 %s373_s14, 2  ;;  %s381_s5 = scalar_lea.vmem %s1007_s2, %s1023_s18 }
  0x2c   : > { %s954_s27 = scalar_lea.vmem %s1005_s0, %s667_s24  ;;  %s384_s7 = scalar_lea.vmem %s1008_s3, %s1023_s18 }
  0x2d   : > { %s668_s8 = sshll.u32 %s1023_s18, 3 }
  0x2e   : > { %s968_s11 = scalar_lea.vmem %s1009_s4, %s668_s8 }
  0x2f   : > { %v836_v16 = vmov 0.0  }
  0x30   : > { %398 = vst [vmem:[#allocation2] sm:$0xff] %v836_v16 }
  0x31 PF: > { %v772_v17 = vld [vmem:[%s330_s12 + $0x38] sm:$0xff]   ;;  %v837_v18 = vmov 0.0   ;;  %v773_v19 = vld [vmem:[%s330_s12 + $0x30] sm:$0xff]   ;;  %vm838_vm0 = vmmov 0   ;;  %v774_v20 = vld [vmem:[%s330_s12 + $0x28] sm:$0xff]   ;;  %p678_p13 = scmp.ne.s32.totalorder %s818_s17, 8 }
  0x32   : > { %693 = vmatprep.subr.bf16.mxu0 %v837_v18  ;;  %709 = vmatprep.mubr.msk.bf16.mxu0 %vm838_vm0, %v837_v18  ;;  %v775_v21 = vld [vmem:[%s330_s12 + $0x20] sm:$0xff]   ;;  %v776_v22 = vld [vmem:[%s330_s12 + $0x18] sm:$0xff]   ;;  %v777_v23 = vld [vmem:[%s330_s12 + $0x10] sm:$0xff]  }
  0x33   : > { %694 = vmatpush3.bf16.msra.mxu0 %v772_v17  ;;  %v778_v24 = vld [vmem:[%s330_s12 + $0x8] sm:$0xff]   ;;  %v779_v25 = vld [vmem:[%s330_s12] sm:$0xff]   ;;  %v400_v26 = vld [vmem:[%s954_s27] sm:$0xf] }
  0x34   : > { %695 = vmatprep.subr.bf16.mxu0 %v837_v18 }
  0x37   : > { %696 = vmatpush3.bf16.msra.mxu0 %v773_v19  ;;  %v399_v27 = vld [vmem:[#allocation2] sm:$0xff] }
  0x38   : > { %697 = vmatprep.subr.bf16.mxu0 %v837_v18 }
  0x3b   : > { %698 = vmatpush3.bf16.msra.mxu0 %v774_v20 }
  0x3c   : > { %699 = vmatprep.subr.bf16.mxu0 %v837_v18 }
  0x3f   : > { %700 = vmatpush3.bf16.msra.mxu0 %v775_v21 }
  0x40   : > { %701 = vmatprep.subr.bf16.mxu0 %v837_v18 }
  0x43   : > { %702 = vmatpush3.bf16.msra.mxu0 %v776_v22 }
  0x44   : > { %703 = vmatprep.subr.bf16.mxu0 %v837_v18 }
  0x47   : > { %704 = vmatpush3.bf16.msra.mxu0 %v777_v23 }
  0x48   : > { %705 = vmatprep.subr.bf16.mxu0 %v837_v18 }
  0x4b   : > { %706 = vmatpush3.bf16.msra.mxu0 %v778_v24 }
  0x4c   : > { %707 = vmatprep.subr.bf16.mxu0 %v837_v18 }
  0x4f   : > { %708 = vmatpush3.bf16.msra.mxu0 %v779_v25 }
  0x52   : > { %710 = vmatmul.mubr.bf16.vlgmr.msra.gmra.mxu0 %v400_v26 }
 0x112   : > { %v499_v28 = vpop.f32.mrf.mxu0 }
 0x113   : > { %v505_v29 = vadd.f32 %v499_v28, %v399_v27 }
 0x114   : > { %v711_v30 = vpop.f32.mrf.mxu0  ;;  %510 = sbr.rel (%p678_p13) target bundleno = 292 (0x124), region = 85 }
 0x115   : > { %506 = vst [vmem:[#allocation2] sm:$0xff] %v505_v29 }
 0x116   : > { %v502_v31 = vpop.f32.mrf.mxu0 }
 0x118   : > { %v712_v32 = vpop.f32.mrf.mxu0 }
 0x119   : > { %v679_v34 = vld [vmem:[%s381_s5] ss:$0 sm:$0xff] }
 0x11a   : > { %v680_v35 = vld [vmem:[%s384_s7] ss:$0 sm:$0xff] }
 0x11c   : > { %v511_v33 = vld [vmem:[#allocation2] sm:$0xff] }
 0x11d   : > { %v519_v36 = vmul.f32 %v679_v34, %v511_v33 }
 0x11f   : > { %v527_v37 = vadd.f32 %v680_v35, %v519_v36 }
 0x121   : > { %v528_v38 = vmax.f32 %v527_v37, 0.0 }
 0x123   : > { %529 = vst [vmem:[%s968_s11] sm:$0xff] %v528_v38 }
 0x124 PF: > { %s14_s21 = sadd.s32 1, %s834_s21   ;;  %s1010_s15 = smov %s814_s16 }
 0x125   : > { %p11_p0 = scmp.ge.s32.totalorder %s14_s21, 20   ;;  %s1011_s16 = smov %s915_s28 }
 0x126   : > { %s1012_s17 = smov %s826_s19  ;;  %s1013_s18 = smov %s830_s20 }
 0x127   : > { %s1014_s19 = smov %s1017_s22  ;;  %s1015_s20 = smov %s1021_s23 }
 0x128   :  { %13 = sbr.rel (!%p11_p0) target bundleno = 4 (0x4), region = 129 }

// kernel: image_encoder_forward.33
= control target key start
LH: loop header
LB: loop body
LE: loop exit
PB: predicated region body
PF: predicated region fallthrough
CT: control target
= control target key end

     0   :  { %s818_s15 = smov 0   ;;  %s820_s16 = smov 0   ;;  %s911_s0 = inlined_call_operand.vmem [shape: bf16[8,128], index: 0, kind: input, shape index: {}]   ;;  %s912_s1 = inlined_call_operand.vmem [shape: bf16[128,256], index: 1, kind: input, shape index: {}]   ;;  %s913_s2 = inlined_call_operand.vmem [shape: f32[1,256], index: 2, kind: input, shape index: {}]   ;;  %s914_s3 = inlined_call_operand.vmem [shape: f32[1,256], index: 3, kind: input, shape index: {}]   ;;  %s915_s4 = inlined_call_operand.vmem [shape: f32[8,256], index: 4, kind: output, shape index: {}]  }
   0x1   :  { %s822_s17 = smov 0   ;;  %s824_s18 = smov 0  }
   0x2   :  { %s826_s19 = smov 0  }
   0x3 LB: > { %s29_s20 = sadd.s32 1, %s785_s18  ;;  %p77_p1 = scmp.ne.s32.totalorder %s777_s16, %s773_s15  ;;  %s789_s19 = sphi %s826_s19, %s14_s19   ;;  %s785_s18 = sphi %s824_s18, %s919_s18   ;;  %s781_s17 = sphi %s822_s17, %s918_s17   ;;  %s777_s16 = sphi %s820_s16, %s917_s16   ;;  %s773_s15 = sphi %s818_s15, %s916_s15  }
   0x4   : > { %p31_p0 = scmp.ge.s32.totalorder %s29_s20, 2  ;;  %p78_p2 = scmp.eq.s32.totalorder %s789_s19, 0 }
   0x5   : > { %s70_s22 = sadd.s32 1, %s777_s16  ;;  %p654_p5 = scmp.ge.s32.totalorder %s789_s19, 2 }
   0x6   : > { %s921_s20 = smov (%p31_p0, %s29_s20), 0  ;;  %p79_p3 = por %p78_p2, %p77_p1 }
   0x7   : > { %s66_s21 = ssub.s32 %s785_s18, %s921_s20  ;;  %193 = sbr.rel (%p654_p5) target bundleno = 26 (0x1a), region = 20 }
   0x8   : > { %p68_p4 = scmp.eq.s32.totalorder %s66_s21, 0 }
   0xa   : > { %s853_s23 = scalar_select %p68_p4, %s777_s16, %s70_s22  }
   0xc   : > { %196 = sbr.rel (!%p79_p3) target bundleno = 26 (0x1a), region = 24  ;;  %s198_s24 = sand.u32 (%p79_p3), 1, %s777_s16  }
   0xd   : > { %s656_s25 = sshll.u32 (%p79_p3), %s785_s18, 2  ;;  %s655_s26 = sshll.u32 (%p79_p3), %s198_s24, 6 }
   0xe   : > { %s861_s29 = scalar_lea.vmem (%p79_p3), %s912_s1, %s656_s25  ;;  %s200_s30 = scalar_lea.vmem (%p79_p3), [#allocation3], %s655_s26 }
   0xf   : > { %v222_v0 = vld [vmem:[%s861_s29] sm:$0xf] (%p79_p3)  ;;  %v224_v1 = vld [vmem:[%s861_s29 + $0x8] sm:$0xf] (%p79_p3)  ;;  %v226_v2 = vld [vmem:[%s861_s29 + $0x10] sm:$0xf] (%p79_p3) }
  0x10   : > { %223 = vst [vmem:[%s200_s30] sm:$0xf] (%p79_p3), %v222_v0  ;;  %225 = vst [vmem:[%s200_s30 + $0x4] sm:$0xf] (%p79_p3), %v224_v1  ;;  %v228_v3 = vld [vmem:[%s861_s29 + $0x18] sm:$0xf] (%p79_p3) }
  0x11   : > { %v230_v4 = vld [vmem:[%s861_s29 + $0x20] sm:$0xf]  ;;  %227 = vst [vmem:[%s200_s30 + $0x8] sm:$0xf] %v226_v2  ;;  %229 = vst [vmem:[%s200_s30 + $0xc] sm:$0xf] %v228_v3 }
  0x12   : > { %231 = vst [vmem:[%s200_s30 + $0x10] sm:$0xf] %v230_v4  ;;  %v232_v5 = vld [vmem:[%s861_s29 + $0x28] sm:$0xf]  ;;  %v234_v6 = vld [vmem:[%s861_s29 + $0x30] sm:$0xf] }
  0x13   : > { %v236_v7 = vld [vmem:[%s861_s29 + $0x38] sm:$0xf]  ;;  %233 = vst [vmem:[%s200_s30 + $0x14] sm:$0xf] %v232_v5  ;;  %235 = vst [vmem:[%s200_s30 + $0x18] sm:$0xf] %v234_v6 }
  0x14   : > { %237 = vst [vmem:[%s200_s30 + $0x1c] sm:$0xf] %v236_v7  ;;  %v238_v8 = vld [vmem:[%s861_s29 + $0x40] sm:$0xf]  ;;  %v240_v9 = vld [vmem:[%s861_s29 + $0x48] sm:$0xf] }
  0x15   : > { %v242_v10 = vld [vmem:[%s861_s29 + $0x50] sm:$0xf]  ;;  %239 = vst [vmem:[%s200_s30 + $0x20] sm:$0xf] %v238_v8  ;;  %241 = vst [vmem:[%s200_s30 + $0x24] sm:$0xf] %v240_v9 }
  0x16   : > { %243 = vst [vmem:[%s200_s30 + $0x28] sm:$0xf] %v242_v10  ;;  %v244_v11 = vld [vmem:[%s861_s29 + $0x58] sm:$0xf]  ;;  %v246_v12 = vld [vmem:[%s861_s29 + $0x60] sm:$0xf] }
  0x17   : > { %v248_v13 = vld [vmem:[%s861_s29 + $0x68] sm:$0xf]  ;;  %245 = vst [vmem:[%s200_s30 + $0x2c] sm:$0xf] %v244_v11  ;;  %247 = vst [vmem:[%s200_s30 + $0x30] sm:$0xf] %v246_v12 }
  0x18   : > { %249 = vst [vmem:[%s200_s30 + $0x34] sm:$0xf] %v248_v13  ;;  %v250_v14 = vld [vmem:[%s861_s29 + $0x70] sm:$0xf]  ;;  %v252_v15 = vld [vmem:[%s861_s29 + $0x78] sm:$0xf] }
  0x19   : > { %251 = vst [vmem:[%s200_s30 + $0x38] sm:$0xf] %v250_v14  ;;  %253 = vst [vmem:[%s200_s30 + $0x3c] sm:$0xf] %v252_v15 }
  0x1a PF: > { %p657_p6 = scmp.ge.s32.totalorder %s789_s19, 1  ;;  %p320_p7 = scmp.lt.s32.totalorder %s789_s19, 3 }
  0x1c   : > { %p321_p8 = pnand %p657_p6, %p320_p7 }
  0x1d   : > { %s327_s5 = sand.u32 (!%p321_p8), 1, %s773_s15   ;;  %p376_p9 = scmp.lt.s32.totalorder (!%p321_p8), %s781_s17, 1 }
  0x1e   : > { %324 = sbr.rel (%p321_p8) target bundleno = 267 (0x10b), region = 73  ;;  %s658_s6 = sshll.u32 (!%p321_p8), %s327_s5, 6 }
  0x1f   : > { %s329_s7 = scalar_lea.vmem (!%p321_p8), [#allocation3], %s658_s6 }
  0x23   : > { %v791_v16 = vmov 0.0   ;;  %vm792_vm0 = vmmov 0   ;;  %v743_v17 = vld [vmem:[%s329_s7 + $0x38] sm:$0xff]   ;;  %v744_v18 = vld [vmem:[%s329_s7 + $0x30] sm:$0xff]   ;;  %v745_v19 = vld [vmem:[%s329_s7 + $0x28] sm:$0xff]   ;;  %s923_s17 = smov (!%p376_p9, %s781_s17), 1 }
  0x24   : > { %681 = vmatprep.subr.bf16.mxu0 %v791_v16  ;;  %697 = vmatprep.mubr.msk.bf16.mxu0 %vm792_vm0, %v791_v16  ;;  %v746_v20 = vld [vmem:[%s329_s7 + $0x20] sm:$0xff]   ;;  %v747_v21 = vld [vmem:[%s329_s7 + $0x18] sm:$0xff]   ;;  %v748_v22 = vld [vmem:[%s329_s7 + $0x10] sm:$0xff]   ;;  %s378_s12 = scalar_lea.vmem %s913_s2, %s923_s17  ;;  %s381_s15 = scalar_lea.vmem %s914_s3, %s923_s17 }
  0x25   : > { %682 = vmatpush3.bf16.msra.mxu0 %v743_v17  ;;  %v749_v23 = vld [vmem:[%s329_s7 + $0x8] sm:$0xff]   ;;  %v750_v24 = vld [vmem:[%s329_s7] sm:$0xff]   ;;  %s659_s21 = sshll.u32 %s923_s17, 3 }
  0x26   : > { %683 = vmatprep.subr.bf16.mxu0 %v791_v16  ;;  %v397_v25 = vld [vmem:[%s911_s0] sm:$0xf]  ;;  %s389_s25 = scalar_lea.vmem %s915_s4, %s659_s21 }
  0x27   : > { %v668_v26 = vld [vmem:[%s378_s12] ss:$0 sm:$0xff] }
  0x28   : > { %v669_v28 = vld [vmem:[%s381_s15] ss:$0 sm:$0xff] }
  0x29   : > { %684 = vmatpush3.bf16.msra.mxu0 %v744_v18 }
  0x2a   : > { %685 = vmatprep.subr.bf16.mxu0 %v791_v16 }
  0x2d   : > { %686 = vmatpush3.bf16.msra.mxu0 %v745_v19 }
  0x2e   : > { %687 = vmatprep.subr.bf16.mxu0 %v791_v16 }
  0x31   : > { %688 = vmatpush3.bf16.msra.mxu0 %v746_v20 }
  0x32   : > { %689 = vmatprep.subr.bf16.mxu0 %v791_v16 }
  0x35   : > { %690 = vmatpush3.bf16.msra.mxu0 %v747_v21 }
  0x36   : > { %691 = vmatprep.subr.bf16.mxu0 %v791_v16 }
  0x39   : > { %692 = vmatpush3.bf16.msra.mxu0 %v748_v22 }
  0x3a   : > { %693 = vmatprep.subr.bf16.mxu0 %v791_v16 }
  0x3d   : > { %694 = vmatpush3.bf16.msra.mxu0 %v749_v23 }
  0x3e   : > { %695 = vmatprep.subr.bf16.mxu0 %v791_v16 }
  0x41   : > { %696 = vmatpush3.bf16.msra.mxu0 %v750_v24 }
  0x44   : > { %698 = vmatmul.mubr.bf16.vlgmr.msra.gmra.mxu0 %v397_v25 }
 0x104   : > { %v496_v27 = vpop.f32.mrf.mxu0 }
 0x105   : > { %v515_v29 = vmul.f32 %v668_v26, %v496_v27 }
 0x106   : > { %v699_v30 = vpop.f32.mrf.mxu0 }
 0x107   : > { %v523_v31 = vadd.f32 %v669_v28, %v515_v29 }
 0x108   : > { %v499_v32 = vpop.f32.mrf.mxu0 }
 0x109   : > { %524 = vst [vmem:[%s389_s25] sm:$0xff] %v523_v31 }
 0x10a   : > { %v700_v33 = vpop.f32.mrf.mxu0 }
 0x10b PF: > { %s14_s19 = sadd.s32 1, %s789_s19   ;;  %s916_s15 = smov %s777_s16 }
 0x10c   : > { %p11_p10 = scmp.ge.s32.totalorder %s14_s19, 4   ;;  %s917_s16 = smov %s853_s23 }
 0x10d   : > { %s918_s17 = smov %s785_s18  ;;  %s919_s18 = smov %s921_s20 }
 0x10e   :  { %13 = sbr.rel (!%p11_p10) target bundleno = 3 (0x3), region = 129 }

// kernel: image_encoder_forward.35
= control target key start
LH: loop header
LB: loop body
LE: loop exit
PB: predicated region body
PF: predicated region fallthrough
CT: control target
= control target key end

     0   :  { %s1312_s0 = inlined_call_operand.vmem [shape: bf16[8,2304], index: 0, kind: input, shape index: {}]   ;;  %s1313_s1 = inlined_call_operand.vmem [shape: bf16[2304,256], index: 1, kind: input, shape index: {}]   ;;  %s1314_s2 = inlined_call_operand.vmem [shape: f32[1,256], index: 2, kind: input, shape index: {}]   ;;  %s1315_s3 = inlined_call_operand.vmem [shape: f32[1,256], index: 3, kind: input, shape index: {}]   ;;  %s1316_s4 = inlined_call_operand.vmem [shape: f32[8,256], index: 4, kind: input, shape index: {}]   ;;  %s1317_s5 = inlined_call_operand.vmem [shape: f32[8,256], index: 5, kind: output, shape index: {}]  }
   0x1   :  { %1318 = sst [smem:[#allocation4_spill]] %s1313_s1 }
   0x2   :  { %s1098_s18 = smov 0   ;;  %s1100_s19 = smov 0  }
   0x3   :  { %s1102_s20 = smov 0   ;;  %s1104_s21 = smov 0  }
   0x4   :  { %s1106_s22 = smov 0   ;;  %s1108_s23 = smov 0  }
   0x5   :  { %s1110_s24 = smov 0  }
   0x6 LB: > { %s27_s25 = sadd.s32 1, %s1057_s22  ;;  %s30_s26 = sadd.s32 1, %s1061_s23  ;;  %s1065_s24 = sphi %s1110_s24, %s15_s24   ;;  %s1061_s23 = sphi %s1108_s23, %s1325_s23   ;;  %s1057_s22 = sphi %s1106_s22, %s1324_s22   ;;  %s1053_s21 = sphi %s1104_s21, %s1323_s21   ;;  %s1049_s20 = sphi %s1102_s20, %s1322_s20   ;;  %s1045_s19 = sphi %s1100_s19, %s1321_s19   ;;  %s1041_s18 = sphi %s1098_s18, %s1320_s18  }
   0x7   : > { %p28_p0 = scmp.ge.s32.totalorder %s27_s25, 9  ;;  %p78_p1 = scmp.ne.s32.totalorder %s1045_s19, %s1041_s18 }
   0x8   : > { %p79_p2 = scmp.eq.s32.totalorder %s1065_s24, 0  ;;  %s71_s30 = sadd.s32 1, %s1045_s19 }
   0x9   : > { %s1327_s25 = smov (%p28_p0, %s27_s25), 0  ;;  %s1329_s26 = smov (!%p28_p0, %s30_s26), %s1061_s23 }
   0xa   : > { %p80_p3 = por %p79_p2, %p78_p1  ;;  %p32_p4 = scmp.ge.s32.totalorder %s1329_s26, 2 }
   0xb   : > { %s66_s27 = ssub.s32 %s1057_s22, %s1327_s25  ;;  %p878_p6 = scmp.ge.s32.totalorder %s1065_s24, 18 }
   0xc   : > { %s1331_s26 = smov (%p32_p4, %s1329_s26), 0 }
   0xd   : > { %s67_s28 = ssub.s32 %s1061_s23, %s1331_s26  ;;  %212 = sbr.rel (%p878_p6) target bundleno = 49 (0x31), region = 16 }
   0xe   : > { %s68_s29 = sor.u32 %s67_s28, %s66_s27 }
   0xf   : > { %p69_p5 = scmp.eq.s32.totalorder %s68_s29, 0 }
  0x11   : > { %s1149_s6 = scalar_select %p69_p5, %s1045_s19, %s71_s30  }
  0x12   : > { %228 = sbr.rel (!%p80_p3) target bundleno = 49 (0x31), region = 24  ;;  %s230_s7 = sand.u32 (%p80_p3), 1, %s1045_s19  }
  0x13   : > { %s913_s8 = sshll.u32 (%p80_p3), %s1057_s22, 6  ;;  %s879_s9 = sshll.u32 (%p80_p3), %s230_s7, 7 }
  0x14   : > { %s235_s10 = sadd.s32 (%p80_p3), %s1061_s23, %s913_s8  ;;  %s1319_s1 = sld [smem:[#allocation4_spill]] (%p80_p3) }
  0x15   : > { %s882_s11 = sshll.u32 (%p80_p3), %s235_s10, 2  ;;  %s1163_s15 = scalar_lea.vmem (%p80_p3), [#allocation3], %s879_s9 }
  0x1a   : > { %s1158_s14 = scalar_lea.vmem %s1319_s1, %s882_s11 }
  0x1b   : > { %v254_v0 = vld [vmem:[%s1158_s14] sm:$0xf]  ;;  %v256_v1 = vld [vmem:[%s1158_s14 + $0x8] sm:$0xf]  ;;  %v258_v2 = vld [vmem:[%s1158_s14 + $0x10] sm:$0xf] }
  0x1c   : > { %255 = vst [vmem:[%s1163_s15] sm:$0xf] %v254_v0  ;;  %257 = vst [vmem:[%s1163_s15 + $0x4] sm:$0xf] %v256_v1  ;;  %v260_v3 = vld [vmem:[%s1158_s14 + $0x18] sm:$0xf] }
  0x1d   : > { %259 = vst [vmem:[%s1163_s15 + $0x8] sm:$0xf] %v258_v2  ;;  %v262_v4 = vld [vmem:[%s1158_s14 + $0x20] sm:$0xf]  ;;  %v264_v5 = vld [vmem:[%s1158_s14 + $0x28] sm:$0xf] }
  0x1e   : > { %261 = vst [vmem:[%s1163_s15 + $0xc] sm:$0xf] %v260_v3  ;;  %263 = vst [vmem:[%s1163_s15 + $0x10] sm:$0xf] %v262_v4  ;;  %v266_v6 = vld [vmem:[%s1158_s14 + $0x30] sm:$0xf] }
  0x1f   : > { %265 = vst [vmem:[%s1163_s15 + $0x14] sm:$0xf] %v264_v5  ;;  %v268_v7 = vld [vmem:[%s1158_s14 + $0x38] sm:$0xf]  ;;  %v270_v8 = vld [vmem:[%s1158_s14 + $0x40] sm:$0xf] }
  0x20   : > { %267 = vst [vmem:[%s1163_s15 + $0x18] sm:$0xf] %v266_v6  ;;  %269 = vst [vmem:[%s1163_s15 + $0x1c] sm:$0xf] %v268_v7  ;;  %v272_v9 = vld [vmem:[%s1158_s14 + $0x48] sm:$0xf] }
  0x21   : > { %271 = vst [vmem:[%s1163_s15 + $0x20] sm:$0xf] %v270_v8  ;;  %v274_v10 = vld [vmem:[%s1158_s14 + $0x50] sm:$0xf]  ;;  %v276_v11 = vld [vmem:[%s1158_s14 + $0x58] sm:$0xf] }
  0x22   : > { %273 = vst [vmem:[%s1163_s15 + $0x24] sm:$0xf] %v272_v9  ;;  %275 = vst [vmem:[%s1163_s15 + $0x28] sm:$0xf] %v274_v10  ;;  %v278_v12 = vld [vmem:[%s1158_s14 + $0x60] sm:$0xf] }
  0x23   : > { %277 = vst [vmem:[%s1163_s15 + $0x2c] sm:$0xf] %v276_v11  ;;  %v280_v13 = vld [vmem:[%s1158_s14 + $0x68] sm:$0xf]  ;;  %v282_v14 = vld [vmem:[%s1158_s14 + $0x70] sm:$0xf] }
  0x24   : > { %279 = vst [vmem:[%s1163_s15 + $0x30] sm:$0xf] %v278_v12  ;;  %281 = vst [vmem:[%s1163_s15 + $0x34] sm:$0xf] %v280_v13  ;;  %v284_v15 = vld [vmem:[%s1158_s14 + $0x78] sm:$0xf] }
  0x25   : > { %283 = vst [vmem:[%s1163_s15 + $0x38] sm:$0xf] %v282_v14  ;;  %v286_v16 = vld [vmem:[%s1158_s14 + $0x80] sm:$0xf]  ;;  %v288_v17 = vld [vmem:[%s1158_s14 + $0x88] sm:$0xf] }
  0x26   : > { %285 = vst [vmem:[%s1163_s15 + $0x3c] sm:$0xf] %v284_v15  ;;  %287 = vst [vmem:[%s1163_s15 + $0x40] sm:$0xf] %v286_v16  ;;  %v290_v18 = vld [vmem:[%s1158_s14 + $0x90] sm:$0xf] }
  0x27   : > { %289 = vst [vmem:[%s1163_s15 + $0x44] sm:$0xf] %v288_v17  ;;  %v292_v19 = vld [vmem:[%s1158_s14 + $0x98] sm:$0xf]  ;;  %v294_v20 = vld [vmem:[%s1158_s14 + $0xa0] sm:$0xf] }
  0x28   : > { %291 = vst [vmem:[%s1163_s15 + $0x48] sm:$0xf] %v290_v18  ;;  %293 = vst [vmem:[%s1163_s15 + $0x4c] sm:$0xf] %v292_v19  ;;  %v296_v21 = vld [vmem:[%s1158_s14 + $0xa8] sm:$0xf] }
  0x29   : > { %295 = vst [vmem:[%s1163_s15 + $0x50] sm:$0xf] %v294_v20  ;;  %v298_v22 = vld [vmem:[%s1158_s14 + $0xb0] sm:$0xf]  ;;  %v300_v23 = vld [vmem:[%s1158_s14 + $0xb8] sm:$0xf] }
  0x2a   : > { %297 = vst [vmem:[%s1163_s15 + $0x54] sm:$0xf] %v296_v21  ;;  %299 = vst [vmem:[%s1163_s15 + $0x58] sm:$0xf] %v298_v22  ;;  %v302_v24 = vld [vmem:[%s1158_s14 + $0xc0] sm:$0xf] }
  0x2b   : > { %301 = vst [vmem:[%s1163_s15 + $0x5c] sm:$0xf] %v300_v23  ;;  %v304_v25 = vld [vmem:[%s1158_s14 + $0xc8] sm:$0xf]  ;;  %v306_v26 = vld [vmem:[%s1158_s14 + $0xd0] sm:$0xf] }
  0x2c   : > { %303 = vst [vmem:[%s1163_s15 + $0x60] sm:$0xf] %v302_v24  ;;  %305 = vst [vmem:[%s1163_s15 + $0x64] sm:$0xf] %v304_v25  ;;  %v308_v27 = vld [vmem:[%s1158_s14 + $0xd8] sm:$0xf] }
  0x2d   : > { %307 = vst [vmem:[%s1163_s15 + $0x68] sm:$0xf] %v306_v26  ;;  %v310_v28 = vld [vmem:[%s1158_s14 + $0xe0] sm:$0xf]  ;;  %v312_v29 = vld [vmem:[%s1158_s14 + $0xe8] sm:$0xf] }
  0x2e   : > { %309 = vst [vmem:[%s1163_s15 + $0x6c] sm:$0xf] %v308_v27  ;;  %311 = vst [vmem:[%s1163_s15 + $0x70] sm:$0xf] %v310_v28  ;;  %v314_v30 = vld [vmem:[%s1158_s14 + $0xf0] sm:$0xf] }
  0x2f   : > { %313 = vst [vmem:[%s1163_s15 + $0x74] sm:$0xf] %v312_v29  ;;  %v316_v31 = vld [vmem:[%s1158_s14 + $0xf8] sm:$0xf]  ;;  %315 = vst [vmem:[%s1163_s15 + $0x78] sm:$0xf] %v314_v30 }
  0x30   : > { %317 = vst [vmem:[%s1163_s15 + $0x7c] sm:$0xf] %v316_v31 }
  0x31 PF: > { %p883_p7 = scmp.ge.s32.totalorder %s1065_s24, 1  ;;  %p427_p8 = scmp.lt.s32.totalorder %s1065_s24, 19 }
  0x33   : > { %p428_p9 = pnand %p883_p7, %p427_p8 }
  0x34   : > { %s434_s16 = sand.u32 (!%p428_p9), 1, %s1041_s18   ;;  %s885_s17 = sshll.u32 (!%p428_p9), %s1049_s20, 1 }
  0x35   : > { %431 = sbr.rel (%p428_p9) target bundleno = 319 (0x13f), region = 77  ;;  %s884_s27 = sshll.u32 (!%p428_p9), %s434_s16, 7 }
  0x36   : > { %p490_p10 = scmp.lt.s32.totalorder (!%p428_p9), %s885_s17, 17  ;;  %p498_p11 = scmp.lt.s32.totalorder (!%p428_p9), %s1053_s21, 1 }
  0x37   : > { %p889_p12 = scmp.ne.s32.totalorder (!%p428_p9), %s1049_s20, 0 }
  0x3a   : > { %s1333_s17 = smov (!%p490_p10, %s885_s17), 17  ;;  %s1335_s21 = smov (!%p498_p11, %s1053_s21), 1 }
  0x3b   : > { %s886_s28 = sshll.u32 %s1333_s17, 2  ;;  %s500_s18 = scalar_lea.vmem %s1314_s2, %s1335_s21 }
  0x3c   : > { %s1237_s7 = scalar_lea.vmem %s1312_s0, %s886_s28  ;;  %s503_s12 = scalar_lea.vmem %s1315_s3, %s1335_s21 }
  0x3d   : > { %s887_s13 = sshll.u32 %s1335_s21, 3  ;;  %s1258_s28 = scalar_lea.vmem [#allocation3], %s884_s27 }
  0x3e   : > { %s1251_s16 = scalar_lea.vmem %s1316_s4, %s887_s13  ;;  %s1256_s29 = scalar_lea.vmem %s1317_s5, %s887_s13 }
  0x3f   : > { %524 = sbr.rel (%p889_p12) target bundleno = 70 (0x46), region = 85 }
  0x44   : > { %v1067_v32 = vmov 0.0  }
  0x45   : > { %525 = vst [vmem:[#allocation2] sm:$0xff] %v1067_v32 }
  0x46 PF: > { %v993_v33 = vld [vmem:[%s1258_s28 + $0x78] sm:$0xff]   ;;  %v995_v35 = vld [vmem:[%s1258_s28 + $0x70] sm:$0xff]   ;;  %v997_v37 = vld [vmem:[%s1258_s28 + $0x68] sm:$0xff]   ;;  %p908_p13 = scmp.ne.s32.totalorder %s1049_s20, 8 }
  0x47   : > { %v994_v34 = vld [vmem:[%s1258_s28 + $0x38] sm:$0xff]   ;;  %914 = vmatprep.subr.bf16.mxu0 %v993_v33  ;;  %v996_v36 = vld [vmem:[%s1258_s28 + $0x30] sm:$0xff]   ;;  %v998_v38 = vld [vmem:[%s1258_s28 + $0x28] sm:$0xff]  }
  0x48   : > { %915 = vmatpush3.bf16.msra.mxu0 %v994_v34  ;;  %v999_v39 = vld [vmem:[%s1258_s28 + $0x60] sm:$0xff]   ;;  %v1001_v41 = vld [vmem:[%s1258_s28 + $0x58] sm:$0xff]   ;;  %v1003_v43 = vld [vmem:[%s1258_s28 + $0x50] sm:$0xff]  }
  0x49   : > { %916 = vmatprep.subr.bf16.mxu0 %v995_v35  ;;  %v1000_v40 = vld [vmem:[%s1258_s28 + $0x20] sm:$0xff]   ;;  %v1002_v42 = vld [vmem:[%s1258_s28 + $0x18] sm:$0xff]   ;;  %v1004_v46 = vld [vmem:[%s1258_s28 + $0x10] sm:$0xff]  }
  0x4a   : > { %v527_v44 = vld [vmem:[%s1237_s7] sm:$0xff]  ;;  %v1005_v47 = vld [vmem:[%s1258_s28 + $0x48] sm:$0xff]   ;;  %v1007_v49 = vld [vmem:[%s1258_s28 + $0x40] sm:$0xff]  }
  0x4b   : > { %v891_v45 = vcombine.high %v527_v44, %v527_v44  ;;  %v1006_v48 = vld [vmem:[%s1258_s28 + $0x8] sm:$0xff]   ;;  %v1008_v50 = vld [vmem:[%s1258_s28] sm:$0xff]   ;;  %v890_v51 = vcombine.low %v527_v44, %v527_v44 }
  0x4c   : > { %917 = vmatpush3.bf16.msra.mxu0 %v996_v36  ;;  %v526_v53 = vld [vmem:[#allocation2] sm:$0xff] }
  0x4d   : > { %918 = vmatprep.subr.bf16.mxu0 %v997_v37  ;;  %695 = vmatprep.mubr.bf16.mxu0 %v891_v45 }
  0x50   : > { %919 = vmatpush3.bf16.msra.mxu0 %v998_v38 }
  0x51   : > { %920 = vmatprep.subr.bf16.mxu0 %v999_v39 }
  0x54   : > { %921 = vmatpush3.bf16.msra.mxu0 %v1000_v40 }
  0x55   : > { %922 = vmatprep.subr.bf16.mxu0 %v1001_v41 }
  0x58   : > { %923 = vmatpush3.bf16.msra.mxu0 %v1002_v42 }
  0x59   : > { %924 = vmatprep.subr.bf16.mxu0 %v1003_v43 }
  0x5c   : > { %925 = vmatpush3.bf16.msra.mxu0 %v1004_v46 }
  0x5d   : > { %926 = vmatprep.subr.bf16.mxu0 %v1005_v47 }
  0x60   : > { %927 = vmatpush3.bf16.msra.mxu0 %v1006_v48 }
  0x61   : > { %928 = vmatprep.subr.bf16.mxu0 %v1007_v49 }
  0x64   : > { %929 = vmatpush3.bf16.msra.mxu0 %v1008_v50 }
  0x67   : > { %696 = vmatmul.mubr.bf16.vlgmr.msra.gmra.mxu0 %v890_v51 }
 0x127   : > { %v930_v52 = vpop.f32.mrf.mxu0 }
 0x129   : > { %v931_v54 = vpop.f32.mrf.mxu0 }
 0x12a   : > { %v932_v55 = vadd.f32 %v931_v54, %v930_v52  ;;  %708 = sbr.rel (%p908_p13) target bundleno = 319 (0x13f), region = 89 }
 0x12b   : > { %v933_v56 = vpop.f32.mrf.mxu0 }
 0x12c   : > { %v703_v57 = vadd.f32 %v932_v55, %v526_v53 }
 0x12d   : > { %v934_v58 = vpop.f32.mrf.mxu0 }
 0x12e   : > { %704 = vst [vmem:[#allocation2] sm:$0xff] %v703_v57 }
 0x12f   : > { %v909_v60 = vld [vmem:[%s500_s18] ss:$0 sm:$0xff] }
 0x130   : > { %v910_v61 = vld [vmem:[%s503_s12] ss:$0 sm:$0xff] }
 0x131   : > { %v726_v63 = vld [vmem:[%s1251_s16] sm:$0xff] }
 0x135   : > { %v709_v59 = vld [vmem:[#allocation2] sm:$0xff] }
 0x136   : > { %v717_v62 = vmul.f32 %v909_v60, %v709_v59 }
 0x138   : > { %v725_v0 = vadd.f32 %v910_v61, %v717_v62 }
 0x13a   : > { %v727_v1 = vadd.f32 %v726_v63, %v725_v0 }
 0x13c   : > { %v728_v2 = vmax.f32 %v727_v1, 0.0 }
 0x13e   : > { %729 = vst [vmem:[%s1256_s29] sm:$0xff] %v728_v2 }
 0x13f PF: > { %s15_s24 = sadd.s32 1, %s1065_s24   ;;  %s1320_s18 = smov %s1045_s19 }
 0x140   : > { %p12_p0 = scmp.ge.s32.totalorder %s15_s24, 20   ;;  %s1321_s19 = smov %s1149_s6 }
 0x141   : > { %s1322_s20 = smov %s1057_s22  ;;  %s1323_s21 = smov %s1061_s23 }
 0x142   : > { %s1324_s22 = smov %s1327_s25  ;;  %s1325_s23 = smov %s1331_s26 }
 0x143   :  { %14 = sbr.rel (!%p12_p0) target bundleno = 6 (0x6), region = 136 }

// kernel: image_encoder_forward.36
= control target key start
LH: loop header
LB: loop body
LE: loop exit
PB: predicated region body
PF: predicated region fallthrough
CT: control target
= control target key end

     0   :  { %s1014_s15 = smov 0   ;;  %s1016_s16 = smov 0   ;;  %s1222_s0 = inlined_call_operand.vmem [shape: bf16[8,2304], index: 0, kind: input, shape index: {}]   ;;  %s1223_s1 = inlined_call_operand.vmem [shape: bf16[2304,256], index: 1, kind: input, shape index: {}]   ;;  %s1224_s2 = inlined_call_operand.vmem [shape: f32[1,256], index: 2, kind: input, shape index: {}]   ;;  %s1225_s3 = inlined_call_operand.vmem [shape: f32[1,256], index: 3, kind: input, shape index: {}]   ;;  %s1226_s4 = inlined_call_operand.vmem [shape: f32[8,256], index: 4, kind: output, shape index: {}]  }
   0x1   :  { %s1018_s17 = smov 0   ;;  %s1020_s18 = smov 0  }
   0x2   :  { %s1022_s19 = smov 0   ;;  %s1024_s20 = smov 0  }
   0x3   :  { %s1026_s21 = smov 0  }
   0x4 LB: > { %s26_s22 = sadd.s32 1, %s978_s19  ;;  %s29_s23 = sadd.s32 1, %s982_s20  ;;  %s986_s21 = sphi %s1026_s21, %s14_s21   ;;  %s982_s20 = sphi %s1024_s20, %s1232_s20   ;;  %s978_s19 = sphi %s1022_s19, %s1231_s19   ;;  %s974_s18 = sphi %s1020_s18, %s1230_s18   ;;  %s970_s17 = sphi %s1018_s17, %s1229_s17   ;;  %s966_s16 = sphi %s1016_s16, %s1228_s16   ;;  %s962_s15 = sphi %s1014_s15, %s1227_s15  }
   0x5   : > { %p27_p0 = scmp.ge.s32.totalorder %s26_s22, 9  ;;  %p77_p1 = scmp.ne.s32.totalorder %s966_s16, %s962_s15 }
   0x6   : > { %p78_p2 = scmp.eq.s32.totalorder %s986_s21, 0  ;;  %s70_s27 = sadd.s32 1, %s966_s16 }
   0x7   : > { %s1234_s22 = smov (%p27_p0, %s26_s22), 0  ;;  %s1236_s23 = smov (!%p27_p0, %s29_s23), %s982_s20 }
   0x8   : > { %p79_p3 = por %p78_p2, %p77_p1  ;;  %p31_p4 = scmp.ge.s32.totalorder %s1236_s23, 2 }
   0x9   : > { %s65_s24 = ssub.s32 %s978_s19, %s1234_s22  ;;  %p800_p6 = scmp.ge.s32.totalorder %s986_s21, 18 }
   0xa   : > { %s1238_s23 = smov (%p31_p4, %s1236_s23), 0 }
   0xb   : > { %s66_s25 = ssub.s32 %s982_s20, %s1238_s23  ;;  %183 = sbr.rel (%p800_p6) target bundleno = 43 (0x2b), region = 16 }
   0xc   : > { %s67_s26 = sor.u32 %s66_s25, %s65_s24 }
   0xd   : > { %p68_p5 = scmp.eq.s32.totalorder %s67_s26, 0 }
   0xf   : > { %s1065_s28 = scalar_select %p68_p5, %s966_s16, %s70_s27  }
  0x10   : > { %199 = sbr.rel (!%p79_p3) target bundleno = 43 (0x2b), region = 24  ;;  %s201_s29 = sand.u32 (%p79_p3), 1, %s966_s16  }
  0x11   : > { %s834_s30 = sshll.u32 (%p79_p3), %s978_s19, 6  ;;  %s801_s5 = sshll.u32 (%p79_p3), %s201_s29, 7 }
  0x12   : > { %s206_s6 = sadd.s32 (%p79_p3), %s982_s20, %s834_s30  ;;  %s1079_s11 = scalar_lea.vmem (%p79_p3), [#allocation3], %s801_s5 }
  0x13   : > { %s804_s7 = sshll.u32 (%p79_p3), %s206_s6, 2 }
  0x14   : > { %s1074_s10 = scalar_lea.vmem (%p79_p3), %s1223_s1, %s804_s7 }
  0x15   : > { %v225_v0 = vld [vmem:[%s1074_s10] sm:$0xf]  ;;  %v227_v1 = vld [vmem:[%s1074_s10 + $0x8] sm:$0xf]  ;;  %v229_v2 = vld [vmem:[%s1074_s10 + $0x10] sm:$0xf] }
  0x16   : > { %226 = vst [vmem:[%s1079_s11] sm:$0xf] %v225_v0  ;;  %228 = vst [vmem:[%s1079_s11 + $0x4] sm:$0xf] %v227_v1  ;;  %v231_v3 = vld [vmem:[%s1074_s10 + $0x18] sm:$0xf] }
  0x17   : > { %230 = vst [vmem:[%s1079_s11 + $0x8] sm:$0xf] %v229_v2  ;;  %v233_v4 = vld [vmem:[%s1074_s10 + $0x20] sm:$0xf]  ;;  %v235_v5 = vld [vmem:[%s1074_s10 + $0x28] sm:$0xf] }
  0x18   : > { %232 = vst [vmem:[%s1079_s11 + $0xc] sm:$0xf] %v231_v3  ;;  %234 = vst [vmem:[%s1079_s11 + $0x10] sm:$0xf] %v233_v4  ;;  %v237_v6 = vld [vmem:[%s1074_s10 + $0x30] sm:$0xf] }
  0x19   : > { %236 = vst [vmem:[%s1079_s11 + $0x14] sm:$0xf] %v235_v5  ;;  %v239_v7 = vld [vmem:[%s1074_s10 + $0x38] sm:$0xf]  ;;  %v241_v8 = vld [vmem:[%s1074_s10 + $0x40] sm:$0xf] }
  0x1a   : > { %238 = vst [vmem:[%s1079_s11 + $0x18] sm:$0xf] %v237_v6  ;;  %240 = vst [vmem:[%s1079_s11 + $0x1c] sm:$0xf] %v239_v7  ;;  %v243_v9 = vld [vmem:[%s1074_s10 + $0x48] sm:$0xf] }
  0x1b   : > { %242 = vst [vmem:[%s1079_s11 + $0x20] sm:$0xf] %v241_v8  ;;  %v245_v10 = vld [vmem:[%s1074_s10 + $0x50] sm:$0xf]  ;;  %v247_v11 = vld [vmem:[%s1074_s10 + $0x58] sm:$0xf] }
  0x1c   : > { %244 = vst [vmem:[%s1079_s11 + $0x24] sm:$0xf] %v243_v9  ;;  %246 = vst [vmem:[%s1079_s11 + $0x28] sm:$0xf] %v245_v10  ;;  %v249_v12 = vld [vmem:[%s1074_s10 + $0x60] sm:$0xf] }
  0x1d   : > { %248 = vst [vmem:[%s1079_s11 + $0x2c] sm:$0xf] %v247_v11  ;;  %v251_v13 = vld [vmem:[%s1074_s10 + $0x68] sm:$0xf]  ;;  %v253_v14 = vld [vmem:[%s1074_s10 + $0x70] sm:$0xf] }
  0x1e   : > { %250 = vst [vmem:[%s1079_s11 + $0x30] sm:$0xf] %v249_v12  ;;  %252 = vst [vmem:[%s1079_s11 + $0x34] sm:$0xf] %v251_v13  ;;  %v255_v15 = vld [vmem:[%s1074_s10 + $0x78] sm:$0xf] }
  0x1f   : > { %254 = vst [vmem:[%s1079_s11 + $0x38] sm:$0xf] %v253_v14  ;;  %v257_v16 = vld [vmem:[%s1074_s10 + $0x80] sm:$0xf]  ;;  %v259_v17 = vld [vmem:[%s1074_s10 + $0x88] sm:$0xf] }
  0x20   : > { %256 = vst [vmem:[%s1079_s11 + $0x3c] sm:$0xf] %v255_v15  ;;  %258 = vst [vmem:[%s1079_s11 + $0x40] sm:$0xf] %v257_v16  ;;  %v261_v18 = vld [vmem:[%s1074_s10 + $0x90] sm:$0xf] }
  0x21   : > { %260 = vst [vmem:[%s1079_s11 + $0x44] sm:$0xf] %v259_v17  ;;  %v263_v19 = vld [vmem:[%s1074_s10 + $0x98] sm:$0xf]  ;;  %v265_v20 = vld [vmem:[%s1074_s10 + $0xa0] sm:$0xf] }
  0x22   : > { %262 = vst [vmem:[%s1079_s11 + $0x48] sm:$0xf] %v261_v18  ;;  %264 = vst [vmem:[%s1079_s11 + $0x4c] sm:$0xf] %v263_v19  ;;  %v267_v21 = vld [vmem:[%s1074_s10 + $0xa8] sm:$0xf] }
  0x23   : > { %266 = vst [vmem:[%s1079_s11 + $0x50] sm:$0xf] %v265_v20  ;;  %v269_v22 = vld [vmem:[%s1074_s10 + $0xb0] sm:$0xf]  ;;  %v271_v23 = vld [vmem:[%s1074_s10 + $0xb8] sm:$0xf] }
  0x24   : > { %268 = vst [vmem:[%s1079_s11 + $0x54] sm:$0xf] %v267_v21  ;;  %270 = vst [vmem:[%s1079_s11 + $0x58] sm:$0xf] %v269_v22  ;;  %v273_v24 = vld [vmem:[%s1074_s10 + $0xc0] sm:$0xf] }
  0x25   : > { %272 = vst [vmem:[%s1079_s11 + $0x5c] sm:$0xf] %v271_v23  ;;  %v275_v25 = vld [vmem:[%s1074_s10 + $0xc8] sm:$0xf]  ;;  %v277_v26 = vld [vmem:[%s1074_s10 + $0xd0] sm:$0xf] }
  0x26   : > { %274 = vst [vmem:[%s1079_s11 + $0x60] sm:$0xf] %v273_v24  ;;  %276 = vst [vmem:[%s1079_s11 + $0x64] sm:$0xf] %v275_v25  ;;  %v279_v27 = vld [vmem:[%s1074_s10 + $0xd8] sm:$0xf] }
  0x27   : > { %278 = vst [vmem:[%s1079_s11 + $0x68] sm:$0xf] %v277_v26  ;;  %v281_v28 = vld [vmem:[%s1074_s10 + $0xe0] sm:$0xf]  ;;  %v283_v29 = vld [vmem:[%s1074_s10 + $0xe8] sm:$0xf] }
  0x28   : > { %280 = vst [vmem:[%s1079_s11 + $0x6c] sm:$0xf] %v279_v27  ;;  %282 = vst [vmem:[%s1079_s11 + $0x70] sm:$0xf] %v281_v28  ;;  %v285_v30 = vld [vmem:[%s1074_s10 + $0xf0] sm:$0xf] }
  0x29   : > { %284 = vst [vmem:[%s1079_s11 + $0x74] sm:$0xf] %v283_v29  ;;  %v287_v31 = vld [vmem:[%s1074_s10 + $0xf8] sm:$0xf]  ;;  %286 = vst [vmem:[%s1079_s11 + $0x78] sm:$0xf] %v285_v30 }
  0x2a   : > { %288 = vst [vmem:[%s1079_s11 + $0x7c] sm:$0xf] %v287_v31 }
  0x2b PF: > { %p805_p7 = scmp.ge.s32.totalorder %s986_s21, 1  ;;  %p387_p8 = scmp.lt.s32.totalorder %s986_s21, 19 }
  0x2d   : > { %p388_p9 = pnand %p805_p7, %p387_p8 }
  0x2e   : > { %s394_s12 = sand.u32 (!%p388_p9), 1, %s962_s15   ;;  %s807_s13 = sshll.u32 (!%p388_p9), %s970_s17, 1 }
  0x2f   : > { %391 = sbr.rel (%p388_p9) target bundleno = 309 (0x135), region = 73  ;;  %s806_s14 = sshll.u32 (!%p388_p9), %s394_s12, 7 }
  0x30   : > { %p440_p10 = scmp.lt.s32.totalorder (!%p388_p9), %s807_s13, 17  ;;  %p448_p11 = scmp.lt.s32.totalorder (!%p388_p9), %s974_s18, 1 }
  0x31   : > { %s1169_s12 = scalar_lea.vmem (!%p388_p9), [#allocation3], %s806_s14  ;;  %p810_p12 = scmp.ne.s32.totalorder (!%p388_p9), %s970_s17, 0 }
  0x34   : > { %s1240_s13 = smov (!%p440_p10, %s807_s13), 17  ;;  %s1242_s18 = smov (!%p448_p11, %s974_s18), 1 }
  0x35   : > { %s808_s24 = sshll.u32 %s1240_s13, 2  ;;  %s450_s15 = scalar_lea.vmem %s1224_s2, %s1242_s18 }
  0x36   : > { %s1153_s27 = scalar_lea.vmem %s1222_s0, %s808_s24  ;;  %s453_s7 = scalar_lea.vmem %s1225_s3, %s1242_s18 }
  0x37   : > { %s809_s8 = sshll.u32 %s1242_s18, 3  ;;  %466 = sbr.rel (%p810_p12) target bundleno = 62 (0x3e), region = 81 }
  0x38   : > { %s1167_s11 = scalar_lea.vmem %s1226_s4, %s809_s8 }
  0x3c   : > { %v988_v32 = vmov 0.0  }
  0x3d   : > { %467 = vst [vmem:[#allocation2] sm:$0xff] %v988_v32 }
  0x3e PF: > { %v914_v33 = vld [vmem:[%s1169_s12 + $0x78] sm:$0xff]   ;;  %v916_v35 = vld [vmem:[%s1169_s12 + $0x70] sm:$0xff]   ;;  %v918_v37 = vld [vmem:[%s1169_s12 + $0x68] sm:$0xff]   ;;  %p829_p13 = scmp.ne.s32.totalorder %s970_s17, 8 }
  0x3f   : > { %v915_v34 = vld [vmem:[%s1169_s12 + $0x38] sm:$0xff]   ;;  %835 = vmatprep.subr.bf16.mxu0 %v914_v33  ;;  %v917_v36 = vld [vmem:[%s1169_s12 + $0x30] sm:$0xff]   ;;  %v919_v38 = vld [vmem:[%s1169_s12 + $0x28] sm:$0xff]  }
  0x40   : > { %836 = vmatpush3.bf16.msra.mxu0 %v915_v34  ;;  %v920_v39 = vld [vmem:[%s1169_s12 + $0x60] sm:$0xff]   ;;  %v922_v41 = vld [vmem:[%s1169_s12 + $0x58] sm:$0xff]   ;;  %v924_v43 = vld [vmem:[%s1169_s12 + $0x50] sm:$0xff]  }
  0x41   : > { %837 = vmatprep.subr.bf16.mxu0 %v916_v35  ;;  %v921_v40 = vld [vmem:[%s1169_s12 + $0x20] sm:$0xff]   ;;  %v923_v42 = vld [vmem:[%s1169_s12 + $0x18] sm:$0xff]   ;;  %v925_v46 = vld [vmem:[%s1169_s12 + $0x10] sm:$0xff]  }
  0x42   : > { %v469_v44 = vld [vmem:[%s1153_s27] sm:$0xff]  ;;  %v926_v47 = vld [vmem:[%s1169_s12 + $0x48] sm:$0xff]   ;;  %v928_v49 = vld [vmem:[%s1169_s12 + $0x40] sm:$0xff]  }
  0x43   : > { %v812_v45 = vcombine.high %v469_v44, %v469_v44  ;;  %v927_v48 = vld [vmem:[%s1169_s12 + $0x8] sm:$0xff]   ;;  %v929_v50 = vld [vmem:[%s1169_s12] sm:$0xff]   ;;  %v811_v51 = vcombine.low %v469_v44, %v469_v44 }
  0x44   : > { %838 = vmatpush3.bf16.msra.mxu0 %v917_v36  ;;  %v468_v53 = vld [vmem:[#allocation2] sm:$0xff] }
  0x45   : > { %839 = vmatprep.subr.bf16.mxu0 %v918_v37  ;;  %637 = vmatprep.mubr.bf16.mxu0 %v812_v45 }
  0x48   : > { %840 = vmatpush3.bf16.msra.mxu0 %v919_v38 }
  0x49   : > { %841 = vmatprep.subr.bf16.mxu0 %v920_v39 }
  0x4c   : > { %842 = vmatpush3.bf16.msra.mxu0 %v921_v40 }
  0x4d   : > { %843 = vmatprep.subr.bf16.mxu0 %v922_v41 }
  0x50   : > { %844 = vmatpush3.bf16.msra.mxu0 %v923_v42 }
  0x51   : > { %845 = vmatprep.subr.bf16.mxu0 %v924_v43 }
  0x54   : > { %846 = vmatpush3.bf16.msra.mxu0 %v925_v46 }
  0x55   : > { %847 = vmatprep.subr.bf16.mxu0 %v926_v47 }
  0x58   : > { %848 = vmatpush3.bf16.msra.mxu0 %v927_v48 }
  0x59   : > { %849 = vmatprep.subr.bf16.mxu0 %v928_v49 }
  0x5c   : > { %850 = vmatpush3.bf16.msra.mxu0 %v929_v50 }
  0x5f   : > { %638 = vmatmul.mubr.bf16.vlgmr.msra.gmra.mxu0 %v811_v51 }
 0x11f   : > { %v851_v52 = vpop.f32.mrf.mxu0 }
 0x121   : > { %v852_v54 = vpop.f32.mrf.mxu0 }
 0x122   : > { %v853_v55 = vadd.f32 %v852_v54, %v851_v52  ;;  %650 = sbr.rel (%p829_p13) target bundleno = 309 (0x135), region = 85 }
 0x123   : > { %v854_v56 = vpop.f32.mrf.mxu0 }
 0x124   : > { %v645_v57 = vadd.f32 %v853_v55, %v468_v53 }
 0x125   : > { %v855_v58 = vpop.f32.mrf.mxu0 }
 0x126   : > { %646 = vst [vmem:[#allocation2] sm:$0xff] %v645_v57 }
 0x127   : > { %v830_v60 = vld [vmem:[%s450_s15] ss:$0 sm:$0xff] }
 0x128   : > { %v831_v61 = vld [vmem:[%s453_s7] ss:$0 sm:$0xff] }
 0x12d   : > { %v651_v59 = vld [vmem:[#allocation2] sm:$0xff] }
 0x12e   : > { %v659_v62 = vmul.f32 %v830_v60, %v651_v59 }
 0x130   : > { %v667_v63 = vadd.f32 %v831_v61, %v659_v62 }
 0x132   : > { %v668_v0 = vmax.f32 %v667_v63, 0.0 }
 0x134   : > { %669 = vst [vmem:[%s1167_s11] sm:$0xff] %v668_v0 }
 0x135 PF: > { %s14_s21 = sadd.s32 1, %s986_s21   ;;  %s1227_s15 = smov %s966_s16 }
 0x136   : > { %p11_p0 = scmp.ge.s32.totalorder %s14_s21, 20   ;;  %s1228_s16 = smov %s1065_s28 }
 0x137   : > { %s1229_s17 = smov %s978_s19  ;;  %s1230_s18 = smov %s982_s20 }
 0x138   : > { %s1231_s19 = smov %s1234_s22  ;;  %s1232_s20 = smov %s1238_s23 }
 0x139   :  { %13 = sbr.rel (!%p11_p0) target bundleno = 4 (0x4), region = 129 }

// kernel: image_encoder_forward.39
= control target key start
LH: loop header
LB: loop body
LE: loop exit
PB: predicated region body
PF: predicated region fallthrough
CT: control target
= control target key end

     0   :  { %s1014_s15 = smov 0   ;;  %s1016_s16 = smov 0   ;;  %s1222_s0 = inlined_call_operand.vmem [shape: bf16[8,2304], index: 0, kind: input, shape index: {}]   ;;  %s1223_s1 = inlined_call_operand.vmem [shape: bf16[2304,512], index: 1, kind: input, shape index: {}]   ;;  %s1224_s2 = inlined_call_operand.vmem [shape: f32[1,512], index: 2, kind: input, shape index: {}]   ;;  %s1225_s3 = inlined_call_operand.vmem [shape: f32[1,512], index: 3, kind: input, shape index: {}]   ;;  %s1226_s4 = inlined_call_operand.vmem [shape: f32[8,512], index: 4, kind: output, shape index: {}]  }
   0x1   :  { %s1018_s17 = smov 0   ;;  %s1020_s18 = smov 0  }
   0x2   :  { %s1022_s19 = smov 0   ;;  %s1024_s20 = smov 0  }
   0x3   :  { %s1026_s21 = smov 0  }
   0x4 LB: > { %s26_s22 = sadd.s32 1, %s978_s19  ;;  %s29_s23 = sadd.s32 1, %s982_s20  ;;  %s986_s21 = sphi %s1026_s21, %s14_s21   ;;  %s982_s20 = sphi %s1024_s20, %s1232_s20   ;;  %s978_s19 = sphi %s1022_s19, %s1231_s19   ;;  %s974_s18 = sphi %s1020_s18, %s1230_s18   ;;  %s970_s17 = sphi %s1018_s17, %s1229_s17   ;;  %s966_s16 = sphi %s1016_s16, %s1228_s16   ;;  %s962_s15 = sphi %s1014_s15, %s1227_s15  }
   0x5   : > { %p27_p0 = scmp.ge.s32.totalorder %s26_s22, 9  ;;  %p77_p1 = scmp.ne.s32.totalorder %s966_s16, %s962_s15 }
   0x6   : > { %p78_p2 = scmp.eq.s32.totalorder %s986_s21, 0  ;;  %s70_s27 = sadd.s32 1, %s966_s16 }
   0x7   : > { %s1234_s22 = smov (%p27_p0, %s26_s22), 0  ;;  %s1236_s23 = smov (!%p27_p0, %s29_s23), %s982_s20 }
   0x8   : > { %p79_p3 = por %p78_p2, %p77_p1  ;;  %p31_p4 = scmp.ge.s32.totalorder %s1236_s23, 4 }
   0x9   : > { %s65_s24 = ssub.s32 %s978_s19, %s1234_s22  ;;  %p800_p6 = scmp.ge.s32.totalorder %s986_s21, 36 }
   0xa   : > { %s1238_s23 = smov (%p31_p4, %s1236_s23), 0 }
   0xb   : > { %s66_s25 = ssub.s32 %s982_s20, %s1238_s23  ;;  %183 = sbr.rel (%p800_p6) target bundleno = 43 (0x2b), region = 16 }
   0xc   : > { %s67_s26 = sor.u32 %s66_s25, %s65_s24 }
   0xd   : > { %p68_p5 = scmp.eq.s32.totalorder %s67_s26, 0 }
   0xf   : > { %s1065_s28 = scalar_select %p68_p5, %s966_s16, %s70_s27  }
  0x10   : > { %199 = sbr.rel (!%p79_p3) target bundleno = 43 (0x2b), region = 24  ;;  %s201_s29 = sand.u32 (%p79_p3), 1, %s966_s16  }
  0x11   : > { %s834_s30 = sshll.u32 (%p79_p3), %s978_s19, 7  ;;  %s801_s5 = sshll.u32 (%p79_p3), %s201_s29, 7 }
  0x12   : > { %s206_s6 = sadd.s32 (%p79_p3), %s982_s20, %s834_s30  ;;  %s1079_s11 = scalar_lea.vmem (%p79_p3), [#allocation3], %s801_s5 }
  0x13   : > { %s804_s7 = sshll.u32 (%p79_p3), %s206_s6, 2 }
  0x14   : > { %s1074_s10 = scalar_lea.vmem (%p79_p3), %s1223_s1, %s804_s7 }
  0x15   : > { %v225_v0 = vld [vmem:[%s1074_s10] sm:$0xf]  ;;  %v227_v1 = vld [vmem:[%s1074_s10 + $0x10] sm:$0xf] }
  0x16   : > { %v229_v2 = vld [vmem:[%s1074_s10 + $0x20] sm:$0xf]  ;;  %226 = vst [vmem:[%s1079_s11] sm:$0xf] %v225_v0  ;;  %228 = vst [vmem:[%s1079_s11 + $0x4] sm:$0xf] %v227_v1 }
  0x17   : > { %230 = vst [vmem:[%s1079_s11 + $0x8] sm:$0xf] %v229_v2  ;;  %v231_v3 = vld [vmem:[%s1074_s10 + $0x30] sm:$0xf]  ;;  %v233_v4 = vld [vmem:[%s1074_s10 + $0x40] sm:$0xf] }
  0x18   : > { %v235_v5 = vld [vmem:[%s1074_s10 + $0x50] sm:$0xf]  ;;  %232 = vst [vmem:[%s1079_s11 + $0xc] sm:$0xf] %v231_v3  ;;  %234 = vst [vmem:[%s1079_s11 + $0x10] sm:$0xf] %v233_v4 }
  0x19   : > { %236 = vst [vmem:[%s1079_s11 + $0x14] sm:$0xf] %v235_v5  ;;  %v237_v6 = vld [vmem:[%s1074_s10 + $0x60] sm:$0xf]  ;;  %v239_v7 = vld [vmem:[%s1074_s10 + $0x70] sm:$0xf] }
  0x1a   : > { %v241_v8 = vld [vmem:[%s1074_s10 + $0x80] sm:$0xf]  ;;  %238 = vst [vmem:[%s1079_s11 + $0x18] sm:$0xf] %v237_v6  ;;  %240 = vst [vmem:[%s1079_s11 + $0x1c] sm:$0xf] %v239_v7 }
  0x1b   : > { %242 = vst [vmem:[%s1079_s11 + $0x20] sm:$0xf] %v241_v8  ;;  %v243_v9 = vld [vmem:[%s1074_s10 + $0x90] sm:$0xf]  ;;  %v245_v10 = vld [vmem:[%s1074_s10 + $0xa0] sm:$0xf] }
  0x1c   : > { %v247_v11 = vld [vmem:[%s1074_s10 + $0xb0] sm:$0xf]  ;;  %244 = vst [vmem:[%s1079_s11 + $0x24] sm:$0xf] %v243_v9  ;;  %246 = vst [vmem:[%s1079_s11 + $0x28] sm:$0xf] %v245_v10 }
  0x1d   : > { %248 = vst [vmem:[%s1079_s11 + $0x2c] sm:$0xf] %v247_v11  ;;  %v249_v12 = vld [vmem:[%s1074_s10 + $0xc0] sm:$0xf]  ;;  %v251_v13 = vld [vmem:[%s1074_s10 + $0xd0] sm:$0xf] }
  0x1e   : > { %v253_v14 = vld [vmem:[%s1074_s10 + $0xe0] sm:$0xf]  ;;  %250 = vst [vmem:[%s1079_s11 + $0x30] sm:$0xf] %v249_v12  ;;  %252 = vst [vmem:[%s1079_s11 + $0x34] sm:$0xf] %v251_v13 }
  0x1f   : > { %254 = vst [vmem:[%s1079_s11 + $0x38] sm:$0xf] %v253_v14  ;;  %v255_v15 = vld [vmem:[%s1074_s10 + $0xf0] sm:$0xf]  ;;  %v257_v16 = vld [vmem:[%s1074_s10 + $0x100] sm:$0xf] }
  0x20   : > { %v259_v17 = vld [vmem:[%s1074_s10 + $0x110] sm:$0xf]  ;;  %256 = vst [vmem:[%s1079_s11 + $0x3c] sm:$0xf] %v255_v15  ;;  %258 = vst [vmem:[%s1079_s11 + $0x40] sm:$0xf] %v257_v16 }
  0x21   : > { %260 = vst [vmem:[%s1079_s11 + $0x44] sm:$0xf] %v259_v17  ;;  %v261_v18 = vld [vmem:[%s1074_s10 + $0x120] sm:$0xf]  ;;  %v263_v19 = vld [vmem:[%s1074_s10 + $0x130] sm:$0xf] }
  0x22   : > { %v265_v20 = vld [vmem:[%s1074_s10 + $0x140] sm:$0xf]  ;;  %262 = vst [vmem:[%s1079_s11 + $0x48] sm:$0xf] %v261_v18  ;;  %264 = vst [vmem:[%s1079_s11 + $0x4c] sm:$0xf] %v263_v19 }
  0x23   : > { %266 = vst [vmem:[%s1079_s11 + $0x50] sm:$0xf] %v265_v20  ;;  %v267_v21 = vld [vmem:[%s1074_s10 + $0x150] sm:$0xf]  ;;  %v269_v22 = vld [vmem:[%s1074_s10 + $0x160] sm:$0xf] }
  0x24   : > { %v271_v23 = vld [vmem:[%s1074_s10 + $0x170] sm:$0xf]  ;;  %268 = vst [vmem:[%s1079_s11 + $0x54] sm:$0xf] %v267_v21  ;;  %270 = vst [vmem:[%s1079_s11 + $0x58] sm:$0xf] %v269_v22 }
  0x25   : > { %272 = vst [vmem:[%s1079_s11 + $0x5c] sm:$0xf] %v271_v23  ;;  %v273_v24 = vld [vmem:[%s1074_s10 + $0x180] sm:$0xf]  ;;  %v275_v25 = vld [vmem:[%s1074_s10 + $0x190] sm:$0xf] }
  0x26   : > { %v277_v26 = vld [vmem:[%s1074_s10 + $0x1a0] sm:$0xf]  ;;  %274 = vst [vmem:[%s1079_s11 + $0x60] sm:$0xf] %v273_v24  ;;  %276 = vst [vmem:[%s1079_s11 + $0x64] sm:$0xf] %v275_v25 }
  0x27   : > { %278 = vst [vmem:[%s1079_s11 + $0x68] sm:$0xf] %v277_v26  ;;  %v279_v27 = vld [vmem:[%s1074_s10 + $0x1b0] sm:$0xf]  ;;  %v281_v28 = vld [vmem:[%s1074_s10 + $0x1c0] sm:$0xf] }
  0x28   : > { %v283_v29 = vld [vmem:[%s1074_s10 + $0x1d0] sm:$0xf]  ;;  %280 = vst [vmem:[%s1079_s11 + $0x6c] sm:$0xf] %v279_v27  ;;  %282 = vst [vmem:[%s1079_s11 + $0x70] sm:$0xf] %v281_v28 }
  0x29   : > { %284 = vst [vmem:[%s1079_s11 + $0x74] sm:$0xf] %v283_v29  ;;  %v285_v30 = vld [vmem:[%s1074_s10 + $0x1e0] sm:$0xf]  ;;  %v287_v31 = vld [vmem:[%s1074_s10 + $0x1f0] sm:$0xf] }
  0x2a   : > { %286 = vst [vmem:[%s1079_s11 + $0x78] sm:$0xf] %v285_v30  ;;  %288 = vst [vmem:[%s1079_s11 + $0x7c] sm:$0xf] %v287_v31 }
  0x2b PF: > { %p805_p7 = scmp.ge.s32.totalorder %s986_s21, 1  ;;  %p387_p8 = scmp.lt.s32.totalorder %s986_s21, 37 }
  0x2d   : > { %p388_p9 = pnand %p805_p7, %p387_p8 }
  0x2e   : > { %s394_s12 = sand.u32 (!%p388_p9), 1, %s962_s15   ;;  %s807_s13 = sshll.u32 (!%p388_p9), %s970_s17, 1 }
  0x2f   : > { %391 = sbr.rel (%p388_p9) target bundleno = 309 (0x135), region = 73  ;;  %s806_s14 = sshll.u32 (!%p388_p9), %s394_s12, 7 }
  0x30   : > { %p440_p10 = scmp.lt.s32.totalorder (!%p388_p9), %s807_s13, 17  ;;  %p448_p11 = scmp.lt.s32.totalorder (!%p388_p9), %s974_s18, 3 }
  0x31   : > { %s1169_s12 = scalar_lea.vmem (!%p388_p9), [#allocation3], %s806_s14  ;;  %p810_p12 = scmp.ne.s32.totalorder (!%p388_p9), %s970_s17, 0 }
  0x34   : > { %s1240_s13 = smov (!%p440_p10, %s807_s13), 17  ;;  %s1242_s18 = smov (!%p448_p11, %s974_s18), 3 }
  0x35   : > { %s808_s24 = sshll.u32 %s1240_s13, 2  ;;  %s450_s15 = scalar_lea.vmem %s1224_s2, %s1242_s18 }
  0x36   : > { %s1153_s27 = scalar_lea.vmem %s1222_s0, %s808_s24  ;;  %s453_s7 = scalar_lea.vmem %s1225_s3, %s1242_s18 }
  0x37   : > { %s809_s8 = sshll.u32 %s1242_s18, 3  ;;  %466 = sbr.rel (%p810_p12) target bundleno = 62 (0x3e), region = 81 }
  0x38   : > { %s1167_s11 = scalar_lea.vmem %s1226_s4, %s809_s8 }
  0x3c   : > { %v988_v32 = vmov 0.0  }
  0x3d   : > { %467 = vst [vmem:[#allocation2] sm:$0xff] %v988_v32 }
  0x3e PF: > { %v914_v33 = vld [vmem:[%s1169_s12 + $0x78] sm:$0xff]   ;;  %v916_v35 = vld [vmem:[%s1169_s12 + $0x70] sm:$0xff]   ;;  %v918_v37 = vld [vmem:[%s1169_s12 + $0x68] sm:$0xff]   ;;  %p829_p13 = scmp.ne.s32.totalorder %s970_s17, 8 }
  0x3f   : > { %v915_v34 = vld [vmem:[%s1169_s12 + $0x38] sm:$0xff]   ;;  %835 = vmatprep.subr.bf16.mxu0 %v914_v33  ;;  %v917_v36 = vld [vmem:[%s1169_s12 + $0x30] sm:$0xff]   ;;  %v919_v38 = vld [vmem:[%s1169_s12 + $0x28] sm:$0xff]  }
  0x40   : > { %836 = vmatpush3.bf16.msra.mxu0 %v915_v34  ;;  %v920_v39 = vld [vmem:[%s1169_s12 + $0x60] sm:$0xff]   ;;  %v922_v41 = vld [vmem:[%s1169_s12 + $0x58] sm:$0xff]   ;;  %v924_v43 = vld [vmem:[%s1169_s12 + $0x50] sm:$0xff]  }
  0x41   : > { %837 = vmatprep.subr.bf16.mxu0 %v916_v35  ;;  %v921_v40 = vld [vmem:[%s1169_s12 + $0x20] sm:$0xff]   ;;  %v923_v42 = vld [vmem:[%s1169_s12 + $0x18] sm:$0xff]   ;;  %v925_v46 = vld [vmem:[%s1169_s12 + $0x10] sm:$0xff]  }
  0x42   : > { %v469_v44 = vld [vmem:[%s1153_s27] sm:$0xff]  ;;  %v926_v47 = vld [vmem:[%s1169_s12 + $0x48] sm:$0xff]   ;;  %v928_v49 = vld [vmem:[%s1169_s12 + $0x40] sm:$0xff]  }
  0x43   : > { %v812_v45 = vcombine.high %v469_v44, %v469_v44  ;;  %v927_v48 = vld [vmem:[%s1169_s12 + $0x8] sm:$0xff]   ;;  %v929_v50 = vld [vmem:[%s1169_s12] sm:$0xff]   ;;  %v811_v51 = vcombine.low %v469_v44, %v469_v44 }
  0x44   : > { %838 = vmatpush3.bf16.msra.mxu0 %v917_v36  ;;  %v468_v53 = vld [vmem:[#allocation2] sm:$0xff] }
  0x45   : > { %839 = vmatprep.subr.bf16.mxu0 %v918_v37  ;;  %637 = vmatprep.mubr.bf16.mxu0 %v812_v45 }
  0x48   : > { %840 = vmatpush3.bf16.msra.mxu0 %v919_v38 }
  0x49   : > { %841 = vmatprep.subr.bf16.mxu0 %v920_v39 }
  0x4c   : > { %842 = vmatpush3.bf16.msra.mxu0 %v921_v40 }
  0x4d   : > { %843 = vmatprep.subr.bf16.mxu0 %v922_v41 }
  0x50   : > { %844 = vmatpush3.bf16.msra.mxu0 %v923_v42 }
  0x51   : > { %845 = vmatprep.subr.bf16.mxu0 %v924_v43 }
  0x54   : > { %846 = vmatpush3.bf16.msra.mxu0 %v925_v46 }
  0x55   : > { %847 = vmatprep.subr.bf16.mxu0 %v926_v47 }
  0x58   : > { %848 = vmatpush3.bf16.msra.mxu0 %v927_v48 }
  0x59   : > { %849 = vmatprep.subr.bf16.mxu0 %v928_v49 }
  0x5c   : > { %850 = vmatpush3.bf16.msra.mxu0 %v929_v50 }
  0x5f   : > { %638 = vmatmul.mubr.bf16.vlgmr.msra.gmra.mxu0 %v811_v51 }
 0x11f   : > { %v851_v52 = vpop.f32.mrf.mxu0 }
 0x121   : > { %v852_v54 = vpop.f32.mrf.mxu0 }
 0x122   : > { %v853_v55 = vadd.f32 %v852_v54, %v851_v52  ;;  %650 = sbr.rel (%p829_p13) target bundleno = 309 (0x135), region = 85 }
 0x123   : > { %v854_v56 = vpop.f32.mrf.mxu0 }
 0x124   : > { %v645_v57 = vadd.f32 %v853_v55, %v468_v53 }
 0x125   : > { %v855_v58 = vpop.f32.mrf.mxu0 }
 0x126   : > { %646 = vst [vmem:[#allocation2] sm:$0xff] %v645_v57 }
 0x127   : > { %v830_v60 = vld [vmem:[%s450_s15] ss:$0 sm:$0xff] }
 0x128   : > { %v831_v61 = vld [vmem:[%s453_s7] ss:$0 sm:$0xff] }
 0x12d   : > { %v651_v59 = vld [vmem:[#allocation2] sm:$0xff] }
 0x12e   : > { %v659_v62 = vmul.f32 %v830_v60, %v651_v59 }
 0x130   : > { %v667_v63 = vadd.f32 %v831_v61, %v659_v62 }
 0x132   : > { %v668_v0 = vmax.f32 %v667_v63, 0.0 }
 0x134   : > { %669 = vst [vmem:[%s1167_s11] sm:$0xff] %v668_v0 }
 0x135 PF: > { %s14_s21 = sadd.s32 1, %s986_s21   ;;  %s1227_s15 = smov %s966_s16 }
 0x136   : > { %p11_p0 = scmp.ge.s32.totalorder %s14_s21, 38   ;;  %s1228_s16 = smov %s1065_s28 }
 0x137   : > { %s1229_s17 = smov %s978_s19  ;;  %s1230_s18 = smov %s982_s20 }
 0x138   : > { %s1231_s19 = smov %s1234_s22  ;;  %s1232_s20 = smov %s1238_s23 }
 0x139   :  { %13 = sbr.rel (!%p11_p0) target bundleno = 4 (0x4), region = 129 }

// kernel: image_encoder_forward.38
= control target key start
LH: loop header
LB: loop body
LE: loop exit
PB: predicated region body
PF: predicated region fallthrough
CT: control target
= control target key end

     0   :  { %s973_s15 = smov 0   ;;  %s975_s16 = smov 0   ;;  %s1134_s0 = inlined_call_operand.vmem [shape: bf16[8,256], index: 0, kind: input, shape index: {}]   ;;  %s1135_s1 = inlined_call_operand.vmem [shape: bf16[256,512], index: 1, kind: input, shape index: {}]   ;;  %s1136_s2 = inlined_call_operand.vmem [shape: f32[1,512], index: 2, kind: input, shape index: {}]   ;;  %s1137_s3 = inlined_call_operand.vmem [shape: f32[1,512], index: 3, kind: input, shape index: {}]   ;;  %s1138_s4 = inlined_call_operand.vmem [shape: f32[8,512], index: 4, kind: output, shape index: {}]  }
   0x1   :  { %s977_s17 = smov 0   ;;  %s979_s18 = smov 0  }
   0x2   :  { %s981_s19 = smov 0  }
   0x3 LB: > { %s29_s20 = sadd.s32 1, %s942_s18  ;;  %p77_p1 = scmp.ne.s32.totalorder %s934_s16, %s930_s15  ;;  %s946_s19 = sphi %s981_s19, %s14_s19   ;;  %s942_s18 = sphi %s979_s18, %s1142_s18   ;;  %s938_s17 = sphi %s977_s17, %s1141_s17   ;;  %s934_s16 = sphi %s975_s16, %s1140_s16   ;;  %s930_s15 = sphi %s973_s15, %s1139_s15  }
   0x4   : > { %p31_p0 = scmp.ge.s32.totalorder %s29_s20, 4  ;;  %p78_p2 = scmp.eq.s32.totalorder %s946_s19, 0 }
   0x5   : > { %s70_s22 = sadd.s32 1, %s934_s16  ;;  %p800_p5 = scmp.ge.s32.totalorder %s946_s19, 4 }
   0x6   : > { %s1144_s20 = smov (%p31_p0, %s29_s20), 0  ;;  %p79_p3 = por %p78_p2, %p77_p1 }
   0x7   : > { %s66_s21 = ssub.s32 %s942_s18, %s1144_s20  ;;  %196 = sbr.rel (%p800_p5) target bundleno = 37 (0x25), region = 20 }
   0x8   : > { %p68_p4 = scmp.eq.s32.totalorder %s66_s21, 0 }
   0xa   : > { %s1008_s23 = scalar_select %p68_p4, %s934_s16, %s70_s22  }
   0xc   : > { %199 = sbr.rel (!%p79_p3) target bundleno = 37 (0x25), region = 24  ;;  %s201_s24 = sand.u32 (%p79_p3), 1, %s934_s16  }
   0xd   : > { %s802_s25 = sshll.u32 (%p79_p3), %s942_s18, 2  ;;  %s801_s26 = sshll.u32 (%p79_p3), %s201_s24, 7 }
   0xe   : > { %s1016_s29 = scalar_lea.vmem (%p79_p3), %s1135_s1, %s802_s25  ;;  %s1020_s30 = scalar_lea.vmem (%p79_p3), [#allocation3], %s801_s26 }
   0xf   : > { %v225_v0 = vld [vmem:[%s1016_s29] sm:$0xf] (%p79_p3)  ;;  %v227_v1 = vld [vmem:[%s1016_s29 + $0x10] sm:$0xf] (%p79_p3) }
  0x10   : > { %226 = vst [vmem:[%s1020_s30] sm:$0xf] (%p79_p3), %v225_v0  ;;  %228 = vst [vmem:[%s1020_s30 + $0x4] sm:$0xf] (%p79_p3), %v227_v1  ;;  %v229_v2 = vld [vmem:[%s1016_s29 + $0x20] sm:$0xf] (%p79_p3) }
  0x11   : > { %v231_v3 = vld [vmem:[%s1016_s29 + $0x30] sm:$0xf]  ;;  %v233_v4 = vld [vmem:[%s1016_s29 + $0x40] sm:$0xf]  ;;  %230 = vst [vmem:[%s1020_s30 + $0x8] sm:$0xf] %v229_v2 }
  0x12   : > { %232 = vst [vmem:[%s1020_s30 + $0xc] sm:$0xf] %v231_v3  ;;  %234 = vst [vmem:[%s1020_s30 + $0x10] sm:$0xf] %v233_v4  ;;  %v235_v5 = vld [vmem:[%s1016_s29 + $0x50] sm:$0xf] }
  0x13   : > { %v237_v6 = vld [vmem:[%s1016_s29 + $0x60] sm:$0xf]  ;;  %v239_v7 = vld [vmem:[%s1016_s29 + $0x70] sm:$0xf]  ;;  %236 = vst [vmem:[%s1020_s30 + $0x14] sm:$0xf] %v235_v5 }
  0x14   : > { %238 = vst [vmem:[%s1020_s30 + $0x18] sm:$0xf] %v237_v6  ;;  %240 = vst [vmem:[%s1020_s30 + $0x1c] sm:$0xf] %v239_v7  ;;  %v241_v8 = vld [vmem:[%s1016_s29 + $0x80] sm:$0xf] }
  0x15   : > { %v243_v9 = vld [vmem:[%s1016_s29 + $0x90] sm:$0xf]  ;;  %v245_v10 = vld [vmem:[%s1016_s29 + $0xa0] sm:$0xf]  ;;  %242 = vst [vmem:[%s1020_s30 + $0x20] sm:$0xf] %v241_v8 }
  0x16   : > { %244 = vst [vmem:[%s1020_s30 + $0x24] sm:$0xf] %v243_v9  ;;  %246 = vst [vmem:[%s1020_s30 + $0x28] sm:$0xf] %v245_v10  ;;  %v247_v11 = vld [vmem:[%s1016_s29 + $0xb0] sm:$0xf] }
  0x17   : > { %v249_v12 = vld [vmem:[%s1016_s29 + $0xc0] sm:$0xf]  ;;  %v251_v13 = vld [vmem:[%s1016_s29 + $0xd0] sm:$0xf]  ;;  %248 = vst [vmem:[%s1020_s30 + $0x2c] sm:$0xf] %v247_v11 }
  0x18   : > { %250 = vst [vmem:[%s1020_s30 + $0x30] sm:$0xf] %v249_v12  ;;  %252 = vst [vmem:[%s1020_s30 + $0x34] sm:$0xf] %v251_v13  ;;  %v253_v14 = vld [vmem:[%s1016_s29 + $0xe0] sm:$0xf] }
  0x19   : > { %v255_v15 = vld [vmem:[%s1016_s29 + $0xf0] sm:$0xf]  ;;  %v257_v16 = vld [vmem:[%s1016_s29 + $0x100] sm:$0xf]  ;;  %254 = vst [vmem:[%s1020_s30 + $0x38] sm:$0xf] %v253_v14 }
  0x1a   : > { %256 = vst [vmem:[%s1020_s30 + $0x3c] sm:$0xf] %v255_v15  ;;  %258 = vst [vmem:[%s1020_s30 + $0x40] sm:$0xf] %v257_v16  ;;  %v259_v17 = vld [vmem:[%s1016_s29 + $0x110] sm:$0xf] }
  0x1b   : > { %v261_v18 = vld [vmem:[%s1016_s29 + $0x120] sm:$0xf]  ;;  %v263_v19 = vld [vmem:[%s1016_s29 + $0x130] sm:$0xf]  ;;  %260 = vst [vmem:[%s1020_s30 + $0x44] sm:$0xf] %v259_v17 }
  0x1c   : > { %262 = vst [vmem:[%s1020_s30 + $0x48] sm:$0xf] %v261_v18  ;;  %264 = vst [vmem:[%s1020_s30 + $0x4c] sm:$0xf] %v263_v19  ;;  %v265_v20 = vld [vmem:[%s1016_s29 + $0x140] sm:$0xf] }
  0x1d   : > { %v267_v21 = vld [vmem:[%s1016_s29 + $0x150] sm:$0xf]  ;;  %v269_v22 = vld [vmem:[%s1016_s29 + $0x160] sm:$0xf]  ;;  %266 = vst [vmem:[%s1020_s30 + $0x50] sm:$0xf] %v265_v20 }
  0x1e   : > { %268 = vst [vmem:[%s1020_s30 + $0x54] sm:$0xf] %v267_v21  ;;  %270 = vst [vmem:[%s1020_s30 + $0x58] sm:$0xf] %v269_v22  ;;  %v271_v23 = vld [vmem:[%s1016_s29 + $0x170] sm:$0xf] }
  0x1f   : > { %v273_v24 = vld [vmem:[%s1016_s29 + $0x180] sm:$0xf]  ;;  %v275_v25 = vld [vmem:[%s1016_s29 + $0x190] sm:$0xf]  ;;  %272 = vst [vmem:[%s1020_s30 + $0x5c] sm:$0xf] %v271_v23 }
  0x20   : > { %274 = vst [vmem:[%s1020_s30 + $0x60] sm:$0xf] %v273_v24  ;;  %276 = vst [vmem:[%s1020_s30 + $0x64] sm:$0xf] %v275_v25  ;;  %v277_v26 = vld [vmem:[%s1016_s29 + $0x1a0] sm:$0xf] }
  0x21   : > { %v279_v27 = vld [vmem:[%s1016_s29 + $0x1b0] sm:$0xf]  ;;  %v281_v28 = vld [vmem:[%s1016_s29 + $0x1c0] sm:$0xf]  ;;  %278 = vst [vmem:[%s1020_s30 + $0x68] sm:$0xf] %v277_v26 }
  0x22   : > { %280 = vst [vmem:[%s1020_s30 + $0x6c] sm:$0xf] %v279_v27  ;;  %282 = vst [vmem:[%s1020_s30 + $0x70] sm:$0xf] %v281_v28  ;;  %v283_v29 = vld [vmem:[%s1016_s29 + $0x1d0] sm:$0xf] }
  0x23   : > { %v285_v30 = vld [vmem:[%s1016_s29 + $0x1e0] sm:$0xf]  ;;  %v287_v31 = vld [vmem:[%s1016_s29 + $0x1f0] sm:$0xf]  ;;  %284 = vst [vmem:[%s1020_s30 + $0x74] sm:$0xf] %v283_v29 }
  0x24   : > { %286 = vst [vmem:[%s1020_s30 + $0x78] sm:$0xf] %v285_v30  ;;  %288 = vst [vmem:[%s1020_s30 + $0x7c] sm:$0xf] %v287_v31 }
  0x25 PF: > { %p803_p6 = scmp.ge.s32.totalorder %s946_s19, 1  ;;  %p387_p7 = scmp.lt.s32.totalorder %s946_s19, 5 }
  0x27   : > { %p388_p8 = pnand %p803_p6, %p387_p7 }
  0x28   : > { %s394_s5 = sand.u32 (!%p388_p8), 1, %s930_s15   ;;  %p448_p9 = scmp.lt.s32.totalorder (!%p388_p8), %s938_s17, 3 }
  0x29   : > { %391 = sbr.rel (%p388_p8) target bundleno = 281 (0x119), region = 73  ;;  %s804_s8 = sshll.u32 (!%p388_p8), %s394_s5, 7 }
  0x2a   : > { %s1090_s9 = scalar_lea.vmem (!%p388_p8), [#allocation3], %s804_s8 }
  0x2e   : > { %v469_v32 = vld [vmem:[%s1134_s0] sm:$0xff]  ;;  %v890_v34 = vld [vmem:[%s1090_s9 + $0x78] sm:$0xff]   ;;  %v892_v36 = vld [vmem:[%s1090_s9 + $0x70] sm:$0xff]   ;;  %s1146_s17 = smov (!%p448_p9, %s938_s17), 3 }
  0x2f   : > { %v807_v33 = vcombine.high %v469_v32, %v469_v32  ;;  %v891_v35 = vld [vmem:[%s1090_s9 + $0x38] sm:$0xff]   ;;  %828 = vmatprep.subr.bf16.mxu0 %v890_v34  ;;  %v893_v37 = vld [vmem:[%s1090_s9 + $0x30] sm:$0xff]   ;;  %v894_v38 = vld [vmem:[%s1090_s9 + $0x68] sm:$0xff]   ;;  %v806_v50 = vcombine.low %v469_v32, %v469_v32  ;;  %s450_s12 = scalar_lea.vmem %s1136_s2, %s1146_s17  ;;  %s453_s15 = scalar_lea.vmem %s1137_s3, %s1146_s17 }
  0x30   : > { %829 = vmatpush3.bf16.msra.mxu0 %v891_v35  ;;  %v895_v39 = vld [vmem:[%s1090_s9 + $0x28] sm:$0xff]   ;;  %v896_v40 = vld [vmem:[%s1090_s9 + $0x60] sm:$0xff]   ;;  %v898_v42 = vld [vmem:[%s1090_s9 + $0x58] sm:$0xff]   ;;  %s805_s21 = sshll.u32 %s1146_s17, 3 }
  0x31   : > { %637 = vmatprep.mubr.bf16.mxu0 %v807_v33  ;;  %830 = vmatprep.subr.bf16.mxu0 %v892_v36  ;;  %v897_v41 = vld [vmem:[%s1090_s9 + $0x20] sm:$0xff]   ;;  %v899_v43 = vld [vmem:[%s1090_s9 + $0x18] sm:$0xff]   ;;  %v900_v44 = vld [vmem:[%s1090_s9 + $0x50] sm:$0xff]   ;;  %s461_s25 = scalar_lea.vmem %s1138_s4, %s805_s21 }
  0x32   : > { %v901_v45 = vld [vmem:[%s1090_s9 + $0x10] sm:$0xff]   ;;  %v902_v46 = vld [vmem:[%s1090_s9 + $0x48] sm:$0xff]   ;;  %v904_v48 = vld [vmem:[%s1090_s9 + $0x40] sm:$0xff]  }
  0x33   : > { %v903_v47 = vld [vmem:[%s1090_s9 + $0x8] sm:$0xff]   ;;  %v905_v49 = vld [vmem:[%s1090_s9] sm:$0xff]  }
  0x34   : > { %831 = vmatpush3.bf16.msra.mxu0 %v893_v37  ;;  %v824_v53 = vld [vmem:[%s450_s12] ss:$0 sm:$0xff] }
  0x35   : > { %832 = vmatprep.subr.bf16.mxu0 %v894_v38  ;;  %v825_v55 = vld [vmem:[%s453_s15] ss:$0 sm:$0xff] }
  0x38   : > { %833 = vmatpush3.bf16.msra.mxu0 %v895_v39 }
  0x39   : > { %834 = vmatprep.subr.bf16.mxu0 %v896_v40 }
  0x3c   : > { %835 = vmatpush3.bf16.msra.mxu0 %v897_v41 }
  0x3d   : > { %836 = vmatprep.subr.bf16.mxu0 %v898_v42 }
  0x40   : > { %837 = vmatpush3.bf16.msra.mxu0 %v899_v43 }
  0x41   : > { %838 = vmatprep.subr.bf16.mxu0 %v900_v44 }
  0x44   : > { %839 = vmatpush3.bf16.msra.mxu0 %v901_v45 }
  0x45   : > { %840 = vmatprep.subr.bf16.mxu0 %v902_v46 }
  0x48   : > { %841 = vmatpush3.bf16.msra.mxu0 %v903_v47 }
  0x49   : > { %842 = vmatprep.subr.bf16.mxu0 %v904_v48 }
  0x4c   : > { %843 = vmatpush3.bf16.msra.mxu0 %v905_v49 }
  0x4f   : > { %638 = vmatmul.mubr.bf16.vlgmr.msra.gmra.mxu0 %v806_v50 }
 0x10f   : > { %v844_v51 = vpop.f32.mrf.mxu0 }
 0x111   : > { %v845_v52 = vpop.f32.mrf.mxu0 }
 0x112   : > { %v846_v54 = vadd.f32 %v845_v52, %v844_v51 }
 0x113   : > { %v847_v56 = vpop.f32.mrf.mxu0 }
 0x114   : > { %v658_v57 = vmul.f32 %v846_v54, %v824_v53 }
 0x115   : > { %v848_v58 = vpop.f32.mrf.mxu0 }
 0x116   : > { %v666_v59 = vadd.f32 %v825_v55, %v658_v57 }
 0x118   : > { %667 = vst [vmem:[%s461_s25] sm:$0xff] %v666_v59 }
 0x119 PF: > { %s14_s19 = sadd.s32 1, %s946_s19   ;;  %s1139_s15 = smov %s934_s16 }
 0x11a   : > { %p11_p10 = scmp.ge.s32.totalorder %s14_s19, 6   ;;  %s1140_s16 = smov %s1008_s23 }
 0x11b   : > { %s1141_s17 = smov %s942_s18  ;;  %s1142_s18 = smov %s1144_s20 }
 0x11c   :  { %13 = sbr.rel (!%p11_p10) target bundleno = 3 (0x3), region = 129 }

// kernel: image_encoder_forward.40
= control target key start
LH: loop header
LB: loop body
LE: loop exit
PB: predicated region body
PF: predicated region fallthrough
CT: control target
= control target key end

     0   :  { %s1312_s0 = inlined_call_operand.vmem [shape: bf16[8,4608], index: 0, kind: input, shape index: {}]   ;;  %s1313_s1 = inlined_call_operand.vmem [shape: bf16[4608,512], index: 1, kind: input, shape index: {}]   ;;  %s1314_s2 = inlined_call_operand.vmem [shape: f32[1,512], index: 2, kind: input, shape index: {}]   ;;  %s1315_s3 = inlined_call_operand.vmem [shape: f32[1,512], index: 3, kind: input, shape index: {}]   ;;  %s1316_s4 = inlined_call_operand.vmem [shape: f32[8,512], index: 4, kind: input, shape index: {}]   ;;  %s1317_s5 = inlined_call_operand.vmem [shape: f32[8,512], index: 5, kind: output, shape index: {}]  }
   0x1   :  { %1318 = sst [smem:[#allocation4_spill]] %s1313_s1 }
   0x2   :  { %s1098_s18 = smov 0   ;;  %s1100_s19 = smov 0  }
   0x3   :  { %s1102_s20 = smov 0   ;;  %s1104_s21 = smov 0  }
   0x4   :  { %s1106_s22 = smov 0   ;;  %s1108_s23 = smov 0  }
   0x5   :  { %s1110_s24 = smov 0  }
   0x6 LB: > { %s27_s25 = sadd.s32 1, %s1057_s22  ;;  %s30_s26 = sadd.s32 1, %s1061_s23  ;;  %s1065_s24 = sphi %s1110_s24, %s15_s24   ;;  %s1061_s23 = sphi %s1108_s23, %s1325_s23   ;;  %s1057_s22 = sphi %s1106_s22, %s1324_s22   ;;  %s1053_s21 = sphi %s1104_s21, %s1323_s21   ;;  %s1049_s20 = sphi %s1102_s20, %s1322_s20   ;;  %s1045_s19 = sphi %s1100_s19, %s1321_s19   ;;  %s1041_s18 = sphi %s1098_s18, %s1320_s18  }
   0x7   : > { %p28_p0 = scmp.ge.s32.totalorder %s27_s25, 18  ;;  %p78_p1 = scmp.ne.s32.totalorder %s1045_s19, %s1041_s18 }
   0x8   : > { %p79_p2 = scmp.eq.s32.totalorder %s1065_s24, 0  ;;  %s71_s30 = sadd.s32 1, %s1045_s19 }
   0x9   : > { %s1327_s25 = smov (%p28_p0, %s27_s25), 0  ;;  %s1329_s26 = smov (!%p28_p0, %s30_s26), %s1061_s23 }
   0xa   : > { %p80_p3 = por %p79_p2, %p78_p1  ;;  %p32_p4 = scmp.ge.s32.totalorder %s1329_s26, 4 }
   0xb   : > { %s66_s27 = ssub.s32 %s1057_s22, %s1327_s25  ;;  %p878_p6 = scmp.ge.s32.totalorder %s1065_s24, 72 }
   0xc   : > { %s1331_s26 = smov (%p32_p4, %s1329_s26), 0 }
   0xd   : > { %s67_s28 = ssub.s32 %s1061_s23, %s1331_s26  ;;  %212 = sbr.rel (%p878_p6) target bundleno = 49 (0x31), region = 16 }
   0xe   : > { %s68_s29 = sor.u32 %s67_s28, %s66_s27 }
   0xf   : > { %p69_p5 = scmp.eq.s32.totalorder %s68_s29, 0 }
  0x11   : > { %s1149_s6 = scalar_select %p69_p5, %s1045_s19, %s71_s30  }
  0x12   : > { %228 = sbr.rel (!%p80_p3) target bundleno = 49 (0x31), region = 24  ;;  %s230_s7 = sand.u32 (%p80_p3), 1, %s1045_s19  }
  0x13   : > { %s913_s8 = sshll.u32 (%p80_p3), %s1057_s22, 7  ;;  %s879_s9 = sshll.u32 (%p80_p3), %s230_s7, 7 }
  0x14   : > { %s235_s10 = sadd.s32 (%p80_p3), %s1061_s23, %s913_s8  ;;  %s1319_s1 = sld [smem:[#allocation4_spill]] (%p80_p3) }
  0x15   : > { %s882_s11 = sshll.u32 (%p80_p3), %s235_s10, 2  ;;  %s1163_s15 = scalar_lea.vmem (%p80_p3), [#allocation3], %s879_s9 }
  0x1a   : > { %s1158_s14 = scalar_lea.vmem %s1319_s1, %s882_s11 }
  0x1b   : > { %v254_v0 = vld [vmem:[%s1158_s14] sm:$0xf]  ;;  %v256_v1 = vld [vmem:[%s1158_s14 + $0x10] sm:$0xf] }
  0x1c   : > { %v258_v2 = vld [vmem:[%s1158_s14 + $0x20] sm:$0xf]  ;;  %255 = vst [vmem:[%s1163_s15] sm:$0xf] %v254_v0  ;;  %257 = vst [vmem:[%s1163_s15 + $0x4] sm:$0xf] %v256_v1 }
  0x1d   : > { %259 = vst [vmem:[%s1163_s15 + $0x8] sm:$0xf] %v258_v2  ;;  %v260_v3 = vld [vmem:[%s1158_s14 + $0x30] sm:$0xf]  ;;  %v262_v4 = vld [vmem:[%s1158_s14 + $0x40] sm:$0xf] }
  0x1e   : > { %v264_v5 = vld [vmem:[%s1158_s14 + $0x50] sm:$0xf]  ;;  %261 = vst [vmem:[%s1163_s15 + $0xc] sm:$0xf] %v260_v3  ;;  %263 = vst [vmem:[%s1163_s15 + $0x10] sm:$0xf] %v262_v4 }
  0x1f   : > { %265 = vst [vmem:[%s1163_s15 + $0x14] sm:$0xf] %v264_v5  ;;  %v266_v6 = vld [vmem:[%s1158_s14 + $0x60] sm:$0xf]  ;;  %v268_v7 = vld [vmem:[%s1158_s14 + $0x70] sm:$0xf] }
  0x20   : > { %v270_v8 = vld [vmem:[%s1158_s14 + $0x80] sm:$0xf]  ;;  %267 = vst [vmem:[%s1163_s15 + $0x18] sm:$0xf] %v266_v6  ;;  %269 = vst [vmem:[%s1163_s15 + $0x1c] sm:$0xf] %v268_v7 }
  0x21   : > { %271 = vst [vmem:[%s1163_s15 + $0x20] sm:$0xf] %v270_v8  ;;  %v272_v9 = vld [vmem:[%s1158_s14 + $0x90] sm:$0xf]  ;;  %v274_v10 = vld [vmem:[%s1158_s14 + $0xa0] sm:$0xf] }
  0x22   : > { %v276_v11 = vld [vmem:[%s1158_s14 + $0xb0] sm:$0xf]  ;;  %273 = vst [vmem:[%s1163_s15 + $0x24] sm:$0xf] %v272_v9  ;;  %275 = vst [vmem:[%s1163_s15 + $0x28] sm:$0xf] %v274_v10 }
  0x23   : > { %277 = vst [vmem:[%s1163_s15 + $0x2c] sm:$0xf] %v276_v11  ;;  %v278_v12 = vld [vmem:[%s1158_s14 + $0xc0] sm:$0xf]  ;;  %v280_v13 = vld [vmem:[%s1158_s14 + $0xd0] sm:$0xf] }
  0x24   : > { %v282_v14 = vld [vmem:[%s1158_s14 + $0xe0] sm:$0xf]  ;;  %279 = vst [vmem:[%s1163_s15 + $0x30] sm:$0xf] %v278_v12  ;;  %281 = vst [vmem:[%s1163_s15 + $0x34] sm:$0xf] %v280_v13 }
  0x25   : > { %283 = vst [vmem:[%s1163_s15 + $0x38] sm:$0xf] %v282_v14  ;;  %v284_v15 = vld [vmem:[%s1158_s14 + $0xf0] sm:$0xf]  ;;  %v286_v16 = vld [vmem:[%s1158_s14 + $0x100] sm:$0xf] }
  0x26   : > { %v288_v17 = vld [vmem:[%s1158_s14 + $0x110] sm:$0xf]  ;;  %285 = vst [vmem:[%s1163_s15 + $0x3c] sm:$0xf] %v284_v15  ;;  %287 = vst [vmem:[%s1163_s15 + $0x40] sm:$0xf] %v286_v16 }
  0x27   : > { %289 = vst [vmem:[%s1163_s15 + $0x44] sm:$0xf] %v288_v17  ;;  %v290_v18 = vld [vmem:[%s1158_s14 + $0x120] sm:$0xf]  ;;  %v292_v19 = vld [vmem:[%s1158_s14 + $0x130] sm:$0xf] }
  0x28   : > { %v294_v20 = vld [vmem:[%s1158_s14 + $0x140] sm:$0xf]  ;;  %291 = vst [vmem:[%s1163_s15 + $0x48] sm:$0xf] %v290_v18  ;;  %293 = vst [vmem:[%s1163_s15 + $0x4c] sm:$0xf] %v292_v19 }
  0x29   : > { %295 = vst [vmem:[%s1163_s15 + $0x50] sm:$0xf] %v294_v20  ;;  %v296_v21 = vld [vmem:[%s1158_s14 + $0x150] sm:$0xf]  ;;  %v298_v22 = vld [vmem:[%s1158_s14 + $0x160] sm:$0xf] }
  0x2a   : > { %v300_v23 = vld [vmem:[%s1158_s14 + $0x170] sm:$0xf]  ;;  %297 = vst [vmem:[%s1163_s15 + $0x54] sm:$0xf] %v296_v21  ;;  %299 = vst [vmem:[%s1163_s15 + $0x58] sm:$0xf] %v298_v22 }
  0x2b   : > { %301 = vst [vmem:[%s1163_s15 + $0x5c] sm:$0xf] %v300_v23  ;;  %v302_v24 = vld [vmem:[%s1158_s14 + $0x180] sm:$0xf]  ;;  %v304_v25 = vld [vmem:[%s1158_s14 + $0x190] sm:$0xf] }
  0x2c   : > { %v306_v26 = vld [vmem:[%s1158_s14 + $0x1a0] sm:$0xf]  ;;  %303 = vst [vmem:[%s1163_s15 + $0x60] sm:$0xf] %v302_v24  ;;  %305 = vst [vmem:[%s1163_s15 + $0x64] sm:$0xf] %v304_v25 }
  0x2d   : > { %307 = vst [vmem:[%s1163_s15 + $0x68] sm:$0xf] %v306_v26  ;;  %v308_v27 = vld [vmem:[%s1158_s14 + $0x1b0] sm:$0xf]  ;;  %v310_v28 = vld [vmem:[%s1158_s14 + $0x1c0] sm:$0xf] }
  0x2e   : > { %v312_v29 = vld [vmem:[%s1158_s14 + $0x1d0] sm:$0xf]  ;;  %309 = vst [vmem:[%s1163_s15 + $0x6c] sm:$0xf] %v308_v27  ;;  %311 = vst [vmem:[%s1163_s15 + $0x70] sm:$0xf] %v310_v28 }
  0x2f   : > { %313 = vst [vmem:[%s1163_s15 + $0x74] sm:$0xf] %v312_v29  ;;  %v314_v30 = vld [vmem:[%s1158_s14 + $0x1e0] sm:$0xf]  ;;  %v316_v31 = vld [vmem:[%s1158_s14 + $0x1f0] sm:$0xf] }
  0x30   : > { %315 = vst [vmem:[%s1163_s15 + $0x78] sm:$0xf] %v314_v30  ;;  %317 = vst [vmem:[%s1163_s15 + $0x7c] sm:$0xf] %v316_v31 }
  0x31 PF: > { %p883_p7 = scmp.ge.s32.totalorder %s1065_s24, 1  ;;  %p427_p8 = scmp.lt.s32.totalorder %s1065_s24, 73 }
  0x33   : > { %p428_p9 = pnand %p883_p7, %p427_p8 }
  0x34   : > { %s434_s16 = sand.u32 (!%p428_p9), 1, %s1041_s18   ;;  %s885_s17 = sshll.u32 (!%p428_p9), %s1049_s20, 1 }
  0x35   : > { %431 = sbr.rel (%p428_p9) target bundleno = 319 (0x13f), region = 77  ;;  %s884_s27 = sshll.u32 (!%p428_p9), %s434_s16, 7 }
  0x36   : > { %p490_p10 = scmp.lt.s32.totalorder (!%p428_p9), %s885_s17, 35  ;;  %p498_p11 = scmp.lt.s32.totalorder (!%p428_p9), %s1053_s21, 3 }
  0x37   : > { %p889_p12 = scmp.ne.s32.totalorder (!%p428_p9), %s1049_s20, 0 }
  0x3a   : > { %s1333_s17 = smov (!%p490_p10, %s885_s17), 35  ;;  %s1335_s21 = smov (!%p498_p11, %s1053_s21), 3 }
  0x3b   : > { %s886_s28 = sshll.u32 %s1333_s17, 2  ;;  %s500_s18 = scalar_lea.vmem %s1314_s2, %s1335_s21 }
  0x3c   : > { %s1237_s7 = scalar_lea.vmem %s1312_s0, %s886_s28  ;;  %s503_s12 = scalar_lea.vmem %s1315_s3, %s1335_s21 }
  0x3d   : > { %s887_s13 = sshll.u32 %s1335_s21, 3  ;;  %s1258_s28 = scalar_lea.vmem [#allocation3], %s884_s27 }
  0x3e   : > { %s1251_s16 = scalar_lea.vmem %s1316_s4, %s887_s13  ;;  %s1256_s29 = scalar_lea.vmem %s1317_s5, %s887_s13 }
  0x3f   : > { %524 = sbr.rel (%p889_p12) target bundleno = 70 (0x46), region = 85 }
  0x44   : > { %v1067_v32 = vmov 0.0  }
  0x45   : > { %525 = vst [vmem:[#allocation2] sm:$0xff] %v1067_v32 }
  0x46 PF: > { %v993_v33 = vld [vmem:[%s1258_s28 + $0x78] sm:$0xff]   ;;  %v995_v35 = vld [vmem:[%s1258_s28 + $0x70] sm:$0xff]   ;;  %v997_v37 = vld [vmem:[%s1258_s28 + $0x68] sm:$0xff]   ;;  %p908_p13 = scmp.ne.s32.totalorder %s1049_s20, 17 }
  0x47   : > { %v994_v34 = vld [vmem:[%s1258_s28 + $0x38] sm:$0xff]   ;;  %914 = vmatprep.subr.bf16.mxu0 %v993_v33  ;;  %v996_v36 = vld [vmem:[%s1258_s28 + $0x30] sm:$0xff]   ;;  %v998_v38 = vld [vmem:[%s1258_s28 + $0x28] sm:$0xff]  }
  0x48   : > { %915 = vmatpush3.bf16.msra.mxu0 %v994_v34  ;;  %v999_v39 = vld [vmem:[%s1258_s28 + $0x60] sm:$0xff]   ;;  %v1001_v41 = vld [vmem:[%s1258_s28 + $0x58] sm:$0xff]   ;;  %v1003_v43 = vld [vmem:[%s1258_s28 + $0x50] sm:$0xff]  }
  0x49   : > { %916 = vmatprep.subr.bf16.mxu0 %v995_v35  ;;  %v1000_v40 = vld [vmem:[%s1258_s28 + $0x20] sm:$0xff]   ;;  %v1002_v42 = vld [vmem:[%s1258_s28 + $0x18] sm:$0xff]   ;;  %v1004_v46 = vld [vmem:[%s1258_s28 + $0x10] sm:$0xff]  }
  0x4a   : > { %v527_v44 = vld [vmem:[%s1237_s7] sm:$0xff]  ;;  %v1005_v47 = vld [vmem:[%s1258_s28 + $0x48] sm:$0xff]   ;;  %v1007_v49 = vld [vmem:[%s1258_s28 + $0x40] sm:$0xff]  }
  0x4b   : > { %v891_v45 = vcombine.high %v527_v44, %v527_v44  ;;  %v1006_v48 = vld [vmem:[%s1258_s28 + $0x8] sm:$0xff]   ;;  %v1008_v50 = vld [vmem:[%s1258_s28] sm:$0xff]   ;;  %v890_v51 = vcombine.low %v527_v44, %v527_v44 }
  0x4c   : > { %917 = vmatpush3.bf16.msra.mxu0 %v996_v36  ;;  %v526_v53 = vld [vmem:[#allocation2] sm:$0xff] }
  0x4d   : > { %918 = vmatprep.subr.bf16.mxu0 %v997_v37  ;;  %695 = vmatprep.mubr.bf16.mxu0 %v891_v45 }
  0x50   : > { %919 = vmatpush3.bf16.msra.mxu0 %v998_v38 }
  0x51   : > { %920 = vmatprep.subr.bf16.mxu0 %v999_v39 }
  0x54   : > { %921 = vmatpush3.bf16.msra.mxu0 %v1000_v40 }
  0x55   : > { %922 = vmatprep.subr.bf16.mxu0 %v1001_v41 }
  0x58   : > { %923 = vmatpush3.bf16.msra.mxu0 %v1002_v42 }
  0x59   : > { %924 = vmatprep.subr.bf16.mxu0 %v1003_v43 }
  0x5c   : > { %925 = vmatpush3.bf16.msra.mxu0 %v1004_v46 }
  0x5d   : > { %926 = vmatprep.subr.bf16.mxu0 %v1005_v47 }
  0x60   : > { %927 = vmatpush3.bf16.msra.mxu0 %v1006_v48 }
  0x61   : > { %928 = vmatprep.subr.bf16.mxu0 %v1007_v49 }
  0x64   : > { %929 = vmatpush3.bf16.msra.mxu0 %v1008_v50 }
  0x67   : > { %696 = vmatmul.mubr.bf16.vlgmr.msra.gmra.mxu0 %v890_v51 }
 0x127   : > { %v930_v52 = vpop.f32.mrf.mxu0 }
 0x129   : > { %v931_v54 = vpop.f32.mrf.mxu0 }
 0x12a   : > { %v932_v55 = vadd.f32 %v931_v54, %v930_v52  ;;  %708 = sbr.rel (%p908_p13) target bundleno = 319 (0x13f), region = 89 }
 0x12b   : > { %v933_v56 = vpop.f32.mrf.mxu0 }
 0x12c   : > { %v703_v57 = vadd.f32 %v932_v55, %v526_v53 }
 0x12d   : > { %v934_v58 = vpop.f32.mrf.mxu0 }
 0x12e   : > { %704 = vst [vmem:[#allocation2] sm:$0xff] %v703_v57 }
 0x12f   : > { %v909_v60 = vld [vmem:[%s500_s18] ss:$0 sm:$0xff] }
 0x130   : > { %v910_v61 = vld [vmem:[%s503_s12] ss:$0 sm:$0xff] }
 0x131   : > { %v726_v63 = vld [vmem:[%s1251_s16] sm:$0xff] }
 0x135   : > { %v709_v59 = vld [vmem:[#allocation2] sm:$0xff] }
 0x136   : > { %v717_v62 = vmul.f32 %v909_v60, %v709_v59 }
 0x138   : > { %v725_v0 = vadd.f32 %v910_v61, %v717_v62 }
 0x13a   : > { %v727_v1 = vadd.f32 %v726_v63, %v725_v0 }
 0x13c   : > { %v728_v2 = vmax.f32 %v727_v1, 0.0 }
 0x13e   : > { %729 = vst [vmem:[%s1256_s29] sm:$0xff] %v728_v2 }
 0x13f PF: > { %s15_s24 = sadd.s32 1, %s1065_s24   ;;  %s1320_s18 = smov %s1045_s19 }
 0x140   : > { %p12_p0 = scmp.ge.s32.totalorder %s15_s24, 74   ;;  %s1321_s19 = smov %s1149_s6 }
 0x141   : > { %s1322_s20 = smov %s1057_s22  ;;  %s1323_s21 = smov %s1061_s23 }
 0x142   : > { %s1324_s22 = smov %s1327_s25  ;;  %s1325_s23 = smov %s1331_s26 }
 0x143   :  { %14 = sbr.rel (!%p12_p0) target bundleno = 6 (0x6), region = 136 }

// kernel: image_encoder_forward.41
= control target key start
LH: loop header
LB: loop body
LE: loop exit
PB: predicated region body
PF: predicated region fallthrough
CT: control target
= control target key end

     0   :  { %s1014_s15 = smov 0   ;;  %s1016_s16 = smov 0   ;;  %s1222_s0 = inlined_call_operand.vmem [shape: bf16[8,4608], index: 0, kind: input, shape index: {}]   ;;  %s1223_s1 = inlined_call_operand.vmem [shape: bf16[4608,512], index: 1, kind: input, shape index: {}]   ;;  %s1224_s2 = inlined_call_operand.vmem [shape: f32[1,512], index: 2, kind: input, shape index: {}]   ;;  %s1225_s3 = inlined_call_operand.vmem [shape: f32[1,512], index: 3, kind: input, shape index: {}]   ;;  %s1226_s4 = inlined_call_operand.vmem [shape: f32[8,512], index: 4, kind: output, shape index: {}]  }
   0x1   :  { %s1018_s17 = smov 0   ;;  %s1020_s18 = smov 0  }
   0x2   :  { %s1022_s19 = smov 0   ;;  %s1024_s20 = smov 0  }
   0x3   :  { %s1026_s21 = smov 0  }
   0x4 LB: > { %s26_s22 = sadd.s32 1, %s978_s19  ;;  %s29_s23 = sadd.s32 1, %s982_s20  ;;  %s986_s21 = sphi %s1026_s21, %s14_s21   ;;  %s982_s20 = sphi %s1024_s20, %s1232_s20   ;;  %s978_s19 = sphi %s1022_s19, %s1231_s19   ;;  %s974_s18 = sphi %s1020_s18, %s1230_s18   ;;  %s970_s17 = sphi %s1018_s17, %s1229_s17   ;;  %s966_s16 = sphi %s1016_s16, %s1228_s16   ;;  %s962_s15 = sphi %s1014_s15, %s1227_s15  }
   0x5   : > { %p27_p0 = scmp.ge.s32.totalorder %s26_s22, 18  ;;  %p77_p1 = scmp.ne.s32.totalorder %s966_s16, %s962_s15 }
   0x6   : > { %p78_p2 = scmp.eq.s32.totalorder %s986_s21, 0  ;;  %s70_s27 = sadd.s32 1, %s966_s16 }
   0x7   : > { %s1234_s22 = smov (%p27_p0, %s26_s22), 0  ;;  %s1236_s23 = smov (!%p27_p0, %s29_s23), %s982_s20 }
   0x8   : > { %p79_p3 = por %p78_p2, %p77_p1  ;;  %p31_p4 = scmp.ge.s32.totalorder %s1236_s23, 4 }
   0x9   : > { %s65_s24 = ssub.s32 %s978_s19, %s1234_s22  ;;  %p800_p6 = scmp.ge.s32.totalorder %s986_s21, 72 }
   0xa   : > { %s1238_s23 = smov (%p31_p4, %s1236_s23), 0 }
   0xb   : > { %s66_s25 = ssub.s32 %s982_s20, %s1238_s23  ;;  %183 = sbr.rel (%p800_p6) target bundleno = 43 (0x2b), region = 16 }
   0xc   : > { %s67_s26 = sor.u32 %s66_s25, %s65_s24 }
   0xd   : > { %p68_p5 = scmp.eq.s32.totalorder %s67_s26, 0 }
   0xf   : > { %s1065_s28 = scalar_select %p68_p5, %s966_s16, %s70_s27  }
  0x10   : > { %199 = sbr.rel (!%p79_p3) target bundleno = 43 (0x2b), region = 24  ;;  %s201_s29 = sand.u32 (%p79_p3), 1, %s966_s16  }
  0x11   : > { %s834_s30 = sshll.u32 (%p79_p3), %s978_s19, 7  ;;  %s801_s5 = sshll.u32 (%p79_p3), %s201_s29, 7 }
  0x12   : > { %s206_s6 = sadd.s32 (%p79_p3), %s982_s20, %s834_s30  ;;  %s1079_s11 = scalar_lea.vmem (%p79_p3), [#allocation3], %s801_s5 }
  0x13   : > { %s804_s7 = sshll.u32 (%p79_p3), %s206_s6, 2 }
  0x14   : > { %s1074_s10 = scalar_lea.vmem (%p79_p3), %s1223_s1, %s804_s7 }
  0x15   : > { %v225_v0 = vld [vmem:[%s1074_s10] sm:$0xf]  ;;  %v227_v1 = vld [vmem:[%s1074_s10 + $0x10] sm:$0xf] }
  0x16   : > { %v229_v2 = vld [vmem:[%s1074_s10 + $0x20] sm:$0xf]  ;;  %226 = vst [vmem:[%s1079_s11] sm:$0xf] %v225_v0  ;;  %228 = vst [vmem:[%s1079_s11 + $0x4] sm:$0xf] %v227_v1 }
  0x17   : > { %230 = vst [vmem:[%s1079_s11 + $0x8] sm:$0xf] %v229_v2  ;;  %v231_v3 = vld [vmem:[%s1074_s10 + $0x30] sm:$0xf]  ;;  %v233_v4 = vld [vmem:[%s1074_s10 + $0x40] sm:$0xf] }
  0x18   : > { %v235_v5 = vld [vmem:[%s1074_s10 + $0x50] sm:$0xf]  ;;  %232 = vst [vmem:[%s1079_s11 + $0xc] sm:$0xf] %v231_v3  ;;  %234 = vst [vmem:[%s1079_s11 + $0x10] sm:$0xf] %v233_v4 }
  0x19   : > { %236 = vst [vmem:[%s1079_s11 + $0x14] sm:$0xf] %v235_v5  ;;  %v237_v6 = vld [vmem:[%s1074_s10 + $0x60] sm:$0xf]  ;;  %v239_v7 = vld [vmem:[%s1074_s10 + $0x70] sm:$0xf] }
  0x1a   : > { %v241_v8 = vld [vmem:[%s1074_s10 + $0x80] sm:$0xf]  ;;  %238 = vst [vmem:[%s1079_s11 + $0x18] sm:$0xf] %v237_v6  ;;  %240 = vst [vmem:[%s1079_s11 + $0x1c] sm:$0xf] %v239_v7 }
  0x1b   : > { %242 = vst [vmem:[%s1079_s11 + $0x20] sm:$0xf] %v241_v8  ;;  %v243_v9 = vld [vmem:[%s1074_s10 + $0x90] sm:$0xf]  ;;  %v245_v10 = vld [vmem:[%s1074_s10 + $0xa0] sm:$0xf] }
  0x1c   : > { %v247_v11 = vld [vmem:[%s1074_s10 + $0xb0] sm:$0xf]  ;;  %244 = vst [vmem:[%s1079_s11 + $0x24] sm:$0xf] %v243_v9  ;;  %246 = vst [vmem:[%s1079_s11 + $0x28] sm:$0xf] %v245_v10 }
  0x1d   : > { %248 = vst [vmem:[%s1079_s11 + $0x2c] sm:$0xf] %v247_v11  ;;  %v249_v12 = vld [vmem:[%s1074_s10 + $0xc0] sm:$0xf]  ;;  %v251_v13 = vld [vmem:[%s1074_s10 + $0xd0] sm:$0xf] }
  0x1e   : > { %v253_v14 = vld [vmem:[%s1074_s10 + $0xe0] sm:$0xf]  ;;  %250 = vst [vmem:[%s1079_s11 + $0x30] sm:$0xf] %v249_v12  ;;  %252 = vst [vmem:[%s1079_s11 + $0x34] sm:$0xf] %v251_v13 }
  0x1f   : > { %254 = vst [vmem:[%s1079_s11 + $0x38] sm:$0xf] %v253_v14  ;;  %v255_v15 = vld [vmem:[%s1074_s10 + $0xf0] sm:$0xf]  ;;  %v257_v16 = vld [vmem:[%s1074_s10 + $0x100] sm:$0xf] }
  0x20   : > { %v259_v17 = vld [vmem:[%s1074_s10 + $0x110] sm:$0xf]  ;;  %256 = vst [vmem:[%s1079_s11 + $0x3c] sm:$0xf] %v255_v15  ;;  %258 = vst [vmem:[%s1079_s11 + $0x40] sm:$0xf] %v257_v16 }
  0x21   : > { %260 = vst [vmem:[%s1079_s11 + $0x44] sm:$0xf] %v259_v17  ;;  %v261_v18 = vld [vmem:[%s1074_s10 + $0x120] sm:$0xf]  ;;  %v263_v19 = vld [vmem:[%s1074_s10 + $0x130] sm:$0xf] }
  0x22   : > { %v265_v20 = vld [vmem:[%s1074_s10 + $0x140] sm:$0xf]  ;;  %262 = vst [vmem:[%s1079_s11 + $0x48] sm:$0xf] %v261_v18  ;;  %264 = vst [vmem:[%s1079_s11 + $0x4c] sm:$0xf] %v263_v19 }
  0x23   : > { %266 = vst [vmem:[%s1079_s11 + $0x50] sm:$0xf] %v265_v20  ;;  %v267_v21 = vld [vmem:[%s1074_s10 + $0x150] sm:$0xf]  ;;  %v269_v22 = vld [vmem:[%s1074_s10 + $0x160] sm:$0xf] }
  0x24   : > { %v271_v23 = vld [vmem:[%s1074_s10 + $0x170] sm:$0xf]  ;;  %268 = vst [vmem:[%s1079_s11 + $0x54] sm:$0xf] %v267_v21  ;;  %270 = vst [vmem:[%s1079_s11 + $0x58] sm:$0xf] %v269_v22 }
  0x25   : > { %272 = vst [vmem:[%s1079_s11 + $0x5c] sm:$0xf] %v271_v23  ;;  %v273_v24 = vld [vmem:[%s1074_s10 + $0x180] sm:$0xf]  ;;  %v275_v25 = vld [vmem:[%s1074_s10 + $0x190] sm:$0xf] }
  0x26   : > { %v277_v26 = vld [vmem:[%s1074_s10 + $0x1a0] sm:$0xf]  ;;  %274 = vst [vmem:[%s1079_s11 + $0x60] sm:$0xf] %v273_v24  ;;  %276 = vst [vmem:[%s1079_s11 + $0x64] sm:$0xf] %v275_v25 }
  0x27   : > { %278 = vst [vmem:[%s1079_s11 + $0x68] sm:$0xf] %v277_v26  ;;  %v279_v27 = vld [vmem:[%s1074_s10 + $0x1b0] sm:$0xf]  ;;  %v281_v28 = vld [vmem:[%s1074_s10 + $0x1c0] sm:$0xf] }
  0x28   : > { %v283_v29 = vld [vmem:[%s1074_s10 + $0x1d0] sm:$0xf]  ;;  %280 = vst [vmem:[%s1079_s11 + $0x6c] sm:$0xf] %v279_v27  ;;  %282 = vst [vmem:[%s1079_s11 + $0x70] sm:$0xf] %v281_v28 }
  0x29   : > { %284 = vst [vmem:[%s1079_s11 + $0x74] sm:$0xf] %v283_v29  ;;  %v285_v30 = vld [vmem:[%s1074_s10 + $0x1e0] sm:$0xf]  ;;  %v287_v31 = vld [vmem:[%s1074_s10 + $0x1f0] sm:$0xf] }
  0x2a   : > { %286 = vst [vmem:[%s1079_s11 + $0x78] sm:$0xf] %v285_v30  ;;  %288 = vst [vmem:[%s1079_s11 + $0x7c] sm:$0xf] %v287_v31 }
  0x2b PF: > { %p805_p7 = scmp.ge.s32.totalorder %s986_s21, 1  ;;  %p387_p8 = scmp.lt.s32.totalorder %s986_s21, 73 }
  0x2d   : > { %p388_p9 = pnand %p805_p7, %p387_p8 }
  0x2e   : > { %s394_s12 = sand.u32 (!%p388_p9), 1, %s962_s15   ;;  %s807_s13 = sshll.u32 (!%p388_p9), %s970_s17, 1 }
  0x2f   : > { %391 = sbr.rel (%p388_p9) target bundleno = 309 (0x135), region = 73  ;;  %s806_s14 = sshll.u32 (!%p388_p9), %s394_s12, 7 }
  0x30   : > { %p440_p10 = scmp.lt.s32.totalorder (!%p388_p9), %s807_s13, 35  ;;  %p448_p11 = scmp.lt.s32.totalorder (!%p388_p9), %s974_s18, 3 }
  0x31   : > { %s1169_s12 = scalar_lea.vmem (!%p388_p9), [#allocation3], %s806_s14  ;;  %p810_p12 = scmp.ne.s32.totalorder (!%p388_p9), %s970_s17, 0 }
  0x34   : > { %s1240_s13 = smov (!%p440_p10, %s807_s13), 35  ;;  %s1242_s18 = smov (!%p448_p11, %s974_s18), 3 }
  0x35   : > { %s808_s24 = sshll.u32 %s1240_s13, 2  ;;  %s450_s15 = scalar_lea.vmem %s1224_s2, %s1242_s18 }
  0x36   : > { %s1153_s27 = scalar_lea.vmem %s1222_s0, %s808_s24  ;;  %s453_s7 = scalar_lea.vmem %s1225_s3, %s1242_s18 }
  0x37   : > { %s809_s8 = sshll.u32 %s1242_s18, 3  ;;  %466 = sbr.rel (%p810_p12) target bundleno = 62 (0x3e), region = 81 }
  0x38   : > { %s1167_s11 = scalar_lea.vmem %s1226_s4, %s809_s8 }
  0x3c   : > { %v988_v32 = vmov 0.0  }
  0x3d   : > { %467 = vst [vmem:[#allocation2] sm:$0xff] %v988_v32 }
  0x3e PF: > { %v914_v33 = vld [vmem:[%s1169_s12 + $0x78] sm:$0xff]   ;;  %v916_v35 = vld [vmem:[%s1169_s12 + $0x70] sm:$0xff]   ;;  %v918_v37 = vld [vmem:[%s1169_s12 + $0x68] sm:$0xff]   ;;  %p829_p13 = scmp.ne.s32.totalorder %s970_s17, 17 }
  0x3f   : > { %v915_v34 = vld [vmem:[%s1169_s12 + $0x38] sm:$0xff]   ;;  %835 = vmatprep.subr.bf16.mxu0 %v914_v33  ;;  %v917_v36 = vld [vmem:[%s1169_s12 + $0x30] sm:$0xff]   ;;  %v919_v38 = vld [vmem:[%s1169_s12 + $0x28] sm:$0xff]  }
  0x40   : > { %836 = vmatpush3.bf16.msra.mxu0 %v915_v34  ;;  %v920_v39 = vld [vmem:[%s1169_s12 + $0x60] sm:$0xff]   ;;  %v922_v41 = vld [vmem:[%s1169_s12 + $0x58] sm:$0xff]   ;;  %v924_v43 = vld [vmem:[%s1169_s12 + $0x50] sm:$0xff]  }
  0x41   : > { %837 = vmatprep.subr.bf16.mxu0 %v916_v35  ;;  %v921_v40 = vld [vmem:[%s1169_s12 + $0x20] sm:$0xff]   ;;  %v923_v42 = vld [vmem:[%s1169_s12 + $0x18] sm:$0xff]   ;;  %v925_v46 = vld [vmem:[%s1169_s12 + $0x10] sm:$0xff]  }
  0x42   : > { %v469_v44 = vld [vmem:[%s1153_s27] sm:$0xff]  ;;  %v926_v47 = vld [vmem:[%s1169_s12 + $0x48] sm:$0xff]   ;;  %v928_v49 = vld [vmem:[%s1169_s12 + $0x40] sm:$0xff]  }
  0x43   : > { %v812_v45 = vcombine.high %v469_v44, %v469_v44  ;;  %v927_v48 = vld [vmem:[%s1169_s12 + $0x8] sm:$0xff]   ;;  %v929_v50 = vld [vmem:[%s1169_s12] sm:$0xff]   ;;  %v811_v51 = vcombine.low %v469_v44, %v469_v44 }
  0x44   : > { %838 = vmatpush3.bf16.msra.mxu0 %v917_v36  ;;  %v468_v53 = vld [vmem:[#allocation2] sm:$0xff] }
  0x45   : > { %839 = vmatprep.subr.bf16.mxu0 %v918_v37  ;;  %637 = vmatprep.mubr.bf16.mxu0 %v812_v45 }
  0x48   : > { %840 = vmatpush3.bf16.msra.mxu0 %v919_v38 }
  0x49   : > { %841 = vmatprep.subr.bf16.mxu0 %v920_v39 }
  0x4c   : > { %842 = vmatpush3.bf16.msra.mxu0 %v921_v40 }
  0x4d   : > { %843 = vmatprep.subr.bf16.mxu0 %v922_v41 }
  0x50   : > { %844 = vmatpush3.bf16.msra.mxu0 %v923_v42 }
  0x51   : > { %845 = vmatprep.subr.bf16.mxu0 %v924_v43 }
  0x54   : > { %846 = vmatpush3.bf16.msra.mxu0 %v925_v46 }
  0x55   : > { %847 = vmatprep.subr.bf16.mxu0 %v926_v47 }
  0x58   : > { %848 = vmatpush3.bf16.msra.mxu0 %v927_v48 }
  0x59   : > { %849 = vmatprep.subr.bf16.mxu0 %v928_v49 }
  0x5c   : > { %850 = vmatpush3.bf16.msra.mxu0 %v929_v50 }
  0x5f   : > { %638 = vmatmul.mubr.bf16.vlgmr.msra.gmra.mxu0 %v811_v51 }
 0x11f   : > { %v851_v52 = vpop.f32.mrf.mxu0 }
 0x121   : > { %v852_v54 = vpop.f32.mrf.mxu0 }
 0x122   : > { %v853_v55 = vadd.f32 %v852_v54, %v851_v52  ;;  %650 = sbr.rel (%p829_p13) target bundleno = 309 (0x135), region = 85 }
 0x123   : > { %v854_v56 = vpop.f32.mrf.mxu0 }
 0x124   : > { %v645_v57 = vadd.f32 %v853_v55, %v468_v53 }
 0x125   : > { %v855_v58 = vpop.f32.mrf.mxu0 }
 0x126   : > { %646 = vst [vmem:[#allocation2] sm:$0xff] %v645_v57 }
 0x127   : > { %v830_v60 = vld [vmem:[%s450_s15] ss:$0 sm:$0xff] }
 0x128   : > { %v831_v61 = vld [vmem:[%s453_s7] ss:$0 sm:$0xff] }
 0x12d   : > { %v651_v59 = vld [vmem:[#allocation2] sm:$0xff] }
 0x12e   : > { %v659_v62 = vmul.f32 %v830_v60, %v651_v59 }
 0x130   : > { %v667_v63 = vadd.f32 %v831_v61, %v659_v62 }
 0x132   : > { %v668_v0 = vmax.f32 %v667_v63, 0.0 }
 0x134   : > { %669 = vst [vmem:[%s1167_s11] sm:$0xff] %v668_v0 }
 0x135 PF: > { %s14_s21 = sadd.s32 1, %s986_s21   ;;  %s1227_s15 = smov %s966_s16 }
 0x136   : > { %p11_p0 = scmp.ge.s32.totalorder %s14_s21, 74   ;;  %s1228_s16 = smov %s1065_s28 }
 0x137   : > { %s1229_s17 = smov %s978_s19  ;;  %s1230_s18 = smov %s982_s20 }
 0x138   : > { %s1231_s19 = smov %s1234_s22  ;;  %s1232_s20 = smov %s1238_s23 }
 0x139   :  { %13 = sbr.rel (!%p11_p0) target bundleno = 4 (0x4), region = 129 }

// kernel: image_encoder_forward.43
= control target key start
LH: loop header
LB: loop body
LE: loop exit
PB: predicated region body
PF: predicated region fallthrough
CT: control target
= control target key end

     0   :  { %s193_s6 = smov 0   ;;  %s213_s0 = inlined_call_operand.vmem [shape: f32[2,1,512], index: 0, kind: input, shape index: {}]   ;;  %s214_s1 = inlined_call_operand.vmem [shape: f32[2,1,512], index: 1, kind: output, shape index: {}]  }
   0x1 LB: > { %s172_s7 = sadd.s32 4294967295, %s195_s6   ;;  %p176_p0 = scmp.ge.s32.totalorder %s195_s6, 1  ;;  %s195_s6 = sphi %s193_s6, %s11_s6  }
   0x2   : > { %p86_p1 = scmp.lt.s32.totalorder %s195_s6, 3 }
   0x4   : > { %p87_p2 = pnand %p176_p0, %p86_p1 }
   0x5   : > { %p104_p3 = scmp.lt.s32.totalorder (!%p87_p2), %s172_s7, 1 }
   0x6   : > { %90 = sbr.rel (%p87_p2) target bundleno = 16 (0x10), region = 24 }
   0xb   : > { %v114_v0 = vlaneseq  ;;  %s216_s7 = smov (!%p104_p3, %s172_s7), 1 }
   0xc   : > { %s177_s8 = sshll.u32 %s216_s7, 2 }
   0xd   : > { %vm116_vm0 = vcmp.lt.s32.totalorder %v114_v0, 512  ;;  %s107_s11 = scalar_lea.vmem %s213_s0, %s177_s8  ;;  %s111_s14 = scalar_lea.vmem %s214_s1, %s177_s8 }
   0xe   : > { %v112_v1 = vld [vmem:[%s107_s11] sm:$0xf] }
   0xf   : > { %118 = vst.msk [vmem:[%s111_s14] sm:$0xf] %vm116_vm0, %v112_v1 }
  0x10 PF: > { %s11_s6 = sadd.s32 1, %s195_s6  }
  0x11   : > { %p8_p4 = scmp.ge.s32.totalorder %s11_s6, 4  }
  0x13   :  { %10 = sbr.rel (!%p8_p4) target bundleno = 1 (0x1), region = 54 }

</bundles_post_ra>
